<compile_context>
chip_gen: v7x
topology: tpu7x:2x2x1
jax: 0.10.0
libtpu: 0.0.40
codegen_flags: <defaults>
</compile_context>

<pallas_src>
import functools

import numpy as np
import jax
import jax.numpy as jnp
from jax import lax
from jax.experimental import pallas as pl
from jax.experimental.pallas import tpu as pltpu


_COMPILER_PARAMS = pltpu.CompilerParams(
    dimension_semantics=("parallel",),
    vmem_limit_bytes=48 * 1024 * 1024,   # fits v7x's 64 MiB/TC with headroom
)


def _full_spec(shape):
    """Whole-array block (weights / constants) resident across the batch grid."""
    nd = len(shape)
    return pl.BlockSpec(shape, lambda *_: (0,) * nd)


def _ln(v, g, b, eps=1e-5):
    mu = jnp.mean(v, axis=-1, keepdims=True)
    c = v - mu
    var = jnp.mean(c * c, axis=-1, keepdims=True)
    return c * lax.rsqrt(var + eps) * g + b


# ---------------------------------------------------------------------------
# Fused per-layer kernel: all MIC branches + merge/FFN tail (+ final Linear)
# ---------------------------------------------------------------------------
def _layer_kernel(*refs, n_br, L, D, conv_k, iso_k, decomp_k, L_out, with_proj):
    f32, bf16 = jnp.float32, jnp.bfloat16

    it = iter(refs)
    src_ref = next(it)
    br_refs = [[next(it) for _ in range(9)] for _ in range(n_br)]
    ng_ref, nb_ref = next(it), next(it)
    mw_ref, mb_ref = next(it), next(it)
    n1g_ref, n1b_ref = next(it), next(it)
    c1w_ref, c1b_ref = next(it), next(it)
    c2w_ref, c2b_ref = next(it), next(it)
    n2g_ref, n2b_ref = next(it), next(it)
    if with_proj:
        pw_ref, pb_ref = next(it), next(it)
    out_ref = next(it)
    pad_refs = [next(it) for _ in range(n_br)]

    x = src_ref[...]                                     # (L, D) f32
    xb = x.astype(bf16)
    ng, nb = ng_ref[...], nb_ref[...]                    # shared LayerNorm (self.norm)

    branch_out = []
    for b in range(n_br):
        (A_ref, T_ref, cw_ref, cb_ref, iw_ref, ib_ref,
         tw_ref, tb_ref, U_ref) = br_refs[b]
        k, ik, lo, dk = conv_k[b], iso_k[b], L_out[b], decomp_k[b]
        x1p_ref = pad_refs[b]

        # ---- series_decomp residual: x - moving_avg_dk(x) (replicate pad) --
        # banded count matrix (integers, exact in bf16) * 1/dk -> MXU
        avg = jnp.dot(A_ref[...], xb, preferred_element_type=f32) * (1.0 / dk)
        res = x - avg                                    # (L, D) f32
        resb = res.astype(bf16)

        # ---- downsample Conv1d (kernel = stride = k, pad = k//2) + tanh -----
        # per-tap: 0/1 gather (bf16) then (lo, D) @ (D, D) on the MXU
        x1 = jnp.zeros((lo, D), f32)
        for j in range(k):
            g = jnp.dot(T_ref[j], resb, preferred_element_type=f32).astype(bf16)
            x1 = x1 + jnp.dot(g, cw_ref[j], preferred_element_type=f32)
        x1 = jnp.tanh(x1 + cb_ref[...])                  # (lo, D)

        # ---- isometric Conv1d over [zeros(lo-1); x1] + tanh -----------------
        # zero-padded activation in VMEM scratch, per-tap contiguous slices
        if lo > 1:
            x1p_ref[pl.ds(0, lo - 1), :] = jnp.zeros((lo - 1, D), f32)
        x1p_ref[pl.ds(lo - 1, lo), :] = x1
        xi = jnp.zeros((lo, D), f32)
        for j in range(ik):
            xi = xi + jnp.dot(x1p_ref[pl.ds(j, lo), :].astype(bf16), iw_ref[j],
                              preferred_element_type=f32)
        xi = jnp.tanh(xi + ib_ref[...])

        xn = _ln(xi + x1, ng, nb).astype(bf16)           # norm((iso + x1))

        # ---- ConvTranspose1d (kernel = stride = k) + tanh, truncate to L ----
        # kernel == stride => non-overlapping taps, per-tap tanh is exact
        tb = tb_ref[...]
        xt = jnp.zeros((L, D), f32)
        for j in range(k):
            tj = jnp.tanh(jnp.dot(xn, tw_ref[j], preferred_element_type=f32) + tb)
            xt = xt + jnp.dot(U_ref[j], tj.astype(bf16), preferred_element_type=f32)

        branch_out.append(_ln(xt + res, ng, nb))         # norm(x + input)

    # ---- merge Conv2d (kernel (n_br, 1)): sum of (L,D)@(D,D) matmuls --------
    mg = jnp.zeros((L, D), f32)
    for b in range(n_br):
        mg = mg + jnp.dot(branch_out[b].astype(bf16), mw_ref[b],
                          preferred_element_type=f32)
    mg = mg + mb_ref[...]

    # ---- norm1 -> 1x1 conv (D->4D) -> 1x1 conv (4D->D) -> norm2 -------------
    y1 = _ln(mg, n1g_ref[...], n1b_ref[...]).astype(bf16)
    h = (jnp.dot(y1, c1w_ref[...], preferred_element_type=f32)
         + c1b_ref[...]).astype(bf16)
    y = jnp.dot(h, c2w_ref[...], preferred_element_type=f32) + c2b_ref[...]
    out = _ln(mg + y, n2g_ref[...], n2b_ref[...])

    if with_proj:
        # fused final Linear, emitted lane-dense as (c_out, L)
        out_ref[...] = (jnp.einsum("cd,ld->cl", pw_ref[...], out.astype(bf16),
                                   preferred_element_type=f32) + pb_ref[...])
    else:
        out_ref[...] = out


# ---------------------------------------------------------------------------
# Host-side structural constants (depend only on L / kernel sizes; reused
# across layers)
# ---------------------------------------------------------------------------
def _decomp_count_band(L, dk):
    """Banded integer-count matrix: moving_avg(x) = (1/dk) * (A @ x) with
    replicate padding folded into the edge counts."""
    pad = (dk - 1) // 2
    A = np.zeros((L, L), np.float32)
    for t in range(L):
        for o in range(-pad, pad + 1):
            u = min(max(t + o, 0), L - 1)
            A[t, u] += 1.0
    return A


def _gather_selectors(L, L_out, k):
    """T[j, s, t] = 1 iff downsample-conv tap j of output s reads residual
    row t = s*k + j - k//2 (out-of-range == zero padding)."""
    cp = k // 2
    T = np.zeros((k, L_out, L), np.float32)
    for j in range(k):
        for s in range(L_out):
            t = s * k + j - cp
            if 0 <= t < L:
                T[j, s, t] = 1.0
    return T


def _scatter_selectors(L, L_out, k):
    """U[j, t, s] = 1 iff transposed-conv tap j of input s writes output row
    t = s*k + j (rows >= L dropped == truncation)."""
    U = np.zeros((k, L, L_out), np.float32)
    for j in range(k):
        for s in range(L_out):
            t = s * k + j
            if t < L:
                U[j, t, s] = 1.0
    return U


def build_layer_constants(L, conv_kernel, iso_kernel, decomp_kernel):
    bf16 = jnp.bfloat16
    A, T, U, L_outs = [], [], [], []
    for b, k in enumerate(conv_kernel):
        dk = decomp_kernel[b]
        assert dk % 2 == 1, "decomp kernel must be odd (as in MICN configs)"
        cp = k // 2
        lo = (L + 2 * cp - k) // k + 1
        assert iso_kernel[b] == lo, "isometric kernel must equal downsampled length"
        L_outs.append(lo)
        A.append(jnp.asarray(_decomp_count_band(L, dk), bf16))
        T.append(jnp.asarray(_gather_selectors(L, lo, k), bf16))
        U.append(jnp.asarray(_scatter_selectors(L, lo, k), bf16))
    return {"A": A, "T": T, "U": U, "L_out": L_outs}


# ---------------------------------------------------------------------------
# One fused pallas_call per MIC layer
# ---------------------------------------------------------------------------
def mic_layer_call(src, lp, consts, conv_kernel, iso_kernel, decomp_kernel,
                   proj=None):
    B, L, D = src.shape
    n_br = len(conv_kernel)
    L_outs = consts["L_out"]
    with_proj = proj is not None

    args = [src]
    for b in range(n_br):
        bp = lp["branch"][b]
        args += [consts["A"][b], consts["T"][b],
                 bp["conv_w"], bp["conv_b"], bp["iso_w"], bp["iso_b"],
                 bp["trans_w"], bp["trans_b"], consts["U"][b]]
    args += [lp["norm_g"], lp["norm_b"], lp["merge_w"], lp["merge_b"],
             lp["n1_g"], lp["n1_b"], lp["c1_w"], lp["c1_b"],
             lp["c2_w"], lp["c2_b"], lp["n2_g"], lp["n2_b"]]

    if with_proj:
        pw, pb = proj
        c_out = pw.shape[0]
        args += [pw, pb]
        out_shape = jax.ShapeDtypeStruct((B, c_out, L), jnp.float32)
        out_specs = pl.BlockSpec((None, c_out, L), lambda b: (b, 0, 0))
    else:
        out_shape = jax.ShapeDtypeStruct((B, L, D), jnp.float32)
        out_specs = pl.BlockSpec((None, L, D), lambda b: (b, 0, 0))

    in_specs = [pl.BlockSpec((None, L, D), lambda b: (b, 0, 0))]
    in_specs += [_full_spec(a.shape) for a in args[1:]]
    scratch_shapes = [pltpu.VMEM((max(2 * lo - 1, 1), D), jnp.float32)
                      for lo in L_outs]

    kernel = functools.partial(
        _layer_kernel, n_br=n_br, L=L, D=D,
        conv_k=tuple(conv_kernel), iso_k=tuple(iso_kernel),
        decomp_k=tuple(decomp_kernel), L_out=tuple(L_outs),
        with_proj=with_proj)

    # advisory cost hint for XLA's scheduling of the surrounding layer chain
    flops, transc = 0, 0
    for b in range(n_br):
        k, ik, lo = conv_kernel[b], iso_kernel[b], L_outs[b]
        flops += 2 * L * L * D            # banded moving average
        flops += 2 * k * lo * L * D       # 0/1 tap gather
        flops += 2 * k * lo * D * D       # downsample conv
        flops += 2 * ik * lo * D * D      # isometric conv
        flops += 2 * k * lo * D * D       # transposed conv
        flops += 2 * k * L * lo * D       # 0/1 tap scatter
        transc += (2 * lo + k * lo) * D   # tanh
    flops += 2 * n_br * L * D * D         # merge conv2d
    flops += 2 * 2 * L * D * 4 * D        # pointwise FFN
    if with_proj:
        flops += 2 * L * D * proj[0].shape[0]
    bytes_accessed = sum(int(np.prod(a.shape)) * a.dtype.itemsize for a in args)
    bytes_accessed += int(np.prod(out_shape.shape)) * 4
    cost = pl.CostEstimate(flops=int(B * flops),
                           transcendentals=int(B * transc),
                           bytes_accessed=int(bytes_accessed))

    return pl.pallas_call(
        kernel,
        grid=(B,),
        out_shape=out_shape,
        in_specs=in_specs,
        out_specs=out_specs,
        scratch_shapes=scratch_shapes,
        compiler_params=_COMPILER_PARAMS,
        cost_estimate=cost,
    )(*args)


def seasonal_prediction_forward(dec, params, conv_kernel, iso_kernel,
                                decomp_kernel):
    B, L, D = dec.shape
    consts = build_layer_constants(L, conv_kernel, iso_kernel, decomp_kernel)
    n_layers = len(params["layers"])
    x = dec
    for li, lp in enumerate(params["layers"]):
        last = li == n_layers - 1
        proj = (params["proj_w"], params["proj_b"]) if last else None
        x = mic_layer_call(x, lp, consts, conv_kernel, iso_kernel,
                           decomp_kernel, proj=proj)
    # last layer emitted the fused projection lane-dense as (B, c_out, L)
    return jnp.transpose(x, (0, 2, 1))


# ---------------------------------------------------------------------------
# Deterministic parameter init (weights pre-transposed into per-tap matmul
# form, bf16)
# ---------------------------------------------------------------------------
def init_params(key, D, conv_kernel, iso_kernel, d_layers, c_out):
    n_br = len(conv_kernel)
    state = [key]

    def nxt():
        state[0], sub = jax.random.split(state[0])
        return sub

    bf16, f32 = jnp.bfloat16, jnp.float32
    params = {"layers": []}
    for _ in range(d_layers):
        lp = {"branch": []}
        for b in range(n_br):
            k = conv_kernel[b]
            ik = iso_kernel[b]
            Wc = jax.random.normal(nxt(), (D, D, k)) * 0.1     # Conv1d (out,in,k)
            bc = jax.random.normal(nxt(), (D,)) * 0.1
            Wi = jax.random.normal(nxt(), (D, D, ik)) * 0.1    # isometric Conv1d
            bi = jax.random.normal(nxt(), (D,)) * 0.1
            Wt = jax.random.normal(nxt(), (D, D, k)) * 0.1     # ConvT1d (in,out,k)
            bt = jax.random.normal(nxt(), (D,)) * 0.1
            lp["branch"].append({
                # per-tap (in, out) matmul weights, tap-major
                "conv_w": jnp.transpose(Wc, (2, 1, 0)).astype(bf16),   # (k, D, D)
                "conv_b": bc.reshape(1, D),
                "iso_w": jnp.transpose(Wi, (2, 1, 0)).astype(bf16),    # (ik, D, D)
                "iso_b": bi.reshape(1, D),
                "trans_w": jnp.transpose(Wt, (2, 0, 1)).astype(bf16),  # (k, D, D)
                "trans_b": bt.reshape(1, D),
            })
        Wm = jax.random.normal(nxt(), (D, D, n_br)) * 0.1      # Conv2d (out,in,n_br,1)
        bm = jax.random.normal(nxt(), (D,)) * 0.1
        W1 = jax.random.normal(nxt(), (4 * D, D)) * 0.1        # 1x1 conv1
        b1 = jax.random.normal(nxt(), (4 * D,)) * 0.1
        W2 = jax.random.normal(nxt(), (D, 4 * D)) * 0.05       # 1x1 conv2
        b2 = jax.random.normal(nxt(), (D,)) * 0.1
        lp.update({
            "merge_w": jnp.transpose(Wm, (2, 1, 0)).astype(bf16),  # (n_br, D, D)
            "merge_b": bm.reshape(1, D),
            "c1_w": W1.T.astype(bf16), "c1_b": b1.reshape(1, 4 * D),
            "c2_w": W2.T.astype(bf16), "c2_b": b2.reshape(1, D),
            "norm_g": jnp.ones((1, D), f32), "norm_b": jnp.zeros((1, D), f32),
            "n1_g": jnp.ones((1, D), f32), "n1_b": jnp.zeros((1, D), f32),
            "n2_g": jnp.ones((1, D), f32), "n2_b": jnp.zeros((1, D), f32),
        })
        params["layers"].append(lp)
    Wp = jax.random.normal(nxt(), (c_out, D)) * 0.1            # Linear (c_out, D)
    bp = jax.random.normal(nxt(), (c_out,)) * 0.1
    params["proj_w"] = Wp.astype(bf16)
    params["proj_b"] = bp.reshape(c_out, 1)
    return params


# ---------------------------------------------------------------------------
if __name__ == "__main__":
    # Small self-consistent configuration (decomp kernel per branch must be odd;
    # isometric kernel must equal the downsampled length, as in MICN configs).
    B, L, D = 2, 16, 32
    c_out = 1
    d_layers = 2
    conv_kernel = [2, 4]
    decomp_kernel = [5, 7]
    iso_kernel = [(L + 2 * (k // 2) - k) // k + 1 for k in conv_kernel]   # [9, 5]

    key = jax.random.PRNGKey(0)
    k_param, k_in = jax.random.split(key)
    params = init_params(k_param, D, conv_kernel, iso_kernel, d_layers, c_out)
    dec = jax.random.normal(k_in, (B, L, D), dtype=jnp.float32)

    fwd = jax.jit(functools.partial(
        seasonal_prediction_forward,
        conv_kernel=tuple(conv_kernel),
        iso_kernel=tuple(iso_kernel),
        decomp_kernel=tuple(decomp_kernel)))

    out = jax.block_until_ready(fwd(dec, params))

    assert out.shape == (B, L, c_out), out.shape
    assert bool(jnp.all(jnp.isfinite(out)))
    # TODO(synk): dropout (p=0.05) is modeled as eval-mode identity.
    print("KERNEL_OK")
</pallas_src>

<mosaic_0001>
module attributes {stable_mosaic.version = 11 : i64} {
  func.func @_layer_kernel(%arg0: i32, %arg1: memref<1x16x32xf32, #tpu.memory_space<vmem>>, %arg2: memref<16x16xbf16, #tpu.memory_space<vmem>>, %arg3: memref<2x9x16xbf16, #tpu.memory_space<vmem>>, %arg4: memref<2x32x32xbf16, #tpu.memory_space<vmem>>, %arg5: memref<1x32xf32, #tpu.memory_space<vmem>>, %arg6: memref<9x32x32xbf16, #tpu.memory_space<vmem>>, %arg7: memref<1x32xf32, #tpu.memory_space<vmem>>, %arg8: memref<2x32x32xbf16, #tpu.memory_space<vmem>>, %arg9: memref<1x32xf32, #tpu.memory_space<vmem>>, %arg10: memref<2x16x9xbf16, #tpu.memory_space<vmem>>, %arg11: memref<16x16xbf16, #tpu.memory_space<vmem>>, %arg12: memref<4x5x16xbf16, #tpu.memory_space<vmem>>, %arg13: memref<4x32x32xbf16, #tpu.memory_space<vmem>>, %arg14: memref<1x32xf32, #tpu.memory_space<vmem>>, %arg15: memref<5x32x32xbf16, #tpu.memory_space<vmem>>, %arg16: memref<1x32xf32, #tpu.memory_space<vmem>>, %arg17: memref<4x32x32xbf16, #tpu.memory_space<vmem>>, %arg18: memref<1x32xf32, #tpu.memory_space<vmem>>, %arg19: memref<4x16x5xbf16, #tpu.memory_space<vmem>>, %arg20: memref<1x32xf32, #tpu.memory_space<vmem>>, %arg21: memref<1x32xf32, #tpu.memory_space<vmem>>, %arg22: memref<2x32x32xbf16, #tpu.memory_space<vmem>>, %arg23: memref<1x32xf32, #tpu.memory_space<vmem>>, %arg24: memref<1x32xf32, #tpu.memory_space<vmem>>, %arg25: memref<1x32xf32, #tpu.memory_space<vmem>>, %arg26: memref<32x128xbf16, #tpu.memory_space<vmem>>, %arg27: memref<1x128xf32, #tpu.memory_space<vmem>>, %arg28: memref<128x32xbf16, #tpu.memory_space<vmem>>, %arg29: memref<1x32xf32, #tpu.memory_space<vmem>>, %arg30: memref<1x32xf32, #tpu.memory_space<vmem>>, %arg31: memref<1x32xf32, #tpu.memory_space<vmem>>, %arg32: memref<1x16x32xf32, #tpu.memory_space<vmem>>, %arg33: memref<17x32xf32, #tpu.memory_space<vmem>>, %arg34: memref<9x32xf32, #tpu.memory_space<vmem>>) attributes {dimension_semantics = [#tpu.dimension_semantics<parallel>], iteration_bounds = array<i64: 2>, scalar_prefetch = 0 : i64, scratch_operands = 2 : i64, tpu.core_type = #tpu.core_type<tc>, window_params = [{transform_indices = @transform_0, window_bounds = array<i64: 1, 16, 32>}, {pipeline_mode = #tpu.pipeline_mode<synchronous>, transform_indices = @transform_1, window_bounds = array<i64: 16, 16>}, {pipeline_mode = #tpu.pipeline_mode<synchronous>, transform_indices = @transform_2, window_bounds = array<i64: 2, 9, 16>}, {pipeline_mode = #tpu.pipeline_mode<synchronous>, transform_indices = @transform_3, window_bounds = array<i64: 2, 32, 32>}, {pipeline_mode = #tpu.pipeline_mode<synchronous>, transform_indices = @transform_4, window_bounds = array<i64: 1, 32>}, {pipeline_mode = #tpu.pipeline_mode<synchronous>, transform_indices = @transform_5, window_bounds = array<i64: 9, 32, 32>}, {pipeline_mode = #tpu.pipeline_mode<synchronous>, transform_indices = @transform_6, window_bounds = array<i64: 1, 32>}, {pipeline_mode = #tpu.pipeline_mode<synchronous>, transform_indices = @transform_7, window_bounds = array<i64: 2, 32, 32>}, {pipeline_mode = #tpu.pipeline_mode<synchronous>, transform_indices = @transform_8, window_bounds = array<i64: 1, 32>}, {pipeline_mode = #tpu.pipeline_mode<synchronous>, transform_indices = @transform_9, window_bounds = array<i64: 2, 16, 9>}, {pipeline_mode = #tpu.pipeline_mode<synchronous>, transform_indices = @transform_10, window_bounds = array<i64: 16, 16>}, {pipeline_mode = #tpu.pipeline_mode<synchronous>, transform_indices = @transform_11, window_bounds = array<i64: 4, 5, 16>}, {pipeline_mode = #tpu.pipeline_mode<synchronous>, transform_indices = @transform_12, window_bounds = array<i64: 4, 32, 32>}, {pipeline_mode = #tpu.pipeline_mode<synchronous>, transform_indices = @transform_13, window_bounds = array<i64: 1, 32>}, {pipeline_mode = #tpu.pipeline_mode<synchronous>, transform_indices = @transform_14, window_bounds = array<i64: 5, 32, 32>}, {pipeline_mode = #tpu.pipeline_mode<synchronous>, transform_indices = @transform_15, window_bounds = array<i64: 1, 32>}, {pipeline_mode = #tpu.pipeline_mode<synchronous>, transform_indices = @transform_16, window_bounds = array<i64: 4, 32, 32>}, {pipeline_mode = #tpu.pipeline_mode<synchronous>, transform_indices = @transform_17, window_bounds = array<i64: 1, 32>}, {pipeline_mode = #tpu.pipeline_mode<synchronous>, transform_indices = @transform_18, window_bounds = array<i64: 4, 16, 5>}, {pipeline_mode = #tpu.pipeline_mode<synchronous>, transform_indices = @transform_19, window_bounds = array<i64: 1, 32>}, {pipeline_mode = #tpu.pipeline_mode<synchronous>, transform_indices = @transform_20, window_bounds = array<i64: 1, 32>}, {pipeline_mode = #tpu.pipeline_mode<synchronous>, transform_indices = @transform_21, window_bounds = array<i64: 2, 32, 32>}, {pipeline_mode = #tpu.pipeline_mode<synchronous>, transform_indices = @transform_22, window_bounds = array<i64: 1, 32>}, {pipeline_mode = #tpu.pipeline_mode<synchronous>, transform_indices = @transform_23, window_bounds = array<i64: 1, 32>}, {pipeline_mode = #tpu.pipeline_mode<synchronous>, transform_indices = @transform_24, window_bounds = array<i64: 1, 32>}, {pipeline_mode = #tpu.pipeline_mode<synchronous>, transform_indices = @transform_25, window_bounds = array<i64: 32, 128>}, {pipeline_mode = #tpu.pipeline_mode<synchronous>, transform_indices = @transform_26, window_bounds = array<i64: 1, 128>}, {pipeline_mode = #tpu.pipeline_mode<synchronous>, transform_indices = @transform_27, window_bounds = array<i64: 128, 32>}, {pipeline_mode = #tpu.pipeline_mode<synchronous>, transform_indices = @transform_28, window_bounds = array<i64: 1, 32>}, {pipeline_mode = #tpu.pipeline_mode<synchronous>, transform_indices = @transform_29, window_bounds = array<i64: 1, 32>}, {pipeline_mode = #tpu.pipeline_mode<synchronous>, transform_indices = @transform_30, window_bounds = array<i64: 1, 32>}, {transform_indices = @transform_31, window_bounds = array<i64: 1, 16, 32>}]} {
    %c0 = arith.constant 0 : index
    %c0_0 = arith.constant 0 : index
    %c0_1 = arith.constant 0 : index
    %0 = vector.load %arg1[%c0, %c0_0, %c0_1] : memref<1x16x32xf32, #tpu.memory_space<vmem>>, vector<1x16x32xf32>
    %1 = vector.shape_cast %0 : vector<1x16x32xf32> to vector<16x32xf32>
    %2 = arith.truncf %1 : vector<16x32xf32> to vector<16x32xbf16>
    %c0_2 = arith.constant 0 : index
    %c0_3 = arith.constant 0 : index
    %3 = vector.load %arg20[%c0_2, %c0_3] : memref<1x32xf32, #tpu.memory_space<vmem>>, vector<1x32xf32>
    %c0_4 = arith.constant 0 : index
    %c0_5 = arith.constant 0 : index
    %4 = vector.load %arg21[%c0_4, %c0_5] : memref<1x32xf32, #tpu.memory_space<vmem>>, vector<1x32xf32>
    %c0_6 = arith.constant 0 : index
    %c0_7 = arith.constant 0 : index
    %5 = vector.load %arg2[%c0_6, %c0_7] : memref<16x16xbf16, #tpu.memory_space<vmem>>, vector<16x16xbf16>
    %cst = arith.constant dense<0.000000e+00> : vector<16x32xf32>
    %6 = tpu.matmul %5, %2, %cst {dimension_numbers = #tpu.dot_dimension_numbers<[1], [0], [0], [1], [0, 0, 1, 1], [], []>} : vector<16x16xbf16>, vector<16x32xbf16>, vector<16x32xf32> -> vector<16x32xf32>
    %cst_8 = arith.constant 2.000000e-01 : f32
    %7 = vector.broadcast %cst_8 : f32 to vector<16x32xf32>
    %8 = arith.mulf %6, %7 : vector<16x32xf32>
    %9 = arith.subf %1, %8 : vector<16x32xf32>
    %10 = arith.truncf %9 : vector<16x32xf32> to vector<16x32xbf16>
    %cst_9 = arith.constant 0.000000e+00 : f32
    %11 = vector.broadcast %cst_9 : f32 to vector<9x32xf32>
    %c0_10 = arith.constant 0 : index
    %c0_11 = arith.constant 0 : index
    %c0_12 = arith.constant 0 : index
    %12 = vector.load %arg3[%c0_10, %c0_11, %c0_12] : memref<2x9x16xbf16, #tpu.memory_space<vmem>>, vector<1x9x16xbf16>
    %13 = vector.shape_cast %12 : vector<1x9x16xbf16> to vector<9x16xbf16>
    %cst_13 = arith.constant dense<0.000000e+00> : vector<9x32xf32>
    %14 = tpu.matmul %13, %10, %cst_13 {dimension_numbers = #tpu.dot_dimension_numbers<[1], [0], [0], [1], [0, 0, 1, 1], [], []>} : vector<9x16xbf16>, vector<16x32xbf16>, vector<9x32xf32> -> vector<9x32xf32>
    %15 = arith.truncf %14 : vector<9x32xf32> to vector<9x32xbf16>
    %c0_14 = arith.constant 0 : index
    %c0_15 = arith.constant 0 : index
    %c0_16 = arith.constant 0 : index
    %16 = vector.load %arg4[%c0_14, %c0_15, %c0_16] : memref<2x32x32xbf16, #tpu.memory_space<vmem>>, vector<1x32x32xbf16>
    %17 = vector.shape_cast %16 : vector<1x32x32xbf16> to vector<32x32xbf16>
    %cst_17 = arith.constant dense<0.000000e+00> : vector<9x32xf32>
    %18 = tpu.matmul %15, %17, %cst_17 {dimension_numbers = #tpu.dot_dimension_numbers<[1], [0], [0], [1], [0, 0, 1, 1], [], []>} : vector<9x32xbf16>, vector<32x32xbf16>, vector<9x32xf32> -> vector<9x32xf32>
    %19 = arith.addf %11, %18 : vector<9x32xf32>
    %c1 = arith.constant 1 : index
    %c0_18 = arith.constant 0 : index
    %c0_19 = arith.constant 0 : index
    %20 = vector.load %arg3[%c1, %c0_18, %c0_19] : memref<2x9x16xbf16, #tpu.memory_space<vmem>>, vector<1x9x16xbf16>
    %21 = vector.shape_cast %20 : vector<1x9x16xbf16> to vector<9x16xbf16>
    %cst_20 = arith.constant dense<0.000000e+00> : vector<9x32xf32>
    %22 = tpu.matmul %21, %10, %cst_20 {dimension_numbers = #tpu.dot_dimension_numbers<[1], [0], [0], [1], [0, 0, 1, 1], [], []>} : vector<9x16xbf16>, vector<16x32xbf16>, vector<9x32xf32> -> vector<9x32xf32>
    %23 = arith.truncf %22 : vector<9x32xf32> to vector<9x32xbf16>
    %c1_21 = arith.constant 1 : index
    %c0_22 = arith.constant 0 : index
    %c0_23 = arith.constant 0 : index
    %24 = vector.load %arg4[%c1_21, %c0_22, %c0_23] : memref<2x32x32xbf16, #tpu.memory_space<vmem>>, vector<1x32x32xbf16>
    %25 = vector.shape_cast %24 : vector<1x32x32xbf16> to vector<32x32xbf16>
    %cst_24 = arith.constant dense<0.000000e+00> : vector<9x32xf32>
    %26 = tpu.matmul %23, %25, %cst_24 {dimension_numbers = #tpu.dot_dimension_numbers<[1], [0], [0], [1], [0, 0, 1, 1], [], []>} : vector<9x32xbf16>, vector<32x32xbf16>, vector<9x32xf32> -> vector<9x32xf32>
    %27 = arith.addf %19, %26 : vector<9x32xf32>
    %c0_25 = arith.constant 0 : index
    %c0_26 = arith.constant 0 : index
    %28 = vector.load %arg5[%c0_25, %c0_26] : memref<1x32xf32, #tpu.memory_space<vmem>>, vector<1x32xf32>
    %29 = vector.broadcast %28 : vector<1x32xf32> to vector<9x32xf32>
    %30 = arith.addf %27, %29 : vector<9x32xf32>
    %31 = math.tanh %30 : vector<9x32xf32>
    %cst_27 = arith.constant 0.000000e+00 : f32
    %32 = vector.broadcast %cst_27 : f32 to vector<8x32xf32>
    %c0_28 = arith.constant 0 : index
    %c0_29 = arith.constant 0 : index
    %33 = vector.load %arg33[%c0_28, %c0_29] : memref<17x32xf32, #tpu.memory_space<vmem>>, vector<8x32xf32>
    tpu.vector_store %arg33[%c0_28, %c0_29], %32 {strides = array<i32>} : memref<17x32xf32, #tpu.memory_space<vmem>>, vector<8x32xf32>,
    %c8 = arith.constant 8 : index
    %c0_30 = arith.constant 0 : index
    %34 = vector.load %arg33[%c8, %c0_30] : memref<17x32xf32, #tpu.memory_space<vmem>>, vector<9x32xf32>
    tpu.vector_store %arg33[%c8, %c0_30], %31 {strides = array<i32>} : memref<17x32xf32, #tpu.memory_space<vmem>>, vector<9x32xf32>,
    %cst_31 = arith.constant 0.000000e+00 : f32
    %35 = vector.broadcast %cst_31 : f32 to vector<9x32xf32>
    %c0_32 = arith.constant 0 : index
    %c0_33 = arith.constant 0 : index
    %36 = vector.load %arg33[%c0_32, %c0_33] : memref<17x32xf32, #tpu.memory_space<vmem>>, vector<9x32xf32>
    %37 = arith.truncf %36 : vector<9x32xf32> to vector<9x32xbf16>
    %c0_34 = arith.constant 0 : index
    %c0_35 = arith.constant 0 : index
    %c0_36 = arith.constant 0 : index
    %38 = vector.load %arg6[%c0_34, %c0_35, %c0_36] : memref<9x32x32xbf16, #tpu.memory_space<vmem>>, vector<1x32x32xbf16>
    %39 = vector.shape_cast %38 : vector<1x32x32xbf16> to vector<32x32xbf16>
    %cst_37 = arith.constant dense<0.000000e+00> : vector<9x32xf32>
    %40 = tpu.matmul %37, %39, %cst_37 {dimension_numbers = #tpu.dot_dimension_numbers<[1], [0], [0], [1], [0, 0, 1, 1], [], []>} : vector<9x32xbf16>, vector<32x32xbf16>, vector<9x32xf32> -> vector<9x32xf32>
    %41 = arith.addf %35, %40 : vector<9x32xf32>
    %c1_38 = arith.constant 1 : index
    %c0_39 = arith.constant 0 : index
    %42 = vector.load %arg33[%c1_38, %c0_39] : memref<17x32xf32, #tpu.memory_space<vmem>>, vector<9x32xf32>
    %43 = arith.truncf %42 : vector<9x32xf32> to vector<9x32xbf16>
    %c1_40 = arith.constant 1 : index
    %c0_41 = arith.constant 0 : index
    %c0_42 = arith.constant 0 : index
    %44 = vector.load %arg6[%c1_40, %c0_41, %c0_42] : memref<9x32x32xbf16, #tpu.memory_space<vmem>>, vector<1x32x32xbf16>
    %45 = vector.shape_cast %44 : vector<1x32x32xbf16> to vector<32x32xbf16>
    %cst_43 = arith.constant dense<0.000000e+00> : vector<9x32xf32>
    %46 = tpu.matmul %43, %45, %cst_43 {dimension_numbers = #tpu.dot_dimension_numbers<[1], [0], [0], [1], [0, 0, 1, 1], [], []>} : vector<9x32xbf16>, vector<32x32xbf16>, vector<9x32xf32> -> vector<9x32xf32>
    %47 = arith.addf %41, %46 : vector<9x32xf32>
    %c2 = arith.constant 2 : index
    %c0_44 = arith.constant 0 : index
    %48 = vector.load %arg33[%c2, %c0_44] : memref<17x32xf32, #tpu.memory_space<vmem>>, vector<9x32xf32>
    %49 = arith.truncf %48 : vector<9x32xf32> to vector<9x32xbf16>
    %c2_45 = arith.constant 2 : index
    %c0_46 = arith.constant 0 : index
    %c0_47 = arith.constant 0 : index
    %50 = vector.load %arg6[%c2_45, %c0_46, %c0_47] : memref<9x32x32xbf16, #tpu.memory_space<vmem>>, vector<1x32x32xbf16>
    %51 = vector.shape_cast %50 : vector<1x32x32xbf16> to vector<32x32xbf16>
    %cst_48 = arith.constant dense<0.000000e+00> : vector<9x32xf32>
    %52 = tpu.matmul %49, %51, %cst_48 {dimension_numbers = #tpu.dot_dimension_numbers<[1], [0], [0], [1], [0, 0, 1, 1], [], []>} : vector<9x32xbf16>, vector<32x32xbf16>, vector<9x32xf32> -> vector<9x32xf32>
    %53 = arith.addf %47, %52 : vector<9x32xf32>
    %c3 = arith.constant 3 : index
    %c0_49 = arith.constant 0 : index
    %54 = vector.load %arg33[%c3, %c0_49] : memref<17x32xf32, #tpu.memory_space<vmem>>, vector<9x32xf32>
    %55 = arith.truncf %54 : vector<9x32xf32> to vector<9x32xbf16>
    %c3_50 = arith.constant 3 : index
    %c0_51 = arith.constant 0 : index
    %c0_52 = arith.constant 0 : index
    %56 = vector.load %arg6[%c3_50, %c0_51, %c0_52] : memref<9x32x32xbf16, #tpu.memory_space<vmem>>, vector<1x32x32xbf16>
    %57 = vector.shape_cast %56 : vector<1x32x32xbf16> to vector<32x32xbf16>
    %cst_53 = arith.constant dense<0.000000e+00> : vector<9x32xf32>
    %58 = tpu.matmul %55, %57, %cst_53 {dimension_numbers = #tpu.dot_dimension_numbers<[1], [0], [0], [1], [0, 0, 1, 1], [], []>} : vector<9x32xbf16>, vector<32x32xbf16>, vector<9x32xf32> -> vector<9x32xf32>
    %59 = arith.addf %53, %58 : vector<9x32xf32>
    %c4 = arith.constant 4 : index
    %c0_54 = arith.constant 0 : index
    %60 = vector.load %arg33[%c4, %c0_54] : memref<17x32xf32, #tpu.memory_space<vmem>>, vector<9x32xf32>
    %61 = arith.truncf %60 : vector<9x32xf32> to vector<9x32xbf16>
    %c4_55 = arith.constant 4 : index
    %c0_56 = arith.constant 0 : index
    %c0_57 = arith.constant 0 : index
    %62 = vector.load %arg6[%c4_55, %c0_56, %c0_57] : memref<9x32x32xbf16, #tpu.memory_space<vmem>>, vector<1x32x32xbf16>
    %63 = vector.shape_cast %62 : vector<1x32x32xbf16> to vector<32x32xbf16>
    %cst_58 = arith.constant dense<0.000000e+00> : vector<9x32xf32>
    %64 = tpu.matmul %61, %63, %cst_58 {dimension_numbers = #tpu.dot_dimension_numbers<[1], [0], [0], [1], [0, 0, 1, 1], [], []>} : vector<9x32xbf16>, vector<32x32xbf16>, vector<9x32xf32> -> vector<9x32xf32>
    %65 = arith.addf %59, %64 : vector<9x32xf32>
    %c5 = arith.constant 5 : index
    %c0_59 = arith.constant 0 : index
    %66 = vector.load %arg33[%c5, %c0_59] : memref<17x32xf32, #tpu.memory_space<vmem>>, vector<9x32xf32>
    %67 = arith.truncf %66 : vector<9x32xf32> to vector<9x32xbf16>
    %c5_60 = arith.constant 5 : index
    %c0_61 = arith.constant 0 : index
    %c0_62 = arith.constant 0 : index
    %68 = vector.load %arg6[%c5_60, %c0_61, %c0_62] : memref<9x32x32xbf16, #tpu.memory_space<vmem>>, vector<1x32x32xbf16>
    %69 = vector.shape_cast %68 : vector<1x32x32xbf16> to vector<32x32xbf16>
    %cst_63 = arith.constant dense<0.000000e+00> : vector<9x32xf32>
    %70 = tpu.matmul %67, %69, %cst_63 {dimension_numbers = #tpu.dot_dimension_numbers<[1], [0], [0], [1], [0, 0, 1, 1], [], []>} : vector<9x32xbf16>, vector<32x32xbf16>, vector<9x32xf32> -> vector<9x32xf32>
    %71 = arith.addf %65, %70 : vector<9x32xf32>
    %c6 = arith.constant 6 : index
    %c0_64 = arith.constant 0 : index
    %72 = vector.load %arg33[%c6, %c0_64] : memref<17x32xf32, #tpu.memory_space<vmem>>, vector<9x32xf32>
    %73 = arith.truncf %72 : vector<9x32xf32> to vector<9x32xbf16>
    %c6_65 = arith.constant 6 : index
    %c0_66 = arith.constant 0 : index
    %c0_67 = arith.constant 0 : index
    %74 = vector.load %arg6[%c6_65, %c0_66, %c0_67] : memref<9x32x32xbf16, #tpu.memory_space<vmem>>, vector<1x32x32xbf16>
    %75 = vector.shape_cast %74 : vector<1x32x32xbf16> to vector<32x32xbf16>
    %cst_68 = arith.constant dense<0.000000e+00> : vector<9x32xf32>
    %76 = tpu.matmul %73, %75, %cst_68 {dimension_numbers = #tpu.dot_dimension_numbers<[1], [0], [0], [1], [0, 0, 1, 1], [], []>} : vector<9x32xbf16>, vector<32x32xbf16>, vector<9x32xf32> -> vector<9x32xf32>
    %77 = arith.addf %71, %76 : vector<9x32xf32>
    %c7 = arith.constant 7 : index
    %c0_69 = arith.constant 0 : index
    %78 = vector.load %arg33[%c7, %c0_69] : memref<17x32xf32, #tpu.memory_space<vmem>>, vector<9x32xf32>
    %79 = arith.truncf %78 : vector<9x32xf32> to vector<9x32xbf16>
    %c7_70 = arith.constant 7 : index
    %c0_71 = arith.constant 0 : index
    %c0_72 = arith.constant 0 : index
    %80 = vector.load %arg6[%c7_70, %c0_71, %c0_72] : memref<9x32x32xbf16, #tpu.memory_space<vmem>>, vector<1x32x32xbf16>
    %81 = vector.shape_cast %80 : vector<1x32x32xbf16> to vector<32x32xbf16>
    %cst_73 = arith.constant dense<0.000000e+00> : vector<9x32xf32>
    %82 = tpu.matmul %79, %81, %cst_73 {dimension_numbers = #tpu.dot_dimension_numbers<[1], [0], [0], [1], [0, 0, 1, 1], [], []>} : vector<9x32xbf16>, vector<32x32xbf16>, vector<9x32xf32> -> vector<9x32xf32>
    %83 = arith.addf %77, %82 : vector<9x32xf32>
    %c8_74 = arith.constant 8 : index
    %c0_75 = arith.constant 0 : index
    %84 = vector.load %arg33[%c8_74, %c0_75] : memref<17x32xf32, #tpu.memory_space<vmem>>, vector<9x32xf32>
    %85 = arith.truncf %84 : vector<9x32xf32> to vector<9x32xbf16>
    %c8_76 = arith.constant 8 : index
    %c0_77 = arith.constant 0 : index
    %c0_78 = arith.constant 0 : index
    %86 = vector.load %arg6[%c8_76, %c0_77, %c0_78] : memref<9x32x32xbf16, #tpu.memory_space<vmem>>, vector<1x32x32xbf16>
    %87 = vector.shape_cast %86 : vector<1x32x32xbf16> to vector<32x32xbf16>
    %cst_79 = arith.constant dense<0.000000e+00> : vector<9x32xf32>
    %88 = tpu.matmul %85, %87, %cst_79 {dimension_numbers = #tpu.dot_dimension_numbers<[1], [0], [0], [1], [0, 0, 1, 1], [], []>} : vector<9x32xbf16>, vector<32x32xbf16>, vector<9x32xf32> -> vector<9x32xf32>
    %89 = arith.addf %83, %88 : vector<9x32xf32>
    %c0_80 = arith.constant 0 : index
    %c0_81 = arith.constant 0 : index
    %90 = vector.load %arg7[%c0_80, %c0_81] : memref<1x32xf32, #tpu.memory_space<vmem>>, vector<1x32xf32>
    %91 = vector.broadcast %90 : vector<1x32xf32> to vector<9x32xf32>
    %92 = arith.addf %89, %91 : vector<9x32xf32>
    %93 = math.tanh %92 : vector<9x32xf32>
    %94 = arith.addf %93, %31 : vector<9x32xf32>
    %cst_82 = arith.constant dense<0.000000e+00> : vector<9xf32>
    %95 = vector.multi_reduction <add>, %94, %cst_82 [1] : vector<9x32xf32> to vector<9xf32>
    %96 = vector.shape_cast %95 : vector<9xf32> to vector<9x1xf32>
    %cst_83 = arith.constant 3.200000e+01 : f32
    %97 = vector.broadcast %cst_83 : f32 to vector<9x1xf32>
    %98 = arith.divf %96, %97 : vector<9x1xf32>
    %99 = vector.broadcast %98 : vector<9x1xf32> to vector<9x32xf32>
    %100 = arith.subf %94, %99 : vector<9x32xf32>
    %101 = arith.mulf %100, %100 : vector<9x32xf32>
    %cst_84 = arith.constant dense<0.000000e+00> : vector<9xf32>
    %102 = vector.multi_reduction <add>, %101, %cst_84 [1] : vector<9x32xf32> to vector<9xf32>
    %103 = vector.shape_cast %102 : vector<9xf32> to vector<9x1xf32>
    %cst_85 = arith.constant 3.200000e+01 : f32
    %104 = vector.broadcast %cst_85 : f32 to vector<9x1xf32>
    %105 = arith.divf %103, %104 : vector<9x1xf32>
    %cst_86 = arith.constant 9.99999974E-6 : f32
    %106 = vector.broadcast %cst_86 : f32 to vector<9x1xf32>
    %107 = arith.addf %105, %106 : vector<9x1xf32>
    %108 = math.rsqrt %107 : vector<9x1xf32>
    %109 = vector.broadcast %108 : vector<9x1xf32> to vector<9x32xf32>
    %110 = arith.mulf %100, %109 : vector<9x32xf32>
    %111 = vector.broadcast %3 : vector<1x32xf32> to vector<9x32xf32>
    %112 = arith.mulf %110, %111 : vector<9x32xf32>
    %113 = vector.broadcast %4 : vector<1x32xf32> to vector<9x32xf32>
    %114 = arith.addf %112, %113 : vector<9x32xf32>
    %115 = arith.truncf %114 : vector<9x32xf32> to vector<9x32xbf16>
    %c0_87 = arith.constant 0 : index
    %c0_88 = arith.constant 0 : index
    %116 = vector.load %arg9[%c0_87, %c0_88] : memref<1x32xf32, #tpu.memory_space<vmem>>, vector<1x32xf32>
    %cst_89 = arith.constant 0.000000e+00 : f32
    %117 = vector.broadcast %cst_89 : f32 to vector<16x32xf32>
    %c0_90 = arith.constant 0 : index
    %c0_91 = arith.constant 0 : index
    %c0_92 = arith.constant 0 : index
    %118 = vector.load %arg8[%c0_90, %c0_91, %c0_92] : memref<2x32x32xbf16, #tpu.memory_space<vmem>>, vector<1x32x32xbf16>
    %119 = vector.shape_cast %118 : vector<1x32x32xbf16> to vector<32x32xbf16>
    %cst_93 = arith.constant dense<0.000000e+00> : vector<9x32xf32>
    %120 = tpu.matmul %115, %119, %cst_93 {dimension_numbers = #tpu.dot_dimension_numbers<[1], [0], [0], [1], [0, 0, 1, 1], [], []>} : vector<9x32xbf16>, vector<32x32xbf16>, vector<9x32xf32> -> vector<9x32xf32>
    %121 = vector.broadcast %116 : vector<1x32xf32> to vector<9x32xf32>
    %122 = arith.addf %120, %121 : vector<9x32xf32>
    %123 = math.tanh %122 : vector<9x32xf32>
    %c0_94 = arith.constant 0 : index
    %c0_95 = arith.constant 0 : index
    %c0_96 = arith.constant 0 : index
    %124 = vector.load %arg10[%c0_94, %c0_95, %c0_96] : memref<2x16x9xbf16, #tpu.memory_space<vmem>>, vector<1x16x9xbf16>
    %125 = vector.shape_cast %124 : vector<1x16x9xbf16> to vector<16x9xbf16>
    %126 = arith.truncf %123 : vector<9x32xf32> to vector<9x32xbf16>
    %cst_97 = arith.constant dense<0.000000e+00> : vector<16x32xf32>
    %127 = tpu.matmul %125, %126, %cst_97 {dimension_numbers = #tpu.dot_dimension_numbers<[1], [0], [0], [1], [0, 0, 1, 1], [], []>} : vector<16x9xbf16>, vector<9x32xbf16>, vector<16x32xf32> -> vector<16x32xf32>
    %128 = arith.addf %117, %127 : vector<16x32xf32>
    %c1_98 = arith.constant 1 : index
    %c0_99 = arith.constant 0 : index
    %c0_100 = arith.constant 0 : index
    %129 = vector.load %arg8[%c1_98, %c0_99, %c0_100] : memref<2x32x32xbf16, #tpu.memory_space<vmem>>, vector<1x32x32xbf16>
    %130 = vector.shape_cast %129 : vector<1x32x32xbf16> to vector<32x32xbf16>
    %cst_101 = arith.constant dense<0.000000e+00> : vector<9x32xf32>
    %131 = tpu.matmul %115, %130, %cst_101 {dimension_numbers = #tpu.dot_dimension_numbers<[1], [0], [0], [1], [0, 0, 1, 1], [], []>} : vector<9x32xbf16>, vector<32x32xbf16>, vector<9x32xf32> -> vector<9x32xf32>
    %132 = vector.broadcast %116 : vector<1x32xf32> to vector<9x32xf32>
    %133 = arith.addf %131, %132 : vector<9x32xf32>
    %134 = math.tanh %133 : vector<9x32xf32>
    %c1_102 = arith.constant 1 : index
    %c0_103 = arith.constant 0 : index
    %c0_104 = arith.constant 0 : index
    %135 = vector.load %arg10[%c1_102, %c0_103, %c0_104] : memref<2x16x9xbf16, #tpu.memory_space<vmem>>, vector<1x16x9xbf16>
    %136 = vector.shape_cast %135 : vector<1x16x9xbf16> to vector<16x9xbf16>
    %137 = arith.truncf %134 : vector<9x32xf32> to vector<9x32xbf16>
    %cst_105 = arith.constant dense<0.000000e+00> : vector<16x32xf32>
    %138 = tpu.matmul %136, %137, %cst_105 {dimension_numbers = #tpu.dot_dimension_numbers<[1], [0], [0], [1], [0, 0, 1, 1], [], []>} : vector<16x9xbf16>, vector<9x32xbf16>, vector<16x32xf32> -> vector<16x32xf32>
    %139 = arith.addf %128, %138 : vector<16x32xf32>
    %140 = arith.addf %139, %9 : vector<16x32xf32>
    %cst_106 = arith.constant dense<0.000000e+00> : vector<16xf32>
    %141 = vector.multi_reduction <add>, %140, %cst_106 [1] : vector<16x32xf32> to vector<16xf32>
    %142 = vector.shape_cast %141 : vector<16xf32> to vector<16x1xf32>
    %cst_107 = arith.constant 3.200000e+01 : f32
    %143 = vector.broadcast %cst_107 : f32 to vector<16x1xf32>
    %144 = arith.divf %142, %143 : vector<16x1xf32>
    %145 = vector.broadcast %144 : vector<16x1xf32> to vector<16x32xf32>
    %146 = arith.subf %140, %145 : vector<16x32xf32>
    %147 = arith.mulf %146, %146 : vector<16x32xf32>
    %cst_108 = arith.constant dense<0.000000e+00> : vector<16xf32>
    %148 = vector.multi_reduction <add>, %147, %cst_108 [1] : vector<16x32xf32> to vector<16xf32>
    %149 = vector.shape_cast %148 : vector<16xf32> to vector<16x1xf32>
    %cst_109 = arith.constant 3.200000e+01 : f32
    %150 = vector.broadcast %cst_109 : f32 to vector<16x1xf32>
    %151 = arith.divf %149, %150 : vector<16x1xf32>
    %cst_110 = arith.constant 9.99999974E-6 : f32
    %152 = vector.broadcast %cst_110 : f32 to vector<16x1xf32>
    %153 = arith.addf %151, %152 : vector<16x1xf32>
    %154 = math.rsqrt %153 : vector<16x1xf32>
    %155 = vector.broadcast %154 : vector<16x1xf32> to vector<16x32xf32>
    %156 = arith.mulf %146, %155 : vector<16x32xf32>
    %157 = vector.broadcast %3 : vector<1x32xf32> to vector<16x32xf32>
    %158 = arith.mulf %156, %157 : vector<16x32xf32>
    %159 = vector.broadcast %4 : vector<1x32xf32> to vector<16x32xf32>
    %160 = arith.addf %158, %159 : vector<16x32xf32>
    %c0_111 = arith.constant 0 : index
    %c0_112 = arith.constant 0 : index
    %161 = vector.load %arg11[%c0_111, %c0_112] : memref<16x16xbf16, #tpu.memory_space<vmem>>, vector<16x16xbf16>
    %cst_113 = arith.constant dense<0.000000e+00> : vector<16x32xf32>
    %162 = tpu.matmul %161, %2, %cst_113 {dimension_numbers = #tpu.dot_dimension_numbers<[1], [0], [0], [1], [0, 0, 1, 1], [], []>} : vector<16x16xbf16>, vector<16x32xbf16>, vector<16x32xf32> -> vector<16x32xf32>
    %cst_114 = arith.constant 0.142857149 : f32
    %163 = vector.broadcast %cst_114 : f32 to vector<16x32xf32>
    %164 = arith.mulf %162, %163 : vector<16x32xf32>
    %165 = arith.subf %1, %164 : vector<16x32xf32>
    %166 = arith.truncf %165 : vector<16x32xf32> to vector<16x32xbf16>
    %cst_115 = arith.constant 0.000000e+00 : f32
    %167 = vector.broadcast %cst_115 : f32 to vector<5x32xf32>
    %c0_116 = arith.constant 0 : index
    %c0_117 = arith.constant 0 : index
    %c0_118 = arith.constant 0 : index
    %168 = vector.load %arg12[%c0_116, %c0_117, %c0_118] : memref<4x5x16xbf16, #tpu.memory_space<vmem>>, vector<1x5x16xbf16>
    %169 = vector.shape_cast %168 : vector<1x5x16xbf16> to vector<5x16xbf16>
    %cst_119 = arith.constant dense<0.000000e+00> : vector<5x32xf32>
    %170 = tpu.matmul %169, %166, %cst_119 {dimension_numbers = #tpu.dot_dimension_numbers<[1], [0], [0], [1], [0, 0, 1, 1], [], []>} : vector<5x16xbf16>, vector<16x32xbf16>, vector<5x32xf32> -> vector<5x32xf32>
    %171 = arith.truncf %170 : vector<5x32xf32> to vector<5x32xbf16>
    %c0_120 = arith.constant 0 : index
    %c0_121 = arith.constant 0 : index
    %c0_122 = arith.constant 0 : index
    %172 = vector.load %arg13[%c0_120, %c0_121, %c0_122] : memref<4x32x32xbf16, #tpu.memory_space<vmem>>, vector<1x32x32xbf16>
    %173 = vector.shape_cast %172 : vector<1x32x32xbf16> to vector<32x32xbf16>
    %cst_123 = arith.constant dense<0.000000e+00> : vector<5x32xf32>
    %174 = tpu.matmul %171, %173, %cst_123 {dimension_numbers = #tpu.dot_dimension_numbers<[1], [0], [0], [1], [0, 0, 1, 1], [], []>} : vector<5x32xbf16>, vector<32x32xbf16>, vector<5x32xf32> -> vector<5x32xf32>
    %175 = arith.addf %167, %174 : vector<5x32xf32>
    %c1_124 = arith.constant 1 : index
    %c0_125 = arith.constant 0 : index
    %c0_126 = arith.constant 0 : index
    %176 = vector.load %arg12[%c1_124, %c0_125, %c0_126] : memref<4x5x16xbf16, #tpu.memory_space<vmem>>, vector<1x5x16xbf16>
    %177 = vector.shape_cast %176 : vector<1x5x16xbf16> to vector<5x16xbf16>
    %cst_127 = arith.constant dense<0.000000e+00> : vector<5x32xf32>
    %178 = tpu.matmul %177, %166, %cst_127 {dimension_numbers = #tpu.dot_dimension_numbers<[1], [0], [0], [1], [0, 0, 1, 1], [], []>} : vector<5x16xbf16>, vector<16x32xbf16>, vector<5x32xf32> -> vector<5x32xf32>
    %179 = arith.truncf %178 : vector<5x32xf32> to vector<5x32xbf16>
    %c1_128 = arith.constant 1 : index
    %c0_129 = arith.constant 0 : index
    %c0_130 = arith.constant 0 : index
    %180 = vector.load %arg13[%c1_128, %c0_129, %c0_130] : memref<4x32x32xbf16, #tpu.memory_space<vmem>>, vector<1x32x32xbf16>
    %181 = vector.shape_cast %180 : vector<1x32x32xbf16> to vector<32x32xbf16>
    %cst_131 = arith.constant dense<0.000000e+00> : vector<5x32xf32>
    %182 = tpu.matmul %179, %181, %cst_131 {dimension_numbers = #tpu.dot_dimension_numbers<[1], [0], [0], [1], [0, 0, 1, 1], [], []>} : vector<5x32xbf16>, vector<32x32xbf16>, vector<5x32xf32> -> vector<5x32xf32>
    %183 = arith.addf %175, %182 : vector<5x32xf32>
    %c2_132 = arith.constant 2 : index
    %c0_133 = arith.constant 0 : index
    %c0_134 = arith.constant 0 : index
    %184 = vector.load %arg12[%c2_132, %c0_133, %c0_134] : memref<4x5x16xbf16, #tpu.memory_space<vmem>>, vector<1x5x16xbf16>
    %185 = vector.shape_cast %184 : vector<1x5x16xbf16> to vector<5x16xbf16>
    %cst_135 = arith.constant dense<0.000000e+00> : vector<5x32xf32>
    %186 = tpu.matmul %185, %166, %cst_135 {dimension_numbers = #tpu.dot_dimension_numbers<[1], [0], [0], [1], [0, 0, 1, 1], [], []>} : vector<5x16xbf16>, vector<16x32xbf16>, vector<5x32xf32> -> vector<5x32xf32>
    %187 = arith.truncf %186 : vector<5x32xf32> to vector<5x32xbf16>
    %c2_136 = arith.constant 2 : index
    %c0_137 = arith.constant 0 : index
    %c0_138 = arith.constant 0 : index
    %188 = vector.load %arg13[%c2_136, %c0_137, %c0_138] : memref<4x32x32xbf16, #tpu.memory_space<vmem>>, vector<1x32x32xbf16>
    %189 = vector.shape_cast %188 : vector<1x32x32xbf16> to vector<32x32xbf16>
    %cst_139 = arith.constant dense<0.000000e+00> : vector<5x32xf32>
    %190 = tpu.matmul %187, %189, %cst_139 {dimension_numbers = #tpu.dot_dimension_numbers<[1], [0], [0], [1], [0, 0, 1, 1], [], []>} : vector<5x32xbf16>, vector<32x32xbf16>, vector<5x32xf32> -> vector<5x32xf32>
    %191 = arith.addf %183, %190 : vector<5x32xf32>
    %c3_140 = arith.constant 3 : index
    %c0_141 = arith.constant 0 : index
    %c0_142 = arith.constant 0 : index
    %192 = vector.load %arg12[%c3_140, %c0_141, %c0_142] : memref<4x5x16xbf16, #tpu.memory_space<vmem>>, vector<1x5x16xbf16>
    %193 = vector.shape_cast %192 : vector<1x5x16xbf16> to vector<5x16xbf16>
    %cst_143 = arith.constant dense<0.000000e+00> : vector<5x32xf32>
    %194 = tpu.matmul %193, %166, %cst_143 {dimension_numbers = #tpu.dot_dimension_numbers<[1], [0], [0], [1], [0, 0, 1, 1], [], []>} : vector<5x16xbf16>, vector<16x32xbf16>, vector<5x32xf32> -> vector<5x32xf32>
    %195 = arith.truncf %194 : vector<5x32xf32> to vector<5x32xbf16>
    %c3_144 = arith.constant 3 : index
    %c0_145 = arith.constant 0 : index
    %c0_146 = arith.constant 0 : index
    %196 = vector.load %arg13[%c3_144, %c0_145, %c0_146] : memref<4x32x32xbf16, #tpu.memory_space<vmem>>, vector<1x32x32xbf16>
    %197 = vector.shape_cast %196 : vector<1x32x32xbf16> to vector<32x32xbf16>
    %cst_147 = arith.constant dense<0.000000e+00> : vector<5x32xf32>
    %198 = tpu.matmul %195, %197, %cst_147 {dimension_numbers = #tpu.dot_dimension_numbers<[1], [0], [0], [1], [0, 0, 1, 1], [], []>} : vector<5x32xbf16>, vector<32x32xbf16>, vector<5x32xf32> -> vector<5x32xf32>
    %199 = arith.addf %191, %198 : vector<5x32xf32>
    %c0_148 = arith.constant 0 : index
    %c0_149 = arith.constant 0 : index
    %200 = vector.load %arg14[%c0_148, %c0_149] : memref<1x32xf32, #tpu.memory_space<vmem>>, vector<1x32xf32>
    %201 = vector.broadcast %200 : vector<1x32xf32> to vector<5x32xf32>
    %202 = arith.addf %199, %201 : vector<5x32xf32>
    %203 = math.tanh %202 : vector<5x32xf32>
    %cst_150 = arith.constant 0.000000e+00 : f32
    %204 = vector.broadcast %cst_150 : f32 to vector<4x32xf32>
    %c0_151 = arith.constant 0 : index
    %c0_152 = arith.constant 0 : index
    %205 = vector.load %arg34[%c0_151, %c0_152] : memref<9x32xf32, #tpu.memory_space<vmem>>, vector<4x32xf32>
    tpu.vector_store %arg34[%c0_151, %c0_152], %204 {strides = array<i32>} : memref<9x32xf32, #tpu.memory_space<vmem>>, vector<4x32xf32>,
    %c4_153 = arith.constant 4 : index
    %c0_154 = arith.constant 0 : index
    %206 = vector.load %arg34[%c4_153, %c0_154] : memref<9x32xf32, #tpu.memory_space<vmem>>, vector<5x32xf32>
    tpu.vector_store %arg34[%c4_153, %c0_154], %203 {strides = array<i32>} : memref<9x32xf32, #tpu.memory_space<vmem>>, vector<5x32xf32>,
    %cst_155 = arith.constant 0.000000e+00 : f32
    %207 = vector.broadcast %cst_155 : f32 to vector<5x32xf32>
    %c0_156 = arith.constant 0 : index
    %c0_157 = arith.constant 0 : index
    %208 = vector.load %arg34[%c0_156, %c0_157] : memref<9x32xf32, #tpu.memory_space<vmem>>, vector<5x32xf32>
    %209 = arith.truncf %208 : vector<5x32xf32> to vector<5x32xbf16>
    %c0_158 = arith.constant 0 : index
    %c0_159 = arith.constant 0 : index
    %c0_160 = arith.constant 0 : index
    %210 = vector.load %arg15[%c0_158, %c0_159, %c0_160] : memref<5x32x32xbf16, #tpu.memory_space<vmem>>, vector<1x32x32xbf16>
    %211 = vector.shape_cast %210 : vector<1x32x32xbf16> to vector<32x32xbf16>
    %cst_161 = arith.constant dense<0.000000e+00> : vector<5x32xf32>
    %212 = tpu.matmul %209, %211, %cst_161 {dimension_numbers = #tpu.dot_dimension_numbers<[1], [0], [0], [1], [0, 0, 1, 1], [], []>} : vector<5x32xbf16>, vector<32x32xbf16>, vector<5x32xf32> -> vector<5x32xf32>
    %213 = arith.addf %207, %212 : vector<5x32xf32>
    %c1_162 = arith.constant 1 : index
    %c0_163 = arith.constant 0 : index
    %214 = vector.load %arg34[%c1_162, %c0_163] : memref<9x32xf32, #tpu.memory_space<vmem>>, vector<5x32xf32>
    %215 = arith.truncf %214 : vector<5x32xf32> to vector<5x32xbf16>
    %c1_164 = arith.constant 1 : index
    %c0_165 = arith.constant 0 : index
    %c0_166 = arith.constant 0 : index
    %216 = vector.load %arg15[%c1_164, %c0_165, %c0_166] : memref<5x32x32xbf16, #tpu.memory_space<vmem>>, vector<1x32x32xbf16>
    %217 = vector.shape_cast %216 : vector<1x32x32xbf16> to vector<32x32xbf16>
    %cst_167 = arith.constant dense<0.000000e+00> : vector<5x32xf32>
    %218 = tpu.matmul %215, %217, %cst_167 {dimension_numbers = #tpu.dot_dimension_numbers<[1], [0], [0], [1], [0, 0, 1, 1], [], []>} : vector<5x32xbf16>, vector<32x32xbf16>, vector<5x32xf32> -> vector<5x32xf32>
    %219 = arith.addf %213, %218 : vector<5x32xf32>
    %c2_168 = arith.constant 2 : index
    %c0_169 = arith.constant 0 : index
    %220 = vector.load %arg34[%c2_168, %c0_169] : memref<9x32xf32, #tpu.memory_space<vmem>>, vector<5x32xf32>
    %221 = arith.truncf %220 : vector<5x32xf32> to vector<5x32xbf16>
    %c2_170 = arith.constant 2 : index
    %c0_171 = arith.constant 0 : index
    %c0_172 = arith.constant 0 : index
    %222 = vector.load %arg15[%c2_170, %c0_171, %c0_172] : memref<5x32x32xbf16, #tpu.memory_space<vmem>>, vector<1x32x32xbf16>
    %223 = vector.shape_cast %222 : vector<1x32x32xbf16> to vector<32x32xbf16>
    %cst_173 = arith.constant dense<0.000000e+00> : vector<5x32xf32>
    %224 = tpu.matmul %221, %223, %cst_173 {dimension_numbers = #tpu.dot_dimension_numbers<[1], [0], [0], [1], [0, 0, 1, 1], [], []>} : vector<5x32xbf16>, vector<32x32xbf16>, vector<5x32xf32> -> vector<5x32xf32>
    %225 = arith.addf %219, %224 : vector<5x32xf32>
    %c3_174 = arith.constant 3 : index
    %c0_175 = arith.constant 0 : index
    %226 = vector.load %arg34[%c3_174, %c0_175] : memref<9x32xf32, #tpu.memory_space<vmem>>, vector<5x32xf32>
    %227 = arith.truncf %226 : vector<5x32xf32> to vector<5x32xbf16>
    %c3_176 = arith.constant 3 : index
    %c0_177 = arith.constant 0 : index
    %c0_178 = arith.constant 0 : index
    %228 = vector.load %arg15[%c3_176, %c0_177, %c0_178] : memref<5x32x32xbf16, #tpu.memory_space<vmem>>, vector<1x32x32xbf16>
    %229 = vector.shape_cast %228 : vector<1x32x32xbf16> to vector<32x32xbf16>
    %cst_179 = arith.constant dense<0.000000e+00> : vector<5x32xf32>
    %230 = tpu.matmul %227, %229, %cst_179 {dimension_numbers = #tpu.dot_dimension_numbers<[1], [0], [0], [1], [0, 0, 1, 1], [], []>} : vector<5x32xbf16>, vector<32x32xbf16>, vector<5x32xf32> -> vector<5x32xf32>
    %231 = arith.addf %225, %230 : vector<5x32xf32>
    %c4_180 = arith.constant 4 : index
    %c0_181 = arith.constant 0 : index
    %232 = vector.load %arg34[%c4_180, %c0_181] : memref<9x32xf32, #tpu.memory_space<vmem>>, vector<5x32xf32>
    %233 = arith.truncf %232 : vector<5x32xf32> to vector<5x32xbf16>
    %c4_182 = arith.constant 4 : index
    %c0_183 = arith.constant 0 : index
    %c0_184 = arith.constant 0 : index
    %234 = vector.load %arg15[%c4_182, %c0_183, %c0_184] : memref<5x32x32xbf16, #tpu.memory_space<vmem>>, vector<1x32x32xbf16>
    %235 = vector.shape_cast %234 : vector<1x32x32xbf16> to vector<32x32xbf16>
    %cst_185 = arith.constant dense<0.000000e+00> : vector<5x32xf32>
    %236 = tpu.matmul %233, %235, %cst_185 {dimension_numbers = #tpu.dot_dimension_numbers<[1], [0], [0], [1], [0, 0, 1, 1], [], []>} : vector<5x32xbf16>, vector<32x32xbf16>, vector<5x32xf32> -> vector<5x32xf32>
    %237 = arith.addf %231, %236 : vector<5x32xf32>
    %c0_186 = arith.constant 0 : index
    %c0_187 = arith.constant 0 : index
    %238 = vector.load %arg16[%c0_186, %c0_187] : memref<1x32xf32, #tpu.memory_space<vmem>>, vector<1x32xf32>
    %239 = vector.broadcast %238 : vector<1x32xf32> to vector<5x32xf32>
    %240 = arith.addf %237, %239 : vector<5x32xf32>
    %241 = math.tanh %240 : vector<5x32xf32>
    %242 = arith.addf %241, %203 : vector<5x32xf32>
    %cst_188 = arith.constant dense<0.000000e+00> : vector<5xf32>
    %243 = vector.multi_reduction <add>, %242, %cst_188 [1] : vector<5x32xf32> to vector<5xf32>
    %244 = vector.shape_cast %243 : vector<5xf32> to vector<5x1xf32>
    %cst_189 = arith.constant 3.200000e+01 : f32
    %245 = vector.broadcast %cst_189 : f32 to vector<5x1xf32>
    %246 = arith.divf %244, %245 : vector<5x1xf32>
    %247 = vector.broadcast %246 : vector<5x1xf32> to vector<5x32xf32>
    %248 = arith.subf %242, %247 : vector<5x32xf32>
    %249 = arith.mulf %248, %248 : vector<5x32xf32>
    %cst_190 = arith.constant dense<0.000000e+00> : vector<5xf32>
    %250 = vector.multi_reduction <add>, %249, %cst_190 [1] : vector<5x32xf32> to vector<5xf32>
    %251 = vector.shape_cast %250 : vector<5xf32> to vector<5x1xf32>
    %cst_191 = arith.constant 3.200000e+01 : f32
    %252 = vector.broadcast %cst_191 : f32 to vector<5x1xf32>
    %253 = arith.divf %251, %252 : vector<5x1xf32>
    %cst_192 = arith.constant 9.99999974E-6 : f32
    %254 = vector.broadcast %cst_192 : f32 to vector<5x1xf32>
    %255 = arith.addf %253, %254 : vector<5x1xf32>
    %256 = math.rsqrt %255 : vector<5x1xf32>
    %257 = vector.broadcast %256 : vector<5x1xf32> to vector<5x32xf32>
    %258 = arith.mulf %248, %257 : vector<5x32xf32>
    %259 = vector.broadcast %3 : vector<1x32xf32> to vector<5x32xf32>
    %260 = arith.mulf %258, %259 : vector<5x32xf32>
    %261 = vector.broadcast %4 : vector<1x32xf32> to vector<5x32xf32>
    %262 = arith.addf %260, %261 : vector<5x32xf32>
    %263 = arith.truncf %262 : vector<5x32xf32> to vector<5x32xbf16>
    %c0_193 = arith.constant 0 : index
    %c0_194 = arith.constant 0 : index
    %264 = vector.load %arg18[%c0_193, %c0_194] : memref<1x32xf32, #tpu.memory_space<vmem>>, vector<1x32xf32>
    %cst_195 = arith.constant 0.000000e+00 : f32
    %265 = vector.broadcast %cst_195 : f32 to vector<16x32xf32>
    %c0_196 = arith.constant 0 : index
    %c0_197 = arith.constant 0 : index
    %c0_198 = arith.constant 0 : index
    %266 = vector.load %arg17[%c0_196, %c0_197, %c0_198] : memref<4x32x32xbf16, #tpu.memory_space<vmem>>, vector<1x32x32xbf16>
    %267 = vector.shape_cast %266 : vector<1x32x32xbf16> to vector<32x32xbf16>
    %cst_199 = arith.constant dense<0.000000e+00> : vector<5x32xf32>
    %268 = tpu.matmul %263, %267, %cst_199 {dimension_numbers = #tpu.dot_dimension_numbers<[1], [0], [0], [1], [0, 0, 1, 1], [], []>} : vector<5x32xbf16>, vector<32x32xbf16>, vector<5x32xf32> -> vector<5x32xf32>
    %269 = vector.broadcast %264 : vector<1x32xf32> to vector<5x32xf32>
    %270 = arith.addf %268, %269 : vector<5x32xf32>
    %271 = math.tanh %270 : vector<5x32xf32>
    %c0_200 = arith.constant 0 : index
    %c0_201 = arith.constant 0 : index
    %c0_202 = arith.constant 0 : index
    %272 = vector.load %arg19[%c0_200, %c0_201, %c0_202] : memref<4x16x5xbf16, #tpu.memory_space<vmem>>, vector<1x16x5xbf16>
    %273 = vector.shape_cast %272 : vector<1x16x5xbf16> to vector<16x5xbf16>
    %274 = arith.truncf %271 : vector<5x32xf32> to vector<5x32xbf16>
    %cst_203 = arith.constant dense<0.000000e+00> : vector<16x32xf32>
    %275 = tpu.matmul %273, %274, %cst_203 {dimension_numbers = #tpu.dot_dimension_numbers<[1], [0], [0], [1], [0, 0, 1, 1], [], []>} : vector<16x5xbf16>, vector<5x32xbf16>, vector<16x32xf32> -> vector<16x32xf32>
    %276 = arith.addf %265, %275 : vector<16x32xf32>
    %c1_204 = arith.constant 1 : index
    %c0_205 = arith.constant 0 : index
    %c0_206 = arith.constant 0 : index
    %277 = vector.load %arg17[%c1_204, %c0_205, %c0_206] : memref<4x32x32xbf16, #tpu.memory_space<vmem>>, vector<1x32x32xbf16>
    %278 = vector.shape_cast %277 : vector<1x32x32xbf16> to vector<32x32xbf16>
    %cst_207 = arith.constant dense<0.000000e+00> : vector<5x32xf32>
    %279 = tpu.matmul %263, %278, %cst_207 {dimension_numbers = #tpu.dot_dimension_numbers<[1], [0], [0], [1], [0, 0, 1, 1], [], []>} : vector<5x32xbf16>, vector<32x32xbf16>, vector<5x32xf32> -> vector<5x32xf32>
    %280 = vector.broadcast %264 : vector<1x32xf32> to vector<5x32xf32>
    %281 = arith.addf %279, %280 : vector<5x32xf32>
    %282 = math.tanh %281 : vector<5x32xf32>
    %c1_208 = arith.constant 1 : index
    %c0_209 = arith.constant 0 : index
    %c0_210 = arith.constant 0 : index
    %283 = vector.load %arg19[%c1_208, %c0_209, %c0_210] : memref<4x16x5xbf16, #tpu.memory_space<vmem>>, vector<1x16x5xbf16>
    %284 = vector.shape_cast %283 : vector<1x16x5xbf16> to vector<16x5xbf16>
    %285 = arith.truncf %282 : vector<5x32xf32> to vector<5x32xbf16>
    %cst_211 = arith.constant dense<0.000000e+00> : vector<16x32xf32>
    %286 = tpu.matmul %284, %285, %cst_211 {dimension_numbers = #tpu.dot_dimension_numbers<[1], [0], [0], [1], [0, 0, 1, 1], [], []>} : vector<16x5xbf16>, vector<5x32xbf16>, vector<16x32xf32> -> vector<16x32xf32>
    %287 = arith.addf %276, %286 : vector<16x32xf32>
    %c2_212 = arith.constant 2 : index
    %c0_213 = arith.constant 0 : index
    %c0_214 = arith.constant 0 : index
    %288 = vector.load %arg17[%c2_212, %c0_213, %c0_214] : memref<4x32x32xbf16, #tpu.memory_space<vmem>>, vector<1x32x32xbf16>
    %289 = vector.shape_cast %288 : vector<1x32x32xbf16> to vector<32x32xbf16>
    %cst_215 = arith.constant dense<0.000000e+00> : vector<5x32xf32>
    %290 = tpu.matmul %263, %289, %cst_215 {dimension_numbers = #tpu.dot_dimension_numbers<[1], [0], [0], [1], [0, 0, 1, 1], [], []>} : vector<5x32xbf16>, vector<32x32xbf16>, vector<5x32xf32> -> vector<5x32xf32>
    %291 = vector.broadcast %264 : vector<1x32xf32> to vector<5x32xf32>
    %292 = arith.addf %290, %291 : vector<5x32xf32>
    %293 = math.tanh %292 : vector<5x32xf32>
    %c2_216 = arith.constant 2 : index
    %c0_217 = arith.constant 0 : index
    %c0_218 = arith.constant 0 : index
    %294 = vector.load %arg19[%c2_216, %c0_217, %c0_218] : memref<4x16x5xbf16, #tpu.memory_space<vmem>>, vector<1x16x5xbf16>
    %295 = vector.shape_cast %294 : vector<1x16x5xbf16> to vector<16x5xbf16>
    %296 = arith.truncf %293 : vector<5x32xf32> to vector<5x32xbf16>
    %cst_219 = arith.constant dense<0.000000e+00> : vector<16x32xf32>
    %297 = tpu.matmul %295, %296, %cst_219 {dimension_numbers = #tpu.dot_dimension_numbers<[1], [0], [0], [1], [0, 0, 1, 1], [], []>} : vector<16x5xbf16>, vector<5x32xbf16>, vector<16x32xf32> -> vector<16x32xf32>
    %298 = arith.addf %287, %297 : vector<16x32xf32>
    %c3_220 = arith.constant 3 : index
    %c0_221 = arith.constant 0 : index
    %c0_222 = arith.constant 0 : index
    %299 = vector.load %arg17[%c3_220, %c0_221, %c0_222] : memref<4x32x32xbf16, #tpu.memory_space<vmem>>, vector<1x32x32xbf16>
    %300 = vector.shape_cast %299 : vector<1x32x32xbf16> to vector<32x32xbf16>
    %cst_223 = arith.constant dense<0.000000e+00> : vector<5x32xf32>
    %301 = tpu.matmul %263, %300, %cst_223 {dimension_numbers = #tpu.dot_dimension_numbers<[1], [0], [0], [1], [0, 0, 1, 1], [], []>} : vector<5x32xbf16>, vector<32x32xbf16>, vector<5x32xf32> -> vector<5x32xf32>
    %302 = vector.broadcast %264 : vector<1x32xf32> to vector<5x32xf32>
    %303 = arith.addf %301, %302 : vector<5x32xf32>
    %304 = math.tanh %303 : vector<5x32xf32>
    %c3_224 = arith.constant 3 : index
    %c0_225 = arith.constant 0 : index
    %c0_226 = arith.constant 0 : index
    %305 = vector.load %arg19[%c3_224, %c0_225, %c0_226] : memref<4x16x5xbf16, #tpu.memory_space<vmem>>, vector<1x16x5xbf16>
    %306 = vector.shape_cast %305 : vector<1x16x5xbf16> to vector<16x5xbf16>
    %307 = arith.truncf %304 : vector<5x32xf32> to vector<5x32xbf16>
    %cst_227 = arith.constant dense<0.000000e+00> : vector<16x32xf32>
    %308 = tpu.matmul %306, %307, %cst_227 {dimension_numbers = #tpu.dot_dimension_numbers<[1], [0], [0], [1], [0, 0, 1, 1], [], []>} : vector<16x5xbf16>, vector<5x32xbf16>, vector<16x32xf32> -> vector<16x32xf32>
    %309 = arith.addf %298, %308 : vector<16x32xf32>
    %310 = arith.addf %309, %165 : vector<16x32xf32>
    %cst_228 = arith.constant dense<0.000000e+00> : vector<16xf32>
    %311 = vector.multi_reduction <add>, %310, %cst_228 [1] : vector<16x32xf32> to vector<16xf32>
    %312 = vector.shape_cast %311 : vector<16xf32> to vector<16x1xf32>
    %cst_229 = arith.constant 3.200000e+01 : f32
    %313 = vector.broadcast %cst_229 : f32 to vector<16x1xf32>
    %314 = arith.divf %312, %313 : vector<16x1xf32>
    %315 = vector.broadcast %314 : vector<16x1xf32> to vector<16x32xf32>
    %316 = arith.subf %310, %315 : vector<16x32xf32>
    %317 = arith.mulf %316, %316 : vector<16x32xf32>
    %cst_230 = arith.constant dense<0.000000e+00> : vector<16xf32>
    %318 = vector.multi_reduction <add>, %317, %cst_230 [1] : vector<16x32xf32> to vector<16xf32>
    %319 = vector.shape_cast %318 : vector<16xf32> to vector<16x1xf32>
    %cst_231 = arith.constant 3.200000e+01 : f32
    %320 = vector.broadcast %cst_231 : f32 to vector<16x1xf32>
    %321 = arith.divf %319, %320 : vector<16x1xf32>
    %cst_232 = arith.constant 9.99999974E-6 : f32
    %322 = vector.broadcast %cst_232 : f32 to vector<16x1xf32>
    %323 = arith.addf %321, %322 : vector<16x1xf32>
    %324 = math.rsqrt %323 : vector<16x1xf32>
    %325 = vector.broadcast %324 : vector<16x1xf32> to vector<16x32xf32>
    %326 = arith.mulf %316, %325 : vector<16x32xf32>
    %327 = vector.broadcast %3 : vector<1x32xf32> to vector<16x32xf32>
    %328 = arith.mulf %326, %327 : vector<16x32xf32>
    %329 = vector.broadcast %4 : vector<1x32xf32> to vector<16x32xf32>
    %330 = arith.addf %328, %329 : vector<16x32xf32>
    %cst_233 = arith.constant 0.000000e+00 : f32
    %331 = vector.broadcast %cst_233 : f32 to vector<16x32xf32>
    %332 = arith.truncf %160 : vector<16x32xf32> to vector<16x32xbf16>
    %c0_234 = arith.constant 0 : index
    %c0_235 = arith.constant 0 : index
    %c0_236 = arith.constant 0 : index
    %333 = vector.load %arg22[%c0_234, %c0_235, %c0_236] : memref<2x32x32xbf16, #tpu.memory_space<vmem>>, vector<1x32x32xbf16>
    %334 = vector.shape_cast %333 : vector<1x32x32xbf16> to vector<32x32xbf16>
    %cst_237 = arith.constant dense<0.000000e+00> : vector<16x32xf32>
    %335 = tpu.matmul %332, %334, %cst_237 {dimension_numbers = #tpu.dot_dimension_numbers<[1], [0], [0], [1], [0, 0, 1, 1], [], []>} : vector<16x32xbf16>, vector<32x32xbf16>, vector<16x32xf32> -> vector<16x32xf32>
    %336 = arith.addf %331, %335 : vector<16x32xf32>
    %337 = arith.truncf %330 : vector<16x32xf32> to vector<16x32xbf16>
    %c1_238 = arith.constant 1 : index
    %c0_239 = arith.constant 0 : index
    %c0_240 = arith.constant 0 : index
    %338 = vector.load %arg22[%c1_238, %c0_239, %c0_240] : memref<2x32x32xbf16, #tpu.memory_space<vmem>>, vector<1x32x32xbf16>
    %339 = vector.shape_cast %338 : vector<1x32x32xbf16> to vector<32x32xbf16>
    %cst_241 = arith.constant dense<0.000000e+00> : vector<16x32xf32>
    %340 = tpu.matmul %337, %339, %cst_241 {dimension_numbers = #tpu.dot_dimension_numbers<[1], [0], [0], [1], [0, 0, 1, 1], [], []>} : vector<16x32xbf16>, vector<32x32xbf16>, vector<16x32xf32> -> vector<16x32xf32>
    %341 = arith.addf %336, %340 : vector<16x32xf32>
    %c0_242 = arith.constant 0 : index
    %c0_243 = arith.constant 0 : index
    %342 = vector.load %arg23[%c0_242, %c0_243] : memref<1x32xf32, #tpu.memory_space<vmem>>, vector<1x32xf32>
    %343 = vector.broadcast %342 : vector<1x32xf32> to vector<16x32xf32>
    %344 = arith.addf %341, %343 : vector<16x32xf32>
    %c0_244 = arith.constant 0 : index
    %c0_245 = arith.constant 0 : index
    %345 = vector.load %arg24[%c0_244, %c0_245] : memref<1x32xf32, #tpu.memory_space<vmem>>, vector<1x32xf32>
    %c0_246 = arith.constant 0 : index
    %c0_247 = arith.constant 0 : index
    %346 = vector.load %arg25[%c0_246, %c0_247] : memref<1x32xf32, #tpu.memory_space<vmem>>, vector<1x32xf32>
    %cst_248 = arith.constant dense<0.000000e+00> : vector<16xf32>
    %347 = vector.multi_reduction <add>, %344, %cst_248 [1] : vector<16x32xf32> to vector<16xf32>
    %348 = vector.shape_cast %347 : vector<16xf32> to vector<16x1xf32>
    %cst_249 = arith.constant 3.200000e+01 : f32
    %349 = vector.broadcast %cst_249 : f32 to vector<16x1xf32>
    %350 = arith.divf %348, %349 : vector<16x1xf32>
    %351 = vector.broadcast %350 : vector<16x1xf32> to vector<16x32xf32>
    %352 = arith.subf %344, %351 : vector<16x32xf32>
    %353 = arith.mulf %352, %352 : vector<16x32xf32>
    %cst_250 = arith.constant dense<0.000000e+00> : vector<16xf32>
    %354 = vector.multi_reduction <add>, %353, %cst_250 [1] : vector<16x32xf32> to vector<16xf32>
    %355 = vector.shape_cast %354 : vector<16xf32> to vector<16x1xf32>
    %cst_251 = arith.constant 3.200000e+01 : f32
    %356 = vector.broadcast %cst_251 : f32 to vector<16x1xf32>
    %357 = arith.divf %355, %356 : vector<16x1xf32>
    %cst_252 = arith.constant 9.99999974E-6 : f32
    %358 = vector.broadcast %cst_252 : f32 to vector<16x1xf32>
    %359 = arith.addf %357, %358 : vector<16x1xf32>
    %360 = math.rsqrt %359 : vector<16x1xf32>
    %361 = vector.broadcast %360 : vector<16x1xf32> to vector<16x32xf32>
    %362 = arith.mulf %352, %361 : vector<16x32xf32>
    %363 = vector.broadcast %345 : vector<1x32xf32> to vector<16x32xf32>
    %364 = arith.mulf %362, %363 : vector<16x32xf32>
    %365 = vector.broadcast %346 : vector<1x32xf32> to vector<16x32xf32>
    %366 = arith.addf %364, %365 : vector<16x32xf32>
    %367 = arith.truncf %366 : vector<16x32xf32> to vector<16x32xbf16>
    %c0_253 = arith.constant 0 : index
    %c0_254 = arith.constant 0 : index
    %368 = vector.load %arg26[%c0_253, %c0_254] : memref<32x128xbf16, #tpu.memory_space<vmem>>, vector<32x128xbf16>
    %cst_255 = arith.constant dense<0.000000e+00> : vector<16x128xf32>
    %369 = tpu.matmul %367, %368, %cst_255 {dimension_numbers = #tpu.dot_dimension_numbers<[1], [0], [0], [1], [0, 0, 1, 1], [], []>} : vector<16x32xbf16>, vector<32x128xbf16>, vector<16x128xf32> -> vector<16x128xf32>
    %c0_256 = arith.constant 0 : index
    %c0_257 = arith.constant 0 : index
    %370 = vector.load %arg27[%c0_256, %c0_257] : memref<1x128xf32, #tpu.memory_space<vmem>>, vector<1x128xf32>
    %371 = vector.broadcast %370 : vector<1x128xf32> to vector<16x128xf32>
    %372 = arith.addf %369, %371 : vector<16x128xf32>
    %373 = arith.truncf %372 : vector<16x128xf32> to vector<16x128xbf16>
    %c0_258 = arith.constant 0 : index
    %c0_259 = arith.constant 0 : index
    %374 = vector.load %arg28[%c0_258, %c0_259] : memref<128x32xbf16, #tpu.memory_space<vmem>>, vector<128x32xbf16>
    %cst_260 = arith.constant dense<0.000000e+00> : vector<16x32xf32>
    %375 = tpu.matmul %373, %374, %cst_260 {dimension_numbers = #tpu.dot_dimension_numbers<[1], [0], [0], [1], [0, 0, 1, 1], [], []>} : vector<16x128xbf16>, vector<128x32xbf16>, vector<16x32xf32> -> vector<16x32xf32>
    %c0_261 = arith.constant 0 : index
    %c0_262 = arith.constant 0 : index
    %376 = vector.load %arg29[%c0_261, %c0_262] : memref<1x32xf32, #tpu.memory_space<vmem>>, vector<1x32xf32>
    %377 = vector.broadcast %376 : vector<1x32xf32> to vector<16x32xf32>
    %378 = arith.addf %375, %377 : vector<16x32xf32>
    %379 = arith.addf %344, %378 : vector<16x32xf32>
    %c0_263 = arith.constant 0 : index
    %c0_264 = arith.constant 0 : index
    %380 = vector.load %arg30[%c0_263, %c0_264] : memref<1x32xf32, #tpu.memory_space<vmem>>, vector<1x32xf32>
    %c0_265 = arith.constant 0 : index
    %c0_266 = arith.constant 0 : index
    %381 = vector.load %arg31[%c0_265, %c0_266] : memref<1x32xf32, #tpu.memory_space<vmem>>, vector<1x32xf32>
    %cst_267 = arith.constant dense<0.000000e+00> : vector<16xf32>
    %382 = vector.multi_reduction <add>, %379, %cst_267 [1] : vector<16x32xf32> to vector<16xf32>
    %383 = vector.shape_cast %382 : vector<16xf32> to vector<16x1xf32>
    %cst_268 = arith.constant 3.200000e+01 : f32
    %384 = vector.broadcast %cst_268 : f32 to vector<16x1xf32>
    %385 = arith.divf %383, %384 : vector<16x1xf32>
    %386 = vector.broadcast %385 : vector<16x1xf32> to vector<16x32xf32>
    %387 = arith.subf %379, %386 : vector<16x32xf32>
    %388 = arith.mulf %387, %387 : vector<16x32xf32>
    %cst_269 = arith.constant dense<0.000000e+00> : vector<16xf32>
    %389 = vector.multi_reduction <add>, %388, %cst_269 [1] : vector<16x32xf32> to vector<16xf32>
    %390 = vector.shape_cast %389 : vector<16xf32> to vector<16x1xf32>
    %cst_270 = arith.constant 3.200000e+01 : f32
    %391 = vector.broadcast %cst_270 : f32 to vector<16x1xf32>
    %392 = arith.divf %390, %391 : vector<16x1xf32>
    %cst_271 = arith.constant 9.99999974E-6 : f32
    %393 = vector.broadcast %cst_271 : f32 to vector<16x1xf32>
    %394 = arith.addf %392, %393 : vector<16x1xf32>
    %395 = math.rsqrt %394 : vector<16x1xf32>
    %396 = vector.broadcast %395 : vector<16x1xf32> to vector<16x32xf32>
    %397 = arith.mulf %387, %396 : vector<16x32xf32>
    %398 = vector.broadcast %380 : vector<1x32xf32> to vector<16x32xf32>
    %399 = arith.mulf %397, %398 : vector<16x32xf32>
    %400 = vector.broadcast %381 : vector<1x32xf32> to vector<16x32xf32>
    %401 = arith.addf %399, %400 : vector<16x32xf32>
    %c0_272 = arith.constant 0 : index
    %c0_273 = arith.constant 0 : index
    %c0_274 = arith.constant 0 : index
    %402 = vector.load %arg32[%c0_272, %c0_273, %c0_274] : memref<1x16x32xf32, #tpu.memory_space<vmem>>, vector<1x16x32xf32>
    %403 = vector.shape_cast %402 : vector<1x16x32xf32> to vector<16x32xf32>
    %404 = vector.shape_cast %401 : vector<16x32xf32> to vector<1x16x32xf32>
    tpu.vector_store %arg32[%c0_272, %c0_273, %c0_274], %404 {strides = array<i32>} : memref<1x16x32xf32, #tpu.memory_space<vmem>>, vector<1x16x32xf32>,
    return
  }
  func.func @transform_0(%arg0: i32) -> (i32, i32, i32) {
    %c0_i32 = arith.constant 0 : i32
    %c0_i32_0 = arith.constant 0 : i32
    %c0_i32_1 = arith.constant 0 : i32
    return %arg0, %c0_i32, %c0_i32_0 : i32, i32, i32
  }
  func.func @transform_1(%arg0: i32) -> (i32, i32) {
    %c0_i32 = arith.constant 0 : i32
    %c0_i32_0 = arith.constant 0 : i32
    %c0_i32_1 = arith.constant 0 : i32
    return %c0_i32, %c0_i32_0 : i32, i32
  }
  func.func @transform_2(%arg0: i32) -> (i32, i32, i32) {
    %c0_i32 = arith.constant 0 : i32
    %c0_i32_0 = arith.constant 0 : i32
    %c0_i32_1 = arith.constant 0 : i32
    %c0_i32_2 = arith.constant 0 : i32
    return %c0_i32, %c0_i32_0, %c0_i32_1 : i32, i32, i32
  }
  func.func @transform_3(%arg0: i32) -> (i32, i32, i32) {
    %c0_i32 = arith.constant 0 : i32
    %c0_i32_0 = arith.constant 0 : i32
    %c0_i32_1 = arith.constant 0 : i32
    %c0_i32_2 = arith.constant 0 : i32
    return %c0_i32, %c0_i32_0, %c0_i32_1 : i32, i32, i32
  }
  func.func @transform_4(%arg0: i32) -> (i32, i32) {
    %c0_i32 = arith.constant 0 : i32
    %c0_i32_0 = arith.constant 0 : i32
    %c0_i32_1 = arith.constant 0 : i32
    return %c0_i32, %c0_i32_0 : i32, i32
  }
  func.func @transform_5(%arg0: i32) -> (i32, i32, i32) {
    %c0_i32 = arith.constant 0 : i32
    %c0_i32_0 = arith.constant 0 : i32
    %c0_i32_1 = arith.constant 0 : i32
    %c0_i32_2 = arith.constant 0 : i32
    return %c0_i32, %c0_i32_0, %c0_i32_1 : i32, i32, i32
  }
  func.func @transform_6(%arg0: i32) -> (i32, i32) {
    %c0_i32 = arith.constant 0 : i32
    %c0_i32_0 = arith.constant 0 : i32
    %c0_i32_1 = arith.constant 0 : i32
    return %c0_i32, %c0_i32_0 : i32, i32
  }
  func.func @transform_7(%arg0: i32) -> (i32, i32, i32) {
    %c0_i32 = arith.constant 0 : i32
    %c0_i32_0 = arith.constant 0 : i32
    %c0_i32_1 = arith.constant 0 : i32
    %c0_i32_2 = arith.constant 0 : i32
    return %c0_i32, %c0_i32_0, %c0_i32_1 : i32, i32, i32
  }
  func.func @transform_8(%arg0: i32) -> (i32, i32) {
    %c0_i32 = arith.constant 0 : i32
    %c0_i32_0 = arith.constant 0 : i32
    %c0_i32_1 = arith.constant 0 : i32
    return %c0_i32, %c0_i32_0 : i32, i32
  }
  func.func @transform_9(%arg0: i32) -> (i32, i32, i32) {
    %c0_i32 = arith.constant 0 : i32
    %c0_i32_0 = arith.constant 0 : i32
    %c0_i32_1 = arith.constant 0 : i32
    %c0_i32_2 = arith.constant 0 : i32
    return %c0_i32, %c0_i32_0, %c0_i32_1 : i32, i32, i32
  }
  func.func @transform_10(%arg0: i32) -> (i32, i32) {
    %c0_i32 = arith.constant 0 : i32
    %c0_i32_0 = arith.constant 0 : i32
    %c0_i32_1 = arith.constant 0 : i32
    return %c0_i32, %c0_i32_0 : i32, i32
  }
  func.func @transform_11(%arg0: i32) -> (i32, i32, i32) {
    %c0_i32 = arith.constant 0 : i32
    %c0_i32_0 = arith.constant 0 : i32
    %c0_i32_1 = arith.constant 0 : i32
    %c0_i32_2 = arith.constant 0 : i32
    return %c0_i32, %c0_i32_0, %c0_i32_1 : i32, i32, i32
  }
  func.func @transform_12(%arg0: i32) -> (i32, i32, i32) {
    %c0_i32 = arith.constant 0 : i32
    %c0_i32_0 = arith.constant 0 : i32
    %c0_i32_1 = arith.constant 0 : i32
    %c0_i32_2 = arith.constant 0 : i32
    return %c0_i32, %c0_i32_0, %c0_i32_1 : i32, i32, i32
  }
  func.func @transform_13(%arg0: i32) -> (i32, i32) {
    %c0_i32 = arith.constant 0 : i32
    %c0_i32_0 = arith.constant 0 : i32
    %c0_i32_1 = arith.constant 0 : i32
    return %c0_i32, %c0_i32_0 : i32, i32
  }
  func.func @transform_14(%arg0: i32) -> (i32, i32, i32) {
    %c0_i32 = arith.constant 0 : i32
    %c0_i32_0 = arith.constant 0 : i32
    %c0_i32_1 = arith.constant 0 : i32
    %c0_i32_2 = arith.constant 0 : i32
    return %c0_i32, %c0_i32_0, %c0_i32_1 : i32, i32, i32
  }
  func.func @transform_15(%arg0: i32) -> (i32, i32) {
    %c0_i32 = arith.constant 0 : i32
    %c0_i32_0 = arith.constant 0 : i32
    %c0_i32_1 = arith.constant 0 : i32
    return %c0_i32, %c0_i32_0 : i32, i32
  }
  func.func @transform_16(%arg0: i32) -> (i32, i32, i32) {
    %c0_i32 = arith.constant 0 : i32
    %c0_i32_0 = arith.constant 0 : i32
    %c0_i32_1 = arith.constant 0 : i32
    %c0_i32_2 = arith.constant 0 : i32
    return %c0_i32, %c0_i32_0, %c0_i32_1 : i32, i32, i32
  }
  func.func @transform_17(%arg0: i32) -> (i32, i32) {
    %c0_i32 = arith.constant 0 : i32
    %c0_i32_0 = arith.constant 0 : i32
    %c0_i32_1 = arith.constant 0 : i32
    return %c0_i32, %c0_i32_0 : i32, i32
  }
  func.func @transform_18(%arg0: i32) -> (i32, i32, i32) {
    %c0_i32 = arith.constant 0 : i32
    %c0_i32_0 = arith.constant 0 : i32
    %c0_i32_1 = arith.constant 0 : i32
    %c0_i32_2 = arith.constant 0 : i32
    return %c0_i32, %c0_i32_0, %c0_i32_1 : i32, i32, i32
  }
  func.func @transform_19(%arg0: i32) -> (i32, i32) {
    %c0_i32 = arith.constant 0 : i32
    %c0_i32_0 = arith.constant 0 : i32
    %c0_i32_1 = arith.constant 0 : i32
    return %c0_i32, %c0_i32_0 : i32, i32
  }
  func.func @transform_20(%arg0: i32) -> (i32, i32) {
    %c0_i32 = arith.constant 0 : i32
    %c0_i32_0 = arith.constant 0 : i32
    %c0_i32_1 = arith.constant 0 : i32
    return %c0_i32, %c0_i32_0 : i32, i32
  }
  func.func @transform_21(%arg0: i32) -> (i32, i32, i32) {
    %c0_i32 = arith.constant 0 : i32
    %c0_i32_0 = arith.constant 0 : i32
    %c0_i32_1 = arith.constant 0 : i32
    %c0_i32_2 = arith.constant 0 : i32
    return %c0_i32, %c0_i32_0, %c0_i32_1 : i32, i32, i32
  }
  func.func @transform_22(%arg0: i32) -> (i32, i32) {
    %c0_i32 = arith.constant 0 : i32
    %c0_i32_0 = arith.constant 0 : i32
    %c0_i32_1 = arith.constant 0 : i32
    return %c0_i32, %c0_i32_0 : i32, i32
  }
  func.func @transform_23(%arg0: i32) -> (i32, i32) {
    %c0_i32 = arith.constant 0 : i32
    %c0_i32_0 = arith.constant 0 : i32
    %c0_i32_1 = arith.constant 0 : i32
    return %c0_i32, %c0_i32_0 : i32, i32
  }
  func.func @transform_24(%arg0: i32) -> (i32, i32) {
    %c0_i32 = arith.constant 0 : i32
    %c0_i32_0 = arith.constant 0 : i32
    %c0_i32_1 = arith.constant 0 : i32
    return %c0_i32, %c0_i32_0 : i32, i32
  }
  func.func @transform_25(%arg0: i32) -> (i32, i32) {
    %c0_i32 = arith.constant 0 : i32
    %c0_i32_0 = arith.constant 0 : i32
    %c0_i32_1 = arith.constant 0 : i32
    return %c0_i32, %c0_i32_0 : i32, i32
  }
  func.func @transform_26(%arg0: i32) -> (i32, i32) {
    %c0_i32 = arith.constant 0 : i32
    %c0_i32_0 = arith.constant 0 : i32
    %c0_i32_1 = arith.constant 0 : i32
    return %c0_i32, %c0_i32_0 : i32, i32
  }
  func.func @transform_27(%arg0: i32) -> (i32, i32) {
    %c0_i32 = arith.constant 0 : i32
    %c0_i32_0 = arith.constant 0 : i32
    %c0_i32_1 = arith.constant 0 : i32
    return %c0_i32, %c0_i32_0 : i32, i32
  }
  func.func @transform_28(%arg0: i32) -> (i32, i32) {
    %c0_i32 = arith.constant 0 : i32
    %c0_i32_0 = arith.constant 0 : i32
    %c0_i32_1 = arith.constant 0 : i32
    return %c0_i32, %c0_i32_0 : i32, i32
  }
  func.func @transform_29(%arg0: i32) -> (i32, i32) {
    %c0_i32 = arith.constant 0 : i32
    %c0_i32_0 = arith.constant 0 : i32
    %c0_i32_1 = arith.constant 0 : i32
    return %c0_i32, %c0_i32_0 : i32, i32
  }
  func.func @transform_30(%arg0: i32) -> (i32, i32) {
    %c0_i32 = arith.constant 0 : i32
    %c0_i32_0 = arith.constant 0 : i32
    %c0_i32_1 = arith.constant 0 : i32
    return %c0_i32, %c0_i32_0 : i32, i32
  }
  func.func @transform_31(%arg0: i32) -> (i32, i32, i32) {
    %c0_i32 = arith.constant 0 : i32
    %c0_i32_0 = arith.constant 0 : i32
    %c0_i32_1 = arith.constant 0 : i32
    return %arg0, %c0_i32, %c0_i32_0 : i32, i32, i32
  }
}

module attributes {stable_mosaic.version = 11 : i64} {
  func.func @_layer_kernel(%arg0: i32, %arg1: memref<1x16x32xf32, #tpu.memory_space<vmem>>, %arg2: memref<16x16xbf16, #tpu.memory_space<vmem>>, %arg3: memref<2x9x16xbf16, #tpu.memory_space<vmem>>, %arg4: memref<2x32x32xbf16, #tpu.memory_space<vmem>>, %arg5: memref<1x32xf32, #tpu.memory_space<vmem>>, %arg6: memref<9x32x32xbf16, #tpu.memory_space<vmem>>, %arg7: memref<1x32xf32, #tpu.memory_space<vmem>>, %arg8: memref<2x32x32xbf16, #tpu.memory_space<vmem>>, %arg9: memref<1x32xf32, #tpu.memory_space<vmem>>, %arg10: memref<2x16x9xbf16, #tpu.memory_space<vmem>>, %arg11: memref<16x16xbf16, #tpu.memory_space<vmem>>, %arg12: memref<4x5x16xbf16, #tpu.memory_space<vmem>>, %arg13: memref<4x32x32xbf16, #tpu.memory_space<vmem>>, %arg14: memref<1x32xf32, #tpu.memory_space<vmem>>, %arg15: memref<5x32x32xbf16, #tpu.memory_space<vmem>>, %arg16: memref<1x32xf32, #tpu.memory_space<vmem>>, %arg17: memref<4x32x32xbf16, #tpu.memory_space<vmem>>, %arg18: memref<1x32xf32, #tpu.memory_space<vmem>>, %arg19: memref<4x16x5xbf16, #tpu.memory_space<vmem>>, %arg20: memref<1x32xf32, #tpu.memory_space<vmem>>, %arg21: memref<1x32xf32, #tpu.memory_space<vmem>>, %arg22: memref<2x32x32xbf16, #tpu.memory_space<vmem>>, %arg23: memref<1x32xf32, #tpu.memory_space<vmem>>, %arg24: memref<1x32xf32, #tpu.memory_space<vmem>>, %arg25: memref<1x32xf32, #tpu.memory_space<vmem>>, %arg26: memref<32x128xbf16, #tpu.memory_space<vmem>>, %arg27: memref<1x128xf32, #tpu.memory_space<vmem>>, %arg28: memref<128x32xbf16, #tpu.memory_space<vmem>>, %arg29: memref<1x32xf32, #tpu.memory_space<vmem>>, %arg30: memref<1x32xf32, #tpu.memory_space<vmem>>, %arg31: memref<1x32xf32, #tpu.memory_space<vmem>>, %arg32: memref<1x32xbf16, #tpu.memory_space<vmem>>, %arg33: memref<1x1xf32, #tpu.memory_space<vmem>>, %arg34: memref<1x1x16xf32, #tpu.memory_space<vmem>>, %arg35: memref<17x32xf32, #tpu.memory_space<vmem>>, %arg36: memref<9x32xf32, #tpu.memory_space<vmem>>) attributes {dimension_semantics = [#tpu.dimension_semantics<parallel>], iteration_bounds = array<i64: 2>, scalar_prefetch = 0 : i64, scratch_operands = 2 : i64, tpu.core_type = #tpu.core_type<tc>, window_params = [{transform_indices = @transform_0, window_bounds = array<i64: 1, 16, 32>}, {pipeline_mode = #tpu.pipeline_mode<synchronous>, transform_indices = @transform_1, window_bounds = array<i64: 16, 16>}, {pipeline_mode = #tpu.pipeline_mode<synchronous>, transform_indices = @transform_2, window_bounds = array<i64: 2, 9, 16>}, {pipeline_mode = #tpu.pipeline_mode<synchronous>, transform_indices = @transform_3, window_bounds = array<i64: 2, 32, 32>}, {pipeline_mode = #tpu.pipeline_mode<synchronous>, transform_indices = @transform_4, window_bounds = array<i64: 1, 32>}, {pipeline_mode = #tpu.pipeline_mode<synchronous>, transform_indices = @transform_5, window_bounds = array<i64: 9, 32, 32>}, {pipeline_mode = #tpu.pipeline_mode<synchronous>, transform_indices = @transform_6, window_bounds = array<i64: 1, 32>}, {pipeline_mode = #tpu.pipeline_mode<synchronous>, transform_indices = @transform_7, window_bounds = array<i64: 2, 32, 32>}, {pipeline_mode = #tpu.pipeline_mode<synchronous>, transform_indices = @transform_8, window_bounds = array<i64: 1, 32>}, {pipeline_mode = #tpu.pipeline_mode<synchronous>, transform_indices = @transform_9, window_bounds = array<i64: 2, 16, 9>}, {pipeline_mode = #tpu.pipeline_mode<synchronous>, transform_indices = @transform_10, window_bounds = array<i64: 16, 16>}, {pipeline_mode = #tpu.pipeline_mode<synchronous>, transform_indices = @transform_11, window_bounds = array<i64: 4, 5, 16>}, {pipeline_mode = #tpu.pipeline_mode<synchronous>, transform_indices = @transform_12, window_bounds = array<i64: 4, 32, 32>}, {pipeline_mode = #tpu.pipeline_mode<synchronous>, transform_indices = @transform_13, window_bounds = array<i64: 1, 32>}, {pipeline_mode = #tpu.pipeline_mode<synchronous>, transform_indices = @transform_14, window_bounds = array<i64: 5, 32, 32>}, {pipeline_mode = #tpu.pipeline_mode<synchronous>, transform_indices = @transform_15, window_bounds = array<i64: 1, 32>}, {pipeline_mode = #tpu.pipeline_mode<synchronous>, transform_indices = @transform_16, window_bounds = array<i64: 4, 32, 32>}, {pipeline_mode = #tpu.pipeline_mode<synchronous>, transform_indices = @transform_17, window_bounds = array<i64: 1, 32>}, {pipeline_mode = #tpu.pipeline_mode<synchronous>, transform_indices = @transform_18, window_bounds = array<i64: 4, 16, 5>}, {pipeline_mode = #tpu.pipeline_mode<synchronous>, transform_indices = @transform_19, window_bounds = array<i64: 1, 32>}, {pipeline_mode = #tpu.pipeline_mode<synchronous>, transform_indices = @transform_20, window_bounds = array<i64: 1, 32>}, {pipeline_mode = #tpu.pipeline_mode<synchronous>, transform_indices = @transform_21, window_bounds = array<i64: 2, 32, 32>}, {pipeline_mode = #tpu.pipeline_mode<synchronous>, transform_indices = @transform_22, window_bounds = array<i64: 1, 32>}, {pipeline_mode = #tpu.pipeline_mode<synchronous>, transform_indices = @transform_23, window_bounds = array<i64: 1, 32>}, {pipeline_mode = #tpu.pipeline_mode<synchronous>, transform_indices = @transform_24, window_bounds = array<i64: 1, 32>}, {pipeline_mode = #tpu.pipeline_mode<synchronous>, transform_indices = @transform_25, window_bounds = array<i64: 32, 128>}, {pipeline_mode = #tpu.pipeline_mode<synchronous>, transform_indices = @transform_26, window_bounds = array<i64: 1, 128>}, {pipeline_mode = #tpu.pipeline_mode<synchronous>, transform_indices = @transform_27, window_bounds = array<i64: 128, 32>}, {pipeline_mode = #tpu.pipeline_mode<synchronous>, transform_indices = @transform_28, window_bounds = array<i64: 1, 32>}, {pipeline_mode = #tpu.pipeline_mode<synchronous>, transform_indices = @transform_29, window_bounds = array<i64: 1, 32>}, {pipeline_mode = #tpu.pipeline_mode<synchronous>, transform_indices = @transform_30, window_bounds = array<i64: 1, 32>}, {pipeline_mode = #tpu.pipeline_mode<synchronous>, transform_indices = @transform_31, window_bounds = array<i64: 1, 32>}, {pipeline_mode = #tpu.pipeline_mode<synchronous>, transform_indices = @transform_32, window_bounds = array<i64: 1, 1>}, {transform_indices = @transform_33, window_bounds = array<i64: 1, 1, 16>}]} {
    %c0 = arith.constant 0 : index
    %c0_0 = arith.constant 0 : index
    %c0_1 = arith.constant 0 : index
    %0 = vector.load %arg1[%c0, %c0_0, %c0_1] : memref<1x16x32xf32, #tpu.memory_space<vmem>>, vector<1x16x32xf32>
    %1 = vector.shape_cast %0 : vector<1x16x32xf32> to vector<16x32xf32>
    %2 = arith.truncf %1 : vector<16x32xf32> to vector<16x32xbf16>
    %c0_2 = arith.constant 0 : index
    %c0_3 = arith.constant 0 : index
    %3 = vector.load %arg20[%c0_2, %c0_3] : memref<1x32xf32, #tpu.memory_space<vmem>>, vector<1x32xf32>
    %c0_4 = arith.constant 0 : index
    %c0_5 = arith.constant 0 : index
    %4 = vector.load %arg21[%c0_4, %c0_5] : memref<1x32xf32, #tpu.memory_space<vmem>>, vector<1x32xf32>
    %c0_6 = arith.constant 0 : index
    %c0_7 = arith.constant 0 : index
    %5 = vector.load %arg2[%c0_6, %c0_7] : memref<16x16xbf16, #tpu.memory_space<vmem>>, vector<16x16xbf16>
    %cst = arith.constant dense<0.000000e+00> : vector<16x32xf32>
    %6 = tpu.matmul %5, %2, %cst {dimension_numbers = #tpu.dot_dimension_numbers<[1], [0], [0], [1], [0, 0, 1, 1], [], []>} : vector<16x16xbf16>, vector<16x32xbf16>, vector<16x32xf32> -> vector<16x32xf32>
    %cst_8 = arith.constant 2.000000e-01 : f32
    %7 = vector.broadcast %cst_8 : f32 to vector<16x32xf32>
    %8 = arith.mulf %6, %7 : vector<16x32xf32>
    %9 = arith.subf %1, %8 : vector<16x32xf32>
    %10 = arith.truncf %9 : vector<16x32xf32> to vector<16x32xbf16>
    %cst_9 = arith.constant 0.000000e+00 : f32
    %11 = vector.broadcast %cst_9 : f32 to vector<9x32xf32>
    %c0_10 = arith.constant 0 : index
    %c0_11 = arith.constant 0 : index
    %c0_12 = arith.constant 0 : index
    %12 = vector.load %arg3[%c0_10, %c0_11, %c0_12] : memref<2x9x16xbf16, #tpu.memory_space<vmem>>, vector<1x9x16xbf16>
    %13 = vector.shape_cast %12 : vector<1x9x16xbf16> to vector<9x16xbf16>
    %cst_13 = arith.constant dense<0.000000e+00> : vector<9x32xf32>
    %14 = tpu.matmul %13, %10, %cst_13 {dimension_numbers = #tpu.dot_dimension_numbers<[1], [0], [0], [1], [0, 0, 1, 1], [], []>} : vector<9x16xbf16>, vector<16x32xbf16>, vector<9x32xf32> -> vector<9x32xf32>
    %15 = arith.truncf %14 : vector<9x32xf32> to vector<9x32xbf16>
    %c0_14 = arith.constant 0 : index
    %c0_15 = arith.constant 0 : index
    %c0_16 = arith.constant 0 : index
    %16 = vector.load %arg4[%c0_14, %c0_15, %c0_16] : memref<2x32x32xbf16, #tpu.memory_space<vmem>>, vector<1x32x32xbf16>
    %17 = vector.shape_cast %16 : vector<1x32x32xbf16> to vector<32x32xbf16>
    %cst_17 = arith.constant dense<0.000000e+00> : vector<9x32xf32>
    %18 = tpu.matmul %15, %17, %cst_17 {dimension_numbers = #tpu.dot_dimension_numbers<[1], [0], [0], [1], [0, 0, 1, 1], [], []>} : vector<9x32xbf16>, vector<32x32xbf16>, vector<9x32xf32> -> vector<9x32xf32>
    %19 = arith.addf %11, %18 : vector<9x32xf32>
    %c1 = arith.constant 1 : index
    %c0_18 = arith.constant 0 : index
    %c0_19 = arith.constant 0 : index
    %20 = vector.load %arg3[%c1, %c0_18, %c0_19] : memref<2x9x16xbf16, #tpu.memory_space<vmem>>, vector<1x9x16xbf16>
    %21 = vector.shape_cast %20 : vector<1x9x16xbf16> to vector<9x16xbf16>
    %cst_20 = arith.constant dense<0.000000e+00> : vector<9x32xf32>
    %22 = tpu.matmul %21, %10, %cst_20 {dimension_numbers = #tpu.dot_dimension_numbers<[1], [0], [0], [1], [0, 0, 1, 1], [], []>} : vector<9x16xbf16>, vector<16x32xbf16>, vector<9x32xf32> -> vector<9x32xf32>
    %23 = arith.truncf %22 : vector<9x32xf32> to vector<9x32xbf16>
    %c1_21 = arith.constant 1 : index
    %c0_22 = arith.constant 0 : index
    %c0_23 = arith.constant 0 : index
    %24 = vector.load %arg4[%c1_21, %c0_22, %c0_23] : memref<2x32x32xbf16, #tpu.memory_space<vmem>>, vector<1x32x32xbf16>
    %25 = vector.shape_cast %24 : vector<1x32x32xbf16> to vector<32x32xbf16>
    %cst_24 = arith.constant dense<0.000000e+00> : vector<9x32xf32>
    %26 = tpu.matmul %23, %25, %cst_24 {dimension_numbers = #tpu.dot_dimension_numbers<[1], [0], [0], [1], [0, 0, 1, 1], [], []>} : vector<9x32xbf16>, vector<32x32xbf16>, vector<9x32xf32> -> vector<9x32xf32>
    %27 = arith.addf %19, %26 : vector<9x32xf32>
    %c0_25 = arith.constant 0 : index
    %c0_26 = arith.constant 0 : index
    %28 = vector.load %arg5[%c0_25, %c0_26] : memref<1x32xf32, #tpu.memory_space<vmem>>, vector<1x32xf32>
    %29 = vector.broadcast %28 : vector<1x32xf32> to vector<9x32xf32>
    %30 = arith.addf %27, %29 : vector<9x32xf32>
    %31 = math.tanh %30 : vector<9x32xf32>
    %cst_27 = arith.constant 0.000000e+00 : f32
    %32 = vector.broadcast %cst_27 : f32 to vector<8x32xf32>
    %c0_28 = arith.constant 0 : index
    %c0_29 = arith.constant 0 : index
    %33 = vector.load %arg35[%c0_28, %c0_29] : memref<17x32xf32, #tpu.memory_space<vmem>>, vector<8x32xf32>
    tpu.vector_store %arg35[%c0_28, %c0_29], %32 {strides = array<i32>} : memref<17x32xf32, #tpu.memory_space<vmem>>, vector<8x32xf32>,
    %c8 = arith.constant 8 : index
    %c0_30 = arith.constant 0 : index
    %34 = vector.load %arg35[%c8, %c0_30] : memref<17x32xf32, #tpu.memory_space<vmem>>, vector<9x32xf32>
    tpu.vector_store %arg35[%c8, %c0_30], %31 {strides = array<i32>} : memref<17x32xf32, #tpu.memory_space<vmem>>, vector<9x32xf32>,
    %cst_31 = arith.constant 0.000000e+00 : f32
    %35 = vector.broadcast %cst_31 : f32 to vector<9x32xf32>
    %c0_32 = arith.constant 0 : index
    %c0_33 = arith.constant 0 : index
    %36 = vector.load %arg35[%c0_32, %c0_33] : memref<17x32xf32, #tpu.memory_space<vmem>>, vector<9x32xf32>
    %37 = arith.truncf %36 : vector<9x32xf32> to vector<9x32xbf16>
    %c0_34 = arith.constant 0 : index
    %c0_35 = arith.constant 0 : index
    %c0_36 = arith.constant 0 : index
    %38 = vector.load %arg6[%c0_34, %c0_35, %c0_36] : memref<9x32x32xbf16, #tpu.memory_space<vmem>>, vector<1x32x32xbf16>
    %39 = vector.shape_cast %38 : vector<1x32x32xbf16> to vector<32x32xbf16>
    %cst_37 = arith.constant dense<0.000000e+00> : vector<9x32xf32>
    %40 = tpu.matmul %37, %39, %cst_37 {dimension_numbers = #tpu.dot_dimension_numbers<[1], [0], [0], [1], [0, 0, 1, 1], [], []>} : vector<9x32xbf16>, vector<32x32xbf16>, vector<9x32xf32> -> vector<9x32xf32>
    %41 = arith.addf %35, %40 : vector<9x32xf32>
    %c1_38 = arith.constant 1 : index
    %c0_39 = arith.constant 0 : index
    %42 = vector.load %arg35[%c1_38, %c0_39] : memref<17x32xf32, #tpu.memory_space<vmem>>, vector<9x32xf32>
    %43 = arith.truncf %42 : vector<9x32xf32> to vector<9x32xbf16>
    %c1_40 = arith.constant 1 : index
    %c0_41 = arith.constant 0 : index
    %c0_42 = arith.constant 0 : index
    %44 = vector.load %arg6[%c1_40, %c0_41, %c0_42] : memref<9x32x32xbf16, #tpu.memory_space<vmem>>, vector<1x32x32xbf16>
    %45 = vector.shape_cast %44 : vector<1x32x32xbf16> to vector<32x32xbf16>
    %cst_43 = arith.constant dense<0.000000e+00> : vector<9x32xf32>
    %46 = tpu.matmul %43, %45, %cst_43 {dimension_numbers = #tpu.dot_dimension_numbers<[1], [0], [0], [1], [0, 0, 1, 1], [], []>} : vector<9x32xbf16>, vector<32x32xbf16>, vector<9x32xf32> -> vector<9x32xf32>
    %47 = arith.addf %41, %46 : vector<9x32xf32>
    %c2 = arith.constant 2 : index
    %c0_44 = arith.constant 0 : index
    %48 = vector.load %arg35[%c2, %c0_44] : memref<17x32xf32, #tpu.memory_space<vmem>>, vector<9x32xf32>
    %49 = arith.truncf %48 : vector<9x32xf32> to vector<9x32xbf16>
    %c2_45 = arith.constant 2 : index
    %c0_46 = arith.constant 0 : index
    %c0_47 = arith.constant 0 : index
    %50 = vector.load %arg6[%c2_45, %c0_46, %c0_47] : memref<9x32x32xbf16, #tpu.memory_space<vmem>>, vector<1x32x32xbf16>
    %51 = vector.shape_cast %50 : vector<1x32x32xbf16> to vector<32x32xbf16>
    %cst_48 = arith.constant dense<0.000000e+00> : vector<9x32xf32>
    %52 = tpu.matmul %49, %51, %cst_48 {dimension_numbers = #tpu.dot_dimension_numbers<[1], [0], [0], [1], [0, 0, 1, 1], [], []>} : vector<9x32xbf16>, vector<32x32xbf16>, vector<9x32xf32> -> vector<9x32xf32>
    %53 = arith.addf %47, %52 : vector<9x32xf32>
    %c3 = arith.constant 3 : index
    %c0_49 = arith.constant 0 : index
    %54 = vector.load %arg35[%c3, %c0_49] : memref<17x32xf32, #tpu.memory_space<vmem>>, vector<9x32xf32>
    %55 = arith.truncf %54 : vector<9x32xf32> to vector<9x32xbf16>
    %c3_50 = arith.constant 3 : index
    %c0_51 = arith.constant 0 : index
    %c0_52 = arith.constant 0 : index
    %56 = vector.load %arg6[%c3_50, %c0_51, %c0_52] : memref<9x32x32xbf16, #tpu.memory_space<vmem>>, vector<1x32x32xbf16>
    %57 = vector.shape_cast %56 : vector<1x32x32xbf16> to vector<32x32xbf16>
    %cst_53 = arith.constant dense<0.000000e+00> : vector<9x32xf32>
    %58 = tpu.matmul %55, %57, %cst_53 {dimension_numbers = #tpu.dot_dimension_numbers<[1], [0], [0], [1], [0, 0, 1, 1], [], []>} : vector<9x32xbf16>, vector<32x32xbf16>, vector<9x32xf32> -> vector<9x32xf32>
    %59 = arith.addf %53, %58 : vector<9x32xf32>
    %c4 = arith.constant 4 : index
    %c0_54 = arith.constant 0 : index
    %60 = vector.load %arg35[%c4, %c0_54] : memref<17x32xf32, #tpu.memory_space<vmem>>, vector<9x32xf32>
    %61 = arith.truncf %60 : vector<9x32xf32> to vector<9x32xbf16>
    %c4_55 = arith.constant 4 : index
    %c0_56 = arith.constant 0 : index
    %c0_57 = arith.constant 0 : index
    %62 = vector.load %arg6[%c4_55, %c0_56, %c0_57] : memref<9x32x32xbf16, #tpu.memory_space<vmem>>, vector<1x32x32xbf16>
    %63 = vector.shape_cast %62 : vector<1x32x32xbf16> to vector<32x32xbf16>
    %cst_58 = arith.constant dense<0.000000e+00> : vector<9x32xf32>
    %64 = tpu.matmul %61, %63, %cst_58 {dimension_numbers = #tpu.dot_dimension_numbers<[1], [0], [0], [1], [0, 0, 1, 1], [], []>} : vector<9x32xbf16>, vector<32x32xbf16>, vector<9x32xf32> -> vector<9x32xf32>
    %65 = arith.addf %59, %64 : vector<9x32xf32>
    %c5 = arith.constant 5 : index
    %c0_59 = arith.constant 0 : index
    %66 = vector.load %arg35[%c5, %c0_59] : memref<17x32xf32, #tpu.memory_space<vmem>>, vector<9x32xf32>
    %67 = arith.truncf %66 : vector<9x32xf32> to vector<9x32xbf16>
    %c5_60 = arith.constant 5 : index
    %c0_61 = arith.constant 0 : index
    %c0_62 = arith.constant 0 : index
    %68 = vector.load %arg6[%c5_60, %c0_61, %c0_62] : memref<9x32x32xbf16, #tpu.memory_space<vmem>>, vector<1x32x32xbf16>
    %69 = vector.shape_cast %68 : vector<1x32x32xbf16> to vector<32x32xbf16>
    %cst_63 = arith.constant dense<0.000000e+00> : vector<9x32xf32>
    %70 = tpu.matmul %67, %69, %cst_63 {dimension_numbers = #tpu.dot_dimension_numbers<[1], [0], [0], [1], [0, 0, 1, 1], [], []>} : vector<9x32xbf16>, vector<32x32xbf16>, vector<9x32xf32> -> vector<9x32xf32>
    %71 = arith.addf %65, %70 : vector<9x32xf32>
    %c6 = arith.constant 6 : index
    %c0_64 = arith.constant 0 : index
    %72 = vector.load %arg35[%c6, %c0_64] : memref<17x32xf32, #tpu.memory_space<vmem>>, vector<9x32xf32>
    %73 = arith.truncf %72 : vector<9x32xf32> to vector<9x32xbf16>
    %c6_65 = arith.constant 6 : index
    %c0_66 = arith.constant 0 : index
    %c0_67 = arith.constant 0 : index
    %74 = vector.load %arg6[%c6_65, %c0_66, %c0_67] : memref<9x32x32xbf16, #tpu.memory_space<vmem>>, vector<1x32x32xbf16>
    %75 = vector.shape_cast %74 : vector<1x32x32xbf16> to vector<32x32xbf16>
    %cst_68 = arith.constant dense<0.000000e+00> : vector<9x32xf32>
    %76 = tpu.matmul %73, %75, %cst_68 {dimension_numbers = #tpu.dot_dimension_numbers<[1], [0], [0], [1], [0, 0, 1, 1], [], []>} : vector<9x32xbf16>, vector<32x32xbf16>, vector<9x32xf32> -> vector<9x32xf32>
    %77 = arith.addf %71, %76 : vector<9x32xf32>
    %c7 = arith.constant 7 : index
    %c0_69 = arith.constant 0 : index
    %78 = vector.load %arg35[%c7, %c0_69] : memref<17x32xf32, #tpu.memory_space<vmem>>, vector<9x32xf32>
    %79 = arith.truncf %78 : vector<9x32xf32> to vector<9x32xbf16>
    %c7_70 = arith.constant 7 : index
    %c0_71 = arith.constant 0 : index
    %c0_72 = arith.constant 0 : index
    %80 = vector.load %arg6[%c7_70, %c0_71, %c0_72] : memref<9x32x32xbf16, #tpu.memory_space<vmem>>, vector<1x32x32xbf16>
    %81 = vector.shape_cast %80 : vector<1x32x32xbf16> to vector<32x32xbf16>
    %cst_73 = arith.constant dense<0.000000e+00> : vector<9x32xf32>
    %82 = tpu.matmul %79, %81, %cst_73 {dimension_numbers = #tpu.dot_dimension_numbers<[1], [0], [0], [1], [0, 0, 1, 1], [], []>} : vector<9x32xbf16>, vector<32x32xbf16>, vector<9x32xf32> -> vector<9x32xf32>
    %83 = arith.addf %77, %82 : vector<9x32xf32>
    %c8_74 = arith.constant 8 : index
    %c0_75 = arith.constant 0 : index
    %84 = vector.load %arg35[%c8_74, %c0_75] : memref<17x32xf32, #tpu.memory_space<vmem>>, vector<9x32xf32>
    %85 = arith.truncf %84 : vector<9x32xf32> to vector<9x32xbf16>
    %c8_76 = arith.constant 8 : index
    %c0_77 = arith.constant 0 : index
    %c0_78 = arith.constant 0 : index
    %86 = vector.load %arg6[%c8_76, %c0_77, %c0_78] : memref<9x32x32xbf16, #tpu.memory_space<vmem>>, vector<1x32x32xbf16>
    %87 = vector.shape_cast %86 : vector<1x32x32xbf16> to vector<32x32xbf16>
    %cst_79 = arith.constant dense<0.000000e+00> : vector<9x32xf32>
    %88 = tpu.matmul %85, %87, %cst_79 {dimension_numbers = #tpu.dot_dimension_numbers<[1], [0], [0], [1], [0, 0, 1, 1], [], []>} : vector<9x32xbf16>, vector<32x32xbf16>, vector<9x32xf32> -> vector<9x32xf32>
    %89 = arith.addf %83, %88 : vector<9x32xf32>
    %c0_80 = arith.constant 0 : index
    %c0_81 = arith.constant 0 : index
    %90 = vector.load %arg7[%c0_80, %c0_81] : memref<1x32xf32, #tpu.memory_space<vmem>>, vector<1x32xf32>
    %91 = vector.broadcast %90 : vector<1x32xf32> to vector<9x32xf32>
    %92 = arith.addf %89, %91 : vector<9x32xf32>
    %93 = math.tanh %92 : vector<9x32xf32>
    %94 = arith.addf %93, %31 : vector<9x32xf32>
    %cst_82 = arith.constant dense<0.000000e+00> : vector<9xf32>
    %95 = vector.multi_reduction <add>, %94, %cst_82 [1] : vector<9x32xf32> to vector<9xf32>
    %96 = vector.shape_cast %95 : vector<9xf32> to vector<9x1xf32>
    %cst_83 = arith.constant 3.200000e+01 : f32
    %97 = vector.broadcast %cst_83 : f32 to vector<9x1xf32>
    %98 = arith.divf %96, %97 : vector<9x1xf32>
    %99 = vector.broadcast %98 : vector<9x1xf32> to vector<9x32xf32>
    %100 = arith.subf %94, %99 : vector<9x32xf32>
    %101 = arith.mulf %100, %100 : vector<9x32xf32>
    %cst_84 = arith.constant dense<0.000000e+00> : vector<9xf32>
    %102 = vector.multi_reduction <add>, %101, %cst_84 [1] : vector<9x32xf32> to vector<9xf32>
    %103 = vector.shape_cast %102 : vector<9xf32> to vector<9x1xf32>
    %cst_85 = arith.constant 3.200000e+01 : f32
    %104 = vector.broadcast %cst_85 : f32 to vector<9x1xf32>
    %105 = arith.divf %103, %104 : vector<9x1xf32>
    %cst_86 = arith.constant 9.99999974E-6 : f32
    %106 = vector.broadcast %cst_86 : f32 to vector<9x1xf32>
    %107 = arith.addf %105, %106 : vector<9x1xf32>
    %108 = math.rsqrt %107 : vector<9x1xf32>
    %109 = vector.broadcast %108 : vector<9x1xf32> to vector<9x32xf32>
    %110 = arith.mulf %100, %109 : vector<9x32xf32>
    %111 = vector.broadcast %3 : vector<1x32xf32> to vector<9x32xf32>
    %112 = arith.mulf %110, %111 : vector<9x32xf32>
    %113 = vector.broadcast %4 : vector<1x32xf32> to vector<9x32xf32>
    %114 = arith.addf %112, %113 : vector<9x32xf32>
    %115 = arith.truncf %114 : vector<9x32xf32> to vector<9x32xbf16>
    %c0_87 = arith.constant 0 : index
    %c0_88 = arith.constant 0 : index
    %116 = vector.load %arg9[%c0_87, %c0_88] : memref<1x32xf32, #tpu.memory_space<vmem>>, vector<1x32xf32>
    %cst_89 = arith.constant 0.000000e+00 : f32
    %117 = vector.broadcast %cst_89 : f32 to vector<16x32xf32>
    %c0_90 = arith.constant 0 : index
    %c0_91 = arith.constant 0 : index
    %c0_92 = arith.constant 0 : index
    %118 = vector.load %arg8[%c0_90, %c0_91, %c0_92] : memref<2x32x32xbf16, #tpu.memory_space<vmem>>, vector<1x32x32xbf16>
    %119 = vector.shape_cast %118 : vector<1x32x32xbf16> to vector<32x32xbf16>
    %cst_93 = arith.constant dense<0.000000e+00> : vector<9x32xf32>
    %120 = tpu.matmul %115, %119, %cst_93 {dimension_numbers = #tpu.dot_dimension_numbers<[1], [0], [0], [1], [0, 0, 1, 1], [], []>} : vector<9x32xbf16>, vector<32x32xbf16>, vector<9x32xf32> -> vector<9x32xf32>
    %121 = vector.broadcast %116 : vector<1x32xf32> to vector<9x32xf32>
    %122 = arith.addf %120, %121 : vector<9x32xf32>
    %123 = math.tanh %122 : vector<9x32xf32>
    %c0_94 = arith.constant 0 : index
    %c0_95 = arith.constant 0 : index
    %c0_96 = arith.constant 0 : index
    %124 = vector.load %arg10[%c0_94, %c0_95, %c0_96] : memref<2x16x9xbf16, #tpu.memory_space<vmem>>, vector<1x16x9xbf16>
    %125 = vector.shape_cast %124 : vector<1x16x9xbf16> to vector<16x9xbf16>
    %126 = arith.truncf %123 : vector<9x32xf32> to vector<9x32xbf16>
    %cst_97 = arith.constant dense<0.000000e+00> : vector<16x32xf32>
    %127 = tpu.matmul %125, %126, %cst_97 {dimension_numbers = #tpu.dot_dimension_numbers<[1], [0], [0], [1], [0, 0, 1, 1], [], []>} : vector<16x9xbf16>, vector<9x32xbf16>, vector<16x32xf32> -> vector<16x32xf32>
    %128 = arith.addf %117, %127 : vector<16x32xf32>
    %c1_98 = arith.constant 1 : index
    %c0_99 = arith.constant 0 : index
    %c0_100 = arith.constant 0 : index
    %129 = vector.load %arg8[%c1_98, %c0_99, %c0_100] : memref<2x32x32xbf16, #tpu.memory_space<vmem>>, vector<1x32x32xbf16>
    %130 = vector.shape_cast %129 : vector<1x32x32xbf16> to vector<32x32xbf16>
    %cst_101 = arith.constant dense<0.000000e+00> : vector<9x32xf32>
    %131 = tpu.matmul %115, %130, %cst_101 {dimension_numbers = #tpu.dot_dimension_numbers<[1], [0], [0], [1], [0, 0, 1, 1], [], []>} : vector<9x32xbf16>, vector<32x32xbf16>, vector<9x32xf32> -> vector<9x32xf32>
    %132 = vector.broadcast %116 : vector<1x32xf32> to vector<9x32xf32>
    %133 = arith.addf %131, %132 : vector<9x32xf32>
    %134 = math.tanh %133 : vector<9x32xf32>
    %c1_102 = arith.constant 1 : index
    %c0_103 = arith.constant 0 : index
    %c0_104 = arith.constant 0 : index
    %135 = vector.load %arg10[%c1_102, %c0_103, %c0_104] : memref<2x16x9xbf16, #tpu.memory_space<vmem>>, vector<1x16x9xbf16>
    %136 = vector.shape_cast %135 : vector<1x16x9xbf16> to vector<16x9xbf16>
    %137 = arith.truncf %134 : vector<9x32xf32> to vector<9x32xbf16>
    %cst_105 = arith.constant dense<0.000000e+00> : vector<16x32xf32>
    %138 = tpu.matmul %136, %137, %cst_105 {dimension_numbers = #tpu.dot_dimension_numbers<[1], [0], [0], [1], [0, 0, 1, 1], [], []>} : vector<16x9xbf16>, vector<9x32xbf16>, vector<16x32xf32> -> vector<16x32xf32>
    %139 = arith.addf %128, %138 : vector<16x32xf32>
    %140 = arith.addf %139, %9 : vector<16x32xf32>
    %cst_106 = arith.constant dense<0.000000e+00> : vector<16xf32>
    %141 = vector.multi_reduction <add>, %140, %cst_106 [1] : vector<16x32xf32> to vector<16xf32>
    %142 = vector.shape_cast %141 : vector<16xf32> to vector<16x1xf32>
    %cst_107 = arith.constant 3.200000e+01 : f32
    %143 = vector.broadcast %cst_107 : f32 to vector<16x1xf32>
    %144 = arith.divf %142, %143 : vector<16x1xf32>
    %145 = vector.broadcast %144 : vector<16x1xf32> to vector<16x32xf32>
    %146 = arith.subf %140, %145 : vector<16x32xf32>
    %147 = arith.mulf %146, %146 : vector<16x32xf32>
    %cst_108 = arith.constant dense<0.000000e+00> : vector<16xf32>
    %148 = vector.multi_reduction <add>, %147, %cst_108 [1] : vector<16x32xf32> to vector<16xf32>
    %149 = vector.shape_cast %148 : vector<16xf32> to vector<16x1xf32>
    %cst_109 = arith.constant 3.200000e+01 : f32
    %150 = vector.broadcast %cst_109 : f32 to vector<16x1xf32>
    %151 = arith.divf %149, %150 : vector<16x1xf32>
    %cst_110 = arith.constant 9.99999974E-6 : f32
    %152 = vector.broadcast %cst_110 : f32 to vector<16x1xf32>
    %153 = arith.addf %151, %152 : vector<16x1xf32>
    %154 = math.rsqrt %153 : vector<16x1xf32>
    %155 = vector.broadcast %154 : vector<16x1xf32> to vector<16x32xf32>
    %156 = arith.mulf %146, %155 : vector<16x32xf32>
    %157 = vector.broadcast %3 : vector<1x32xf32> to vector<16x32xf32>
    %158 = arith.mulf %156, %157 : vector<16x32xf32>
    %159 = vector.broadcast %4 : vector<1x32xf32> to vector<16x32xf32>
    %160 = arith.addf %158, %159 : vector<16x32xf32>
    %c0_111 = arith.constant 0 : index
    %c0_112 = arith.constant 0 : index
    %161 = vector.load %arg11[%c0_111, %c0_112] : memref<16x16xbf16, #tpu.memory_space<vmem>>, vector<16x16xbf16>
    %cst_113 = arith.constant dense<0.000000e+00> : vector<16x32xf32>
    %162 = tpu.matmul %161, %2, %cst_113 {dimension_numbers = #tpu.dot_dimension_numbers<[1], [0], [0], [1], [0, 0, 1, 1], [], []>} : vector<16x16xbf16>, vector<16x32xbf16>, vector<16x32xf32> -> vector<16x32xf32>
    %cst_114 = arith.constant 0.142857149 : f32
    %163 = vector.broadcast %cst_114 : f32 to vector<16x32xf32>
    %164 = arith.mulf %162, %163 : vector<16x32xf32>
    %165 = arith.subf %1, %164 : vector<16x32xf32>
    %166 = arith.truncf %165 : vector<16x32xf32> to vector<16x32xbf16>
    %cst_115 = arith.constant 0.000000e+00 : f32
    %167 = vector.broadcast %cst_115 : f32 to vector<5x32xf32>
    %c0_116 = arith.constant 0 : index
    %c0_117 = arith.constant 0 : index
    %c0_118 = arith.constant 0 : index
    %168 = vector.load %arg12[%c0_116, %c0_117, %c0_118] : memref<4x5x16xbf16, #tpu.memory_space<vmem>>, vector<1x5x16xbf16>
    %169 = vector.shape_cast %168 : vector<1x5x16xbf16> to vector<5x16xbf16>
    %cst_119 = arith.constant dense<0.000000e+00> : vector<5x32xf32>
    %170 = tpu.matmul %169, %166, %cst_119 {dimension_numbers = #tpu.dot_dimension_numbers<[1], [0], [0], [1], [0, 0, 1, 1], [], []>} : vector<5x16xbf16>, vector<16x32xbf16>, vector<5x32xf32> -> vector<5x32xf32>
    %171 = arith.truncf %170 : vector<5x32xf32> to vector<5x32xbf16>
    %c0_120 = arith.constant 0 : index
    %c0_121 = arith.constant 0 : index
    %c0_122 = arith.constant 0 : index
    %172 = vector.load %arg13[%c0_120, %c0_121, %c0_122] : memref<4x32x32xbf16, #tpu.memory_space<vmem>>, vector<1x32x32xbf16>
    %173 = vector.shape_cast %172 : vector<1x32x32xbf16> to vector<32x32xbf16>
    %cst_123 = arith.constant dense<0.000000e+00> : vector<5x32xf32>
    %174 = tpu.matmul %171, %173, %cst_123 {dimension_numbers = #tpu.dot_dimension_numbers<[1], [0], [0], [1], [0, 0, 1, 1], [], []>} : vector<5x32xbf16>, vector<32x32xbf16>, vector<5x32xf32> -> vector<5x32xf32>
    %175 = arith.addf %167, %174 : vector<5x32xf32>
    %c1_124 = arith.constant 1 : index
    %c0_125 = arith.constant 0 : index
    %c0_126 = arith.constant 0 : index
    %176 = vector.load %arg12[%c1_124, %c0_125, %c0_126] : memref<4x5x16xbf16, #tpu.memory_space<vmem>>, vector<1x5x16xbf16>
    %177 = vector.shape_cast %176 : vector<1x5x16xbf16> to vector<5x16xbf16>
    %cst_127 = arith.constant dense<0.000000e+00> : vector<5x32xf32>
    %178 = tpu.matmul %177, %166, %cst_127 {dimension_numbers = #tpu.dot_dimension_numbers<[1], [0], [0], [1], [0, 0, 1, 1], [], []>} : vector<5x16xbf16>, vector<16x32xbf16>, vector<5x32xf32> -> vector<5x32xf32>
    %179 = arith.truncf %178 : vector<5x32xf32> to vector<5x32xbf16>
    %c1_128 = arith.constant 1 : index
    %c0_129 = arith.constant 0 : index
    %c0_130 = arith.constant 0 : index
    %180 = vector.load %arg13[%c1_128, %c0_129, %c0_130] : memref<4x32x32xbf16, #tpu.memory_space<vmem>>, vector<1x32x32xbf16>
    %181 = vector.shape_cast %180 : vector<1x32x32xbf16> to vector<32x32xbf16>
    %cst_131 = arith.constant dense<0.000000e+00> : vector<5x32xf32>
    %182 = tpu.matmul %179, %181, %cst_131 {dimension_numbers = #tpu.dot_dimension_numbers<[1], [0], [0], [1], [0, 0, 1, 1], [], []>} : vector<5x32xbf16>, vector<32x32xbf16>, vector<5x32xf32> -> vector<5x32xf32>
    %183 = arith.addf %175, %182 : vector<5x32xf32>
    %c2_132 = arith.constant 2 : index
    %c0_133 = arith.constant 0 : index
    %c0_134 = arith.constant 0 : index
    %184 = vector.load %arg12[%c2_132, %c0_133, %c0_134] : memref<4x5x16xbf16, #tpu.memory_space<vmem>>, vector<1x5x16xbf16>
    %185 = vector.shape_cast %184 : vector<1x5x16xbf16> to vector<5x16xbf16>
    %cst_135 = arith.constant dense<0.000000e+00> : vector<5x32xf32>
    %186 = tpu.matmul %185, %166, %cst_135 {dimension_numbers = #tpu.dot_dimension_numbers<[1], [0], [0], [1], [0, 0, 1, 1], [], []>} : vector<5x16xbf16>, vector<16x32xbf16>, vector<5x32xf32> -> vector<5x32xf32>
    %187 = arith.truncf %186 : vector<5x32xf32> to vector<5x32xbf16>
    %c2_136 = arith.constant 2 : index
    %c0_137 = arith.constant 0 : index
    %c0_138 = arith.constant 0 : index
    %188 = vector.load %arg13[%c2_136, %c0_137, %c0_138] : memref<4x32x32xbf16, #tpu.memory_space<vmem>>, vector<1x32x32xbf16>
    %189 = vector.shape_cast %188 : vector<1x32x32xbf16> to vector<32x32xbf16>
    %cst_139 = arith.constant dense<0.000000e+00> : vector<5x32xf32>
    %190 = tpu.matmul %187, %189, %cst_139 {dimension_numbers = #tpu.dot_dimension_numbers<[1], [0], [0], [1], [0, 0, 1, 1], [], []>} : vector<5x32xbf16>, vector<32x32xbf16>, vector<5x32xf32> -> vector<5x32xf32>
    %191 = arith.addf %183, %190 : vector<5x32xf32>
    %c3_140 = arith.constant 3 : index
    %c0_141 = arith.constant 0 : index
    %c0_142 = arith.constant 0 : index
    %192 = vector.load %arg12[%c3_140, %c0_141, %c0_142] : memref<4x5x16xbf16, #tpu.memory_space<vmem>>, vector<1x5x16xbf16>
    %193 = vector.shape_cast %192 : vector<1x5x16xbf16> to vector<5x16xbf16>
    %cst_143 = arith.constant dense<0.000000e+00> : vector<5x32xf32>
    %194 = tpu.matmul %193, %166, %cst_143 {dimension_numbers = #tpu.dot_dimension_numbers<[1], [0], [0], [1], [0, 0, 1, 1], [], []>} : vector<5x16xbf16>, vector<16x32xbf16>, vector<5x32xf32> -> vector<5x32xf32>
    %195 = arith.truncf %194 : vector<5x32xf32> to vector<5x32xbf16>
    %c3_144 = arith.constant 3 : index
    %c0_145 = arith.constant 0 : index
    %c0_146 = arith.constant 0 : index
    %196 = vector.load %arg13[%c3_144, %c0_145, %c0_146] : memref<4x32x32xbf16, #tpu.memory_space<vmem>>, vector<1x32x32xbf16>
    %197 = vector.shape_cast %196 : vector<1x32x32xbf16> to vector<32x32xbf16>
    %cst_147 = arith.constant dense<0.000000e+00> : vector<5x32xf32>
    %198 = tpu.matmul %195, %197, %cst_147 {dimension_numbers = #tpu.dot_dimension_numbers<[1], [0], [0], [1], [0, 0, 1, 1], [], []>} : vector<5x32xbf16>, vector<32x32xbf16>, vector<5x32xf32> -> vector<5x32xf32>
    %199 = arith.addf %191, %198 : vector<5x32xf32>
    %c0_148 = arith.constant 0 : index
    %c0_149 = arith.constant 0 : index
    %200 = vector.load %arg14[%c0_148, %c0_149] : memref<1x32xf32, #tpu.memory_space<vmem>>, vector<1x32xf32>
    %201 = vector.broadcast %200 : vector<1x32xf32> to vector<5x32xf32>
    %202 = arith.addf %199, %201 : vector<5x32xf32>
    %203 = math.tanh %202 : vector<5x32xf32>
    %cst_150 = arith.constant 0.000000e+00 : f32
    %204 = vector.broadcast %cst_150 : f32 to vector<4x32xf32>
    %c0_151 = arith.constant 0 : index
    %c0_152 = arith.constant 0 : index
    %205 = vector.load %arg36[%c0_151, %c0_152] : memref<9x32xf32, #tpu.memory_space<vmem>>, vector<4x32xf32>
    tpu.vector_store %arg36[%c0_151, %c0_152], %204 {strides = array<i32>} : memref<9x32xf32, #tpu.memory_space<vmem>>, vector<4x32xf32>,
    %c4_153 = arith.constant 4 : index
    %c0_154 = arith.constant 0 : index
    %206 = vector.load %arg36[%c4_153, %c0_154] : memref<9x32xf32, #tpu.memory_space<vmem>>, vector<5x32xf32>
    tpu.vector_store %arg36[%c4_153, %c0_154], %203 {strides = array<i32>} : memref<9x32xf32, #tpu.memory_space<vmem>>, vector<5x32xf32>,
    %cst_155 = arith.constant 0.000000e+00 : f32
    %207 = vector.broadcast %cst_155 : f32 to vector<5x32xf32>
    %c0_156 = arith.constant 0 : index
    %c0_157 = arith.constant 0 : index
    %208 = vector.load %arg36[%c0_156, %c0_157] : memref<9x32xf32, #tpu.memory_space<vmem>>, vector<5x32xf32>
    %209 = arith.truncf %208 : vector<5x32xf32> to vector<5x32xbf16>
    %c0_158 = arith.constant 0 : index
    %c0_159 = arith.constant 0 : index
    %c0_160 = arith.constant 0 : index
    %210 = vector.load %arg15[%c0_158, %c0_159, %c0_160] : memref<5x32x32xbf16, #tpu.memory_space<vmem>>, vector<1x32x32xbf16>
    %211 = vector.shape_cast %210 : vector<1x32x32xbf16> to vector<32x32xbf16>
    %cst_161 = arith.constant dense<0.000000e+00> : vector<5x32xf32>
    %212 = tpu.matmul %209, %211, %cst_161 {dimension_numbers = #tpu.dot_dimension_numbers<[1], [0], [0], [1], [0, 0, 1, 1], [], []>} : vector<5x32xbf16>, vector<32x32xbf16>, vector<5x32xf32> -> vector<5x32xf32>
    %213 = arith.addf %207, %212 : vector<5x32xf32>
    %c1_162 = arith.constant 1 : index
    %c0_163 = arith.constant 0 : index
    %214 = vector.load %arg36[%c1_162, %c0_163] : memref<9x32xf32, #tpu.memory_space<vmem>>, vector<5x32xf32>
    %215 = arith.truncf %214 : vector<5x32xf32> to vector<5x32xbf16>
    %c1_164 = arith.constant 1 : index
    %c0_165 = arith.constant 0 : index
    %c0_166 = arith.constant 0 : index
    %216 = vector.load %arg15[%c1_164, %c0_165, %c0_166] : memref<5x32x32xbf16, #tpu.memory_space<vmem>>, vector<1x32x32xbf16>
    %217 = vector.shape_cast %216 : vector<1x32x32xbf16> to vector<32x32xbf16>
    %cst_167 = arith.constant dense<0.000000e+00> : vector<5x32xf32>
    %218 = tpu.matmul %215, %217, %cst_167 {dimension_numbers = #tpu.dot_dimension_numbers<[1], [0], [0], [1], [0, 0, 1, 1], [], []>} : vector<5x32xbf16>, vector<32x32xbf16>, vector<5x32xf32> -> vector<5x32xf32>
    %219 = arith.addf %213, %218 : vector<5x32xf32>
    %c2_168 = arith.constant 2 : index
    %c0_169 = arith.constant 0 : index
    %220 = vector.load %arg36[%c2_168, %c0_169] : memref<9x32xf32, #tpu.memory_space<vmem>>, vector<5x32xf32>
    %221 = arith.truncf %220 : vector<5x32xf32> to vector<5x32xbf16>
    %c2_170 = arith.constant 2 : index
    %c0_171 = arith.constant 0 : index
    %c0_172 = arith.constant 0 : index
    %222 = vector.load %arg15[%c2_170, %c0_171, %c0_172] : memref<5x32x32xbf16, #tpu.memory_space<vmem>>, vector<1x32x32xbf16>
    %223 = vector.shape_cast %222 : vector<1x32x32xbf16> to vector<32x32xbf16>
    %cst_173 = arith.constant dense<0.000000e+00> : vector<5x32xf32>
    %224 = tpu.matmul %221, %223, %cst_173 {dimension_numbers = #tpu.dot_dimension_numbers<[1], [0], [0], [1], [0, 0, 1, 1], [], []>} : vector<5x32xbf16>, vector<32x32xbf16>, vector<5x32xf32> -> vector<5x32xf32>
    %225 = arith.addf %219, %224 : vector<5x32xf32>
    %c3_174 = arith.constant 3 : index
    %c0_175 = arith.constant 0 : index
    %226 = vector.load %arg36[%c3_174, %c0_175] : memref<9x32xf32, #tpu.memory_space<vmem>>, vector<5x32xf32>
    %227 = arith.truncf %226 : vector<5x32xf32> to vector<5x32xbf16>
    %c3_176 = arith.constant 3 : index
    %c0_177 = arith.constant 0 : index
    %c0_178 = arith.constant 0 : index
    %228 = vector.load %arg15[%c3_176, %c0_177, %c0_178] : memref<5x32x32xbf16, #tpu.memory_space<vmem>>, vector<1x32x32xbf16>
    %229 = vector.shape_cast %228 : vector<1x32x32xbf16> to vector<32x32xbf16>
    %cst_179 = arith.constant dense<0.000000e+00> : vector<5x32xf32>
    %230 = tpu.matmul %227, %229, %cst_179 {dimension_numbers = #tpu.dot_dimension_numbers<[1], [0], [0], [1], [0, 0, 1, 1], [], []>} : vector<5x32xbf16>, vector<32x32xbf16>, vector<5x32xf32> -> vector<5x32xf32>
    %231 = arith.addf %225, %230 : vector<5x32xf32>
    %c4_180 = arith.constant 4 : index
    %c0_181 = arith.constant 0 : index
    %232 = vector.load %arg36[%c4_180, %c0_181] : memref<9x32xf32, #tpu.memory_space<vmem>>, vector<5x32xf32>
    %233 = arith.truncf %232 : vector<5x32xf32> to vector<5x32xbf16>
    %c4_182 = arith.constant 4 : index
    %c0_183 = arith.constant 0 : index
    %c0_184 = arith.constant 0 : index
    %234 = vector.load %arg15[%c4_182, %c0_183, %c0_184] : memref<5x32x32xbf16, #tpu.memory_space<vmem>>, vector<1x32x32xbf16>
    %235 = vector.shape_cast %234 : vector<1x32x32xbf16> to vector<32x32xbf16>
    %cst_185 = arith.constant dense<0.000000e+00> : vector<5x32xf32>
    %236 = tpu.matmul %233, %235, %cst_185 {dimension_numbers = #tpu.dot_dimension_numbers<[1], [0], [0], [1], [0, 0, 1, 1], [], []>} : vector<5x32xbf16>, vector<32x32xbf16>, vector<5x32xf32> -> vector<5x32xf32>
    %237 = arith.addf %231, %236 : vector<5x32xf32>
    %c0_186 = arith.constant 0 : index
    %c0_187 = arith.constant 0 : index
    %238 = vector.load %arg16[%c0_186, %c0_187] : memref<1x32xf32, #tpu.memory_space<vmem>>, vector<1x32xf32>
    %239 = vector.broadcast %238 : vector<1x32xf32> to vector<5x32xf32>
    %240 = arith.addf %237, %239 : vector<5x32xf32>
    %241 = math.tanh %240 : vector<5x32xf32>
    %242 = arith.addf %241, %203 : vector<5x32xf32>
    %cst_188 = arith.constant dense<0.000000e+00> : vector<5xf32>
    %243 = vector.multi_reduction <add>, %242, %cst_188 [1] : vector<5x32xf32> to vector<5xf32>
    %244 = vector.shape_cast %243 : vector<5xf32> to vector<5x1xf32>
    %cst_189 = arith.constant 3.200000e+01 : f32
    %245 = vector.broadcast %cst_189 : f32 to vector<5x1xf32>
    %246 = arith.divf %244, %245 : vector<5x1xf32>
    %247 = vector.broadcast %246 : vector<5x1xf32> to vector<5x32xf32>
    %248 = arith.subf %242, %247 : vector<5x32xf32>
    %249 = arith.mulf %248, %248 : vector<5x32xf32>
    %cst_190 = arith.constant dense<0.000000e+00> : vector<5xf32>
    %250 = vector.multi_reduction <add>, %249, %cst_190 [1] : vector<5x32xf32> to vector<5xf32>
    %251 = vector.shape_cast %250 : vector<5xf32> to vector<5x1xf32>
    %cst_191 = arith.constant 3.200000e+01 : f32
    %252 = vector.broadcast %cst_191 : f32 to vector<5x1xf32>
    %253 = arith.divf %251, %252 : vector<5x1xf32>
    %cst_192 = arith.constant 9.99999974E-6 : f32
    %254 = vector.broadcast %cst_192 : f32 to vector<5x1xf32>
    %255 = arith.addf %253, %254 : vector<5x1xf32>
    %256 = math.rsqrt %255 : vector<5x1xf32>
    %257 = vector.broadcast %256 : vector<5x1xf32> to vector<5x32xf32>
    %258 = arith.mulf %248, %257 : vector<5x32xf32>
    %259 = vector.broadcast %3 : vector<1x32xf32> to vector<5x32xf32>
    %260 = arith.mulf %258, %259 : vector<5x32xf32>
    %261 = vector.broadcast %4 : vector<1x32xf32> to vector<5x32xf32>
    %262 = arith.addf %260, %261 : vector<5x32xf32>
    %263 = arith.truncf %262 : vector<5x32xf32> to vector<5x32xbf16>
    %c0_193 = arith.constant 0 : index
    %c0_194 = arith.constant 0 : index
    %264 = vector.load %arg18[%c0_193, %c0_194] : memref<1x32xf32, #tpu.memory_space<vmem>>, vector<1x32xf32>
    %cst_195 = arith.constant 0.000000e+00 : f32
    %265 = vector.broadcast %cst_195 : f32 to vector<16x32xf32>
    %c0_196 = arith.constant 0 : index
    %c0_197 = arith.constant 0 : index
    %c0_198 = arith.constant 0 : index
    %266 = vector.load %arg17[%c0_196, %c0_197, %c0_198] : memref<4x32x32xbf16, #tpu.memory_space<vmem>>, vector<1x32x32xbf16>
    %267 = vector.shape_cast %266 : vector<1x32x32xbf16> to vector<32x32xbf16>
    %cst_199 = arith.constant dense<0.000000e+00> : vector<5x32xf32>
    %268 = tpu.matmul %263, %267, %cst_199 {dimension_numbers = #tpu.dot_dimension_numbers<[1], [0], [0], [1], [0, 0, 1, 1], [], []>} : vector<5x32xbf16>, vector<32x32xbf16>, vector<5x32xf32> -> vector<5x32xf32>
    %269 = vector.broadcast %264 : vector<1x32xf32> to vector<5x32xf32>
    %270 = arith.addf %268, %269 : vector<5x32xf32>
    %271 = math.tanh %270 : vector<5x32xf32>
    %c0_200 = arith.constant 0 : index
    %c0_201 = arith.constant 0 : index
    %c0_202 = arith.constant 0 : index
    %272 = vector.load %arg19[%c0_200, %c0_201, %c0_202] : memref<4x16x5xbf16, #tpu.memory_space<vmem>>, vector<1x16x5xbf16>
    %273 = vector.shape_cast %272 : vector<1x16x5xbf16> to vector<16x5xbf16>
    %274 = arith.truncf %271 : vector<5x32xf32> to vector<5x32xbf16>
    %cst_203 = arith.constant dense<0.000000e+00> : vector<16x32xf32>
    %275 = tpu.matmul %273, %274, %cst_203 {dimension_numbers = #tpu.dot_dimension_numbers<[1], [0], [0], [1], [0, 0, 1, 1], [], []>} : vector<16x5xbf16>, vector<5x32xbf16>, vector<16x32xf32> -> vector<16x32xf32>
    %276 = arith.addf %265, %275 : vector<16x32xf32>
    %c1_204 = arith.constant 1 : index
    %c0_205 = arith.constant 0 : index
    %c0_206 = arith.constant 0 : index
    %277 = vector.load %arg17[%c1_204, %c0_205, %c0_206] : memref<4x32x32xbf16, #tpu.memory_space<vmem>>, vector<1x32x32xbf16>
    %278 = vector.shape_cast %277 : vector<1x32x32xbf16> to vector<32x32xbf16>
    %cst_207 = arith.constant dense<0.000000e+00> : vector<5x32xf32>
    %279 = tpu.matmul %263, %278, %cst_207 {dimension_numbers = #tpu.dot_dimension_numbers<[1], [0], [0], [1], [0, 0, 1, 1], [], []>} : vector<5x32xbf16>, vector<32x32xbf16>, vector<5x32xf32> -> vector<5x32xf32>
    %280 = vector.broadcast %264 : vector<1x32xf32> to vector<5x32xf32>
    %281 = arith.addf %279, %280 : vector<5x32xf32>
    %282 = math.tanh %281 : vector<5x32xf32>
    %c1_208 = arith.constant 1 : index
    %c0_209 = arith.constant 0 : index
    %c0_210 = arith.constant 0 : index
    %283 = vector.load %arg19[%c1_208, %c0_209, %c0_210] : memref<4x16x5xbf16, #tpu.memory_space<vmem>>, vector<1x16x5xbf16>
    %284 = vector.shape_cast %283 : vector<1x16x5xbf16> to vector<16x5xbf16>
    %285 = arith.truncf %282 : vector<5x32xf32> to vector<5x32xbf16>
    %cst_211 = arith.constant dense<0.000000e+00> : vector<16x32xf32>
    %286 = tpu.matmul %284, %285, %cst_211 {dimension_numbers = #tpu.dot_dimension_numbers<[1], [0], [0], [1], [0, 0, 1, 1], [], []>} : vector<16x5xbf16>, vector<5x32xbf16>, vector<16x32xf32> -> vector<16x32xf32>
    %287 = arith.addf %276, %286 : vector<16x32xf32>
    %c2_212 = arith.constant 2 : index
    %c0_213 = arith.constant 0 : index
    %c0_214 = arith.constant 0 : index
    %288 = vector.load %arg17[%c2_212, %c0_213, %c0_214] : memref<4x32x32xbf16, #tpu.memory_space<vmem>>, vector<1x32x32xbf16>
    %289 = vector.shape_cast %288 : vector<1x32x32xbf16> to vector<32x32xbf16>
    %cst_215 = arith.constant dense<0.000000e+00> : vector<5x32xf32>
    %290 = tpu.matmul %263, %289, %cst_215 {dimension_numbers = #tpu.dot_dimension_numbers<[1], [0], [0], [1], [0, 0, 1, 1], [], []>} : vector<5x32xbf16>, vector<32x32xbf16>, vector<5x32xf32> -> vector<5x32xf32>
    %291 = vector.broadcast %264 : vector<1x32xf32> to vector<5x32xf32>
    %292 = arith.addf %290, %291 : vector<5x32xf32>
    %293 = math.tanh %292 : vector<5x32xf32>
    %c2_216 = arith.constant 2 : index
    %c0_217 = arith.constant 0 : index
    %c0_218 = arith.constant 0 : index
    %294 = vector.load %arg19[%c2_216, %c0_217, %c0_218] : memref<4x16x5xbf16, #tpu.memory_space<vmem>>, vector<1x16x5xbf16>
    %295 = vector.shape_cast %294 : vector<1x16x5xbf16> to vector<16x5xbf16>
    %296 = arith.truncf %293 : vector<5x32xf32> to vector<5x32xbf16>
    %cst_219 = arith.constant dense<0.000000e+00> : vector<16x32xf32>
    %297 = tpu.matmul %295, %296, %cst_219 {dimension_numbers = #tpu.dot_dimension_numbers<[1], [0], [0], [1], [0, 0, 1, 1], [], []>} : vector<16x5xbf16>, vector<5x32xbf16>, vector<16x32xf32> -> vector<16x32xf32>
    %298 = arith.addf %287, %297 : vector<16x32xf32>
    %c3_220 = arith.constant 3 : index
    %c0_221 = arith.constant 0 : index
    %c0_222 = arith.constant 0 : index
    %299 = vector.load %arg17[%c3_220, %c0_221, %c0_222] : memref<4x32x32xbf16, #tpu.memory_space<vmem>>, vector<1x32x32xbf16>
    %300 = vector.shape_cast %299 : vector<1x32x32xbf16> to vector<32x32xbf16>
    %cst_223 = arith.constant dense<0.000000e+00> : vector<5x32xf32>
    %301 = tpu.matmul %263, %300, %cst_223 {dimension_numbers = #tpu.dot_dimension_numbers<[1], [0], [0], [1], [0, 0, 1, 1], [], []>} : vector<5x32xbf16>, vector<32x32xbf16>, vector<5x32xf32> -> vector<5x32xf32>
    %302 = vector.broadcast %264 : vector<1x32xf32> to vector<5x32xf32>
    %303 = arith.addf %301, %302 : vector<5x32xf32>
    %304 = math.tanh %303 : vector<5x32xf32>
    %c3_224 = arith.constant 3 : index
    %c0_225 = arith.constant 0 : index
    %c0_226 = arith.constant 0 : index
    %305 = vector.load %arg19[%c3_224, %c0_225, %c0_226] : memref<4x16x5xbf16, #tpu.memory_space<vmem>>, vector<1x16x5xbf16>
    %306 = vector.shape_cast %305 : vector<1x16x5xbf16> to vector<16x5xbf16>
    %307 = arith.truncf %304 : vector<5x32xf32> to vector<5x32xbf16>
    %cst_227 = arith.constant dense<0.000000e+00> : vector<16x32xf32>
    %308 = tpu.matmul %306, %307, %cst_227 {dimension_numbers = #tpu.dot_dimension_numbers<[1], [0], [0], [1], [0, 0, 1, 1], [], []>} : vector<16x5xbf16>, vector<5x32xbf16>, vector<16x32xf32> -> vector<16x32xf32>
    %309 = arith.addf %298, %308 : vector<16x32xf32>
    %310 = arith.addf %309, %165 : vector<16x32xf32>
    %cst_228 = arith.constant dense<0.000000e+00> : vector<16xf32>
    %311 = vector.multi_reduction <add>, %310, %cst_228 [1] : vector<16x32xf32> to vector<16xf32>
    %312 = vector.shape_cast %311 : vector<16xf32> to vector<16x1xf32>
    %cst_229 = arith.constant 3.200000e+01 : f32
    %313 = vector.broadcast %cst_229 : f32 to vector<16x1xf32>
    %314 = arith.divf %312, %313 : vector<16x1xf32>
    %315 = vector.broadcast %314 : vector<16x1xf32> to vector<16x32xf32>
    %316 = arith.subf %310, %315 : vector<16x32xf32>
    %317 = arith.mulf %316, %316 : vector<16x32xf32>
    %cst_230 = arith.constant dense<0.000000e+00> : vector<16xf32>
    %318 = vector.multi_reduction <add>, %317, %cst_230 [1] : vector<16x32xf32> to vector<16xf32>
    %319 = vector.shape_cast %318 : vector<16xf32> to vector<16x1xf32>
    %cst_231 = arith.constant 3.200000e+01 : f32
    %320 = vector.broadcast %cst_231 : f32 to vector<16x1xf32>
    %321 = arith.divf %319, %320 : vector<16x1xf32>
    %cst_232 = arith.constant 9.99999974E-6 : f32
    %322 = vector.broadcast %cst_232 : f32 to vector<16x1xf32>
    %323 = arith.addf %321, %322 : vector<16x1xf32>
    %324 = math.rsqrt %323 : vector<16x1xf32>
    %325 = vector.broadcast %324 : vector<16x1xf32> to vector<16x32xf32>
    %326 = arith.mulf %316, %325 : vector<16x32xf32>
    %327 = vector.broadcast %3 : vector<1x32xf32> to vector<16x32xf32>
    %328 = arith.mulf %326, %327 : vector<16x32xf32>
    %329 = vector.broadcast %4 : vector<1x32xf32> to vector<16x32xf32>
    %330 = arith.addf %328, %329 : vector<16x32xf32>
    %cst_233 = arith.constant 0.000000e+00 : f32
    %331 = vector.broadcast %cst_233 : f32 to vector<16x32xf32>
    %332 = arith.truncf %160 : vector<16x32xf32> to vector<16x32xbf16>
    %c0_234 = arith.constant 0 : index
    %c0_235 = arith.constant 0 : index
    %c0_236 = arith.constant 0 : index
    %333 = vector.load %arg22[%c0_234, %c0_235, %c0_236] : memref<2x32x32xbf16, #tpu.memory_space<vmem>>, vector<1x32x32xbf16>
    %334 = vector.shape_cast %333 : vector<1x32x32xbf16> to vector<32x32xbf16>
    %cst_237 = arith.constant dense<0.000000e+00> : vector<16x32xf32>
    %335 = tpu.matmul %332, %334, %cst_237 {dimension_numbers = #tpu.dot_dimension_numbers<[1], [0], [0], [1], [0, 0, 1, 1], [], []>} : vector<16x32xbf16>, vector<32x32xbf16>, vector<16x32xf32> -> vector<16x32xf32>
    %336 = arith.addf %331, %335 : vector<16x32xf32>
    %337 = arith.truncf %330 : vector<16x32xf32> to vector<16x32xbf16>
    %c1_238 = arith.constant 1 : index
    %c0_239 = arith.constant 0 : index
    %c0_240 = arith.constant 0 : index
    %338 = vector.load %arg22[%c1_238, %c0_239, %c0_240] : memref<2x32x32xbf16, #tpu.memory_space<vmem>>, vector<1x32x32xbf16>
    %339 = vector.shape_cast %338 : vector<1x32x32xbf16> to vector<32x32xbf16>
    %cst_241 = arith.constant dense<0.000000e+00> : vector<16x32xf32>
    %340 = tpu.matmul %337, %339, %cst_241 {dimension_numbers = #tpu.dot_dimension_numbers<[1], [0], [0], [1], [0, 0, 1, 1], [], []>} : vector<16x32xbf16>, vector<32x32xbf16>, vector<16x32xf32> -> vector<16x32xf32>
    %341 = arith.addf %336, %340 : vector<16x32xf32>
    %c0_242 = arith.constant 0 : index
    %c0_243 = arith.constant 0 : index
    %342 = vector.load %arg23[%c0_242, %c0_243] : memref<1x32xf32, #tpu.memory_space<vmem>>, vector<1x32xf32>
    %343 = vector.broadcast %342 : vector<1x32xf32> to vector<16x32xf32>
    %344 = arith.addf %341, %343 : vector<16x32xf32>
    %c0_244 = arith.constant 0 : index
    %c0_245 = arith.constant 0 : index
    %345 = vector.load %arg24[%c0_244, %c0_245] : memref<1x32xf32, #tpu.memory_space<vmem>>, vector<1x32xf32>
    %c0_246 = arith.constant 0 : index
    %c0_247 = arith.constant 0 : index
    %346 = vector.load %arg25[%c0_246, %c0_247] : memref<1x32xf32, #tpu.memory_space<vmem>>, vector<1x32xf32>
    %cst_248 = arith.constant dense<0.000000e+00> : vector<16xf32>
    %347 = vector.multi_reduction <add>, %344, %cst_248 [1] : vector<16x32xf32> to vector<16xf32>
    %348 = vector.shape_cast %347 : vector<16xf32> to vector<16x1xf32>
    %cst_249 = arith.constant 3.200000e+01 : f32
    %349 = vector.broadcast %cst_249 : f32 to vector<16x1xf32>
    %350 = arith.divf %348, %349 : vector<16x1xf32>
    %351 = vector.broadcast %350 : vector<16x1xf32> to vector<16x32xf32>
    %352 = arith.subf %344, %351 : vector<16x32xf32>
    %353 = arith.mulf %352, %352 : vector<16x32xf32>
    %cst_250 = arith.constant dense<0.000000e+00> : vector<16xf32>
    %354 = vector.multi_reduction <add>, %353, %cst_250 [1] : vector<16x32xf32> to vector<16xf32>
    %355 = vector.shape_cast %354 : vector<16xf32> to vector<16x1xf32>
    %cst_251 = arith.constant 3.200000e+01 : f32
    %356 = vector.broadcast %cst_251 : f32 to vector<16x1xf32>
    %357 = arith.divf %355, %356 : vector<16x1xf32>
    %cst_252 = arith.constant 9.99999974E-6 : f32
    %358 = vector.broadcast %cst_252 : f32 to vector<16x1xf32>
    %359 = arith.addf %357, %358 : vector<16x1xf32>
    %360 = math.rsqrt %359 : vector<16x1xf32>
    %361 = vector.broadcast %360 : vector<16x1xf32> to vector<16x32xf32>
    %362 = arith.mulf %352, %361 : vector<16x32xf32>
    %363 = vector.broadcast %345 : vector<1x32xf32> to vector<16x32xf32>
    %364 = arith.mulf %362, %363 : vector<16x32xf32>
    %365 = vector.broadcast %346 : vector<1x32xf32> to vector<16x32xf32>
    %366 = arith.addf %364, %365 : vector<16x32xf32>
    %367 = arith.truncf %366 : vector<16x32xf32> to vector<16x32xbf16>
    %c0_253 = arith.constant 0 : index
    %c0_254 = arith.constant 0 : index
    %368 = vector.load %arg26[%c0_253, %c0_254] : memref<32x128xbf16, #tpu.memory_space<vmem>>, vector<32x128xbf16>
    %cst_255 = arith.constant dense<0.000000e+00> : vector<16x128xf32>
    %369 = tpu.matmul %367, %368, %cst_255 {dimension_numbers = #tpu.dot_dimension_numbers<[1], [0], [0], [1], [0, 0, 1, 1], [], []>} : vector<16x32xbf16>, vector<32x128xbf16>, vector<16x128xf32> -> vector<16x128xf32>
    %c0_256 = arith.constant 0 : index
    %c0_257 = arith.constant 0 : index
    %370 = vector.load %arg27[%c0_256, %c0_257] : memref<1x128xf32, #tpu.memory_space<vmem>>, vector<1x128xf32>
    %371 = vector.broadcast %370 : vector<1x128xf32> to vector<16x128xf32>
    %372 = arith.addf %369, %371 : vector<16x128xf32>
    %373 = arith.truncf %372 : vector<16x128xf32> to vector<16x128xbf16>
    %c0_258 = arith.constant 0 : index
    %c0_259 = arith.constant 0 : index
    %374 = vector.load %arg28[%c0_258, %c0_259] : memref<128x32xbf16, #tpu.memory_space<vmem>>, vector<128x32xbf16>
    %cst_260 = arith.constant dense<0.000000e+00> : vector<16x32xf32>
    %375 = tpu.matmul %373, %374, %cst_260 {dimension_numbers = #tpu.dot_dimension_numbers<[1], [0], [0], [1], [0, 0, 1, 1], [], []>} : vector<16x128xbf16>, vector<128x32xbf16>, vector<16x32xf32> -> vector<16x32xf32>
    %c0_261 = arith.constant 0 : index
    %c0_262 = arith.constant 0 : index
    %376 = vector.load %arg29[%c0_261, %c0_262] : memref<1x32xf32, #tpu.memory_space<vmem>>, vector<1x32xf32>
    %377 = vector.broadcast %376 : vector<1x32xf32> to vector<16x32xf32>
    %378 = arith.addf %375, %377 : vector<16x32xf32>
    %379 = arith.addf %344, %378 : vector<16x32xf32>
    %c0_263 = arith.constant 0 : index
    %c0_264 = arith.constant 0 : index
    %380 = vector.load %arg30[%c0_263, %c0_264] : memref<1x32xf32, #tpu.memory_space<vmem>>, vector<1x32xf32>
    %c0_265 = arith.constant 0 : index
    %c0_266 = arith.constant 0 : index
    %381 = vector.load %arg31[%c0_265, %c0_266] : memref<1x32xf32, #tpu.memory_space<vmem>>, vector<1x32xf32>
    %cst_267 = arith.constant dense<0.000000e+00> : vector<16xf32>
    %382 = vector.multi_reduction <add>, %379, %cst_267 [1] : vector<16x32xf32> to vector<16xf32>
    %383 = vector.shape_cast %382 : vector<16xf32> to vector<16x1xf32>
    %cst_268 = arith.constant 3.200000e+01 : f32
    %384 = vector.broadcast %cst_268 : f32 to vector<16x1xf32>
    %385 = arith.divf %383, %384 : vector<16x1xf32>
    %386 = vector.broadcast %385 : vector<16x1xf32> to vector<16x32xf32>
    %387 = arith.subf %379, %386 : vector<16x32xf32>
    %388 = arith.mulf %387, %387 : vector<16x32xf32>
    %cst_269 = arith.constant dense<0.000000e+00> : vector<16xf32>
    %389 = vector.multi_reduction <add>, %388, %cst_269 [1] : vector<16x32xf32> to vector<16xf32>
    %390 = vector.shape_cast %389 : vector<16xf32> to vector<16x1xf32>
    %cst_270 = arith.constant 3.200000e+01 : f32
    %391 = vector.broadcast %cst_270 : f32 to vector<16x1xf32>
    %392 = arith.divf %390, %391 : vector<16x1xf32>
    %cst_271 = arith.constant 9.99999974E-6 : f32
    %393 = vector.broadcast %cst_271 : f32 to vector<16x1xf32>
    %394 = arith.addf %392, %393 : vector<16x1xf32>
    %395 = math.rsqrt %394 : vector<16x1xf32>
    %396 = vector.broadcast %395 : vector<16x1xf32> to vector<16x32xf32>
    %397 = arith.mulf %387, %396 : vector<16x32xf32>
    %398 = vector.broadcast %380 : vector<1x32xf32> to vector<16x32xf32>
    %399 = arith.mulf %397, %398 : vector<16x32xf32>
    %400 = vector.broadcast %381 : vector<1x32xf32> to vector<16x32xf32>
    %401 = arith.addf %399, %400 : vector<16x32xf32>
    %c0_272 = arith.constant 0 : index
    %c0_273 = arith.constant 0 : index
    %402 = vector.load %arg32[%c0_272, %c0_273] : memref<1x32xbf16, #tpu.memory_space<vmem>>, vector<1x32xbf16>
    %403 = arith.truncf %401 : vector<16x32xf32> to vector<16x32xbf16>
    "tpu.trace_start"() <{level = 10 : i32, message = "cd,ld->cl"}> : () -> ()
    %cst_274 = arith.constant dense<0.000000e+00> : vector<1x16xf32>
    %404 = tpu.matmul %402, %403, %cst_274 {dimension_numbers = #tpu.dot_dimension_numbers<[1], [1], [0], [0], [0, 0, 1, 0], [], []>} : vector<1x32xbf16>, vector<16x32xbf16>, vector<1x16xf32> -> vector<1x16xf32>
    "tpu.trace_stop"() : () -> ()
    %c0_275 = arith.constant 0 : index
    %c0_276 = arith.constant 0 : index
    %405 = vector.load %arg33[%c0_275, %c0_276] : memref<1x1xf32, #tpu.memory_space<vmem>>, vector<1x1xf32>
    %406 = vector.broadcast %405 : vector<1x1xf32> to vector<1x16xf32>
    %407 = arith.addf %404, %406 : vector<1x16xf32>
    %c0_277 = arith.constant 0 : index
    %c0_278 = arith.constant 0 : index
    %c0_279 = arith.constant 0 : index
    %408 = vector.load %arg34[%c0_277, %c0_278, %c0_279] : memref<1x1x16xf32, #tpu.memory_space<vmem>>, vector<1x1x16xf32>
    %409 = vector.shape_cast %408 : vector<1x1x16xf32> to vector<1x16xf32>
    %410 = vector.shape_cast %407 : vector<1x16xf32> to vector<1x1x16xf32>
    tpu.vector_store %arg34[%c0_277, %c0_278, %c0_279], %410 {strides = array<i32>} : memref<1x1x16xf32, #tpu.memory_space<vmem>>, vector<1x1x16xf32>,
    return
  }
  func.func @transform_0(%arg0: i32) -> (i32, i32, i32) {
    %c0_i32 = arith.constant 0 : i32
    %c0_i32_0 = arith.constant 0 : i32
    %c0_i32_1 = arith.constant 0 : i32
    return %arg0, %c0_i32, %c0_i32_0 : i32, i32, i32
  }
  func.func @transform_1(%arg0: i32) -> (i32, i32) {
    %c0_i32 = arith.constant 0 : i32
    %c0_i32_0 = arith.constant 0 : i32
    %c0_i32_1 = arith.constant 0 : i32
    return %c0_i32, %c0_i32_0 : i32, i32
  }
  func.func @transform_2(%arg0: i32) -> (i32, i32, i32) {
    %c0_i32 = arith.constant 0 : i32
    %c0_i32_0 = arith.constant 0 : i32
    %c0_i32_1 = arith.constant 0 : i32
    %c0_i32_2 = arith.constant 0 : i32
    return %c0_i32, %c0_i32_0, %c0_i32_1 : i32, i32, i32
  }
  func.func @transform_3(%arg0: i32) -> (i32, i32, i32) {
    %c0_i32 = arith.constant 0 : i32
    %c0_i32_0 = arith.constant 0 : i32
    %c0_i32_1 = arith.constant 0 : i32
    %c0_i32_2 = arith.constant 0 : i32
    return %c0_i32, %c0_i32_0, %c0_i32_1 : i32, i32, i32
  }
  func.func @transform_4(%arg0: i32) -> (i32, i32) {
    %c0_i32 = arith.constant 0 : i32
    %c0_i32_0 = arith.constant 0 : i32
    %c0_i32_1 = arith.constant 0 : i32
    return %c0_i32, %c0_i32_0 : i32, i32
  }
  func.func @transform_5(%arg0: i32) -> (i32, i32, i32) {
    %c0_i32 = arith.constant 0 : i32
    %c0_i32_0 = arith.constant 0 : i32
    %c0_i32_1 = arith.constant 0 : i32
    %c0_i32_2 = arith.constant 0 : i32
    return %c0_i32, %c0_i32_0, %c0_i32_1 : i32, i32, i32
  }
  func.func @transform_6(%arg0: i32) -> (i32, i32) {
    %c0_i32 = arith.constant 0 : i32
    %c0_i32_0 = arith.constant 0 : i32
    %c0_i32_1 = arith.constant 0 : i32
    return %c0_i32, %c0_i32_0 : i32, i32
  }
  func.func @transform_7(%arg0: i32) -> (i32, i32, i32) {
    %c0_i32 = arith.constant 0 : i32
    %c0_i32_0 = arith.constant 0 : i32
    %c0_i32_1 = arith.constant 0 : i32
    %c0_i32_2 = arith.constant 0 : i32
    return %c0_i32, %c0_i32_0, %c0_i32_1 : i32, i32, i32
  }
  func.func @transform_8(%arg0: i32) -> (i32, i32) {
    %c0_i32 = arith.constant 0 : i32
    %c0_i32_0 = arith.constant 0 : i32
    %c0_i32_1 = arith.constant 0 : i32
    return %c0_i32, %c0_i32_0 : i32, i32
  }
  func.func @transform_9(%arg0: i32) -> (i32, i32, i32) {
    %c0_i32 = arith.constant 0 : i32
    %c0_i32_0 = arith.constant 0 : i32
    %c0_i32_1 = arith.constant 0 : i32
    %c0_i32_2 = arith.constant 0 : i32
    return %c0_i32, %c0_i32_0, %c0_i32_1 : i32, i32, i32
  }
  func.func @transform_10(%arg0: i32) -> (i32, i32) {
    %c0_i32 = arith.constant 0 : i32
    %c0_i32_0 = arith.constant 0 : i32
    %c0_i32_1 = arith.constant 0 : i32
    return %c0_i32, %c0_i32_0 : i32, i32
  }
  func.func @transform_11(%arg0: i32) -> (i32, i32, i32) {
    %c0_i32 = arith.constant 0 : i32
    %c0_i32_0 = arith.constant 0 : i32
    %c0_i32_1 = arith.constant 0 : i32
    %c0_i32_2 = arith.constant 0 : i32
    return %c0_i32, %c0_i32_0, %c0_i32_1 : i32, i32, i32
  }
  func.func @transform_12(%arg0: i32) -> (i32, i32, i32) {
    %c0_i32 = arith.constant 0 : i32
    %c0_i32_0 = arith.constant 0 : i32
    %c0_i32_1 = arith.constant 0 : i32
    %c0_i32_2 = arith.constant 0 : i32
    return %c0_i32, %c0_i32_0, %c0_i32_1 : i32, i32, i32
  }
  func.func @transform_13(%arg0: i32) -> (i32, i32) {
    %c0_i32 = arith.constant 0 : i32
    %c0_i32_0 = arith.constant 0 : i32
    %c0_i32_1 = arith.constant 0 : i32
    return %c0_i32, %c0_i32_0 : i32, i32
  }
  func.func @transform_14(%arg0: i32) -> (i32, i32, i32) {
    %c0_i32 = arith.constant 0 : i32
    %c0_i32_0 = arith.constant 0 : i32
    %c0_i32_1 = arith.constant 0 : i32
    %c0_i32_2 = arith.constant 0 : i32
    return %c0_i32, %c0_i32_0, %c0_i32_1 : i32, i32, i32
  }
  func.func @transform_15(%arg0: i32) -> (i32, i32) {
    %c0_i32 = arith.constant 0 : i32
    %c0_i32_0 = arith.constant 0 : i32
    %c0_i32_1 = arith.constant 0 : i32
    return %c0_i32, %c0_i32_0 : i32, i32
  }
  func.func @transform_16(%arg0: i32) -> (i32, i32, i32) {
    %c0_i32 = arith.constant 0 : i32
    %c0_i32_0 = arith.constant 0 : i32
    %c0_i32_1 = arith.constant 0 : i32
    %c0_i32_2 = arith.constant 0 : i32
    return %c0_i32, %c0_i32_0, %c0_i32_1 : i32, i32, i32
  }
  func.func @transform_17(%arg0: i32) -> (i32, i32) {
    %c0_i32 = arith.constant 0 : i32
    %c0_i32_0 = arith.constant 0 : i32
    %c0_i32_1 = arith.constant 0 : i32
    return %c0_i32, %c0_i32_0 : i32, i32
  }
  func.func @transform_18(%arg0: i32) -> (i32, i32, i32) {
    %c0_i32 = arith.constant 0 : i32
    %c0_i32_0 = arith.constant 0 : i32
    %c0_i32_1 = arith.constant 0 : i32
    %c0_i32_2 = arith.constant 0 : i32
    return %c0_i32, %c0_i32_0, %c0_i32_1 : i32, i32, i32
  }
  func.func @transform_19(%arg0: i32) -> (i32, i32) {
    %c0_i32 = arith.constant 0 : i32
    %c0_i32_0 = arith.constant 0 : i32
    %c0_i32_1 = arith.constant 0 : i32
    return %c0_i32, %c0_i32_0 : i32, i32
  }
  func.func @transform_20(%arg0: i32) -> (i32, i32) {
    %c0_i32 = arith.constant 0 : i32
    %c0_i32_0 = arith.constant 0 : i32
    %c0_i32_1 = arith.constant 0 : i32
    return %c0_i32, %c0_i32_0 : i32, i32
  }
  func.func @transform_21(%arg0: i32) -> (i32, i32, i32) {
    %c0_i32 = arith.constant 0 : i32
    %c0_i32_0 = arith.constant 0 : i32
    %c0_i32_1 = arith.constant 0 : i32
    %c0_i32_2 = arith.constant 0 : i32
    return %c0_i32, %c0_i32_0, %c0_i32_1 : i32, i32, i32
  }
  func.func @transform_22(%arg0: i32) -> (i32, i32) {
    %c0_i32 = arith.constant 0 : i32
    %c0_i32_0 = arith.constant 0 : i32
    %c0_i32_1 = arith.constant 0 : i32
    return %c0_i32, %c0_i32_0 : i32, i32
  }
  func.func @transform_23(%arg0: i32) -> (i32, i32) {
    %c0_i32 = arith.constant 0 : i32
    %c0_i32_0 = arith.constant 0 : i32
    %c0_i32_1 = arith.constant 0 : i32
    return %c0_i32, %c0_i32_0 : i32, i32
  }
  func.func @transform_24(%arg0: i32) -> (i32, i32) {
    %c0_i32 = arith.constant 0 : i32
    %c0_i32_0 = arith.constant 0 : i32
    %c0_i32_1 = arith.constant 0 : i32
    return %c0_i32, %c0_i32_0 : i32, i32
  }
  func.func @transform_25(%arg0: i32) -> (i32, i32) {
    %c0_i32 = arith.constant 0 : i32
    %c0_i32_0 = arith.constant 0 : i32
    %c0_i32_1 = arith.constant 0 : i32
    return %c0_i32, %c0_i32_0 : i32, i32
  }
  func.func @transform_26(%arg0: i32) -> (i32, i32) {
    %c0_i32 = arith.constant 0 : i32
    %c0_i32_0 = arith.constant 0 : i32
    %c0_i32_1 = arith.constant 0 : i32
    return %c0_i32, %c0_i32_0 : i32, i32
  }
  func.func @transform_27(%arg0: i32) -> (i32, i32) {
    %c0_i32 = arith.constant 0 : i32
    %c0_i32_0 = arith.constant 0 : i32
    %c0_i32_1 = arith.constant 0 : i32
    return %c0_i32, %c0_i32_0 : i32, i32
  }
  func.func @transform_28(%arg0: i32) -> (i32, i32) {
    %c0_i32 = arith.constant 0 : i32
    %c0_i32_0 = arith.constant 0 : i32
    %c0_i32_1 = arith.constant 0 : i32
    return %c0_i32, %c0_i32_0 : i32, i32
  }
  func.func @transform_29(%arg0: i32) -> (i32, i32) {
    %c0_i32 = arith.constant 0 : i32
    %c0_i32_0 = arith.constant 0 : i32
    %c0_i32_1 = arith.constant 0 : i32
    return %c0_i32, %c0_i32_0 : i32, i32
  }
  func.func @transform_30(%arg0: i32) -> (i32, i32) {
    %c0_i32 = arith.constant 0 : i32
    %c0_i32_0 = arith.constant 0 : i32
    %c0_i32_1 = arith.constant 0 : i32
    return %c0_i32, %c0_i32_0 : i32, i32
  }
  func.func @transform_31(%arg0: i32) -> (i32, i32) {
    %c0_i32 = arith.constant 0 : i32
    %c0_i32_0 = arith.constant 0 : i32
    %c0_i32_1 = arith.constant 0 : i32
    return %c0_i32, %c0_i32_0 : i32, i32
  }
  func.func @transform_32(%arg0: i32) -> (i32, i32) {
    %c0_i32 = arith.constant 0 : i32
    %c0_i32_0 = arith.constant 0 : i32
    %c0_i32_1 = arith.constant 0 : i32
    return %c0_i32, %c0_i32_0 : i32, i32
  }
  func.func @transform_33(%arg0: i32) -> (i32, i32, i32) {
    %c0_i32 = arith.constant 0 : i32
    %c0_i32_0 = arith.constant 0 : i32
    %c0_i32_1 = arith.constant 0 : i32
    return %arg0, %c0_i32, %c0_i32_0 : i32, i32, i32
  }
}

</mosaic_0001>

<bundles_post_ra>
// kernel: seasonal_prediction_forward.2
= control target key start
LH: loop header
LB: loop body
LE: loop exit
PB: predicated region body
PF: predicated region fallthrough
CT: control target
= control target key end

     0   :  { %s5863_s6 = smov 1   ;;  %s5864_s10 = smov 2   ;;  %s6791_s0 = inlined_call_operand.smem [shape: u32[32], index: -1, kind: input, shape index: {}] }
   0x1   :  { %s5924_s5 = sld [smem:[%s6791_s0]]   ;;  %s5865_s14 = smov 3  }
   0x2   :  { %s5929_s9 = sld [smem:[%s6791_s0 + %s5863_s6]]   ;;  %s5866_s18 = smov 4  }
   0x3   :  { %s5934_s13 = sld [smem:[%s6791_s0 + %s5864_s10]]   ;;  %s5867_s22 = smov 5  }
   0x4   :  { %s5939_s17 = sld [smem:[%s6791_s0 + %s5865_s14]]   ;;  %s5868_s26 = smov 6  }
   0x5   :  { %s5944_s21 = sld [smem:[%s6791_s0 + %s5866_s18]]   ;;  %s5869_s30 = smov 7  }
   0x6   :  { %s5949_s25 = sld [smem:[%s6791_s0 + %s5867_s22]]   ;;  %s5870_s4 = smov 8  }
   0x7   :  { %s5954_s29 = sld [smem:[%s6791_s0 + %s5868_s26]]   ;;  %s5871_s10 = smov 9  }
   0x8   :  { %6808 = sst [smem:[#allocation35_spill]] %s5929_s9  ;;  %s5872_s15 = smov 10  }
   0x9   :  { %6809 = sst [smem:[#allocation36_spill]] %s5934_s13  ;;  %s5873_s20 = smov 11  }
   0xa   :  { %6810 = sst [smem:[#allocation37_spill]] %s5939_s17  ;;  %s5874_s26 = smov 12  }
   0xb   :  { %6811 = sst [smem:[#allocation38_spill]] %s5944_s21  ;;  %s5875_s1 = smov 13  }
   0xc   :  { %s5959_s3 = sld [smem:[%s6791_s0 + %s5869_s30]]   ;;  %s5876_s7 = smov 14  }
   0xd   :  { %6812 = sst [smem:[#allocation39_spill]] %s5954_s29  ;;  %s5878_s22 = smov 16  }
   0xe   :  { %s5964_s8 = sld [smem:[%s6791_s0 + %s5870_s4]]   ;;  %s5879_s28 = smov 17  }
   0xf   :  { %s5969_s14 = sld [smem:[%s6791_s0 + %s5871_s10]]  }
  0x10   :  { %s5974_s19 = sld [smem:[%s6791_s0 + %s5872_s15]]   ;;  %s5877_s15 = smov 15  }
  0x11   :  { %s5979_s24 = sld [smem:[%s6791_s0 + %s5873_s20]]  }
  0x12   :  { %6813 = sst [smem:[#allocation40_spill]] %s5959_s3 }
  0x13   :  { %s5984_s30 = sld [smem:[%s6791_s0 + %s5874_s26]]  }
  0x14   :  { %s5989_s6 = sld [smem:[%s6791_s0 + %s5875_s1]]  }
  0x15   :  { %6814 = sst [smem:[#allocation41_spill]] %s5969_s14 }
  0x16   :  { %6815 = sst [smem:[#allocation42_spill]] %s5974_s19 }
  0x17   :  { %6816 = sst [smem:[#allocation43_spill]] %s5979_s24 }
  0x18   :  { %s5994_s12 = sld [smem:[%s6791_s0 + %s5876_s7]]   ;;  %s5880_s7 = smov 18  }
  0x19   :  { %s5999_s20 = sld [smem:[%s6791_s0 + %s5877_s15]]   ;;  %s5881_s15 = smov 19  }
  0x1a   :  { %s6004_s27 = sld [smem:[%s6791_s0 + %s5878_s22]]   ;;  %s5882_s22 = smov 20  }
  0x1b   :  { %s6009_s4 = sld [smem:[%s6791_s0 + %s5879_s28]]   ;;  %s5883_s28 = smov 21  }
  0x1c   :  { %s6019_s24 = sld [smem:[%s6791_s0 + %s5881_s15]]   ;;  %s5885_s15 = smov 23  }
  0x1d   :  { %s6024_s19 = sld [smem:[%s6791_s0 + %s5882_s22]]   ;;  %s5886_s22 = smov 24  }
  0x1e   :  { %6817 = sst [smem:[#allocation44_spill]] %s5994_s12 }
  0x1f   :  { %s6014_s12 = sld [smem:[%s6791_s0 + %s5880_s7]]   ;;  %s5884_s7 = smov 22  }
  0x20   :  { %s6029_s14 = sld [smem:[%s6791_s0 + %s5883_s28]]   ;;  %s5887_s28 = smov 25  }
  0x21   :  { %6818 = sst [smem:[#allocation45_spill]] %s6009_s4 }
  0x22   :  { %6820 = sst [smem:[#allocation47_spill]] %s6019_s24 }
  0x23   :  { %6821 = sst [smem:[#allocation48_spill]] %s6024_s19 }
  0x24   :  { %s6039_s24 = sld [smem:[%s6791_s0 + %s5885_s15]]   ;;  %s5889_s15 = smov 27  }
  0x25   :  { %6819 = sst [smem:[#allocation46_spill]] %s6014_s12 }
  0x26   :  { %s6034_s12 = sld [smem:[%s6791_s0 + %s5884_s7]]   ;;  %s5888_s7 = smov 26  }
  0x27   :  { %s6044_s19 = sld [smem:[%s6791_s0 + %s5886_s22]]   ;;  %s5890_s22 = smov 28  }
  0x28   :  { %s6049_s29 = sld [smem:[%s6791_s0 + %s5887_s28]]   ;;  %s5891_s28 = smov 29  }
  0x29   :  { %s6054_s21 = sld [smem:[%s6791_s0 + %s5888_s7]]   ;;  %s5892_s7 = smov 30  }
  0x2a   :  { %6822 = sst [smem:[#allocation49_spill]] %s6039_s24 }
  0x2b   :  { %s6059_s24 = sld [smem:[%s6791_s0 + %s5889_s15]]   ;;  %s5893_s15 = smov 31  }
  0x2c   :  { %s6069_s13 = sld [smem:[%s6791_s0 + %s5891_s28]]  }
  0x2d   :  { %6823 = sst [smem:[#allocation50_spill]] %s6044_s19 }
  0x2e   :  { %s6064_s19 = sld [smem:[%s6791_s0 + %s5890_s22]]  }
  0x2f   :  { %s6074_s9 = sld [smem:[%s6791_s0 + %s5892_s7]]  }
  0x31   :  { %6824 = sst [smem:[#allocation51_spill]] %s6059_s24 }
  0x32   :  { %s6079_s24 = sld [smem:[%s6791_s0 + %s5893_s15]]  }
  0x35   :  { %6825 = sst [smem:[#allocation52_spill]] %s6074_s9 }
  0x38   :  { %6826 = sst [smem:[#allocation53_spill]] %s6079_s24 }
  0x39   :  { %68 = vsyncpa [#allocation5], 0 }
  0x3a   :  { %70 = vsyncpa [#allocation5 + $0x1], 0 }
  0x3b   :  { %71 = vsyncpa [#allocation7], 0 }
  0x3c   :  { %72 = vsyncpa [#allocation10], 0 }
  0x3d   :  { %73 = vsyncpa [#allocation13], 0 }
  0x3e   :  { %74 = vsyncpa [#allocation16], 0 }
  0x3f   :  { %75 = vsyncpa [#allocation19], 0 }
  0x40   :  { %76 = vsyncpa [#allocation22], 0 }
  0x41   :  { %77 = vsyncpa [#allocation25], 0  ;;  %s6081_s22 = smov 0   ;;  %s6083_s23 = smov 0  }
  0x42   :  { %s6085_s26 = smov 0   ;;  %s6087_s28 = smov 0  }
  0x43 LB: > { %s6827_s4 = sld [smem:[#allocation45_spill]]  ;;  %s6829_s3 = sld [smem:[#allocation40_spill]]  ;;  %s5857_s26 = sphi %s6085_s26, %s6873_s26   ;;  %s5853_s23 = sphi %s6083_s23, %s6872_s23   ;;  %s5849_s22 = sphi %s6081_s22, %s6871_s22   ;;  %s5861_s28 = sphi %s6087_s28, %s6874_s28  }
  0x44   : > { %s6828_s17 = sld [smem:[#allocation37_spill]]  ;;  %s5894_s0 = smov [#allocation6]  }
  0x45   : > { %s788_s1 = sshll.u32 %s5894_s0, 4  ;;  %s6102_s2 = sadd.s32 4294967295, %s5861_s28   ;;  %s6107_s1 = int_to_ptr.vmem [resolvable:$true] %s788_s1 }
  0x46   : > { %p4369_p0 = scmp.ge.s32.totalorder %s5861_s28, 1  ;;  %p6798_p1 = scmp.eq.s32.totalorder %s6102_s2, 0 }
  0x47   : > { %p770_p2 = scmp.lt.s32.totalorder %s5861_s28, 3  ;;  %s5895_s10 = smov [#allocation9]  }
  0x48   : > { %s820_s11 = sshll.u32 %s5895_s10, 4  ;;  %s5896_s16 = smov [#allocation12]   ;;  %s6121_s11 = int_to_ptr.vmem [resolvable:$true] %s820_s11 }
  0x49   : > { %p6109_p3 = pnand %p4369_p0, %p770_p2  ;;  %s853_s18 = sshll.u32 %s5896_s16, 4  ;;  %s6123_s18 = int_to_ptr.vmem [resolvable:$true] %s853_s18 }
  0x4a   : > { %s5377_s0 = scalar_lea.hbm %s6828_s17, 512 }
  0x4b   : > { %s6830_s7 = scalar_select %p6109_p3, 1, 0 }
  0x4c   : > { %p5091_p4 = pneg %p6109_p3  ;;  %p5378_p6 = scmp.ne.s32.totalorder %s6828_s17, %s5377_s0 }
  0x4d   : > { %p5384_p10 = scmp.lt.u32.totalorder %s5377_s0, %s6828_s17 }
  0x4e   : > { %p6117_p5 = pnand %p5091_p4, %p6798_p1 }
  0x50   : > { %p6129_p7 = pneg %p6117_p5 }
  0x52   : > { %p5380_p8 = pnand %p6129_p7, %p5378_p6 }
  0x54   : > { %p5381_p9 = pneg %p5380_p8 }
  0x56   : > { %p5386_p11 = pnand %p5384_p10, %p5381_p9 }
  0x58   : > { %5389 = shalt.err (!%p5386_p11)
}
  0x59   : > { %s5390_s10 = scalar_lea.vmem %s6107_s1, 512  ;;  %p5398_p2 = scmp.lt.s32.totalorder %s6107_s1, %s6107_s1 }
  0x5a   : > { %p5391_p12 = scmp.ne.s32.totalorder %s6107_s1, %s5390_s10  ;;  %p5399_p4 = scmp.lt.s32.totalorder %s5390_s10, %s5390_s10 }
  0x5c   : > { %p5393_p13 = pnand %p5391_p12, %p6129_p7  ;;  %p5400_p1 = por %p5399_p4, %p5398_p2 }
  0x5e   : > { %p5394_p0 = pneg %p5393_p13 }
  0x60   : > { %p5401_p3 = pnand %p5400_p1, %p5394_p0 }
  0x62   : > { %5404 = shalt.err (!%p5401_p3)
}
  0x63   : > { %s6802_s16 = smov 64   ;;  %s6804_s0 = smov 4  }
  0x64   : > { %5094 = dma.hbm_to_vmem [thread:$0]  (!%p6117_p5), %s6828_s17, 512, %s6107_s1, [#allocation7], %s6802_s16, %s6802_s16, %s6804_s0  }
  0x65   : > { %s5405_s9 = scalar_lea.hbm %s6829_s3, 512 }
  0x66   : > { %p5406_p6 = scmp.ne.s32.totalorder %s6829_s3, %s5405_s9  ;;  %p5412_p3 = scmp.lt.u32.totalorder %s5405_s9, %s6829_s3 }
  0x68   : > { %p5408_p8 = pnand %p5406_p6, %p6129_p7 }
  0x6a   : > { %p5409_p1 = pneg %p5408_p8 }
  0x6c   : > { %p5414_p9 = pnand %p5412_p3, %p5409_p1 }
  0x6e   : > { %5417 = shalt.err (!%p5414_p9)
}
  0x6f   : > { %s5418_s10 = scalar_lea.vmem %s6121_s11, 512  ;;  %p5426_p13 = scmp.lt.s32.totalorder %s6121_s11, %s6121_s11 }
  0x70   : > { %p5419_p10 = scmp.ne.s32.totalorder %s6121_s11, %s5418_s10  ;;  %p5427_p0 = scmp.lt.s32.totalorder %s5418_s10, %s5418_s10 }
  0x72   : > { %p5421_p11 = pnand %p5419_p10, %p6129_p7  ;;  %p5428_p2 = por %p5427_p0, %p5426_p13 }
  0x74   : > { %p5422_p12 = pneg %p5421_p11 }
  0x76   : > { %p5429_p4 = pnand %p5428_p2, %p5422_p12 }
  0x78   : > { %5432 = shalt.err (!%p5429_p4)
}
  0x79   : > { %5100 = dma.hbm_to_vmem [thread:$0]  (!%p6117_p5), %s6829_s3, 512, %s6121_s11, [#allocation10], %s6802_s16, %s6802_s16, %s6804_s0  }
  0x7a   : > { %s5433_s9 = scalar_lea.hbm %s5984_s30, 1024 }
  0x7b   : > { %p5434_p6 = scmp.ne.s32.totalorder %s5984_s30, %s5433_s9  ;;  %p5440_p3 = scmp.lt.u32.totalorder %s5433_s9, %s5984_s30 }
  0x7d   : > { %p5436_p8 = pnand %p5434_p6, %p6129_p7 }
  0x7f   : > { %p5437_p1 = pneg %p5436_p8 }
  0x81   : > { %p5442_p9 = pnand %p5440_p3, %p5437_p1 }
  0x83   : > { %5445 = shalt.err (!%p5442_p9)
}
  0x84   : > { %s5446_s1 = scalar_lea.vmem %s6123_s18, 1024  ;;  %p5454_p13 = scmp.lt.s32.totalorder %s6123_s18, %s6123_s18 }
  0x85   : > { %p5447_p10 = scmp.ne.s32.totalorder %s6123_s18, %s5446_s1  ;;  %p5455_p0 = scmp.lt.s32.totalorder %s5446_s1, %s5446_s1 }
  0x87   : > { %p5449_p11 = pnand %p5447_p10, %p6129_p7  ;;  %p5456_p2 = por %p5455_p0, %p5454_p13 }
  0x89   : > { %p5450_p12 = pneg %p5449_p11 }
  0x8b   : > { %p5457_p4 = pnand %p5456_p2, %p5450_p12 }
  0x8d   : > { %5460 = shalt.err (!%p5457_p4)
}
  0x8e   : > { %5106 = dma.hbm_to_vmem [thread:$0]  (!%p6117_p5), %s5984_s30, 1024, %s6123_s18, [#allocation13], %s6802_s16, %s6802_s16, %s6804_s0  }
  0x8f   : > { %s5899_s11 = smov [#allocation15]   ;;  %s5900_s9 = smov [#allocation18]  }
  0x90   : > { %s881_s10 = sshll.u32 %s5899_s11, 4  ;;  %s905_s1 = sshll.u32 %s5900_s9, 4  ;;  %s882_s10 = int_to_ptr.vmem [resolvable:$true] %s881_s10  ;;  %s906_s1 = int_to_ptr.vmem [resolvable:$true] %s905_s1 }
  0x91   : > { %s5461_s3 = scalar_lea.hbm %s5999_s20, 16 }
  0x92   : > { %p5462_p6 = scmp.ne.s32.totalorder %s5999_s20, %s5461_s3  ;;  %p5468_p3 = scmp.lt.u32.totalorder %s5461_s3, %s5999_s20 }
  0x94   : > { %p5464_p8 = pnand %p5462_p6, %p6129_p7 }
  0x96   : > { %p5465_p1 = pneg %p5464_p8 }
  0x98   : > { %p5470_p9 = pnand %p5468_p3, %p5465_p1 }
  0x9a   : > { %5473 = shalt.err (!%p5470_p9)
}
  0x9b   : > { %s5474_s17 = scalar_lea.vmem %s882_s10, 16  ;;  %s5481_s18 = scalar_lea.vmem %s882_s10, 32 }
  0x9c   : > { %p5475_p10 = scmp.ne.s32.totalorder %s882_s10, %s5474_s17  ;;  %p5482_p13 = scmp.lt.s32.totalorder %s882_s10, %s882_s10 }
  0x9d   : > { %p5483_p0 = scmp.lt.s32.totalorder %s5481_s18, %s5474_s17 }
  0x9e   : > { %p5477_p11 = pnand %p5475_p10, %p6129_p7 }
  0x9f   : > { %p5484_p2 = por %p5483_p0, %p5482_p13 }
  0xa0   : > { %p5478_p12 = pneg %p5477_p11 }
  0xa2   : > { %p5485_p4 = pnand %p5484_p2, %p5478_p12 }
  0xa4   : > { %5488 = shalt.err (!%p5485_p4)
}
  0xa5   : > { %5112 = dma.hbm_to_vmem [thread:$0]  (!%p6117_p5), %s5999_s20, 16, %s882_s10, [#allocation16]  }
  0xa6   : > { %s5489_s3 = scalar_lea.hbm %s6827_s4, 16 }
  0xa7   : > { %p5490_p6 = scmp.ne.s32.totalorder %s6827_s4, %s5489_s3  ;;  %p5496_p3 = scmp.lt.u32.totalorder %s5489_s3, %s6827_s4 }
  0xa9   : > { %p5492_p8 = pnand %p5490_p6, %p6129_p7 }
  0xab   : > { %p5493_p1 = pneg %p5492_p8 }
  0xad   : > { %p5498_p9 = pnand %p5496_p3, %p5493_p1 }
  0xaf   : > { %5501 = shalt.err (!%p5498_p9)
}
  0xb0   : > { %s5502_s17 = scalar_lea.vmem %s906_s1, 16  ;;  %s5509_s11 = scalar_lea.vmem %s906_s1, 32 }
  0xb1   : > { %p5503_p10 = scmp.ne.s32.totalorder %s906_s1, %s5502_s17  ;;  %p5510_p13 = scmp.lt.s32.totalorder %s906_s1, %s906_s1 }
  0xb2   : > { %p5511_p0 = scmp.lt.s32.totalorder %s5509_s11, %s5502_s17 }
  0xb3   : > { %p5505_p11 = pnand %p5503_p10, %p6129_p7 }
  0xb4   : > { %p5512_p2 = por %p5511_p0, %p5510_p13 }
  0xb5   : > { %p5506_p12 = pneg %p5505_p11 }
  0xb7   : > { %p5513_p4 = pnand %p5512_p2, %p5506_p12 }
  0xb9   : > { %5516 = shalt.err (!%p5513_p4)
}
  0xba   : > { %5118 = dma.hbm_to_vmem [thread:$0]  (!%p6117_p5), %s6827_s4, 16, %s906_s1, [#allocation19]  }
  0xbb   : > { %s5901_s10 = smov [#allocation21]   ;;  %s5902_s18 = smov [#allocation24]  }
  0xbc   : > { %s938_s9 = sshll.u32 %s5901_s10, 4  ;;  %s968_s3 = sshll.u32 %s5902_s18, 4  ;;  %s939_s9 = int_to_ptr.vmem [resolvable:$true] %s938_s9  ;;  %s969_s3 = int_to_ptr.vmem [resolvable:$true] %s968_s3 }
  0xbd   : > { %s5517_s16 = scalar_lea.hbm %s6034_s12, 16 }
  0xbe   : > { %p5518_p6 = scmp.ne.s32.totalorder %s6034_s12, %s5517_s16  ;;  %p5524_p3 = scmp.lt.u32.totalorder %s5517_s16, %s6034_s12 }
  0xc0   : > { %p5520_p8 = pnand %p5518_p6, %p6129_p7 }
  0xc2   : > { %p5521_p1 = pneg %p5520_p8 }
  0xc4   : > { %p5526_p9 = pnand %p5524_p3, %p5521_p1 }
  0xc6   : > { %5529 = shalt.err (!%p5526_p9)
}
  0xc7   : > { %s5530_s17 = scalar_lea.vmem %s939_s9, 16  ;;  %s5537_s1 = scalar_lea.vmem %s939_s9, 32 }
  0xc8   : > { %p5531_p10 = scmp.ne.s32.totalorder %s939_s9, %s5530_s17  ;;  %p5538_p13 = scmp.lt.s32.totalorder %s939_s9, %s939_s9 }
  0xc9   : > { %p5539_p0 = scmp.lt.s32.totalorder %s5537_s1, %s5530_s17 }
  0xca   : > { %p5533_p11 = pnand %p5531_p10, %p6129_p7 }
  0xcb   : > { %p5540_p2 = por %p5539_p0, %p5538_p13 }
  0xcc   : > { %p5534_p12 = pneg %p5533_p11 }
  0xce   : > { %p5541_p4 = pnand %p5540_p2, %p5534_p12 }
  0xd0   : > { %5544 = shalt.err (!%p5541_p4)
}
  0xd1   : > { %5124 = dma.hbm_to_vmem [thread:$0]  (!%p6117_p5), %s6034_s12, 16, %s939_s9, [#allocation22]  }
  0xd2   : > { %s5545_s16 = scalar_lea.hbm %s6054_s21, 16 }
  0xd3   : > { %p5546_p6 = scmp.ne.s32.totalorder %s6054_s21, %s5545_s16  ;;  %p5552_p3 = scmp.lt.u32.totalorder %s5545_s16, %s6054_s21 }
  0xd5   : > { %p5548_p8 = pnand %p5546_p6, %p6129_p7 }
  0xd7   : > { %p5549_p1 = pneg %p5548_p8 }
  0xd9   : > { %p5554_p9 = pnand %p5552_p3, %p5549_p1 }
  0xdb   : > { %5557 = shalt.err (!%p5554_p9)
}
  0xdc   : > { %s5558_s11 = scalar_lea.vmem %s969_s3, 16  ;;  %s5565_s10 = scalar_lea.vmem %s969_s3, 32 }
  0xdd   : > { %p5559_p10 = scmp.ne.s32.totalorder %s969_s3, %s5558_s11  ;;  %p5566_p13 = scmp.lt.s32.totalorder %s969_s3, %s969_s3 }
  0xde   : > { %p5567_p0 = scmp.lt.s32.totalorder %s5565_s10, %s5558_s11 }
  0xdf   : > { %p5561_p11 = pnand %p5559_p10, %p6129_p7 }
  0xe0   : > { %p5568_p2 = por %p5567_p0, %p5566_p13 }
  0xe1   : > { %p5562_p12 = pneg %p5561_p11 }
  0xe3   : > { %p5569_p4 = pnand %p5568_p2, %p5562_p12 }
  0xe5   : > { %5572 = shalt.err (!%p5569_p4)
}
  0xe6   : > { %5130 = dma.hbm_to_vmem [thread:$0]  (!%p6117_p5), %s6054_s21, 16, %s969_s3, [#allocation25]  }
  0xe7   : > { %s5903_s9 = smov [#allocation8]   ;;  %s5904_s17 = smov [#allocation11]  }
  0xe8   : > { %s804_s18 = sshll.u32 %s5903_s9, 4  ;;  %s834_s1 = sshll.u32 %s5904_s17, 4  ;;  %s805_s18 = int_to_ptr.vmem [resolvable:$true] %s804_s18  ;;  %s835_s1 = int_to_ptr.vmem [resolvable:$true] %s834_s1 }
  0xe9   : > { %s5573_s16 = scalar_lea.hbm %s5949_s25, 2304 }
  0xea   : > { %p5574_p6 = scmp.ne.s32.totalorder %s5949_s25, %s5573_s16  ;;  %p5580_p3 = scmp.lt.u32.totalorder %s5573_s16, %s5949_s25 }
  0xec   : > { %p5576_p8 = pnand %p5574_p6, %p6129_p7 }
  0xee   : > { %p5577_p1 = pneg %p5576_p8 }
  0xf0   : > { %p5582_p9 = pnand %p5580_p3, %p5577_p1 }
  0xf2   : > { %5585 = shalt.err (!%p5582_p9)
}
  0xf3   : > { %s5586_s11 = scalar_lea.vmem %s805_s18, 2304  ;;  %p5594_p13 = scmp.lt.s32.totalorder %s805_s18, %s805_s18 }
  0xf4   : > { %p5587_p10 = scmp.ne.s32.totalorder %s805_s18, %s5586_s11  ;;  %p5595_p0 = scmp.lt.s32.totalorder %s5586_s11, %s5586_s11 }
  0xf6   : > { %p5589_p11 = pnand %p5587_p10, %p6129_p7  ;;  %p5596_p2 = por %p5595_p0, %p5594_p13 }
  0xf8   : > { %p5590_p12 = pneg %p5589_p11 }
  0xfa   : > { %p5597_p4 = pnand %p5596_p2, %p5590_p12 }
  0xfc   : > { %5600 = shalt.err (!%p5597_p4)
}
  0xfd   : > { %s6833_s3 = smov 64   ;;  %s5601_s10 = scalar_lea.hbm %s5964_s8, 16 }
  0xfe   : > { %5097 = dma.hbm_to_vmem [thread:$0]  (!%p6117_p5), %s5949_s25, 2304, %s805_s18, [#allocation7], %s6833_s3, %s6833_s3, %s6804_s0  }
  0xff   : > { %p5602_p6 = scmp.ne.s32.totalorder %s5964_s8, %s5601_s10  ;;  %p5608_p3 = scmp.lt.u32.totalorder %s5601_s10, %s5964_s8 }
 0x101   : > { %p5604_p8 = pnand %p5602_p6, %p6129_p7 }
 0x103   : > { %p5605_p1 = pneg %p5604_p8 }
 0x105   : > { %p5610_p9 = pnand %p5608_p3, %p5605_p1 }
 0x107   : > { %5613 = shalt.err (!%p5610_p9)
}
 0x108   : > { %s5614_s9 = scalar_lea.vmem %s835_s1, 16  ;;  %s5621_s17 = scalar_lea.vmem %s835_s1, 32 }
 0x109   : > { %p5615_p10 = scmp.ne.s32.totalorder %s835_s1, %s5614_s9  ;;  %p5622_p13 = scmp.lt.s32.totalorder %s835_s1, %s835_s1 }
 0x10a   : > { %p5623_p0 = scmp.lt.s32.totalorder %s5621_s17, %s5614_s9 }
 0x10b   : > { %p5617_p11 = pnand %p5615_p10, %p6129_p7 }
 0x10c   : > { %p5624_p2 = por %p5623_p0, %p5622_p13 }
 0x10d   : > { %p5618_p12 = pneg %p5617_p11 }
 0x10f   : > { %p5625_p4 = pnand %p5624_p2, %p5618_p12 }
 0x111   : > { %5628 = shalt.err (!%p5625_p4)
}
 0x112   : > { %5103 = dma.hbm_to_vmem [thread:$0]  (!%p6117_p5), %s5964_s8, 16, %s835_s1, [#allocation10]  }
 0x113   : > { %s5905_s18 = smov [#allocation14]   ;;  %s5906_s11 = smov [#allocation17]  }
 0x114   : > { %s867_s16 = sshll.u32 %s5905_s18, 4  ;;  %s891_s10 = sshll.u32 %s5906_s11, 4  ;;  %s868_s16 = int_to_ptr.vmem [resolvable:$true] %s867_s16  ;;  %s892_s10 = int_to_ptr.vmem [resolvable:$true] %s891_s10 }
 0x115   : > { %s5629_s0 = scalar_lea.hbm %s5989_s6, 16 }
 0x116   : > { %p5630_p6 = scmp.ne.s32.totalorder %s5989_s6, %s5629_s0  ;;  %p5636_p3 = scmp.lt.u32.totalorder %s5629_s0, %s5989_s6 }
 0x118   : > { %p5632_p8 = pnand %p5630_p6, %p6129_p7 }
 0x11a   : > { %p5633_p1 = pneg %p5632_p8 }
 0x11c   : > { %p5638_p9 = pnand %p5636_p3, %p5633_p1 }
 0x11e   : > { %5641 = shalt.err (!%p5638_p9)
}
 0x11f   : > { %s5642_s9 = scalar_lea.vmem %s868_s16, 16  ;;  %s5649_s1 = scalar_lea.vmem %s868_s16, 32 }
 0x120   : > { %p5643_p10 = scmp.ne.s32.totalorder %s868_s16, %s5642_s9  ;;  %p5650_p13 = scmp.lt.s32.totalorder %s868_s16, %s868_s16 }
 0x121   : > { %p5651_p0 = scmp.lt.s32.totalorder %s5649_s1, %s5642_s9 }
 0x122   : > { %p5645_p11 = pnand %p5643_p10, %p6129_p7 }
 0x123   : > { %p5652_p2 = por %p5651_p0, %p5650_p13 }
 0x124   : > { %p5646_p12 = pneg %p5645_p11 }
 0x126   : > { %p5653_p4 = pnand %p5652_p2, %p5646_p12 }
 0x128   : > { %5656 = shalt.err (!%p5653_p4)
}
 0x129   : > { %5109 = dma.hbm_to_vmem [thread:$0]  (!%p6117_p5), %s5989_s6, 16, %s868_s16, [#allocation13]  }
 0x12a   : > { %s5657_s0 = scalar_lea.hbm %s6004_s27, 1024 }
 0x12b   : > { %p5658_p6 = scmp.ne.s32.totalorder %s6004_s27, %s5657_s0  ;;  %p5664_p3 = scmp.lt.u32.totalorder %s5657_s0, %s6004_s27 }
 0x12d   : > { %p5660_p8 = pnand %p5658_p6, %p6129_p7 }
 0x12f   : > { %p5661_p1 = pneg %p5660_p8 }
 0x131   : > { %p5666_p9 = pnand %p5664_p3, %p5661_p1 }
 0x133   : > { %5669 = shalt.err (!%p5666_p9)
}
 0x134   : > { %s5670_s17 = scalar_lea.vmem %s892_s10, 1024  ;;  %p5678_p13 = scmp.lt.s32.totalorder %s892_s10, %s892_s10 }
 0x135   : > { %p5671_p10 = scmp.ne.s32.totalorder %s892_s10, %s5670_s17  ;;  %p5679_p0 = scmp.lt.s32.totalorder %s5670_s17, %s5670_s17 }
 0x137   : > { %p5673_p11 = pnand %p5671_p10, %p6129_p7  ;;  %p5680_p2 = por %p5679_p0, %p5678_p13 }
 0x139   : > { %p5674_p12 = pneg %p5673_p11 }
 0x13b   : > { %p5681_p4 = pnand %p5680_p2, %p5674_p12 }
 0x13d   : > { %5684 = shalt.err (!%p5681_p4)
}
 0x13e   : > { %s6834_s18 = smov 4   ;;  %s5907_s16 = smov [#allocation20]  }
 0x13f   : > { %5115 = dma.hbm_to_vmem [thread:$0]  (!%p6117_p5), %s6004_s27, 1024, %s892_s10, [#allocation16], %s6833_s3, %s6833_s3, %s6834_s18  }
 0x140   : > { %s924_s11 = sshll.u32 %s5907_s16, 4  ;;  %s5908_s9 = smov [#allocation23]   ;;  %s925_s11 = int_to_ptr.vmem [resolvable:$true] %s924_s11 }
 0x141   : > { %s954_s1 = sshll.u32 %s5908_s9, 4  ;;  %s5685_s0 = scalar_lea.hbm %s6029_s14, 512  ;;  %s955_s1 = int_to_ptr.vmem [resolvable:$true] %s954_s1 }
 0x142   : > { %p5686_p6 = scmp.ne.s32.totalorder %s6029_s14, %s5685_s0  ;;  %p5692_p3 = scmp.lt.u32.totalorder %s5685_s0, %s6029_s14 }
 0x144   : > { %p5688_p8 = pnand %p5686_p6, %p6129_p7 }
 0x146   : > { %p5689_p1 = pneg %p5688_p8 }
 0x148   : > { %p5694_p9 = pnand %p5692_p3, %p5689_p1 }
 0x14a   : > { %5697 = shalt.err (!%p5694_p9)
}
 0x14b   : > { %s5698_s17 = scalar_lea.vmem %s925_s11, 512  ;;  %p5706_p13 = scmp.lt.s32.totalorder %s925_s11, %s925_s11 }
 0x14c   : > { %p5699_p10 = scmp.ne.s32.totalorder %s925_s11, %s5698_s17  ;;  %p5707_p0 = scmp.lt.s32.totalorder %s5698_s17, %s5698_s17 }
 0x14e   : > { %p5701_p11 = pnand %p5699_p10, %p6129_p7  ;;  %p5708_p2 = por %p5707_p0, %p5706_p13 }
 0x150   : > { %p5702_p12 = pneg %p5701_p11 }
 0x152   : > { %p5709_p4 = pnand %p5708_p2, %p5702_p12 }
 0x154   : > { %5712 = shalt.err (!%p5709_p4)
}
 0x155   : > { %5121 = dma.hbm_to_vmem [thread:$0]  (!%p6117_p5), %s6029_s14, 512, %s925_s11, [#allocation19], %s6833_s3, %s6833_s3, %s6834_s18  }
 0x156   : > { %s5713_s10 = scalar_lea.hbm %s6049_s29, 256 }
 0x157   : > { %p5714_p6 = scmp.ne.s32.totalorder %s6049_s29, %s5713_s10  ;;  %p5720_p3 = scmp.lt.u32.totalorder %s5713_s10, %s6049_s29 }
 0x159   : > { %p5716_p8 = pnand %p5714_p6, %p6129_p7 }
 0x15b   : > { %p5717_p1 = pneg %p5716_p8 }
 0x15d   : > { %p5722_p9 = pnand %p5720_p3, %p5717_p1 }
 0x15f   : > { %5725 = shalt.err (!%p5722_p9)
}
 0x160   : > { %s5726_s16 = scalar_lea.vmem %s955_s1, 256  ;;  %p5734_p13 = scmp.lt.s32.totalorder %s955_s1, %s955_s1 }
 0x161   : > { %p5727_p10 = scmp.ne.s32.totalorder %s955_s1, %s5726_s16  ;;  %p5735_p0 = scmp.lt.s32.totalorder %s5726_s16, %s5726_s16 }
 0x163   : > { %p5729_p11 = pnand %p5727_p10, %p6129_p7  ;;  %p5736_p2 = por %p5735_p0, %p5734_p13 }
 0x165   : > { %p5730_p12 = pneg %p5729_p11 }
 0x167   : > { %p5737_p4 = pnand %p5736_p2, %p5730_p12 }
 0x169   : > { %5740 = shalt.err (!%p5737_p4)
}
 0x16a   : > { %5127 = dma.hbm_to_vmem [thread:$0]  (!%p6117_p5), %s6049_s29, 256, %s955_s1, [#allocation22], %s6833_s3, %s6833_s3, %s6834_s18  }
 0x16b   : > { %s5909_s11 = smov [#allocation26]   ;;  %s5741_s0 = scalar_lea.hbm %s6064_s19, 16 }
 0x16c   : > { %s982_s9 = sshll.u32 %s5909_s11, 4  ;;  %p5742_p6 = scmp.ne.s32.totalorder %s6064_s19, %s5741_s0  ;;  %s983_s9 = int_to_ptr.vmem [resolvable:$true] %s982_s9 }
 0x16d   : > { %p5748_p3 = scmp.lt.u32.totalorder %s5741_s0, %s6064_s19 }
 0x16e   : > { %p5744_p8 = pnand %p5742_p6, %p6129_p7 }
 0x170   : > { %p5745_p1 = pneg %p5744_p8 }
 0x172   : > { %p5750_p9 = pnand %p5748_p3, %p5745_p1 }
 0x174   : > { %5753 = shalt.err (!%p5750_p9)
}
 0x175   : > { %s5754_s17 = scalar_lea.vmem %s983_s9, 16  ;;  %s5761_s10 = scalar_lea.vmem %s983_s9, 32 }
 0x176   : > { %p5755_p10 = scmp.ne.s32.totalorder %s983_s9, %s5754_s17  ;;  %p5762_p13 = scmp.lt.s32.totalorder %s983_s9, %s983_s9 }
 0x177   : > { %p5763_p0 = scmp.lt.s32.totalorder %s5761_s10, %s5754_s17 }
 0x178   : > { %p5757_p11 = pnand %p5755_p10, %p6129_p7 }
 0x179   : > { %p5764_p2 = por %p5763_p0, %p5762_p13 }
 0x17a   : > { %p5758_p12 = pneg %p5757_p11 }
 0x17c   : > { %p5765_p4 = pnand %p5764_p2, %p5758_p12 }
 0x17e   : > { %5768 = shalt.err (!%p5765_p4)
}
 0x17f   : > { %5133 = dma.hbm_to_vmem [thread:$0]  (!%p6117_p5), %s6064_s19, 16, %s983_s9, [#allocation25]  }
 0x180   : > { %s6308_s24 = sadd.s32 1, %s5861_s28   ;;  %s90_s15 = sadd.s32 1, %s5857_s26 }
 0x181   : > { %s87_s3 = ssub.s32 %s5861_s28, %s6308_s24  ;;  %p97_p7 = scmp.ne.s32.totalorder %s5857_s26, %s5853_s23 }
 0x182   : > { %p88_p6 = scmp.eq.s32.totalorder %s87_s3, 0  ;;  %p98_p8 = scmp.eq.s32.totalorder %s5861_s28, 0 }
 0x183   : > { %p103_p1 = scmp.ne.s32.totalorder %s5853_s23, %s5849_s22  ;;  %p5152_p3 = scmp.lt.s32.totalorder %s5861_s28, 2 }
 0x184   : > { %s6320_s18 = scalar_select %p88_p6, %s5857_s26, %s90_s15  }
 0x185   : > { %p99_p9 = por %p98_p8, %p97_p7  ;;  %p6835_p10 = scmp.eq.s32.totalorder %s6102_s2, 0 }
 0x186   : > { %s999_s16 = sand.u32 1, %s5857_s26   ;;  %s4571_s11 = sshll.u32 %s5861_s28, 8 }
 0x187   : > { %p6324_p11 = por %p6835_p10, %p103_p1  ;;  %s4385_s9 = sshll.u32 %s999_s16, 4 }
 0x188   : > { %s6331_s0 = scalar_lea.hbm %s5924_s5, %s4571_s11  ;;  %s1003_s22 = scalar_lea.vmem [#allocation4], %s4385_s9 }
 0x189   : > { %s6836_s1 = scalar_select %p6324_p11, 1, 0 }
 0x18a   : > { %s1010_s17 = sshll.u32 %s1003_s22, 4  ;;  %p6333_p5 = pnand %p5152_p3, %p99_p9  ;;  %s6337_s17 = int_to_ptr.vmem [resolvable:$true] %s1010_s17 }
 0x18b   : > { %s6339_s15 = scalar_lea.sflag [#allocation5], %s999_s16  ;;  %s5769_s28 = scalar_lea.hbm %s6331_s0, 256 }
 0x18c   : > { %p5770_p12 = scmp.ne.s32.totalorder %s6331_s0, %s5769_s28  ;;  %p5771_p13 = pneg %p6333_p5 }
 0x18d   : > { %s5774_s3 = scalar_lea.hbm %s5924_s5, 512  ;;  %p5775_p4 = scmp.lt.u32.totalorder %s6331_s0, %s5924_s5 }
 0x18e   : > { %p5772_p0 = pnand %p5771_p13, %p5770_p12  ;;  %p5776_p7 = scmp.lt.u32.totalorder %s5774_s3, %s5769_s28 }
 0x18f   : > { %p5778_p8 = scmp.lt.u32.totalorder %s5769_s28, %s6331_s0 }
 0x190   : > { %p5773_p2 = pneg %p5772_p0  ;;  %p5777_p6 = por %p5776_p7, %p5775_p4 }
 0x192   : > { %p5779_p1 = por %p5778_p8, %p5777_p6 }
 0x194   : > { %p5780_p3 = pnand %p5779_p1, %p5773_p2 }
 0x196   : > { %5783 = shalt.err (!%p5780_p3)
}
 0x197   : > { %s5784_s16 = scalar_lea.vmem %s6337_s17, 256  ;;  %s5910_s11 = smov [#allocation4]  }
 0x198   : > { %p5785_p9 = scmp.ne.s32.totalorder %s6337_s17, %s5784_s16  ;;  %s5789_s9 = sshll.u32 %s5910_s11, 4  ;;  %s5790_s9 = int_to_ptr.vmem [resolvable:$false] %s5789_s9 }
 0x199   : > { %s5791_s22 = scalar_lea.vmem %s5790_s9, 512  ;;  %p5792_p12 = scmp.lt.s32.totalorder %s6337_s17, %s5790_s9 }
 0x19a   : > { %p5787_p10 = pnand %p5785_p9, %p5771_p13  ;;  %p5793_p0 = scmp.lt.s32.totalorder %s5791_s22, %s5784_s16 }
 0x19c   : > { %p5788_p11 = pneg %p5787_p10  ;;  %p5794_p4 = por %p5793_p0, %p5792_p12 }
 0x19e   : > { %p5795_p7 = pnand %p5794_p4, %p5788_p11 }
 0x1a0   : > { %5798 = shalt.err (!%p5795_p7)
}
 0x1a1   : > { %s5911_s28 = smov 128   ;;  %s5912_s3 = smov 8  }
 0x1a2   : > { %5137 = dma.hbm_to_vmem [thread:$0]  (!%p6333_p5), %s6331_s0, 256, %s6337_s17, %s6339_s15, %s5911_s28, %s5911_s28, %s5912_s3  }
 0x1a3   : > { %p6838_p13 = scmp.ne.s32.totalorder %s6830_s7, 0 }
 0x1a4   : > { %s1024_s11 = sand.u32 (!%p6838_p13), 1, %s5853_s23   ;;  %p6839_p2 = scmp.ne.s32.totalorder (!%p6838_p13), %s6836_s1, 0 }
 0x1a5   : > { %1022 = sbr.rel (%p6838_p13) target bundleno = 5727 (0x165f), region = 144  ;;  %s4389_s4 = sshll.u32 (!%p6838_p13), %s1024_s11, 4 }
 0x1a6   : > { %s1025_s9 = scalar_lea.sflag (!%p6838_p13), [#allocation5], %s1024_s11  ;;  %s1028_s16 = scalar_lea.vmem (!%p6838_p13), [#allocation4], %s4389_s4 }
 0x1ac   : > { %5816 = dma.done.wait (%p6839_p2), %s1025_s9, 256  }
 0x1ad   : > { %5818 = vsyncadd (%p6839_p2), %s1025_s9, 4294967040  ;;  %p6840_p11 = scmp.eq.s32.totalorder %s6102_s2, 0 }
 0x1af   : > { %5820 = dma.done.wait (%p6840_p11), [#allocation7], 2816   ;;  %p6841_p6 = pmov %p6840_p11 }
 0x1b1   : > { %5822 = vsyncadd (%p6841_p6), [#allocation7], 4294964480  ;;  %p6842_p5 = pmov %p6841_p6 }
 0x1b3   : > { %5824 = dma.done.wait (%p6842_p5), [#allocation10], 528   ;;  %p6843_p8 = pmov %p6842_p5 }
 0x1b4   : > { %p6844_p1 = pmov %p6842_p5 }
 0x1b5   : > { %5826 = vsyncadd (%p6843_p8), [#allocation10], 4294966768 }
 0x1b6   : > { %5828 = dma.done.wait (%p6844_p1), [#allocation13], 1040   ;;  %p6845_p3 = pmov %p6844_p1 }
 0x1b7   : > { %p6846_p9 = pmov %p6844_p1 }
 0x1b8   : > { %5830 = vsyncadd (%p6845_p3), [#allocation13], 4294966256 }
 0x1b9   : > { %5832 = dma.done.wait (%p6846_p9), [#allocation16], 1040   ;;  %p6847_p10 = pmov %p6844_p1 }
 0x1ba   : > { %p6848_p12 = pmov %p6844_p1 }
 0x1bb   : > { %5834 = vsyncadd (%p6847_p10), [#allocation16], 4294966256 }
 0x1bc   : > { %5836 = dma.done.wait (%p6848_p12), [#allocation19], 528   ;;  %p6849_p0 = pmov %p6844_p1 }
 0x1be   : > { %5838 = vsyncadd (%p6849_p0), [#allocation19], 4294966768  ;;  %p6850_p4 = pmov %p6849_p0 }
 0x1bf   : > { %p6851_p7 = pmov %p6849_p0 }
 0x1c0   : > { %5840 = dma.done.wait (%p6850_p4), [#allocation22], 272  }
 0x1c1   : > { %5842 = vsyncadd (%p6851_p7), [#allocation22], 4294967024  ;;  %p6852_p13 = pmov %p6849_p0 }
 0x1c2   : > { %p6853_p2 = pmov %p6849_p0 }
 0x1c3   : > { %5844 = dma.done.wait (%p6852_p13), [#allocation25], 32  }
 0x1c4   : > { %5846 = vsyncadd (%p6853_p2), [#allocation25], 4294967264  ;;  %s6854_s4 = sld [smem:[#allocation35_spill]]  ;;  %v5913_v0 = vmov 0.0   ;;  %vm5914_vm0 = vmmov 0   ;;  %v6404_v1 = vld [vmem:[%s1028_s16] sm:$0xff] }
 0x1c5   : > { %4697 = vmatprep.subr.bf16.mxu0 %v5913_v0  ;;  %4699 = vmatprep.mubr.msk.bf16.mxu0 %vm5914_vm0, %v5913_v0  ;;  %v6406_v2 = vld [vmem:[%s1028_s16 + $0x8] sm:$0xff]  ;;  %s6855_s7 = sld [smem:[#allocation36_spill]]  ;;  %vm1181_vm1 = vcmask 130048   ;;  %v5254_v16 = vld [vmem:[#allocation6 + $0x10] sm:$0xff]   ;;  %vm1357_vm2 = vcmask 261120   ;;  %v5256_v23 = vld [vmem:[#allocation6] sm:$0xff]  }
 0x1c6   : > { %4703 = vmatprep.subr.bf16.mxu1 %v5913_v0  ;;  %4705 = vmatprep.mubr.msk.bf16.mxu1 %vm5914_vm0, %v5913_v0  ;;  %v6410_v3 = vpack.c.bf16 %v6406_v2, %v6404_v1  ;;  %v5255_v17 = vld [vmem:[#allocation6 + $0x18] sm:$0xff]   ;;  %1469 = vst.msk [vmem:[#allocation2] sm:$0xff] %vm1357_vm2, %v5913_v0  ;;  %v5257_v29 = vld [vmem:[#allocation6 + $0x8] sm:$0xff]   ;;  %v5258_v30 = vld [vmem:[#allocation8 + $0x10] sm:$0xff]   ;;  %s6856_s1 = sld [smem:[#allocation38_spill]]  ;;  %vm1471_vm3 = vcmask 253952  }
 0x1c7   : > { %v5259_v31 = vld [vmem:[#allocation8] sm:$0xff]   ;;  %v5260_v32 = vld [vmem:[#allocation8 + $0x18] sm:$0xff]   ;;  %v5261_v33 = vld [vmem:[#allocation8 + $0x8] sm:$0xff]   ;;  %s6857_s0 = sld [smem:[#allocation39_spill]]  ;;  %s6859_s10 = sld [smem:[#allocation48_spill]]  ;;  %vm2264_vm4 = vcmask 1043456  }
 0x1c8   : > { %4698 = vmatpush3.bf16.msra.mxu0 %v6410_v3  ;;  %v5262_v50 = vld [vmem:[#allocation8 + $0x20] sm:$0xff]   ;;  %v5263_v51 = vld [vmem:[#allocation8 + $0x30] sm:$0xff]   ;;  %v5264_v57 = vld [vmem:[#allocation8 + $0x28] sm:$0xff]   ;;  %s6858_s17 = sld [smem:[#allocation47_spill]]  ;;  %s6860_s15 = sld [smem:[#allocation41_spill]]  ;;  %vm2265_vm5 = vcmask 1044480  }
 0x1c9   : > { %4709 = vmatprep.subr.bf16.mxu0 %v5913_v0  ;;  %v5265_v58 = vld [vmem:[#allocation8 + $0x38] sm:$0xff]   ;;  %v5266_v63 = vld [vmem:[#allocation8 + $0x40] sm:$0xff]   ;;  %s6861_s22 = sld [smem:[#allocation42_spill]]  ;;  %vm2260_vm6 = vcmask 72704   ;;  %s6862_s28 = sld [smem:[#allocation43_spill]]  ;;  %vm2885_vm7 = vcmask 257024  }
 0x1ca   : > { %v5251_v4 = vld [vmem:[%s6854_s4] sm:$0xff]   ;;  %s6864_s11 = sld [smem:[#allocation44_spill]]  ;;  %2886 = vst.msk [vmem:[#allocation3] sm:$0xf] %vm2885_vm7, %v5913_v0  ;;  %vm2887_vm8 = vcmask 258048   ;;  %s6865_s9 = sld [smem:[#allocation46_spill]] }
 0x1cb   : > { %4700 = vmatmul.mubr.msk.bf16.vlgmr.msra.gmra.mrb[0].mxu0 %vm1181_vm1, %v5251_v4  ;;  %v5252_v14 = vld [vmem:[%s6855_s7 + $0x8] sm:$0x1f]   ;;  %v5253_v15 = vld [vmem:[%s6855_s7] sm:$0x1f]   ;;  %v5267_v4 = vld [vmem:[#allocation8 + $0x50] sm:$0xff]   ;;  %vm3368_vm9 = vcmask 1041408  }
 0x1cc   : > { %4711 = vmatprep.mubr.msk.bf16.mxu0 %vm5914_vm0, %v5913_v0  ;;  %v4420_v39 = vld [vmem:[%s6856_s1] ss:$0 sm:$0xff]  ;;  %vm3369_vm10 = vcmask 1042432   ;;  %vm3364_vm11 = vcmask 39936   ;;  %s6866_s16 = sld [smem:[#allocation51_spill]]  ;;  %s6867_s4 = sld [smem:[#allocation49_spill]] }
 0x1cd   : > { %v1473_v49 = vld [vmem:[#allocation2] sm:$0xff]  ;;  %s6868_s1 = sld [smem:[#allocation50_spill]]  ;;  %p1163_p11 = scmp.lt.s32.totalorder %s6102_s2, 1 }
 0x1cf   : > { %s6863_s3 = smov %s6862_s28  ;;  %s6876_s2 = smov (!%p1163_p11, %s6102_s2), 1 }
 0x29e   : > { %v1219_v5 = vpop.f32.mrb[0].mxu0 }
 0x29f   : > { %v1226_v6 = vmul.f32 0.2, %v1219_v5  ;;  %v4701_v7 = vpop.f32.mrb[1].mxu0 }
 0x2a0   : > { %v1222_v8 = vpop.f32.mrb[2].mxu0  ;;  %v5268_v7 = vld [vmem:[#allocation8 + $0x48] sm:$0xff]  }
 0x2a1   : > { %v1227_v9 = vmul.f32 0.2, %v1222_v8  ;;  %v4702_v10 = vpop.f32.mrb[3].mxu0  ;;  %v6419_v11 = vsub.f32 %v6404_v1, %v1226_v6  ;;  %v5269_v8 = vld [vmem:[#allocation8 + $0x58] sm:$0xff]  }
 0x2a3   : > { %v6422_v12 = vsub.f32 %v6406_v2, %v1227_v9 }
 0x2a5   : > { %v1230_v13 = vpack.c.bf16 %v6422_v12, %v6419_v11 }
 0x2a7   : > { %4704 = vmatpush3.bf16.msra.mxu1 %v1230_v13  ;;  %4710 = vmatpush3.bf16.msra.mxu0 %v1230_v13 }
 0x2a8   : > { %4715 = vmatprep.subr.bf16.mxu0 %v5913_v0  ;;  %4731 = vmatprep.subr.bf16.mxu1 %v5913_v0 }
 0x2aa   : > { %4712 = vmatmul.mubr.msk.bf16.vlgmr.msra.gmra.mrb[4].mxu0 %vm1181_vm1, %v5252_v14  ;;  %4706 = vmatmul.mubr.msk.bf16.vlgmr.msra.gmra.mrb[0].mxu1 %vm1181_vm1, %v5253_v15  ;;  %v5270_v15 = vld [vmem:[#allocation8 + $0x60] sm:$0xff]  }
 0x2ab   : > { %4716 = vmatpush3.bf16.msra.mxu0 %v5254_v16  ;;  %4719 = vmatprep.mubr.msk.bf16.mxu0 %vm5914_vm0, %v5913_v0  ;;  %v5271_v16 = vld [vmem:[#allocation8 + $0x70] sm:$0xff]  }
 0x2ac   : > { %4717 = vmatprep.subr.bf16.mxu0 %v5913_v0  ;;  %4735 = vmatprep.mubr.msk.bf16.mxu1 %vm5914_vm0, %v5913_v0 }
 0x2ad   : > { %4732 = vmatpush3.bf16.msra.mxu1 %v5258_v30 }
 0x2ae   : > { %4733 = vmatprep.subr.bf16.mxu1 %v5913_v0 }
 0x2af   : > { %4718 = vmatpush3.bf16.msra.mxu0 %v5255_v17 }
 0x2b0   : > { %4723 = vmatprep.subr.bf16.mxu0 %v5913_v0 }
 0x2b1   : > { %4734 = vmatpush3.bf16.msra.mxu1 %v5260_v32 }
 0x2b2   : > { %4747 = vmatprep.subr.bf16.mxu1 %v5913_v0 }
 0x37d   : > { %v1332_v18 = vpop.f32.mrb[4].mxu0  ;;  %v1275_v19 = vpop.f32.mrb[0].mxu1 }
 0x37e   : > { %v4713_v20 = vpop.f32.mrb[5].mxu0  ;;  %v4707_v21 = vpop.f32.mrb[1].mxu1 }
 0x37f   : > { %v1335_v22 = vpop.f32.mrb[6].mxu0  ;;  %v1278_v24 = vpop.f32.mrb[2].mxu1  ;;  %v5273_v20 = vld [vmem:[#allocation8 + $0x78] sm:$0xff]  }
 0x380   : > { %v1339_v25 = vpack.c.bf16 %v1335_v22, %v1332_v18  ;;  %v4714_v26 = vpop.f32.mrb[7].mxu0  ;;  %v1282_v27 = vpack.c.bf16 %v1278_v24, %v1275_v19  ;;  %v4708_v28 = vpop.f32.mrb[3].mxu1  ;;  %v5272_v19 = vld [vmem:[#allocation8 + $0x68] sm:$0xff]  }
 0x381   : > { %v5275_v28 = vld [vmem:[#allocation8 + $0x88] sm:$0xff]  }
 0x382   : > { %4720 = vmatmul.mubr.msk.bf16.vlgmr.msra.gmra.mrb[8].mxu0 %vm1357_vm2, %v1339_v25  ;;  %v5274_v25 = vld [vmem:[#allocation8 + $0x80] sm:$0xff]  }
 0x383   : > { %4724 = vmatpush3.bf16.msra.mxu0 %v5256_v23  ;;  %4727 = vmatprep.mubr.msk.bf16.mxu0 %vm5914_vm0, %v5913_v0 }
 0x384   : > { %4725 = vmatprep.subr.bf16.mxu0 %v5913_v0 }
 0x387   : > { %4726 = vmatpush3.bf16.msra.mxu0 %v5257_v29 }
 0x388   : > { %4739 = vmatprep.subr.bf16.mxu0 %v5913_v0 }
 0x38a   : > { %4728 = vmatmul.mubr.msk.bf16.vlgmr.msra.gmra.mrb[12].mxu0 %vm1357_vm2, %v1282_v27 }
 0x38b   : > { %4743 = vmatprep.mubr.msk.bf16.mxu0 %vm5914_vm0, %v5913_v0  ;;  %4740 = vmatpush3.bf16.msra.mxu0 %v5259_v31 }
 0x38c   : > { %4741 = vmatprep.subr.bf16.mxu0 %v5913_v0 }
 0x38f   : > { %4742 = vmatpush3.bf16.msra.mxu0 %v5261_v33 }
 0x390   : > { %4755 = vmatprep.subr.bf16.mxu0 %v5913_v0 }
 0x455   : > { %v1395_v34 = vpop.f32.mrb[8].mxu0 }
 0x456   : > { %v4721_v35 = vpop.f32.mrb[9].mxu0 }
 0x457   : > { %v1398_v36 = vpop.f32.mrb[10].mxu0 }
 0x458   : > { %v4722_v37 = vpop.f32.mrb[11].mxu0 }
 0x45d   : > { %v1451_v38 = vpop.f32.mrb[12].mxu0 }
 0x45e   : > { %v1452_v40 = vadd.f32 %v1451_v38, %v1395_v34  ;;  %v4729_v41 = vpop.f32.mrb[13].mxu0 }
 0x45f   : > { %v1454_v42 = vpop.f32.mrb[14].mxu0 }
 0x460   : > { %v1465_v43 = vadd.f32 %v4420_v39, %v1452_v40  ;;  %v1455_v44 = vadd.f32 %v1454_v42, %v1398_v36  ;;  %v4730_v45 = vpop.f32.mrb[15].mxu0 }
 0x462   : > { %5327 = vtanh.f32 %v1465_v43  ;;  %v1466_v46 = vadd.f32 %v4420_v39, %v1455_v44 }
 0x464   : > { %5329 = vtanh.f32 %v1466_v46 }
 0x46c   : > { %v6453_v47 = vpop.eup %5327 }
 0x46d   : > { %1470 = vst.msk [vmem:[#allocation2 + $0x8] sm:$0xff] %vm1357_vm2, %v6453_v47 }
 0x46e   : > { %v6457_v48 = vpop.eup %5329 }
 0x46f   : > { %1472 = vst.msk [vmem:[#allocation2 + $0x10] sm:$0x1] %vm1471_vm3, %v6457_v48 }
 0x474   : > { %v1480_v52 = vld [vmem:[#allocation2 + $0x1] sm:$0xff]  ;;  %v1481_v53 = vld [vmem:[#allocation2 + $0x9] sm:$0x1]  ;;  %v1601_v60 = vld [vmem:[#allocation2 + $0xa] sm:$0x1] }
 0x475   : > { %v1474_v54 = vld [vmem:[#allocation2 + $0x8] sm:$0x1]  ;;  %v1482_v55 = vpack.c.bf16 %v1481_v53, %v1480_v52  ;;  %v1667_v62 = vld [vmem:[#allocation2 + $0xb] sm:$0x1]  ;;  %v1733_v10 = vld [vmem:[#allocation2 + $0xc] sm:$0x1] }
 0x476   : > { %v1475_v56 = vpack.c.bf16 %v1474_v54, %v1473_v49  ;;  %v1600_v59 = vld [vmem:[#allocation2 + $0x2] sm:$0xff]  ;;  %v1799_v14 = vld [vmem:[#allocation2 + $0xd] sm:$0x1]  ;;  %v1865_v22 = vld [vmem:[#allocation2 + $0xe] sm:$0x1] }
 0x477   : > { %4736 = vmatmul.mubr.msk.bf16.vlgmr.msra.gmra.mrb[4].mxu1 %vm1357_vm2, %v1482_v55  ;;  %v1666_v61 = vld [vmem:[#allocation2 + $0x3] sm:$0xff]  ;;  %v1602_v5 = vpack.c.bf16 %v1601_v60, %v1600_v59  ;;  %v1931_v24 = vld [vmem:[#allocation2 + $0xf] sm:$0x1]  ;;  %v1997_v29 = vld [vmem:[#allocation2 + $0x10] sm:$0x1] }
 0x478   : > { %4744 = vmatmul.mubr.msk.bf16.vlgmr.msra.gmra.mrb[16].mxu0 %vm1357_vm2, %v1475_v56  ;;  %4748 = vmatpush3.bf16.msra.mxu1 %v5262_v50  ;;  %v1668_v6 = vpack.c.bf16 %v1667_v62, %v1666_v61  ;;  %v1732_v9 = vld [vmem:[#allocation2 + $0x4] sm:$0xff] }
 0x479   : > { %4756 = vmatpush3.bf16.msra.mxu0 %v5263_v51  ;;  %4749 = vmatprep.subr.bf16.mxu1 %v5913_v0  ;;  %v1798_v13 = vld [vmem:[#allocation2 + $0x5] sm:$0xff]  ;;  %v1734_v17 = vpack.c.bf16 %v1733_v10, %v1732_v9 }
 0x47a   : > { %4757 = vmatprep.subr.bf16.mxu0 %v5913_v0  ;;  %4751 = vmatprep.mubr.msk.bf16.mxu1 %vm5914_vm0, %v5913_v0  ;;  %v1800_v18 = vpack.c.bf16 %v1799_v14, %v1798_v13  ;;  %v1864_v21 = vld [vmem:[#allocation2 + $0x6] sm:$0xff] }
 0x47b   : > { %4759 = vmatprep.mubr.msk.bf16.mxu0 %vm5914_vm0, %v5913_v0  ;;  %v1930_v23 = vld [vmem:[#allocation2 + $0x7] sm:$0xff]  ;;  %v1866_v26 = vpack.c.bf16 %v1865_v22, %v1864_v21 }
 0x47c   : > { %4750 = vmatpush3.bf16.msra.mxu1 %v5264_v57  ;;  %v1932_v27 = vpack.c.bf16 %v1931_v24, %v1930_v23  ;;  %v1996_v30 = vld [vmem:[#allocation2 + $0x8] sm:$0xff]  ;;  %v4448_v23 = vld [vmem:[%s6857_s0] ss:$0 sm:$0xff]  ;;  %s6869_s0 = sld [smem:[#allocation52_spill]] }
 0x47d   : > { %4758 = vmatpush3.bf16.msra.mxu0 %v5265_v58  ;;  %4763 = vmatprep.subr.bf16.mxu1 %v5913_v0  ;;  %v1998_v31 = vpack.c.bf16 %v1997_v29, %v1996_v30 }
 0x47e   : > { %4771 = vmatprep.subr.bf16.mxu0 %v5913_v0 }
 0x47f   : > { %4752 = vmatmul.mubr.msk.bf16.vlgmr.msra.gmra.mrb[8].mxu1 %vm1357_vm2, %v1602_v5 }
 0x480   : > { %4760 = vmatmul.mubr.msk.bf16.vlgmr.msra.gmra.mrb[20].mxu0 %vm1357_vm2, %v1668_v6  ;;  %4764 = vmatpush3.bf16.msra.mxu1 %v5266_v63 }
 0x481   : > { %4772 = vmatpush3.bf16.msra.mxu0 %v5267_v4  ;;  %4765 = vmatprep.subr.bf16.mxu1 %v5913_v0 }
 0x482   : > { %4773 = vmatprep.subr.bf16.mxu0 %v5913_v0  ;;  %4767 = vmatprep.mubr.msk.bf16.mxu1 %vm5914_vm0, %v5913_v0 }
 0x483   : > { %4775 = vmatprep.mubr.msk.bf16.mxu0 %vm5914_vm0, %v5913_v0 }
 0x484   : > { %4766 = vmatpush3.bf16.msra.mxu1 %v5268_v7 }
 0x485   : > { %4774 = vmatpush3.bf16.msra.mxu0 %v5269_v8  ;;  %4779 = vmatprep.subr.bf16.mxu1 %v5913_v0 }
 0x486   : > { %4787 = vmatprep.subr.bf16.mxu0 %v5913_v0 }
 0x487   : > { %4768 = vmatmul.mubr.msk.bf16.vlgmr.msra.gmra.mrb[12].mxu1 %vm1357_vm2, %v1734_v17 }
 0x488   : > { %4776 = vmatmul.mubr.msk.bf16.vlgmr.msra.gmra.mrb[24].mxu0 %vm1357_vm2, %v1800_v18  ;;  %4780 = vmatpush3.bf16.msra.mxu1 %v5270_v15 }
 0x489   : > { %4788 = vmatpush3.bf16.msra.mxu0 %v5271_v16  ;;  %4781 = vmatprep.subr.bf16.mxu1 %v5913_v0 }
 0x48a   : > { %4789 = vmatprep.subr.bf16.mxu0 %v5913_v0  ;;  %4783 = vmatprep.mubr.msk.bf16.mxu1 %vm5914_vm0, %v5913_v0 }
 0x48b   : > { %4791 = vmatprep.mubr.msk.bf16.mxu0 %vm5914_vm0, %v5913_v0 }
 0x48c   : > { %4782 = vmatpush3.bf16.msra.mxu1 %v5272_v19 }
 0x48d   : > { %4790 = vmatpush3.bf16.msra.mxu0 %v5273_v20  ;;  %4795 = vmatprep.subr.bf16.mxu1 %v5913_v0 }
 0x48e   : > { %4803 = vmatprep.subr.bf16.mxu0 %v5913_v0 }
 0x48f   : > { %4784 = vmatmul.mubr.msk.bf16.vlgmr.msra.gmra.mrb[16].mxu1 %vm1357_vm2, %v1866_v26 }
 0x490   : > { %4792 = vmatmul.mubr.msk.bf16.vlgmr.msra.gmra.mrb[28].mxu0 %vm1357_vm2, %v1932_v27  ;;  %4796 = vmatpush3.bf16.msra.mxu1 %v5274_v25 }
 0x491   : > { %4799 = vmatprep.mubr.msk.bf16.mxu1 %vm5914_vm0, %v5913_v0  ;;  %4797 = vmatprep.subr.bf16.mxu1 %v5913_v0 }
 0x492   : > { %4807 = vmatprep.mubr.msk.bf16.mxu0 %vm5914_vm0, %v5913_v0 }
 0x494   : > { %4798 = vmatpush3.bf16.msra.mxu1 %v5275_v28 }
 0x495   : > { %4811 = vmatprep.subr.bf16.mxu1 %v5913_v0 }
 0x497   : > { %4800 = vmatmul.mubr.msk.bf16.vlgmr.msra.gmra.mrb[20].mxu1 %vm1357_vm2, %v1998_v31 }
 0x498   : > { %4815 = vmatprep.mubr.msk.bf16.mxu1 %vm5914_vm0, %v5913_v0 }
 0x54a   : > { %v1537_v32 = vpop.f32.mrb[4].mxu1 }
 0x54b   : > { %v1593_v33 = vpop.f32.mrb[16].mxu0  ;;  %v4737_v35 = vpop.f32.mrb[5].mxu1 }
 0x54c   : > { %v1594_v34 = vadd.f32 %v1593_v33, %v1537_v32  ;;  %v4745_v36 = vpop.f32.mrb[17].mxu0  ;;  %v1540_v37 = vpop.f32.mrb[6].mxu1 }
 0x54d   : > { %v1596_v38 = vpop.f32.mrb[18].mxu0  ;;  %v4738_v40 = vpop.f32.mrb[7].mxu1 }
 0x54e   : > { %v1597_v39 = vadd.f32 %v1596_v38, %v1540_v37  ;;  %v4746_v41 = vpop.f32.mrb[19].mxu0 }
 0x552   : > { %v1657_v42 = vpop.f32.mrb[8].mxu1 }
 0x553   : > { %v1723_v43 = vpop.f32.mrb[20].mxu0  ;;  %v1664_v44 = vadd.f32 %v1657_v42, %v1594_v34  ;;  %v4753_v45 = vpop.f32.mrb[9].mxu1 }
 0x554   : > { %v4761_v46 = vpop.f32.mrb[21].mxu0  ;;  %v1660_v49 = vpop.f32.mrb[10].mxu1 }
 0x555   : > { %v1726_v50 = vpop.f32.mrb[22].mxu0  ;;  %v1730_v51 = vadd.f32 %v1723_v43, %v1664_v44  ;;  %v1665_v52 = vadd.f32 %v1660_v49, %v1597_v39  ;;  %v4754_v53 = vpop.f32.mrb[11].mxu1  ;;  %v5276_v46 = vld [vmem:[#allocation9] sm:$0xff]   ;;  %v5278_v49 = vld [vmem:[#allocation9 + $0x8] sm:$0xff]  }
 0x556   : > { %v4762_v54 = vpop.f32.mrb[23].mxu0  ;;  %4804 = vmatpush3.bf16.msra.mxu0 %v5276_v46 }
 0x557   : > { %v1731_v55 = vadd.f32 %v1726_v50, %v1665_v52  ;;  %v5279_v50 = vld [vmem:[#allocation9 + $0x18] sm:$0xff]   ;;  %4805 = vmatprep.subr.bf16.mxu0 %v5913_v0 }
 0x55a   : > { %v1789_v56 = vpop.f32.mrb[12].mxu1  ;;  %4806 = vmatpush3.bf16.msra.mxu0 %v5278_v49 }
 0x55b   : > { %v1855_v57 = vpop.f32.mrb[24].mxu0  ;;  %v1796_v58 = vadd.f32 %v1789_v56, %v1730_v51  ;;  %v4769_v59 = vpop.f32.mrb[13].mxu1  ;;  %4819 = vmatprep.subr.bf16.mxu0 %v5913_v0 }
 0x55c   : > { %v4777_v60 = vpop.f32.mrb[25].mxu0  ;;  %v1792_v61 = vpop.f32.mrb[14].mxu1  ;;  %v6514_v59 = vld [vmem:[%s6858_s17] ss:$0 sm:$0xff]  ;;  %s6870_s17 = sld [smem:[#allocation53_spill]] }
 0x55d   : > { %v1858_v62 = vpop.f32.mrb[26].mxu0  ;;  %v1862_v63 = vadd.f32 %v1855_v57, %v1796_v58  ;;  %v1797_v4 = vadd.f32 %v1792_v61, %v1731_v55  ;;  %v4770_v5 = vpop.f32.mrb[15].mxu1 }
 0x55e   : > { %v4778_v6 = vpop.f32.mrb[27].mxu0 }
 0x55f   : > { %v1863_v7 = vadd.f32 %v1858_v62, %v1797_v4 }
 0x562   : > { %v1921_v8 = vpop.f32.mrb[16].mxu1 }
 0x563   : > { %v1987_v9 = vpop.f32.mrb[28].mxu0  ;;  %v1928_v10 = vadd.f32 %v1921_v8, %v1862_v63  ;;  %v4785_v13 = vpop.f32.mrb[17].mxu1  ;;  %v6518_v63 = vld [vmem:[%s6859_s10] ss:$0 sm:$0xff]  ;;  %v4451_v8 = vld [vmem:[#allocation11] ss:$0 sm:$0xff] }
 0x564   : > { %v4793_v14 = vpop.f32.mrb[29].mxu0  ;;  %v1924_v15 = vpop.f32.mrb[18].mxu1  ;;  %s4572_s10 = sshll.u32 %s6876_s2, 4 }
 0x565   : > { %v1990_v16 = vpop.f32.mrb[30].mxu0  ;;  %v1994_v17 = vadd.f32 %v1987_v9, %v1928_v10  ;;  %v1929_v18 = vadd.f32 %v1924_v15, %v1863_v7  ;;  %v4786_v19 = vpop.f32.mrb[19].mxu1 }
 0x566   : > { %v4794_v20 = vpop.f32.mrb[31].mxu0 }
 0x567   : > { %v1995_v21 = vadd.f32 %v1990_v16, %v1929_v18 }
 0x56a   : > { %v2053_v22 = vpop.f32.mrb[20].mxu1 }
 0x56b   : > { %v2060_v24 = vadd.f32 %v2053_v22, %v1994_v17  ;;  %v4801_v25 = vpop.f32.mrb[21].mxu1 }
 0x56c   : > { %v2056_v26 = vpop.f32.mrb[22].mxu1 }
 0x56d   : > { %v2069_v27 = vadd.f32 %v4448_v23, %v2060_v24  ;;  %v2061_v28 = vadd.f32 %v2056_v26, %v1995_v21  ;;  %v4802_v29 = vpop.f32.mrb[23].mxu1 }
 0x56f   : > { %5331 = vtanh.f32 %v2069_v27  ;;  %v2070_v30 = vadd.f32 %v4448_v23, %v2061_v28  ;;  %v5915_v23 = vmov 65535  }
 0x570   : > { %v2266_v24 = vsel %vm2264_vm4, 4294967295, %v5915_v23 }
 0x571   : > { %5333 = vtanh.f32 %v2070_v30  ;;  %v2267_v28 = vsel %vm2265_vm5, %v2266_v24, 0 }
 0x579   : > { %v5332_v31 = vpop.eup %5331 }
 0x57a   : > { %v2073_v32 = vadd.f32 %v5332_v31, %v6453_v47 }
 0x57b   : > { %v5334_v33 = vpop.eup %5333 }
 0x57c   : > { %v2075_v34 = vsel %vm1357_vm2, %v2073_v32, 0.0  ;;  %v2074_v35 = vadd.f32 %v5334_v33, %v6457_v48  ;;  %v5277_v48 = vld [vmem:[#allocation9 + $0x10] sm:$0xff]  }
 0x57d   : > { %2076 = vadd.xlane.f32.xlu0 %v2075_v34  ;;  %4812 = vmatpush3.bf16.msra.mxu1 %v5277_v48  ;;  %v5281_v34 = vld [vmem:[%s6860_s15] sm:$0xff]  }
 0x57e   : > { %v2078_v36 = vsel %vm1471_vm3, %v2074_v35, 0.0  ;;  %4813 = vmatprep.subr.bf16.mxu1 %v5913_v0 }
 0x581   : > { %2079 = vadd.xlane.f32.xlu0 %v2078_v36  ;;  %4814 = vmatpush3.bf16.msra.mxu1 %v5279_v50  ;;  %v5282_v36 = vld [vmem:[%s6861_s22] sm:$0xff]   ;;  %s1167_s22 = scalar_lea.vmem %s6870_s17, %s4572_s10 }
 0x582   : > { %4825 = vmatprep.subr.bf16.mxu1 %v5913_v0 }
 0x60a   : > { %v2077_v37 = vpop.xlane.xlu0 %2076 }
 0x60b   : > { %v2082_v38 = vmul.f32 0.03125, %v2077_v37 }
 0x60d   : > { %v2084_v39 = vsub.f32 %v2073_v32, %v2082_v38 }
 0x60e   : > { %v2080_v40 = vpop.xlane.xlu0 %2079 }
 0x60f   : > { %v2083_v41 = vmul.f32 0.03125, %v2080_v40  ;;  %v2086_v42 = vmul.f32 %v2084_v39, %v2084_v39 }
 0x611   : > { %v2085_v43 = vsub.f32 %v2074_v35, %v2083_v41  ;;  %v2088_v44 = vsel %vm1357_vm2, %v2086_v42, 0.0  ;;  %v5280_v35 = vld [vmem:[%s6860_s15 + $0x8] sm:$0xff]  }
 0x612   : > { %2089 = vadd.xlane.f32.xlu1 %v2088_v44 }
 0x613   : > { %v2087_v47 = vmul.f32 %v2085_v43, %v2085_v43 }
 0x615   : > { %v2091_v45 = vsel %vm1471_vm3, %v2087_v47, 0.0 }
 0x616   : > { %2092 = vadd.xlane.f32.xlu1 %v2091_v45 }
 0x69f   : > { %v2090_v51 = vpop.xlane.xlu1 %2089 }
 0x6a0   : > { %v2094_v52 = vmul.f32 0.03125, %v2090_v51 }
 0x6a2   : > { %v2096_v53 = vadd.f32 1e-05, %v2094_v52 }
 0x6a3   : > { %v2093_v54 = vpop.xlane.xlu1 %2092 }
 0x6a4   : > { %5335 = vrsqrt.f32 %v2096_v53  ;;  %v2095_v55 = vmul.f32 0.03125, %v2093_v54 }
 0x6a6   : > { %v2097_v56 = vadd.f32 1e-05, %v2095_v55  ;;  %v2452_v55 = vld [vmem:[%s6862_s28] sm:$0x7] }
 0x6a8   : > { %5337 = vrsqrt.f32 %v2097_v56  ;;  %v4467_v56 = vld [vmem:[%s6863_s3 + $0x4] sm:$0x7] }
 0x6ae   : > { %v5336_v57 = vpop.eup %5335 }
 0x6af   : > { %v2100_v58 = vmul.f32 %v5336_v57, %v2084_v39  ;;  %v5283_v57 = vld [vmem:[#allocation12 + $0x10] sm:$0xff]  }
 0x6b1   : > { %v2108_v61 = vmul.f32 %v6514_v59, %v2100_v58  ;;  %v5284_v58 = vld [vmem:[#allocation12] sm:$0xff]  }
 0x6b2   : > { %v5338_v60 = vpop.eup %5337 }
 0x6b3   : > { %v2101_v62 = vmul.f32 %v5338_v60, %v2085_v43  ;;  %v2116_v5 = vadd.f32 %v6518_v63, %v2108_v61 }
 0x6b5   : > { %v2109_v4 = vmul.f32 %v6514_v59, %v2101_v62 }
 0x6b7   : > { %v2117_v6 = vadd.f32 %v6518_v63, %v2109_v4 }
 0x6b9   : > { %v2118_v7 = vpack.c.bf16 %v2117_v6, %v2116_v5 }
 0x6bb   : > { %4808 = vmatmul.mubr.msk.bf16.vlgmr.msra.gmra.mrb[32].mxu0 %vm1357_vm2, %v2118_v7  ;;  %4816 = vmatmul.mubr.msk.bf16.vlgmr.msra.gmra.mrb[24].mxu1 %vm1357_vm2, %v2118_v7 }
 0x6bc   : > { %4821 = vmatprep.mubr.msk.bf16.mxu0 %vm5914_vm0, %v5913_v0  ;;  %4827 = vmatprep.mubr.msk.bf16.mxu1 %vm5914_vm0, %v5913_v0 }
 0x78e   : > { %v2179_v9 = vpop.f32.mrb[32].mxu0  ;;  %v2242_v10 = vpop.f32.mrb[24].mxu1 }
 0x78f   : > { %v2180_v13 = vadd.f32 %v4451_v8, %v2179_v9  ;;  %v2243_v14 = vadd.f32 %v4451_v8, %v2242_v10  ;;  %v4809_v15 = vpop.f32.mrb[33].mxu0  ;;  %v4817_v16 = vpop.f32.mrb[25].mxu1 }
 0x790   : > { %v2182_v17 = vpop.f32.mrb[34].mxu0  ;;  %v2245_v18 = vpop.f32.mrb[26].mxu1  ;;  %v5287_v15 = vld [vmem:[#allocation12 + $0x20] sm:$0xff]   ;;  %v5288_v16 = vld [vmem:[#allocation12 + $0x28] sm:$0xff]  }
 0x791   : > { %5339 = vtanh.f32 %v2180_v13  ;;  %v2183_v19 = vadd.f32 %v4451_v8, %v2182_v17  ;;  %v2246_v20 = vadd.f32 %v4451_v8, %v2245_v18  ;;  %v4810_v21 = vpop.f32.mrb[35].mxu0  ;;  %v4818_v22 = vpop.f32.mrb[27].mxu1  ;;  %v4475_v13 = vld [vmem:[%s6863_s3 + $0x8] sm:$0x7] }
 0x792   : > { %5341 = vtanh.f32 %v2243_v14  ;;  %v4480_v14 = vld [vmem:[%s6863_s3 + $0xc] sm:$0x7] }
 0x793   : > { %5343 = vtanh.f32 %v2183_v19 }
 0x794   : > { %5345 = vtanh.f32 %v2246_v20 }
 0x79b   : > { %v5340_v25 = vpop.eup %5339 }
 0x79c   : > { %v5342_v26 = vpop.eup %5341 }
 0x79d   : > { %v5344_v27 = vpop.eup %5343 }
 0x79e   : > { %v5346_v29 = vpop.eup %5345  ;;  %v2190_v30 = vpack.c.bf16 %v5344_v27, %v5340_v25 }
 0x79f   : > { %v2254_v31 = vpack.c.bf16 %v5346_v29, %v5342_v26 }
 0x7a0   : > { %v2321_v32 = vand.u32 %v2267_v28, %v2190_v30 }
 0x7a1   : > { %v2269_v33 = vand.u32 %v2267_v28, %v2254_v31  ;;  %v5289_v28 = vld [vmem:[#allocation12 + $0x30] sm:$0xff]  }
 0x7a2   : > { %4826 = vmatpush3.bf16.msra.mxu1 %v2321_v32 }
 0x7a3   : > { %4820 = vmatpush3.bf16.msra.mxu0 %v2269_v33  ;;  %4837 = vmatprep.subr.bf16.mxu1 %v5913_v0  ;;  %v5290_v33 = vld [vmem:[#allocation12 + $0x38] sm:$0xff]  }
 0x7a4   : > { %4831 = vmatprep.subr.bf16.mxu0 %v5913_v0 }
 0x7a5   : > { %4828 = vmatmul.mubr.msk.bf16.vlgmr.msra.gmra.mrb[28].mxu1 %vm2260_vm6, %v5281_v34 }
 0x7a6   : > { %4822 = vmatmul.mubr.msk.bf16.vlgmr.msra.gmra.mrb[36].mxu0 %vm2260_vm6, %v5280_v35  ;;  %4839 = vmatprep.mubr.msk.bf16.mxu1 %vm5914_vm0, %v5913_v0 }
 0x7a7   : > { %4832 = vmatpush3.bf16.msra.mxu0 %v6410_v3  ;;  %4833 = vmatprep.mubr.msk.bf16.mxu0 %vm5914_vm0, %v5913_v0 }
 0x7a8   : > { %4843 = vmatprep.subr.bf16.mxu0 %v5913_v0 }
 0x7ae   : > { %4834 = vmatmul.mubr.msk.bf16.vlgmr.msra.gmra.mrb[40].mxu0 %vm1181_vm1, %v5282_v36 }
 0x7af   : > { %4845 = vmatprep.mubr.msk.bf16.mxu0 %vm5914_vm0, %v5913_v0 }
 0x878   : > { %v2357_v37 = vpop.f32.mrb[28].mxu1 }
 0x879   : > { %v2305_v38 = vpop.f32.mrb[36].mxu0  ;;  %v4829_v39 = vpop.f32.mrb[29].mxu1 }
 0x87a   : > { %v6544_v40 = vadd.f32 %v2357_v37, %v2305_v38  ;;  %v4823_v41 = vpop.f32.mrb[37].mxu0  ;;  %v2360_v42 = vpop.f32.mrb[30].mxu1  ;;  %v5291_v39 = vld [vmem:[%s6864_s11 + $0x10] sm:$0xff]  }
 0x87b   : > { %v2308_v3 = vpop.f32.mrb[38].mxu0  ;;  %v4830_v43 = vpop.f32.mrb[31].mxu1  ;;  %v5292_v41 = vld [vmem:[%s6864_s11] sm:$0xff]  }
 0x87c   : > { %v6546_v44 = vadd.f32 %v2360_v42, %v2308_v3  ;;  %v4824_v47 = vpop.f32.mrb[39].mxu0  ;;  %v5293_v42 = vld [vmem:[%s6864_s11 + $0x18] sm:$0xff]   ;;  %v5294_v3 = vld [vmem:[%s6864_s11 + $0x8] sm:$0xff]  }
 0x881   : > { %v2440_v45 = vpop.f32.mrb[40].mxu0 }
 0x882   : > { %v2447_v46 = vmul.f32 0.14285715, %v2440_v45  ;;  %v4835_v48 = vpop.f32.mrb[41].mxu0 }
 0x883   : > { %v2443_v49 = vpop.f32.mrb[42].mxu0 }
 0x884   : > { %v2448_v50 = vmul.f32 0.14285715, %v2443_v49  ;;  %v4836_v51 = vpop.f32.mrb[43].mxu0  ;;  %v6549_v52 = vsub.f32 %v6404_v1, %v2447_v46  ;;  %v5285_v1 = vld [vmem:[#allocation12 + $0x18] sm:$0xff]  }
 0x886   : > { %v6552_v53 = vsub.f32 %v6406_v2, %v2448_v50  ;;  %v5286_v2 = vld [vmem:[#allocation12 + $0x8] sm:$0xff]   ;;  %v4485_v50 = vld [vmem:[#allocation14] ss:$0 sm:$0xff] }
 0x888   : > { %v2451_v54 = vpack.c.bf16 %v6552_v53, %v6549_v52 }
 0x88a   : > { %4838 = vmatpush3.bf16.msra.mxu1 %v2451_v54  ;;  %4844 = vmatpush3.bf16.msra.mxu0 %v2451_v54 }
 0x88b   : > { %4849 = vmatprep.subr.bf16.mxu1 %v5913_v0  ;;  %4857 = vmatprep.subr.bf16.mxu0 %v5913_v0 }
 0x88d   : > { %4840 = vmatmul.mubr.msk.bf16.vlgmr.msra.gmra.mrb[32].mxu1 %vm1181_vm1, %v2452_v55  ;;  %4846 = vmatmul.mubr.msk.bf16.vlgmr.msra.gmra.mrb[44].mxu0 %vm1181_vm1, %v4467_v56 }
 0x88e   : > { %4850 = vmatpush3.bf16.msra.mxu1 %v5283_v57  ;;  %4858 = vmatpush3.bf16.msra.mxu0 %v5284_v58 }
 0x88f   : > { %4851 = vmatprep.subr.bf16.mxu1 %v5913_v0  ;;  %4859 = vmatprep.subr.bf16.mxu0 %v5913_v0 }
 0x890   : > { %4853 = vmatprep.mubr.msk.bf16.mxu1 %vm5914_vm0, %v5913_v0  ;;  %4861 = vmatprep.mubr.msk.bf16.mxu0 %vm5914_vm0, %v5913_v0 }
 0x892   : > { %4852 = vmatpush3.bf16.msra.mxu1 %v5285_v1  ;;  %4860 = vmatpush3.bf16.msra.mxu0 %v5286_v2  ;;  %v5295_v1 = vld [vmem:[%s6864_s11 + $0x20] sm:$0xff]  }
 0x893   : > { %4865 = vmatprep.subr.bf16.mxu1 %v5913_v0  ;;  %4871 = vmatprep.subr.bf16.mxu0 %v5913_v0 }
 0x960   : > { %v2490_v60 = vpop.f32.mrb[32].mxu1  ;;  %v2540_v61 = vpop.f32.mrb[44].mxu0 }
 0x961   : > { %v2496_v62 = vpack.c.bf16 %v2490_v60, %v2490_v60  ;;  %v2546_v4 = vpack.c.bf16 %v2540_v61, %v2540_v61  ;;  %v4847_v5 = vpop.f32.mrb[45].mxu0  ;;  %v4841_v6 = vpop.f32.mrb[33].mxu1  ;;  %v5296_v61 = vld [vmem:[%s6864_s11 + $0x30] sm:$0xff]  }
 0x962   : > { %v2543_v7 = vpop.f32.mrb[46].mxu0  ;;  %v2493_v8 = vpop.f32.mrb[34].mxu1  ;;  %v5297_v5 = vld [vmem:[%s6864_s11 + $0x28] sm:$0xff]   ;;  %v5298_v6 = vld [vmem:[%s6864_s11 + $0x38] sm:$0xff]  }
 0x963   : > { %v4848_v9 = vpop.f32.mrb[47].mxu0  ;;  %4854 = vmatmul.mubr.msk.bf16.vlgmr.msra.gmra.mrb[36].mxu1 %vm1357_vm2, %v2546_v4  ;;  %4862 = vmatmul.mubr.msk.bf16.vlgmr.msra.gmra.mrb[48].mxu0 %vm1357_vm2, %v2496_v62  ;;  %v4842_v10 = vpop.f32.mrb[35].mxu1 }
 0x964   : > { %4866 = vmatpush3.bf16.msra.mxu1 %v2451_v54  ;;  %4867 = vmatprep.mubr.msk.bf16.mxu1 %vm5914_vm0, %v5913_v0  ;;  %v5299_v9 = vld [vmem:[%s6864_s11 + $0x40] sm:$0xff]  }
 0x965   : > { %4879 = vmatprep.subr.bf16.mxu1 %v5913_v0  ;;  %4875 = vmatprep.mubr.msk.bf16.mxu0 %vm5914_vm0, %v5913_v0 }
 0x966   : > { %4872 = vmatpush3.bf16.msra.mxu0 %v5287_v15 }
 0x967   : > { %4873 = vmatprep.subr.bf16.mxu0 %v5913_v0 }
 0x96a   : > { %4874 = vmatpush3.bf16.msra.mxu0 %v5288_v16 }
 0x96b   : > { %4868 = vmatmul.mubr.msk.bf16.vlgmr.msra.gmra.mrb[40].mxu1 %vm1181_vm1, %v4475_v13  ;;  %4885 = vmatprep.subr.bf16.mxu0 %v5913_v0 }
 0x96c   : > { %4880 = vmatpush3.bf16.msra.mxu1 %v2451_v54  ;;  %4881 = vmatprep.mubr.msk.bf16.mxu1 %vm5914_vm0, %v5913_v0 }
 0x96d   : > { %4893 = vmatprep.subr.bf16.mxu1 %v5913_v0 }
 0x973   : > { %4882 = vmatmul.mubr.msk.bf16.vlgmr.msra.gmra.mrb[44].mxu1 %vm1181_vm1, %v4480_v14  ;;  %v5300_v14 = vld [vmem:[%s6864_s11 + $0x48] sm:$0xff]  }
 0x974   : > { %4897 = vmatprep.mubr.msk.bf16.mxu1 %vm5914_vm0, %v5913_v0  ;;  %4894 = vmatpush3.bf16.msra.mxu1 %v5291_v39 }
 0x975   : > { %4895 = vmatprep.subr.bf16.mxu1 %v5913_v0 }
 0x978   : > { %4896 = vmatpush3.bf16.msra.mxu1 %v5293_v42 }
 0x979   : > { %4909 = vmatprep.subr.bf16.mxu1 %v5913_v0 }
 0xa36   : > { %v2601_v17 = vpop.f32.mrb[36].mxu1  ;;  %v2656_v18 = vpop.f32.mrb[48].mxu0 }
 0xa37   : > { %v2657_v19 = vadd.f32 %v2656_v18, %v2601_v17  ;;  %v4855_v20 = vpop.f32.mrb[37].mxu1  ;;  %v4863_v21 = vpop.f32.mrb[49].mxu0 }
 0xa38   : > { %v2604_v22 = vpop.f32.mrb[38].mxu1  ;;  %v2659_v24 = vpop.f32.mrb[50].mxu0 }
 0xa39   : > { %v4856_v25 = vpop.f32.mrb[39].mxu1  ;;  %v4864_v26 = vpop.f32.mrb[51].mxu0 }
 0xa3e   : > { %v2701_v27 = vpop.f32.mrb[40].mxu1 }
 0xa3f   : > { %v2707_v29 = vpack.c.bf16 %v2701_v27, %v2701_v27  ;;  %v4869_v30 = vpop.f32.mrb[41].mxu1 }
 0xa40   : > { %v2704_v31 = vpop.f32.mrb[42].mxu1 }
 0xa41   : > { %v4870_v32 = vpop.f32.mrb[43].mxu1  ;;  %4876 = vmatmul.mubr.msk.bf16.vlgmr.msra.gmra.mrb[52].mxu0 %vm1357_vm2, %v2707_v29 }
 0xa42   : > { %4886 = vmatpush3.bf16.msra.mxu0 %v5289_v28  ;;  %4889 = vmatprep.mubr.msk.bf16.mxu0 %vm5914_vm0, %v5913_v0 }
 0xa43   : > { %4887 = vmatprep.subr.bf16.mxu0 %v5913_v0 }
 0xa46   : > { %v2808_v34 = vpop.f32.mrb[44].mxu1  ;;  %4888 = vmatpush3.bf16.msra.mxu0 %v5290_v33 }
 0xa47   : > { %v2814_v35 = vpack.c.bf16 %v2808_v34, %v2808_v34  ;;  %v4883_v36 = vpop.f32.mrb[45].mxu1  ;;  %4901 = vmatprep.subr.bf16.mxu0 %v5913_v0 }
 0xa48   : > { %v2811_v37 = vpop.f32.mrb[46].mxu1 }
 0xa49   : > { %v4884_v38 = vpop.f32.mrb[47].mxu1  ;;  %4890 = vmatmul.mubr.msk.bf16.vlgmr.msra.gmra.mrb[56].mxu0 %vm1357_vm2, %v2814_v35 }
 0xa4a   : > { %4905 = vmatprep.mubr.msk.bf16.mxu0 %vm5914_vm0, %v5913_v0  ;;  %4902 = vmatpush3.bf16.msra.mxu0 %v5292_v41  ;;  %v4517_v38 = vld [vmem:[#allocation15] ss:$0 sm:$0xff] }
 0xa4b   : > { %4903 = vmatprep.subr.bf16.mxu0 %v5913_v0 }
 0xa4e   : > { %4904 = vmatpush3.bf16.msra.mxu0 %v5294_v3 }
 0xa4f   : > { %4917 = vmatprep.subr.bf16.mxu0 %v5913_v0 }
 0xb14   : > { %v2762_v43 = vpop.f32.mrb[52].mxu0 }
 0xb15   : > { %v2768_v47 = vadd.f32 %v2762_v43, %v2657_v19  ;;  %v4877_v45 = vpop.f32.mrb[53].mxu0 }
 0xb16   : > { %v2765_v46 = vpop.f32.mrb[54].mxu0 }
 0xb17   : > { %v4878_v48 = vpop.f32.mrb[55].mxu0 }
 0xb18   : > { %v6640_v48 = vadd.f32 %v6544_v40, %v6419_v11  ;;  %v5301_v40 = vld [vmem:[#allocation17] sm:$0xff]  }
 0xb1c   : > { %v2869_v49 = vpop.f32.mrb[56].mxu0 }
 0xb1d   : > { %v2875_v51 = vadd.f32 %v2869_v49, %v2768_v47  ;;  %v4891_v54 = vpop.f32.mrb[57].mxu0  ;;  %v2366_v49 = vsel %vm1357_vm2, %v6640_v48, 0.0 }
 0xb1e   : > { %v2872_v55 = vpop.f32.mrb[58].mxu0 }
 0xb1f   : > { %v2883_v56 = vadd.f32 %v4485_v50, %v2875_v51  ;;  %v4892_v57 = vpop.f32.mrb[59].mxu0 }
 0xb20   : > { %v6647_v57 = vadd.f32 %v6546_v44, %v6422_v12 }
 0xb21   : > { %5347 = vtanh.f32 %v2883_v56 }
 0xb22   : > { %v2369_v11 = vsel %vm1357_vm2, %v6647_v57, 0.0 }
 0xb2b   : > { %v6605_v58 = vpop.eup %5347 }
 0xb2c   : > { %2888 = vst.msk [vmem:[#allocation3 + $0x4] sm:$0x1f] %vm2887_vm8, %v6605_v58 }
 0xb33   : > { %v2895_v2 = vld [vmem:[#allocation3 + $0x1] sm:$0x1f] }
 0xb34   : > { %v2889_v60 = vld [vmem:[#allocation3] sm:$0x1f]  ;;  %v2896_v62 = vpack.c.bf16 %v2895_v2, %v2895_v2 }
 0xb35   : > { %v2890_v4 = vpack.c.bf16 %v2889_v60, %v2889_v60  ;;  %v3012_v7 = vld [vmem:[#allocation3 + $0x2] sm:$0x1f] }
 0xb36   : > { %4898 = vmatmul.mubr.msk.bf16.vlgmr.msra.gmra.mrb[48].mxu1 %vm1357_vm2, %v2896_v62  ;;  %v3075_v8 = vld [vmem:[#allocation3 + $0x3] sm:$0x1f]  ;;  %v3013_v10 = vpack.c.bf16 %v3012_v7, %v3012_v7 }
 0xb37   : > { %4906 = vmatmul.mubr.msk.bf16.vlgmr.msra.gmra.mrb[60].mxu0 %vm1357_vm2, %v2890_v4  ;;  %4910 = vmatpush3.bf16.msra.mxu1 %v5295_v1  ;;  %v3076_v13 = vpack.c.bf16 %v3075_v8, %v3075_v8  ;;  %v3138_v15 = vld [vmem:[#allocation3 + $0x4] sm:$0x1f]  ;;  %v5303_v1 = vld [vmem:[#allocation17 + $0x8] sm:$0xff]  }
 0xb38   : > { %4918 = vmatpush3.bf16.msra.mxu0 %v5296_v61  ;;  %4911 = vmatprep.subr.bf16.mxu1 %v5913_v0  ;;  %v3139_v16 = vpack.c.bf16 %v3138_v15, %v3138_v15  ;;  %v5304_v2 = vld [vmem:[#allocation17 + $0x18] sm:$0xff]   ;;  %v6663_v7 = vld [vmem:[#allocation18] ss:$0 sm:$0xff] }
 0xb39   : > { %4919 = vmatprep.subr.bf16.mxu0 %v5913_v0  ;;  %4913 = vmatprep.mubr.msk.bf16.mxu1 %vm5914_vm0, %v5913_v0 }
 0xb3a   : > { %4921 = vmatprep.mubr.msk.bf16.mxu0 %vm5914_vm0, %v5913_v0 }
 0xb3b   : > { %4912 = vmatpush3.bf16.msra.mxu1 %v5297_v5 }
 0xb3c   : > { %4920 = vmatpush3.bf16.msra.mxu0 %v5298_v6  ;;  %4925 = vmatprep.subr.bf16.mxu1 %v5913_v0 }
 0xb3d   : > { %4933 = vmatprep.subr.bf16.mxu0 %v5913_v0 }
 0xb3e   : > { %4914 = vmatmul.mubr.msk.bf16.vlgmr.msra.gmra.mrb[52].mxu1 %vm1357_vm2, %v3013_v10 }
 0xb3f   : > { %4922 = vmatmul.mubr.msk.bf16.vlgmr.msra.gmra.mrb[64].mxu0 %vm1357_vm2, %v3076_v13  ;;  %4926 = vmatpush3.bf16.msra.mxu1 %v5299_v9 }
 0xb40   : > { %4929 = vmatprep.mubr.msk.bf16.mxu1 %vm5914_vm0, %v5913_v0  ;;  %4927 = vmatprep.subr.bf16.mxu1 %v5913_v0 }
 0xb41   : > { %4937 = vmatprep.mubr.msk.bf16.mxu0 %vm5914_vm0, %v5913_v0  ;;  %4934 = vmatpush3.bf16.msra.mxu0 %v5301_v40 }
 0xb42   : > { %4935 = vmatprep.subr.bf16.mxu0 %v5913_v0 }
 0xb43   : > { %4928 = vmatpush3.bf16.msra.mxu1 %v5300_v14 }
 0xb44   : > { %4941 = vmatprep.subr.bf16.mxu1 %v5913_v0 }
 0xb45   : > { %4936 = vmatpush3.bf16.msra.mxu0 %v5303_v1 }
 0xb46   : > { %4930 = vmatmul.mubr.msk.bf16.vlgmr.msra.gmra.mrb[56].mxu1 %vm1357_vm2, %v3139_v16  ;;  %4949 = vmatprep.subr.bf16.mxu0 %v5913_v0 }
 0xb47   : > { %4945 = vmatprep.mubr.msk.bf16.mxu1 %vm5914_vm0, %v5913_v0 }
 0xc09   : > { %v2951_v17 = vpop.f32.mrb[48].mxu1 }
 0xc0a   : > { %v3006_v18 = vpop.f32.mrb[60].mxu0  ;;  %v4899_v20 = vpop.f32.mrb[49].mxu1 }
 0xc0b   : > { %v3007_v19 = vadd.f32 %v3006_v18, %v2951_v17  ;;  %v4907_v21 = vpop.f32.mrb[61].mxu0  ;;  %v2954_v22 = vpop.f32.mrb[50].mxu1  ;;  %v3370_v20 = vsel %vm3368_vm9, 4294967295, %v5915_v23  ;;  %v5308_v23 = vld [vmem:[#allocation17 + $0x28] sm:$0xff]  }
 0xc0c   : > { %v3009_v24 = vpop.f32.mrb[62].mxu0  ;;  %v4900_v25 = vpop.f32.mrb[51].mxu1  ;;  %v6668_v22 = vsel %vm3369_vm10, %v3370_v20, 0 }
 0xc0d   : > { %v4908_v26 = vpop.f32.mrb[63].mxu0 }
 0xc11   : > { %v3068_v27 = vpop.f32.mrb[52].mxu1 }
 0xc12   : > { %v3131_v28 = vpop.f32.mrb[64].mxu0  ;;  %v3074_v29 = vadd.f32 %v3068_v27, %v3007_v19  ;;  %v4915_v30 = vpop.f32.mrb[53].mxu1 }
 0xc13   : > { %v4923_v31 = vpop.f32.mrb[65].mxu0  ;;  %v3071_v32 = vpop.f32.mrb[54].mxu1  ;;  %v5305_v30 = vld [vmem:[%s6865_s9 + $0x8] sm:$0xff]  }
 0xc14   : > { %v3134_v33 = vpop.f32.mrb[66].mxu0  ;;  %v3137_v34 = vadd.f32 %v3131_v28, %v3074_v29  ;;  %v4916_v35 = vpop.f32.mrb[55].mxu1  ;;  %v5306_v29 = vld [vmem:[%s6865_s9] sm:$0xff]   ;;  %v5309_v32 = vld [vmem:[#allocation17 + $0x30] sm:$0xff]  }
 0xc15   : > { %v4924_v36 = vpop.f32.mrb[67].mxu0  ;;  %v5307_v31 = vld [vmem:[#allocation17 + $0x20] sm:$0xff]   ;;  %v5310_v33 = vld [vmem:[#allocation17 + $0x38] sm:$0xff]  }
 0xc19   : > { %v3194_v37 = vpop.f32.mrb[56].mxu1 }
 0xc1a   : > { %v3200_v39 = vadd.f32 %v3194_v37, %v3137_v34  ;;  %v4931_v41 = vpop.f32.mrb[57].mxu1 }
 0xc1b   : > { %v3197_v42 = vpop.f32.mrb[58].mxu1 }
 0xc1c   : > { %v3208_v3 = vadd.f32 %v4517_v38, %v3200_v39  ;;  %v4932_v43 = vpop.f32.mrb[59].mxu1 }
 0xc1e   : > { %5349 = vtanh.f32 %v3208_v3 }
 0xc28   : > { %v5350_v47 = vpop.eup %5349 }
 0xc29   : > { %v3210_v45 = vadd.f32 %v5350_v47, %v6605_v58  ;;  %v5302_v58 = vld [vmem:[#allocation17 + $0x10] sm:$0xff]  }
 0xc2a   : > { %4942 = vmatpush3.bf16.msra.mxu1 %v5302_v58 }
 0xc2b   : > { %v3211_v46 = vsel %vm2887_vm8, %v3210_v45, 0.0  ;;  %4943 = vmatprep.subr.bf16.mxu1 %v5913_v0 }
 0xc2c   : > { %3212 = vadd.xlane.f32.xlu0 %v3211_v46 }
 0xc2e   : > { %4944 = vmatpush3.bf16.msra.mxu1 %v5304_v2  ;;  %v5311_v2 = vld [vmem:[%s6865_s9 + $0x10] sm:$0xff]  }
 0xc2f   : > { %4955 = vmatprep.subr.bf16.mxu1 %v5913_v0 }
 0xc30   : > { %2367 = vadd.xlane.f32.xlu0 %v2366_v49 }
 0xcb9   : > { %v3213_v50 = vpop.xlane.xlu0 %3212 }
 0xcba   : > { %v3214_v51 = vmul.f32 0.03125, %v3213_v50 }
 0xcbc   : > { %v3215_v54 = vsub.f32 %v3210_v45, %v3214_v51 }
 0xcbe   : > { %v3216_v55 = vmul.f32 %v3215_v54, %v3215_v54 }
 0xcc0   : > { %v3217_v56 = vsel %vm2887_vm8, %v3216_v55, 0.0 }
 0xcc1   : > { %3218 = vadd.xlane.f32.xlu1 %v3217_v56 }
 0xcc5   : > { %2370 = vadd.xlane.f32.xlu1 %v2369_v11 }
 0xd4e   : > { %v3219_v12 = vpop.xlane.xlu1 %3218 }
 0xd4f   : > { %v3220_v44 = vmul.f32 0.03125, %v3219_v12 }
 0xd51   : > { %v3221_v60 = vadd.f32 1e-05, %v3220_v44 }
 0xd53   : > { %5351 = vrsqrt.f32 %v3221_v60 }
 0xd5d   : > { %v5352_v61 = vpop.eup %5351 }
 0xd5e   : > { %v3223_v62 = vmul.f32 %v5352_v61, %v3215_v54  ;;  %v5312_v61 = vld [vmem:[%s6865_s9 + $0x18] sm:$0xff]  }
 0xd60   : > { %v3224_v4 = vmul.f32 %v6514_v59, %v3223_v62 }
 0xd62   : > { %v3225_v5 = vadd.f32 %v6518_v63, %v3224_v4 }
 0xd64   : > { %v3226_v6 = vpack.c.bf16 %v3225_v5, %v3225_v5 }
 0xd66   : > { %4938 = vmatmul.mubr.msk.bf16.vlgmr.msra.gmra.mrb[68].mxu0 %vm1357_vm2, %v3226_v6  ;;  %4946 = vmatmul.mubr.msk.bf16.vlgmr.msra.gmra.mrb[60].mxu1 %vm1357_vm2, %v3226_v6 }
 0xd67   : > { %4951 = vmatprep.mubr.msk.bf16.mxu0 %vm5914_vm0, %v5913_v0  ;;  %4957 = vmatprep.mubr.msk.bf16.mxu1 %vm5914_vm0, %v5913_v0 }
 0xe39   : > { %v3287_v8 = vpop.f32.mrb[68].mxu0  ;;  %v3348_v9 = vpop.f32.mrb[60].mxu1 }
 0xe3a   : > { %v3288_v10 = vadd.f32 %v6663_v7, %v3287_v8  ;;  %v3349_v13 = vadd.f32 %v6663_v7, %v3348_v9  ;;  %v4939_v14 = vpop.f32.mrb[69].mxu0  ;;  %v4947_v15 = vpop.f32.mrb[61].mxu1 }
 0xe3b   : > { %v3290_v16 = vpop.f32.mrb[70].mxu0  ;;  %v3351_v17 = vpop.f32.mrb[62].mxu1 }
 0xe3c   : > { %5353 = vtanh.f32 %v3288_v10  ;;  %v4940_v18 = vpop.f32.mrb[71].mxu0  ;;  %v4948_v19 = vpop.f32.mrb[63].mxu1 }
 0xe3d   : > { %5355 = vtanh.f32 %v3349_v13  ;;  %v2371_v10 = vpop.xlane.xlu1 %2370 }
 0xe3e   : > { %v2373_v14 = vmul.f32 0.03125, %v2371_v10 }
 0xe40   : > { %v2375_v20 = vsub.f32 %v6647_v57, %v2373_v14  ;;  %v5313_v57 = vld [vmem:[#allocation20] sm:$0xff]  }
 0xe46   : > { %v5354_v21 = vpop.eup %5353 }
 0xe47   : > { %v5356_v24 = vpop.eup %5355  ;;  %v3296_v25 = vpack.c.bf16 %v5354_v21, %v5354_v21 }
 0xe48   : > { %v3358_v26 = vpack.c.bf16 %v5356_v24, %v5356_v24 }
 0xe49   : > { %v3425_v27 = vand.u32 %v6668_v22, %v3296_v25 }
 0xe4a   : > { %v3373_v28 = vand.u32 %v6668_v22, %v3358_v26 }
 0xe4b   : > { %4956 = vmatpush3.bf16.msra.mxu1 %v3425_v27 }
 0xe4c   : > { %4950 = vmatpush3.bf16.msra.mxu0 %v3373_v28  ;;  %4969 = vmatprep.subr.bf16.mxu1 %v5913_v0 }
 0xe4d   : > { %4961 = vmatprep.subr.bf16.mxu0 %v5913_v0 }
 0xe4e   : > { %4958 = vmatmul.mubr.msk.bf16.vlgmr.msra.gmra.mrb[64].mxu1 %vm3364_vm11, %v5306_v29  ;;  %v2377_v29 = vmul.f32 %v2375_v20, %v2375_v20 }
 0xe4f   : > { %4952 = vmatmul.mubr.msk.bf16.vlgmr.msra.gmra.mrb[72].mxu0 %vm3364_vm11, %v5305_v30  ;;  %4971 = vmatprep.mubr.msk.bf16.mxu1 %vm5914_vm0, %v5913_v0 }
 0xe50   : > { %4962 = vmatpush3.bf16.msra.mxu0 %v5307_v31  ;;  %4965 = vmatprep.mubr.msk.bf16.mxu0 %vm5914_vm0, %v5913_v0  ;;  %v2381_v30 = vsel %vm1357_vm2, %v2377_v29, 0.0  ;;  %v5314_v31 = vld [vmem:[#allocation20 + $0x8] sm:$0xff]  }
 0xe51   : > { %4963 = vmatprep.subr.bf16.mxu0 %v5913_v0 }
 0xe54   : > { %4964 = vmatpush3.bf16.msra.mxu0 %v5308_v23 }
 0xe55   : > { %4975 = vmatprep.subr.bf16.mxu0 %v5913_v0 }
 0xe57   : > { %4966 = vmatmul.mubr.msk.bf16.vlgmr.msra.gmra.mrb[76].mxu0 %vm1357_vm2, %v3226_v6 }
 0xe58   : > { %4976 = vmatpush3.bf16.msra.mxu0 %v5309_v32  ;;  %4979 = vmatprep.mubr.msk.bf16.mxu0 %vm5914_vm0, %v5913_v0 }
 0xe59   : > { %4977 = vmatprep.subr.bf16.mxu0 %v5913_v0 }
 0xe5c   : > { %4978 = vmatpush3.bf16.msra.mxu0 %v5310_v33 }
 0xe5d   : > { %4989 = vmatprep.subr.bf16.mxu0 %v5913_v0 }
 0xe5f   : > { %4980 = vmatmul.mubr.msk.bf16.vlgmr.msra.gmra.mrb[80].mxu0 %vm1357_vm2, %v3226_v6  ;;  %v2368_v6 = vpop.xlane.xlu0 %2367 }
 0xe60   : > { %4993 = vmatprep.mubr.msk.bf16.mxu0 %vm5914_vm0, %v5913_v0  ;;  %v2372_v13 = vmul.f32 0.03125, %v2368_v6 }
 0xe62   : > { %v2374_v16 = vsub.f32 %v6640_v48, %v2372_v13 }
 0xe64   : > { %v2376_v27 = vmul.f32 %v2374_v16, %v2374_v16 }
 0xe66   : > { %v2378_v48 = vsel %vm1357_vm2, %v2376_v27, 0.0 }
 0xf21   : > { %v3461_v34 = vpop.f32.mrb[64].mxu1 }
 0xf22   : > { %v3409_v35 = vpop.f32.mrb[72].mxu0  ;;  %v4959_v36 = vpop.f32.mrb[65].mxu1 }
 0xf23   : > { %v3462_v37 = vadd.f32 %v3461_v34, %v3409_v35  ;;  %v4953_v38 = vpop.f32.mrb[73].mxu0  ;;  %v3464_v39 = vpop.f32.mrb[66].mxu1 }
 0xf24   : > { %v3412_v41 = vpop.f32.mrb[74].mxu0  ;;  %v4960_v42 = vpop.f32.mrb[67].mxu1 }
 0xf25   : > { %v3465_v3 = vadd.f32 %v3464_v39, %v3412_v41  ;;  %v4954_v43 = vpop.f32.mrb[75].mxu0 }
 0xf2a   : > { %v3519_v47 = vpop.f32.mrb[76].mxu0 }
 0xf2b   : > { %v3520_v45 = vadd.f32 %v6663_v7, %v3519_v47  ;;  %v4967_v46 = vpop.f32.mrb[77].mxu0 }
 0xf2c   : > { %v3522_v49 = vpop.f32.mrb[78].mxu0 }
 0xf2d   : > { %5357 = vtanh.f32 %v3520_v45  ;;  %v4968_v50 = vpop.f32.mrb[79].mxu0 }
 0xf32   : > { %v3635_v51 = vpop.f32.mrb[80].mxu0 }
 0xf33   : > { %v3636_v54 = vadd.f32 %v6663_v7, %v3635_v51  ;;  %v4981_v55 = vpop.f32.mrb[81].mxu0 }
 0xf34   : > { %v3638_v56 = vpop.f32.mrb[82].mxu0 }
 0xf35   : > { %5359 = vtanh.f32 %v3636_v54  ;;  %v4982_v11 = vpop.f32.mrb[83].mxu0 }
 0xf37   : > { %v5358_v40 = vpop.eup %5357 }
 0xf38   : > { %v3529_v58 = vpack.c.bf16 %v5358_v40, %v5358_v40  ;;  %v5315_v40 = vld [vmem:[#allocation20 + $0x10] sm:$0xff]  }
 0xf39   : > { %4990 = vmatpush3.bf16.msra.mxu0 %v5315_v40 }
 0xf3a   : > { %v3539_v1 = vand.u32 %v3529_v58, %v6668_v22  ;;  %v5316_v58 = vld [vmem:[#allocation20 + $0x18] sm:$0xff]   ;;  %4991 = vmatprep.subr.bf16.mxu0 %v5913_v0 }
 0xf3c   : > { %4970 = vmatpush3.bf16.msra.mxu1 %v3539_v1 }
 0xf3d   : > { %4983 = vmatprep.subr.bf16.mxu1 %v5913_v0  ;;  %4992 = vmatpush3.bf16.msra.mxu0 %v5316_v58 }
 0xf3e   : > { %5005 = vmatprep.subr.bf16.mxu0 %v5913_v0 }
 0xf3f   : > { %v5360_v12 = vpop.eup %5359  ;;  %4972 = vmatmul.mubr.msk.bf16.vlgmr.msra.gmra.mrb[68].mxu1 %vm3364_vm11, %v5311_v2 }
 0xf40   : > { %v3645_v44 = vpack.c.bf16 %v5360_v12, %v5360_v12  ;;  %4985 = vmatprep.mubr.msk.bf16.mxu1 %vm5914_vm0, %v5913_v0 }
 0xf42   : > { %v3655_v60 = vand.u32 %v3645_v44, %v6668_v22 }
 0xf44   : > { %4984 = vmatpush3.bf16.msra.mxu1 %v3655_v60 }
 0xf45   : > { %4997 = vmatprep.subr.bf16.mxu1 %v5913_v0 }
 0xf47   : > { %4986 = vmatmul.mubr.msk.bf16.vlgmr.msra.gmra.mrb[72].mxu1 %vm3364_vm11, %v5312_v61 }
 0xf48   : > { %5001 = vmatprep.mubr.msk.bf16.mxu1 %vm5914_vm0, %v5913_v0  ;;  %4998 = vmatpush3.bf16.msra.mxu1 %v5313_v57 }
 0xf49   : > { %4999 = vmatprep.subr.bf16.mxu1 %v5913_v0 }
 0xf4c   : > { %5000 = vmatpush3.bf16.msra.mxu1 %v5314_v31 }
 0xf4d   : > { %5013 = vmatprep.subr.bf16.mxu1 %v5913_v0 }
0x1012   : > { %v3575_v62 = vpop.f32.mrb[68].mxu1 }
0x1013   : > { %v3582_v4 = vadd.f32 %v3575_v62, %v3462_v37  ;;  %v4973_v5 = vpop.f32.mrb[69].mxu1 }
0x1014   : > { %v3578_v7 = vpop.f32.mrb[70].mxu1 }
0x1015   : > { %v3583_v8 = vadd.f32 %v3578_v7, %v3465_v3  ;;  %v4974_v9 = vpop.f32.mrb[71].mxu1 }
0x101a   : > { %v3691_v15 = vpop.f32.mrb[72].mxu1 }
0x101b   : > { %v3698_v17 = vadd.f32 %v3691_v15, %v3582_v4  ;;  %v4987_v18 = vpop.f32.mrb[73].mxu1 }
0x101c   : > { %v3694_v19 = vpop.f32.mrb[74].mxu1 }
0x101d   : > { %v3699_v21 = vadd.f32 %v3694_v19, %v3583_v8  ;;  %v4988_v22 = vpop.f32.mrb[75].mxu1  ;;  %v3700_v24 = vadd.f32 %v3698_v17, %v6549_v52  ;;  %v4551_v19 = vld [vmem:[#allocation21] ss:$0 sm:$0xff] }
0x101f   : > { %v3702_v25 = vsel %vm1357_vm2, %v3700_v24, 0.0  ;;  %v3701_v26 = vadd.f32 %v3699_v21, %v6552_v53 }
0x1020   : > { %3703 = vadd.xlane.f32.xlu0 %v3702_v25 }
0x1021   : > { %v3705_v28 = vsel %vm1357_vm2, %v3701_v26, 0.0 }
0x1022   : > { %3706 = vadd.xlane.f32.xlu1 %v3705_v28 }
0x1024   : > { %2379 = vadd.xlane.f32.xlu0 %v2378_v48 }
0x1026   : > { %2382 = vadd.xlane.f32.xlu1 %v2381_v30 }
0x10ad   : > { %v3704_v52 = vpop.xlane.xlu0 %3703 }
0x10ae   : > { %v3708_v53 = vmul.f32 0.03125, %v3704_v52 }
0x10af   : > { %v3707_v23 = vpop.xlane.xlu1 %3706 }
0x10b0   : > { %v3710_v32 = vsub.f32 %v3700_v24, %v3708_v53  ;;  %v3709_v33 = vmul.f32 0.03125, %v3707_v23 }
0x10b1   : > { %v2380_v34 = vpop.xlane.xlu0 %2379 }
0x10b2   : > { %v3711_v35 = vsub.f32 %v3701_v26, %v3709_v33  ;;  %v2384_v36 = vmul.f32 0.03125, %v2380_v34  ;;  %v3712_v37 = vmul.f32 %v3710_v32, %v3710_v32  ;;  %v5317_v33 = vld [vmem:[#allocation23] sm:$0xff]   ;;  %v5318_v34 = vld [vmem:[#allocation23 + $0x8] sm:$0xff]  }
0x10b3   : > { %v2383_v38 = vpop.xlane.xlu1 %2382 }
0x10b4   : > { %v2386_v39 = vadd.f32 1e-05, %v2384_v36  ;;  %v2385_v41 = vmul.f32 0.03125, %v2383_v38  ;;  %v3714_v42 = vsel %vm1357_vm2, %v3712_v37, 0.0  ;;  %v3713_v3 = vmul.f32 %v3711_v35, %v3711_v35  ;;  %v5320_v36 = vld [vmem:[%s6866_s16 + $0x8] sm:$0xff]   ;;  %v5321_v37 = vld [vmem:[%s6866_s16 + $0x10] sm:$0xff]  }
0x10b5   : > { %3715 = vadd.xlane.f32.xlu0 %v3714_v42  ;;  %v5322_v38 = vld [vmem:[%s6866_s16 + $0x18] sm:$0xff]  }
0x10b6   : > { %5361 = vrsqrt.f32 %v2386_v39  ;;  %v2387_v43 = vadd.f32 1e-05, %v2385_v41  ;;  %v3717_v47 = vsel %vm1357_vm2, %v3713_v3, 0.0  ;;  %v5323_v39 = vld [vmem:[%s6866_s16 + $0x20] sm:$0xff]   ;;  %v5324_v41 = vld [vmem:[%s6866_s16 + $0x28] sm:$0xff]  }
0x10b7   : > { %3718 = vadd.xlane.f32.xlu1 %v3717_v47 }
0x10b8   : > { %5363 = vrsqrt.f32 %v2387_v43 }
0x10c0   : > { %v5362_v45 = vpop.eup %5361 }
0x10c1   : > { %v2390_v46 = vmul.f32 %v5362_v45, %v2374_v16 }
0x10c2   : > { %v5364_v49 = vpop.eup %5363 }
0x10c3   : > { %v2392_v50 = vmul.f32 %v6514_v59, %v2390_v46  ;;  %v2391_v51 = vmul.f32 %v5364_v49, %v2375_v20 }
0x10c5   : > { %v2393_v54 = vmul.f32 %v6514_v59, %v2391_v51  ;;  %v2394_v55 = vadd.f32 %v6518_v63, %v2392_v50  ;;  %v4552_v50 = vld [vmem:[%s6867_s4] ss:$0 sm:$0xff] }
0x10c7   : > { %v2395_v56 = vadd.f32 %v6518_v63, %v2393_v54 }
0x10c9   : > { %v3732_v11 = vpack.c.bf16 %v2395_v56, %v2394_v55 }
0x10cb   : > { %5002 = vmatmul.mubr.msk.bf16.vlgmr.msra.gmra.mrb[76].mxu1 %vm1357_vm2, %v3732_v11  ;;  %v4553_v11 = vld [vmem:[%s6868_s1] ss:$0 sm:$0xff] }
0x10cc   : > { %5029 = vmatprep.mubr.msk.bf16.mxu1 %vm5914_vm0, %v5913_v0 }
0x1142   : > { %v3716_v1 = vpop.xlane.xlu0 %3715 }
0x1143   : > { %v3720_v2 = vmul.f32 0.03125, %v3716_v1 }
0x1144   : > { %v3719_v12 = vpop.xlane.xlu1 %3718 }
0x1145   : > { %v3722_v44 = vadd.f32 1e-05, %v3720_v2  ;;  %v3721_v60 = vmul.f32 0.03125, %v3719_v12  ;;  %v5325_v12 = vld [vmem:[%s6866_s16 + $0x30] sm:$0xff]  }
0x1147   : > { %5365 = vrsqrt.f32 %v3722_v44  ;;  %v3723_v61 = vadd.f32 1e-05, %v3721_v60  ;;  %v5326_v44 = vld [vmem:[%s6866_s16 + $0x38] sm:$0xff]   ;;  %v4554_v60 = vld [vmem:[#allocation24] ss:$0 sm:$0xff] }
0x1149   : > { %5367 = vrsqrt.f32 %v3723_v61 }
0x1151   : > { %v5366_v62 = vpop.eup %5365 }
0x1152   : > { %v3726_v4 = vmul.f32 %v5366_v62, %v3710_v32 }
0x1153   : > { %v5368_v5 = vpop.eup %5367 }
0x1154   : > { %v3728_v6 = vmul.f32 %v6514_v59, %v3726_v4  ;;  %v3727_v7 = vmul.f32 %v5368_v5, %v3711_v35  ;;  %v5319_v35 = vld [vmem:[%s6866_s16] sm:$0xff]  }
0x1155   : > { %5014 = vmatpush3.bf16.msra.mxu1 %v5319_v35  ;;  %v4568_v35 = vld [vmem:[%s6869_s0] ss:$0 sm:$0xff] }
0x1156   : > { %v3729_v8 = vmul.f32 %v6514_v59, %v3727_v7  ;;  %v3730_v9 = vadd.f32 %v6518_v63, %v3728_v6  ;;  %5015 = vmatprep.subr.bf16.mxu1 %v5913_v0 }
0x1158   : > { %v3731_v10 = vadd.f32 %v6518_v63, %v3729_v8 }
0x1159   : > { %5016 = vmatpush3.bf16.msra.mxu1 %v5320_v36 }
0x115a   : > { %v3737_v13 = vpack.c.bf16 %v3731_v10, %v3730_v9  ;;  %5017 = vmatprep.subr.bf16.mxu1 %v5913_v0  ;;  %v4558_v9 = vld [vmem:[#allocation26] ss:$0 sm:$0xff] }
0x115c   : > { %4994 = vmatmul.mubr.msk.bf16.vlgmr.msra.gmra.mrb[84].mxu0 %vm1357_vm2, %v3737_v13 }
0x115d   : > { %5009 = vmatprep.mubr.msk.bf16.mxu0 %vm5914_vm0, %v5913_v0  ;;  %5006 = vmatpush3.bf16.msra.mxu0 %v5317_v33 }
0x115e   : > { %5007 = vmatprep.subr.bf16.mxu0 %v5913_v0  ;;  %5018 = vmatpush3.bf16.msra.mxu1 %v5321_v37 }
0x115f   : > { %5019 = vmatprep.subr.bf16.mxu1 %v5913_v0 }
0x1161   : > { %5008 = vmatpush3.bf16.msra.mxu0 %v5318_v34 }
0x1162   : > { %5020 = vmatpush3.bf16.msra.mxu1 %v5322_v38 }
0x1163   : > { %5021 = vmatprep.subr.bf16.mxu1 %v5913_v0 }
0x1166   : > { %5022 = vmatpush3.bf16.msra.mxu1 %v5323_v39 }
0x1167   : > { %5023 = vmatprep.subr.bf16.mxu1 %v5913_v0 }
0x116a   : > { %5024 = vmatpush3.bf16.msra.mxu1 %v5324_v41 }
0x116b   : > { %5025 = vmatprep.subr.bf16.mxu1 %v5913_v0 }
0x116e   : > { %5026 = vmatpush3.bf16.msra.mxu1 %v5325_v12 }
0x116f   : > { %5027 = vmatprep.subr.bf16.mxu1 %v5913_v0 }
0x1172   : > { %5028 = vmatpush3.bf16.msra.mxu1 %v5326_v44 }
0x119e   : > { %v3848_v14 = vpop.f32.mrb[76].mxu1 }
0x119f   : > { %v5003_v15 = vpop.f32.mrb[77].mxu1 }
0x11a0   : > { %v3851_v16 = vpop.f32.mrb[78].mxu1 }
0x11a1   : > { %v5004_v17 = vpop.f32.mrb[79].mxu1 }
0x122f   : > { %v3792_v18 = vpop.f32.mrb[84].mxu0 }
0x1230   : > { %v3849_v20 = vadd.f32 %v3848_v14, %v3792_v18  ;;  %v4995_v21 = vpop.f32.mrb[85].mxu0 }
0x1231   : > { %v3795_v22 = vpop.f32.mrb[86].mxu0 }
0x1232   : > { %v6734_v59 = vadd.f32 %v4551_v19, %v3849_v20  ;;  %v3852_v24 = vadd.f32 %v3851_v16, %v3795_v22  ;;  %v4996_v25 = vpop.f32.mrb[87].mxu0 }
0x1234   : > { %v6736_v63 = vadd.f32 %v4551_v19, %v3852_v24  ;;  %v3866_v26 = vsel %vm1357_vm2, %v6734_v59, 0.0 }
0x1235   : > { %3867 = vadd.xlane.f32.xlu0 %v3866_v26 }
0x1236   : > { %v3869_v27 = vsel %vm1357_vm2, %v6736_v63, 0.0 }
0x1237   : > { %3870 = vadd.xlane.f32.xlu1 %v3869_v27 }
0x12c2   : > { %v3868_v28 = vpop.xlane.xlu0 %3867 }
0x12c3   : > { %v3872_v29 = vmul.f32 0.03125, %v3868_v28 }
0x12c4   : > { %v3871_v48 = vpop.xlane.xlu1 %3870 }
0x12c5   : > { %v3874_v30 = vsub.f32 %v6734_v59, %v3872_v29  ;;  %v3873_v57 = vmul.f32 0.03125, %v3871_v48 }
0x12c7   : > { %v3875_v31 = vsub.f32 %v6736_v63, %v3873_v57  ;;  %v3876_v52 = vmul.f32 %v3874_v30, %v3874_v30 }
0x12c9   : > { %v3878_v53 = vsel %vm1357_vm2, %v3876_v52, 0.0  ;;  %v3877_v23 = vmul.f32 %v3875_v31, %v3875_v31 }
0x12ca   : > { %3879 = vadd.xlane.f32.xlu0 %v3878_v53 }
0x12cb   : > { %v3881_v32 = vsel %vm1357_vm2, %v3877_v23, 0.0 }
0x12cc   : > { %3882 = vadd.xlane.f32.xlu1 %v3881_v32  ;;  %v4567_v32 = vld [vmem:[%s6069_s13] ss:$0 sm:$0xff] }
0x1357   : > { %v3880_v42 = vpop.xlane.xlu0 %3879 }
0x1358   : > { %v3884_v3 = vmul.f32 0.03125, %v3880_v42 }
0x1359   : > { %v3883_v43 = vpop.xlane.xlu1 %3882 }
0x135a   : > { %v3886_v47 = vadd.f32 1e-05, %v3884_v3  ;;  %v3885_v45 = vmul.f32 0.03125, %v3883_v43 }
0x135c   : > { %5369 = vrsqrt.f32 %v3886_v47  ;;  %v3887_v46 = vadd.f32 1e-05, %v3885_v45 }
0x135e   : > { %5371 = vrsqrt.f32 %v3887_v46 }
0x1366   : > { %v5370_v49 = vpop.eup %5369 }
0x1367   : > { %v3890_v51 = vmul.f32 %v5370_v49, %v3874_v30 }
0x1368   : > { %v5372_v54 = vpop.eup %5371 }
0x1369   : > { %v3898_v55 = vmul.f32 %v4552_v50, %v3890_v51  ;;  %v3891_v56 = vmul.f32 %v5372_v54, %v3875_v31 }
0x136b   : > { %v3899_v40 = vmul.f32 %v4552_v50, %v3891_v56  ;;  %v3906_v58 = vadd.f32 %v4553_v11, %v3898_v55 }
0x136d   : > { %v3907_v1 = vadd.f32 %v4553_v11, %v3899_v40 }
0x136f   : > { %v3908_v2 = vpack.c.bf16 %v3907_v1, %v3906_v58 }
0x1371   : > { %5010 = vmatmul.mubr.msk.bf16.vlgmr.msra.gmra.mrb[88].mxu0 %vm1357_vm2, %v3908_v2 }
0x1444   : > { %v3969_v61 = vpop.f32.mrb[88].mxu0 }
0x1445   : > { %v5011_v62 = vpop.f32.mrb[89].mxu0  ;;  %v3970_v5 = vadd.f32 %v4554_v60, %v3969_v61 }
0x1446   : > { %v3972_v4 = vpop.f32.mrb[90].mxu0 }
0x1447   : > { %v3973_v6 = vadd.f32 %v4554_v60, %v3972_v4  ;;  %v5012_v7 = vpop.f32.mrb[91].mxu0 }
0x1449   : > { %v3976_v8 = vpack.c.bf16 %v3973_v6, %v3970_v5 }
0x144b   : > { %5030 = vmatmul.mubr.bf16.vlgmr.msra.gmra.mrb[80].mxu1 %v3976_v8 }
0x151e   : > { %v4082_v10 = vpop.f32.mrb[80].mxu1 }
0x151f   : > { %v4083_v13 = vadd.f32 %v4558_v9, %v4082_v10  ;;  %v5031_v14 = vpop.f32.mrb[81].mxu1 }
0x1520   : > { %v4085_v15 = vpop.f32.mrb[82].mxu1 }
0x1521   : > { %v4086_v16 = vadd.f32 %v4558_v9, %v4085_v15  ;;  %v5032_v17 = vpop.f32.mrb[83].mxu1  ;;  %v4089_v0 = vadd.f32 %v4083_v13, %v6734_v59 }
0x1523   : > { %v4093_v18 = vsel %vm1357_vm2, %v4089_v0, 0.0  ;;  %v4090_v19 = vadd.f32 %v4086_v16, %v6736_v63 }
0x1524   : > { %4094 = vadd.xlane.f32.xlu0 %v4093_v18 }
0x1525   : > { %v4096_v20 = vsel %vm1357_vm2, %v4090_v19, 0.0 }
0x1526   : > { %4097 = vadd.xlane.f32.xlu1 %v4096_v20 }
0x15b1   : > { %v4095_v21 = vpop.xlane.xlu0 %4094 }
0x15b2   : > { %v4099_v22 = vmul.f32 0.03125, %v4095_v21 }
0x15b3   : > { %v4098_v24 = vpop.xlane.xlu1 %4097 }
0x15b4   : > { %v4101_v25 = vsub.f32 %v4089_v0, %v4099_v22  ;;  %v4100_v26 = vmul.f32 0.03125, %v4098_v24 }
0x15b6   : > { %v4102_v27 = vsub.f32 %v4090_v19, %v4100_v26  ;;  %v4103_v28 = vmul.f32 %v4101_v25, %v4101_v25 }
0x15b8   : > { %v4105_v29 = vsel %vm1357_vm2, %v4103_v28, 0.0  ;;  %v4104_v59 = vmul.f32 %v4102_v27, %v4102_v27 }
0x15b9   : > { %4106 = vadd.xlane.f32.xlu0 %v4105_v29 }
0x15ba   : > { %v4108_v63 = vsel %vm1357_vm2, %v4104_v59, 0.0 }
0x15bb   : > { %4109 = vadd.xlane.f32.xlu1 %v4108_v63 }
0x1646   : > { %v4107_v48 = vpop.xlane.xlu0 %4106 }
0x1647   : > { %v4111_v30 = vmul.f32 0.03125, %v4107_v48 }
0x1648   : > { %v4110_v57 = vpop.xlane.xlu1 %4109 }
0x1649   : > { %v4113_v31 = vadd.f32 1e-05, %v4111_v30  ;;  %v4112_v52 = vmul.f32 0.03125, %v4110_v57 }
0x164b   : > { %5373 = vrsqrt.f32 %v4113_v31  ;;  %v4114_v53 = vadd.f32 1e-05, %v4112_v52 }
0x164d   : > { %5375 = vrsqrt.f32 %v4114_v53 }
0x1655   : > { %v5374_v23 = vpop.eup %5373 }
0x1656   : > { %v4117_v33 = vmul.f32 %v5374_v23, %v4101_v25 }
0x1657   : > { %v5376_v34 = vpop.eup %5375 }
0x1658   : > { %v4125_v36 = vmul.f32 %v4567_v32, %v4117_v33  ;;  %v4118_v37 = vmul.f32 %v5376_v34, %v4102_v27 }
0x165a   : > { %v4133_v38 = vadd.f32 %v4568_v35, %v4125_v36  ;;  %v4126_v39 = vmul.f32 %v4567_v32, %v4118_v37 }
0x165c   : > { %4135 = vst.msk [vmem:[%s1167_s22] sm:$0xff] %vm1357_vm2, %v4133_v38  ;;  %v4134_v41 = vadd.f32 %v4568_v35, %v4126_v39 }
0x165e   : > { %4136 = vst.msk [vmem:[%s1167_s22 + $0x8] sm:$0xff] %vm1357_vm2, %v4134_v41 }
0x165f PF: > { %p80_p6 = scmp.ge.s32.totalorder %s6308_s24, 4   ;;  %s6871_s22 = smov %s5853_s23 }
0x1660   : > { %s6872_s23 = smov %s5857_s26  ;;  %s6873_s26 = smov %s6320_s18 }
0x1661   : > { %s6874_s28 = smov %s6308_s24  ;;  %82 = sbr.rel (!%p80_p6) target bundleno = 67 (0x43), region = 300 }
0x1668   :  { %4158 = vsyncpa [#allocation5], 1 }
0x1669   :  { %4160 = vsyncpa [#allocation5 + $0x1], 1 }
0x166a   :  { %4161 = vsyncpa [#allocation7], 1 }
0x166b   :  { %4162 = vsyncpa [#allocation10], 1 }
0x166c   :  { %4163 = vsyncpa [#allocation13], 1 }
0x166d   :  { %4164 = vsyncpa [#allocation16], 1 }
0x166e   :  { %4165 = vsyncpa [#allocation19], 1 }
0x166f   :  { %4166 = vsyncpa [#allocation22], 1 }
0x1670   :  { %4167 = vsyncpa [#allocation25], 1 }

// kernel: seasonal_prediction_forward.3
= control target key start
LH: loop header
LB: loop body
LE: loop exit
PB: predicated region body
PF: predicated region fallthrough
CT: control target
= control target key end

     0   :  { %s5119_s6 = smov 1   ;;  %s5120_s10 = smov 2   ;;  %s5858_s0 = inlined_call_operand.smem [shape: u32[34], index: -1, kind: input, shape index: {}] }
   0x1   :  { %s5165_s5 = sld [smem:[%s5858_s0]]   ;;  %s5121_s14 = smov 3  }
   0x2   :  { %s5170_s9 = sld [smem:[%s5858_s0 + %s5119_s6]]   ;;  %s5122_s18 = smov 4  }
   0x3   :  { %s5175_s13 = sld [smem:[%s5858_s0 + %s5120_s10]]   ;;  %s5123_s22 = smov 5  }
   0x4   :  { %s5180_s17 = sld [smem:[%s5858_s0 + %s5121_s14]]   ;;  %s5124_s26 = smov 6  }
   0x5   :  { %s5185_s21 = sld [smem:[%s5858_s0 + %s5122_s18]]   ;;  %s5125_s30 = smov 7  }
   0x6   :  { %s5190_s25 = sld [smem:[%s5858_s0 + %s5123_s22]]   ;;  %s5126_s4 = smov 8  }
   0x7   :  { %5872 = sst [smem:[#allocation8_spill]] %s5165_s5  ;;  %s5127_s10 = smov 9  }
   0x8   :  { %5873 = sst [smem:[#allocation9_spill]] %s5170_s9  ;;  %s5128_s15 = smov 10  }
   0x9   :  { %5874 = sst [smem:[#allocation10_spill]] %s5175_s13  ;;  %s5129_s20 = smov 11  }
   0xa   :  { %s5195_s29 = sld [smem:[%s5858_s0 + %s5124_s26]]   ;;  %s5130_s26 = smov 12  }
   0xb   :  { %s5200_s3 = sld [smem:[%s5858_s0 + %s5125_s30]]   ;;  %s5131_s1 = smov 13  }
   0xc   :  { %s5205_s8 = sld [smem:[%s5858_s0 + %s5126_s4]]   ;;  %s5132_s7 = smov 14  }
   0xd   :  { %s5210_s14 = sld [smem:[%s5858_s0 + %s5127_s10]]   ;;  %s5134_s22 = smov 16  }
   0xe   :  { %s5215_s19 = sld [smem:[%s5858_s0 + %s5128_s15]]   ;;  %s5133_s15 = smov 15  }
   0xf   :  { %s5220_s24 = sld [smem:[%s5858_s0 + %s5129_s20]]   ;;  %s5135_s28 = smov 17  }
  0x10   :  { %s5225_s30 = sld [smem:[%s5858_s0 + %s5130_s26]]  }
  0x11   :  { %5875 = sst [smem:[#allocation11_spill]] %s5200_s3 }
  0x12   :  { %5876 = sst [smem:[#allocation12_spill]] %s5205_s8 }
  0x13   :  { %5877 = sst [smem:[#allocation13_spill]] %s5210_s14 }
  0x14   :  { %s5230_s6 = sld [smem:[%s5858_s0 + %s5131_s1]]   ;;  %s5151_s1 = smov 33  }
  0x15   :  { %s5235_s12 = sld [smem:[%s5858_s0 + %s5132_s7]]   ;;  %s5136_s7 = smov 18  }
  0x16   :  { %5878 = sst [smem:[#allocation14_spill]] %s5225_s30 }
  0x17   :  { %s5240_s20 = sld [smem:[%s5858_s0 + %s5133_s15]]   ;;  %s5137_s15 = smov 19  }
  0x18   :  { %s5245_s27 = sld [smem:[%s5858_s0 + %s5134_s22]]   ;;  %s5138_s22 = smov 20  }
  0x19   :  { %s5250_s4 = sld [smem:[%s5858_s0 + %s5135_s28]]   ;;  %s5139_s28 = smov 21  }
  0x1a   :  { %5879 = sst [smem:[#allocation15_spill]] %s5230_s6 }
  0x1b   :  { %5880 = sst [smem:[#allocation16_spill]] %s5235_s12 }
  0x1c   :  { %s5255_s6 = sld [smem:[%s5858_s0 + %s5136_s7]]   ;;  %s5140_s7 = smov 22  }
  0x1d   :  { %5881 = sst [smem:[#allocation17_spill]] %s5240_s20 }
  0x1e   :  { %5882 = sst [smem:[#allocation18_spill]] %s5245_s27 }
  0x1f   :  { %5883 = sst [smem:[#allocation19_spill]] %s5250_s4 }
  0x20   :  { %s5260_s20 = sld [smem:[%s5858_s0 + %s5137_s15]]   ;;  %s5141_s15 = smov 23  }
  0x21   :  { %s5265_s27 = sld [smem:[%s5858_s0 + %s5138_s22]]   ;;  %s5142_s22 = smov 24  }
  0x22   :  { %5884 = sst [smem:[#allocation20_spill]] %s5255_s6 }
  0x23   :  { %s5270_s4 = sld [smem:[%s5858_s0 + %s5139_s28]]   ;;  %s5143_s28 = smov 25  }
  0x24   :  { %s5275_s6 = sld [smem:[%s5858_s0 + %s5140_s7]]   ;;  %s5144_s7 = smov 26  }
  0x25   :  { %s5280_s12 = sld [smem:[%s5858_s0 + %s5141_s15]]   ;;  %s5145_s15 = smov 27  }
  0x26   :  { %s5285_s30 = sld [smem:[%s5858_s0 + %s5142_s22]]   ;;  %s5146_s22 = smov 28  }
  0x29   :  { %5885 = sst [smem:[#allocation21_spill]] %s5270_s4 }
  0x2a   :  { %5886 = sst [smem:[#allocation22_spill]] %s5275_s6 }
  0x2b   :  { %5887 = sst [smem:[#allocation23_spill]] %s5280_s12 }
  0x2c   :  { %5888 = sst [smem:[#allocation24_spill]] %s5285_s30 }
  0x2d   :  { %s5290_s4 = sld [smem:[%s5858_s0 + %s5143_s28]]   ;;  %s5147_s28 = smov 29  }
  0x2e   :  { %s5295_s6 = sld [smem:[%s5858_s0 + %s5144_s7]]   ;;  %s5148_s7 = smov 30  }
  0x2f   :  { %s5300_s12 = sld [smem:[%s5858_s0 + %s5145_s15]]   ;;  %s5149_s15 = smov 31  }
  0x30   :  { %s5305_s30 = sld [smem:[%s5858_s0 + %s5146_s22]]   ;;  %s5150_s22 = smov 32  }
  0x33   :  { %5889 = sst [smem:[#allocation25_spill]] %s5290_s4 }
  0x34   :  { %5890 = sst [smem:[#allocation26_spill]] %s5295_s6 }
  0x35   :  { %5891 = sst [smem:[#allocation27_spill]] %s5300_s12 }
  0x36   :  { %5892 = sst [smem:[#allocation28_spill]] %s5305_s30 }
  0x37   :  { %s5310_s4 = sld [smem:[%s5858_s0 + %s5147_s28]]  }
  0x38   :  { %s5315_s6 = sld [smem:[%s5858_s0 + %s5148_s7]]  }
  0x39   :  { %s5320_s12 = sld [smem:[%s5858_s0 + %s5149_s15]]  }
  0x3a   :  { %s4139_s30 = sld [smem:[%s5858_s0 + %s5150_s22]]  }
  0x3d   :  { %5893 = sst [smem:[#allocation29_spill]] %s5310_s4 }
  0x3e   :  { %5894 = sst [smem:[#allocation30_spill]] %s5315_s6 }
  0x3f   :  { %5895 = sst [smem:[#allocation31_spill]] %s5320_s12 }
  0x40   :  { %s5328_s4 = sld [smem:[%s5858_s0 + %s5151_s1]]   ;;  %v72_v0 = vstv %s4139_s30 }
  0x41   :  { %73 = vst [vmem:[#allocation4] sm:$0x1] %v72_v0 }
  0x42   :  { %74 = vsyncpa [#allocation6], 0 }
  0x43   :  { %76 = vsyncpa [#allocation6 + $0x1], 0  ;;  %s5330_s7 = smov 0   ;;  %s5332_s10 = smov 0  }
  0x44   :  { %s5334_s11 = smov 0   ;;  %s5336_s15 = smov 0  }
  0x45 LB: > { %s5896_s14 = sld [smem:[#allocation13_spill]]  ;;  %s5897_s13 = sld [smem:[#allocation10_spill]]  ;;  %s5113_s11 = sphi %s5334_s11, %s5924_s11   ;;  %s5109_s10 = sphi %s5332_s10, %s5923_s10   ;;  %s5105_s7 = sphi %s5330_s7, %s5922_s7   ;;  %s5117_s15 = sphi %s5336_s15, %s5925_s15  }
  0x46   : > { %s5898_s3 = sld [smem:[#allocation11_spill]]  ;;  %s5351_s0 = sadd.s32 4294967295, %s5117_s15  }
  0x47   : > { %s4142_s30 = sadd.s32 4294967294, %s5117_s15   ;;  %s5355_s16 = sadd.s32 1, %s5117_s15  }
  0x48   : > { %s787_s18 = sadd.s32 1, %s5113_s11  ;;  %s784_s22 = ssub.s32 %s5117_s15, %s5355_s16 }
  0x49   : > { %p797_p0 = scmp.ne.s32.totalorder %s5113_s11, %s5109_s10  ;;  %p785_p1 = scmp.eq.s32.totalorder %s784_s22, 0 }
  0x4a   : > { %p798_p2 = scmp.eq.s32.totalorder %s5351_s0, 1  ;;  %p803_p3 = scmp.ne.s32.totalorder %s5109_s10, %s5105_s7 }
  0x4b   : > { %p804_p4 = scmp.eq.s32.totalorder %s4142_s30, 1  ;;  %p4145_p7 = scmp.ge.s32.totalorder %s5117_s15, 1 }
  0x4c   : > { %s5366_s23 = scalar_select %p785_p1, %s5113_s11, %s787_s18  }
  0x4d   : > { %p5368_p5 = por %p798_p2, %p797_p0  ;;  %p5372_p6 = por %p804_p4, %p803_p3 }
  0x4e   : > { %p926_p8 = scmp.lt.s32.totalorder %s5117_s15, 3 }
  0x50   : > { %p927_p9 = pnand %p4145_p7, %p926_p8 }
  0x51   : > { %s5901_s5 = sld [smem:[#allocation8_spill]] (!%p927_p9)  ;;  %s5902_s9 = sld [smem:[#allocation9_spill]] (!%p927_p9)  ;;  %v5152_v1 = vmov (!%p927_p9), 0.0   ;;  %vm5153_vm0 = vmmov (!%p927_p9), 0   ;;  %vm1027_vm1 = vcmask (!%p927_p9), 130048   ;;  %v4932_v17 = vld [vmem:[%s5180_s17 + $0x10] sm:$0xff] (!%p927_p9)  }
  0x52   : > { %930 = sbr.rel (%p927_p9) target bundleno = 5604 (0x15e4), region = 152  ;;  %p1009_p10 = scmp.lt.s32.totalorder (!%p927_p9), %s5351_s0, 1  ;;  %4510 = vmatprep.subr.bf16.mxu0 (!%p927_p9), %v5152_v1  ;;  %4512 = vmatprep.mubr.msk.bf16.mxu0 (!%p927_p9), %vm5153_vm0, %v5152_v1  ;;  %v4930_v15 = vld [vmem:[%s5897_s13 + $0x8] sm:$0x1f] (!%p927_p9)   ;;  %v4931_v16 = vld [vmem:[%s5897_s13] sm:$0x1f] (!%p927_p9)  }
  0x53   : > { %4516 = vmatprep.subr.bf16.mxu1 (!%p927_p9), %v5152_v1  ;;  %4518 = vmatprep.mubr.msk.bf16.mxu1 (!%p927_p9), %vm5153_vm0, %v5152_v1  ;;  %v4933_v18 = vld [vmem:[%s5180_s17 + $0x18] sm:$0xff] (!%p927_p9)   ;;  %vm1203_vm2 = vcmask (!%p927_p9), 261120   ;;  %v4934_v24 = vld [vmem:[%s5180_s17] sm:$0xff] (!%p927_p9)   ;;  %v4935_v30 = vld [vmem:[%s5180_s17 + $0x8] sm:$0xff] (!%p927_p9)   ;;  %vm1317_vm3 = vcmask (!%p927_p9), 253952   ;;  %s5903_s8 = sld [smem:[#allocation12_spill]] (!%p927_p9) }
  0x54   : > { %1315 = vst.msk [vmem:[#allocation2] sm:$0xff] (!%p927_p9), %vm1203_vm2, %v5152_v1  ;;  %v4936_v31 = vld [vmem:[%s5190_s25 + $0x10] sm:$0xff] (!%p927_p9)   ;;  %v4937_v32 = vld [vmem:[%s5190_s25] sm:$0xff] (!%p927_p9)   ;;  %v4938_v33 = vld [vmem:[%s5190_s25 + $0x18] sm:$0xff] (!%p927_p9)   ;;  %vm2110_vm4 = vcmask (!%p927_p9), 1043456   ;;  %vm2111_vm5 = vcmask (!%p927_p9), 1044480  }
  0x55   : > { %v4939_v34 = vld [vmem:[%s5190_s25 + $0x8] sm:$0xff] (!%p927_p9)   ;;  %v4166_v40 = vld [vmem:[%s5185_s21] ss:$0 sm:$0xff] (!%p927_p9)  ;;  %v4941_v52 = vld [vmem:[%s5190_s25 + $0x30] sm:$0xff] (!%p927_p9)   ;;  %vm2106_vm6 = vcmask (!%p927_p9), 72704   ;;  %s5904_s18 = sld [smem:[#allocation14_spill]] (!%p927_p9) }
  0x56   : > { %v4940_v51 = vld [vmem:[%s5190_s25 + $0x20] sm:$0xff] (!%p927_p9)   ;;  %v4942_v58 = vld [vmem:[%s5190_s25 + $0x28] sm:$0xff] (!%p927_p9)   ;;  %v4943_v59 = vld [vmem:[%s5190_s25 + $0x38] sm:$0xff] (!%p927_p9)   ;;  %s5905_s22 = sld [smem:[#allocation16_spill]] (!%p927_p9)  ;;  %vm2731_vm7 = vcmask (!%p927_p9), 257024   ;;  %vm2733_vm8 = vcmask (!%p927_p9), 258048  }
  0x57   : > { %v4929_v4 = vld [vmem:[%s5902_s9] sm:$0xff] (!%p927_p9)   ;;  %2732 = vst.msk [vmem:[#allocation3] sm:$0xf] (!%p927_p9), %vm2731_vm7, %v5152_v1  ;;  %vm3214_vm9 = vcmask (!%p927_p9), 1041408   ;;  %vm3215_vm10 = vcmask (!%p927_p9), 1042432   ;;  %vm3210_vm11 = vcmask (!%p927_p9), 39936  }
  0x58   : > { %v4944_v0 = vld [vmem:[%s5190_s25 + $0x40] sm:$0xff] (!%p927_p9)   ;;  %s5918_s9 = sld [smem:[#allocation28_spill]] (!%p927_p9)  ;;  %s5920_s6 = sld [smem:[#allocation30_spill]] (!%p927_p9)  ;;  %vm4039_vm12 = vcmask (!%p927_p9), 122880  }
  0x59   : > { %s1010_s28 = scalar_select %p1009_p10, %s5351_s0, 1 }
  0x5a   : > { %s5921_s12 = sld [smem:[#allocation31_spill]] }
  0x5b   : > { %s4383_s2 = sshll.u32 %s1010_s28, 4  ;;  %v1319_v50 = vld [vmem:[#allocation2] sm:$0xff]  ;;  %s5906_s28 = sld [smem:[#allocation15_spill]] }
  0x5c   : > { %s1013_s30 = scalar_lea.vmem %s5901_s5, %s4383_s2  ;;  %s5907_s2 = sld [smem:[#allocation17_spill]] }
  0x5d   : > { %v5387_v2 = vld [vmem:[%s1013_s30] sm:$0xff]  ;;  %v5389_v3 = vld [vmem:[%s1013_s30 + $0x8] sm:$0xff]  ;;  %s5908_s30 = sld [smem:[#allocation18_spill]]  ;;  %s5916_s5 = sld [smem:[#allocation24_spill]] }
  0x5e   : > { %v5394_v5 = vpack.c.bf16 %v5389_v3, %v5387_v2 }
  0x60   : > { %4511 = vmatpush3.bf16.msra.mxu0 %v5394_v5 }
  0x61   : > { %4522 = vmatprep.subr.bf16.mxu0 %v5152_v1 }
  0x63   : > { %4513 = vmatmul.mubr.msk.bf16.vlgmr.msra.gmra.mrb[0].mxu0 %vm1027_vm1, %v4929_v4  ;;  %v4945_v4 = vld [vmem:[%s5190_s25 + $0x50] sm:$0xff]  }
  0x64   : > { %4524 = vmatprep.mubr.msk.bf16.mxu0 %vm5153_vm0, %v5152_v1 }
 0x136   : > { %v1065_v6 = vpop.f32.mrb[0].mxu0 }
 0x137   : > { %v1072_v7 = vmul.f32 0.2, %v1065_v6  ;;  %v4514_v8 = vpop.f32.mrb[1].mxu0 }
 0x138   : > { %v1068_v9 = vpop.f32.mrb[2].mxu0  ;;  %v4946_v8 = vld [vmem:[%s5190_s25 + $0x48] sm:$0xff]  }
 0x139   : > { %v1073_v10 = vmul.f32 0.2, %v1068_v9  ;;  %v4515_v11 = vpop.f32.mrb[3].mxu0  ;;  %v5402_v12 = vsub.f32 %v5387_v2, %v1072_v7  ;;  %v4947_v9 = vld [vmem:[%s5190_s25 + $0x58] sm:$0xff]  }
 0x13b   : > { %v5405_v13 = vsub.f32 %v5389_v3, %v1073_v10 }
 0x13d   : > { %v1076_v14 = vpack.c.bf16 %v5405_v13, %v5402_v12 }
 0x13f   : > { %4517 = vmatpush3.bf16.msra.mxu1 %v1076_v14  ;;  %4523 = vmatpush3.bf16.msra.mxu0 %v1076_v14 }
 0x140   : > { %4528 = vmatprep.subr.bf16.mxu0 %v5152_v1  ;;  %4544 = vmatprep.subr.bf16.mxu1 %v5152_v1 }
 0x142   : > { %4525 = vmatmul.mubr.msk.bf16.vlgmr.msra.gmra.mrb[4].mxu0 %vm1027_vm1, %v4930_v15  ;;  %4519 = vmatmul.mubr.msk.bf16.vlgmr.msra.gmra.mrb[0].mxu1 %vm1027_vm1, %v4931_v16  ;;  %v4948_v16 = vld [vmem:[%s5190_s25 + $0x60] sm:$0xff]  }
 0x143   : > { %4529 = vmatpush3.bf16.msra.mxu0 %v4932_v17  ;;  %4532 = vmatprep.mubr.msk.bf16.mxu0 %vm5153_vm0, %v5152_v1  ;;  %v4949_v17 = vld [vmem:[%s5190_s25 + $0x70] sm:$0xff]  }
 0x144   : > { %4530 = vmatprep.subr.bf16.mxu0 %v5152_v1  ;;  %4548 = vmatprep.mubr.msk.bf16.mxu1 %vm5153_vm0, %v5152_v1 }
 0x145   : > { %4545 = vmatpush3.bf16.msra.mxu1 %v4936_v31 }
 0x146   : > { %4546 = vmatprep.subr.bf16.mxu1 %v5152_v1 }
 0x147   : > { %4531 = vmatpush3.bf16.msra.mxu0 %v4933_v18 }
 0x148   : > { %4536 = vmatprep.subr.bf16.mxu0 %v5152_v1 }
 0x149   : > { %4547 = vmatpush3.bf16.msra.mxu1 %v4938_v33 }
 0x14a   : > { %4560 = vmatprep.subr.bf16.mxu1 %v5152_v1 }
 0x215   : > { %v1178_v19 = vpop.f32.mrb[4].mxu0  ;;  %v1121_v20 = vpop.f32.mrb[0].mxu1 }
 0x216   : > { %v4526_v21 = vpop.f32.mrb[5].mxu0  ;;  %v4520_v22 = vpop.f32.mrb[1].mxu1 }
 0x217   : > { %v1181_v23 = vpop.f32.mrb[6].mxu0  ;;  %v1124_v25 = vpop.f32.mrb[2].mxu1  ;;  %v4951_v21 = vld [vmem:[%s5190_s25 + $0x78] sm:$0xff]  }
 0x218   : > { %v1185_v26 = vpack.c.bf16 %v1181_v23, %v1178_v19  ;;  %v4527_v27 = vpop.f32.mrb[7].mxu0  ;;  %v1128_v28 = vpack.c.bf16 %v1124_v25, %v1121_v20  ;;  %v4521_v29 = vpop.f32.mrb[3].mxu1  ;;  %v4950_v20 = vld [vmem:[%s5190_s25 + $0x68] sm:$0xff]  }
 0x219   : > { %v4953_v29 = vld [vmem:[%s5190_s25 + $0x88] sm:$0xff]  }
 0x21a   : > { %4533 = vmatmul.mubr.msk.bf16.vlgmr.msra.gmra.mrb[8].mxu0 %vm1203_vm2, %v1185_v26  ;;  %v4952_v26 = vld [vmem:[%s5190_s25 + $0x80] sm:$0xff]  }
 0x21b   : > { %4537 = vmatpush3.bf16.msra.mxu0 %v4934_v24  ;;  %4540 = vmatprep.mubr.msk.bf16.mxu0 %vm5153_vm0, %v5152_v1 }
 0x21c   : > { %4538 = vmatprep.subr.bf16.mxu0 %v5152_v1 }
 0x21f   : > { %4539 = vmatpush3.bf16.msra.mxu0 %v4935_v30 }
 0x220   : > { %4552 = vmatprep.subr.bf16.mxu0 %v5152_v1 }
 0x222   : > { %4541 = vmatmul.mubr.msk.bf16.vlgmr.msra.gmra.mrb[12].mxu0 %vm1203_vm2, %v1128_v28 }
 0x223   : > { %4556 = vmatprep.mubr.msk.bf16.mxu0 %vm5153_vm0, %v5152_v1  ;;  %4553 = vmatpush3.bf16.msra.mxu0 %v4937_v32 }
 0x224   : > { %4554 = vmatprep.subr.bf16.mxu0 %v5152_v1 }
 0x227   : > { %4555 = vmatpush3.bf16.msra.mxu0 %v4939_v34 }
 0x228   : > { %4568 = vmatprep.subr.bf16.mxu0 %v5152_v1 }
 0x2ed   : > { %v1241_v35 = vpop.f32.mrb[8].mxu0 }
 0x2ee   : > { %v4534_v36 = vpop.f32.mrb[9].mxu0 }
 0x2ef   : > { %v1244_v37 = vpop.f32.mrb[10].mxu0 }
 0x2f0   : > { %v4535_v38 = vpop.f32.mrb[11].mxu0 }
 0x2f5   : > { %v1297_v39 = vpop.f32.mrb[12].mxu0 }
 0x2f6   : > { %v1298_v41 = vadd.f32 %v1297_v39, %v1241_v35  ;;  %v4542_v42 = vpop.f32.mrb[13].mxu0 }
 0x2f7   : > { %v1300_v43 = vpop.f32.mrb[14].mxu0 }
 0x2f8   : > { %v1311_v44 = vadd.f32 %v4166_v40, %v1298_v41  ;;  %v1301_v45 = vadd.f32 %v1300_v43, %v1244_v37  ;;  %v4543_v46 = vpop.f32.mrb[15].mxu0 }
 0x2fa   : > { %5005 = vtanh.f32 %v1311_v44  ;;  %v1312_v47 = vadd.f32 %v4166_v40, %v1301_v45 }
 0x2fc   : > { %5007 = vtanh.f32 %v1312_v47 }
 0x304   : > { %v5444_v48 = vpop.eup %5005 }
 0x305   : > { %1316 = vst.msk [vmem:[#allocation2 + $0x8] sm:$0xff] %vm1203_vm2, %v5444_v48 }
 0x306   : > { %v5448_v49 = vpop.eup %5007 }
 0x307   : > { %1318 = vst.msk [vmem:[#allocation2 + $0x10] sm:$0x1] %vm1317_vm3, %v5448_v49 }
 0x30c   : > { %v1326_v53 = vld [vmem:[#allocation2 + $0x1] sm:$0xff]  ;;  %v1327_v54 = vld [vmem:[#allocation2 + $0x9] sm:$0x1]  ;;  %v1447_v61 = vld [vmem:[#allocation2 + $0xa] sm:$0x1] }
 0x30d   : > { %v1320_v55 = vld [vmem:[#allocation2 + $0x8] sm:$0x1]  ;;  %v1328_v56 = vpack.c.bf16 %v1327_v54, %v1326_v53  ;;  %v1513_v63 = vld [vmem:[#allocation2 + $0xb] sm:$0x1]  ;;  %v1579_v11 = vld [vmem:[#allocation2 + $0xc] sm:$0x1] }
 0x30e   : > { %v1321_v57 = vpack.c.bf16 %v1320_v55, %v1319_v50  ;;  %v1446_v60 = vld [vmem:[#allocation2 + $0x2] sm:$0xff]  ;;  %v1645_v15 = vld [vmem:[#allocation2 + $0xd] sm:$0x1]  ;;  %v1711_v23 = vld [vmem:[#allocation2 + $0xe] sm:$0x1] }
 0x30f   : > { %4549 = vmatmul.mubr.msk.bf16.vlgmr.msra.gmra.mrb[4].mxu1 %vm1203_vm2, %v1328_v56  ;;  %v1512_v62 = vld [vmem:[#allocation2 + $0x3] sm:$0xff]  ;;  %v1448_v6 = vpack.c.bf16 %v1447_v61, %v1446_v60  ;;  %v1777_v25 = vld [vmem:[#allocation2 + $0xf] sm:$0x1]  ;;  %v1843_v30 = vld [vmem:[#allocation2 + $0x10] sm:$0x1] }
 0x310   : > { %4557 = vmatmul.mubr.msk.bf16.vlgmr.msra.gmra.mrb[16].mxu0 %vm1203_vm2, %v1321_v57  ;;  %4561 = vmatpush3.bf16.msra.mxu1 %v4940_v51  ;;  %v1514_v7 = vpack.c.bf16 %v1513_v63, %v1512_v62  ;;  %v1578_v10 = vld [vmem:[#allocation2 + $0x4] sm:$0xff] }
 0x311   : > { %4569 = vmatpush3.bf16.msra.mxu0 %v4941_v52  ;;  %4562 = vmatprep.subr.bf16.mxu1 %v5152_v1  ;;  %v1644_v14 = vld [vmem:[#allocation2 + $0x5] sm:$0xff]  ;;  %v1580_v18 = vpack.c.bf16 %v1579_v11, %v1578_v10 }
 0x312   : > { %4570 = vmatprep.subr.bf16.mxu0 %v5152_v1  ;;  %4564 = vmatprep.mubr.msk.bf16.mxu1 %vm5153_vm0, %v5152_v1  ;;  %v1646_v19 = vpack.c.bf16 %v1645_v15, %v1644_v14  ;;  %v1710_v22 = vld [vmem:[#allocation2 + $0x6] sm:$0xff] }
 0x313   : > { %4572 = vmatprep.mubr.msk.bf16.mxu0 %vm5153_vm0, %v5152_v1  ;;  %v1776_v24 = vld [vmem:[#allocation2 + $0x7] sm:$0xff]  ;;  %v1712_v27 = vpack.c.bf16 %v1711_v23, %v1710_v22 }
 0x314   : > { %4563 = vmatpush3.bf16.msra.mxu1 %v4942_v58  ;;  %v1778_v28 = vpack.c.bf16 %v1777_v25, %v1776_v24  ;;  %v1842_v31 = vld [vmem:[#allocation2 + $0x8] sm:$0xff]  ;;  %v4226_v24 = vld [vmem:[%s5195_s29] ss:$0 sm:$0xff] }
 0x315   : > { %4571 = vmatpush3.bf16.msra.mxu0 %v4943_v59  ;;  %4576 = vmatprep.subr.bf16.mxu1 %v5152_v1  ;;  %v1844_v32 = vpack.c.bf16 %v1843_v30, %v1842_v31 }
 0x316   : > { %4584 = vmatprep.subr.bf16.mxu0 %v5152_v1 }
 0x317   : > { %4565 = vmatmul.mubr.msk.bf16.vlgmr.msra.gmra.mrb[8].mxu1 %vm1203_vm2, %v1448_v6 }
 0x318   : > { %4573 = vmatmul.mubr.msk.bf16.vlgmr.msra.gmra.mrb[20].mxu0 %vm1203_vm2, %v1514_v7  ;;  %4577 = vmatpush3.bf16.msra.mxu1 %v4944_v0 }
 0x319   : > { %4585 = vmatpush3.bf16.msra.mxu0 %v4945_v4  ;;  %4578 = vmatprep.subr.bf16.mxu1 %v5152_v1 }
 0x31a   : > { %4586 = vmatprep.subr.bf16.mxu0 %v5152_v1  ;;  %4580 = vmatprep.mubr.msk.bf16.mxu1 %vm5153_vm0, %v5152_v1 }
 0x31b   : > { %4588 = vmatprep.mubr.msk.bf16.mxu0 %vm5153_vm0, %v5152_v1 }
 0x31c   : > { %4579 = vmatpush3.bf16.msra.mxu1 %v4946_v8 }
 0x31d   : > { %4587 = vmatpush3.bf16.msra.mxu0 %v4947_v9  ;;  %4592 = vmatprep.subr.bf16.mxu1 %v5152_v1 }
 0x31e   : > { %4600 = vmatprep.subr.bf16.mxu0 %v5152_v1 }
 0x31f   : > { %4581 = vmatmul.mubr.msk.bf16.vlgmr.msra.gmra.mrb[12].mxu1 %vm1203_vm2, %v1580_v18 }
 0x320   : > { %4589 = vmatmul.mubr.msk.bf16.vlgmr.msra.gmra.mrb[24].mxu0 %vm1203_vm2, %v1646_v19  ;;  %4593 = vmatpush3.bf16.msra.mxu1 %v4948_v16 }
 0x321   : > { %4601 = vmatpush3.bf16.msra.mxu0 %v4949_v17  ;;  %4594 = vmatprep.subr.bf16.mxu1 %v5152_v1 }
 0x322   : > { %4602 = vmatprep.subr.bf16.mxu0 %v5152_v1  ;;  %4596 = vmatprep.mubr.msk.bf16.mxu1 %vm5153_vm0, %v5152_v1 }
 0x323   : > { %4604 = vmatprep.mubr.msk.bf16.mxu0 %vm5153_vm0, %v5152_v1 }
 0x324   : > { %4595 = vmatpush3.bf16.msra.mxu1 %v4950_v20 }
 0x325   : > { %4603 = vmatpush3.bf16.msra.mxu0 %v4951_v21  ;;  %4608 = vmatprep.subr.bf16.mxu1 %v5152_v1 }
 0x326   : > { %4616 = vmatprep.subr.bf16.mxu0 %v5152_v1 }
 0x327   : > { %4597 = vmatmul.mubr.msk.bf16.vlgmr.msra.gmra.mrb[16].mxu1 %vm1203_vm2, %v1712_v27 }
 0x328   : > { %4605 = vmatmul.mubr.msk.bf16.vlgmr.msra.gmra.mrb[28].mxu0 %vm1203_vm2, %v1778_v28  ;;  %4609 = vmatpush3.bf16.msra.mxu1 %v4952_v26 }
 0x329   : > { %4612 = vmatprep.mubr.msk.bf16.mxu1 %vm5153_vm0, %v5152_v1  ;;  %4610 = vmatprep.subr.bf16.mxu1 %v5152_v1 }
 0x32a   : > { %4620 = vmatprep.mubr.msk.bf16.mxu0 %vm5153_vm0, %v5152_v1 }
 0x32c   : > { %4611 = vmatpush3.bf16.msra.mxu1 %v4953_v29 }
 0x32d   : > { %4624 = vmatprep.subr.bf16.mxu1 %v5152_v1 }
 0x32f   : > { %4613 = vmatmul.mubr.msk.bf16.vlgmr.msra.gmra.mrb[20].mxu1 %vm1203_vm2, %v1844_v32 }
 0x330   : > { %4628 = vmatprep.mubr.msk.bf16.mxu1 %vm5153_vm0, %v5152_v1 }
 0x3e2   : > { %v1383_v33 = vpop.f32.mrb[4].mxu1 }
 0x3e3   : > { %v1439_v34 = vpop.f32.mrb[16].mxu0  ;;  %v4550_v36 = vpop.f32.mrb[5].mxu1 }
 0x3e4   : > { %v1440_v35 = vadd.f32 %v1439_v34, %v1383_v33  ;;  %v4558_v37 = vpop.f32.mrb[17].mxu0  ;;  %v1386_v38 = vpop.f32.mrb[6].mxu1 }
 0x3e5   : > { %v1442_v39 = vpop.f32.mrb[18].mxu0  ;;  %v4551_v41 = vpop.f32.mrb[7].mxu1 }
 0x3e6   : > { %v1443_v40 = vadd.f32 %v1442_v39, %v1386_v38  ;;  %v4559_v42 = vpop.f32.mrb[19].mxu0 }
 0x3ea   : > { %v1503_v43 = vpop.f32.mrb[8].mxu1 }
 0x3eb   : > { %v1569_v44 = vpop.f32.mrb[20].mxu0  ;;  %v1510_v45 = vadd.f32 %v1503_v43, %v1440_v35  ;;  %v4566_v46 = vpop.f32.mrb[9].mxu1 }
 0x3ec   : > { %v4574_v47 = vpop.f32.mrb[21].mxu0  ;;  %v1506_v50 = vpop.f32.mrb[10].mxu1  ;;  %v4954_v46 = vld [vmem:[%s5898_s3] sm:$0xff]  }
 0x3ed   : > { %v1572_v51 = vpop.f32.mrb[22].mxu0  ;;  %v1576_v52 = vadd.f32 %v1569_v44, %v1510_v45  ;;  %v1511_v53 = vadd.f32 %v1506_v50, %v1443_v40  ;;  %v4567_v54 = vpop.f32.mrb[11].mxu1  ;;  %v4955_v47 = vld [vmem:[%s5898_s3 + $0x10] sm:$0xff]   ;;  %4617 = vmatpush3.bf16.msra.mxu0 %v4954_v46  ;;  %v4956_v50 = vld [vmem:[%s5898_s3 + $0x8] sm:$0xff]  }
 0x3ee   : > { %v4575_v55 = vpop.f32.mrb[23].mxu0  ;;  %4625 = vmatpush3.bf16.msra.mxu1 %v4955_v47  ;;  %4618 = vmatprep.subr.bf16.mxu0 %v5152_v1 }
 0x3ef   : > { %v1577_v56 = vadd.f32 %v1572_v51, %v1511_v53  ;;  %v4957_v51 = vld [vmem:[%s5898_s3 + $0x18] sm:$0xff]   ;;  %4626 = vmatprep.subr.bf16.mxu1 %v5152_v1  ;;  %s5913_s3 = sld [smem:[#allocation25_spill]] }
 0x3f1   : > { %4619 = vmatpush3.bf16.msra.mxu0 %v4956_v50 }
 0x3f2   : > { %v1635_v57 = vpop.f32.mrb[12].mxu1  ;;  %4627 = vmatpush3.bf16.msra.mxu1 %v4957_v51  ;;  %4632 = vmatprep.subr.bf16.mxu0 %v5152_v1 }
 0x3f3   : > { %v1701_v58 = vpop.f32.mrb[24].mxu0  ;;  %v1642_v59 = vadd.f32 %v1635_v57, %v1576_v52  ;;  %v4582_v60 = vpop.f32.mrb[13].mxu1  ;;  %4638 = vmatprep.subr.bf16.mxu1 %v5152_v1 }
 0x3f4   : > { %v4590_v61 = vpop.f32.mrb[25].mxu0  ;;  %v1638_v62 = vpop.f32.mrb[14].mxu1  ;;  %v5523_v60 = vld [vmem:[%s5260_s20] ss:$0 sm:$0xff] }
 0x3f5   : > { %v1704_v63 = vpop.f32.mrb[26].mxu0  ;;  %v1708_v0 = vadd.f32 %v1701_v58, %v1642_v59  ;;  %v1643_v4 = vadd.f32 %v1638_v62, %v1577_v56  ;;  %v4583_v6 = vpop.f32.mrb[15].mxu1 }
 0x3f6   : > { %v4591_v7 = vpop.f32.mrb[27].mxu0 }
 0x3f7   : > { %v1709_v8 = vadd.f32 %v1704_v63, %v1643_v4 }
 0x3fa   : > { %v1767_v9 = vpop.f32.mrb[16].mxu1 }
 0x3fb   : > { %v1833_v10 = vpop.f32.mrb[28].mxu0  ;;  %v1774_v11 = vadd.f32 %v1767_v9, %v1708_v0  ;;  %v4598_v14 = vpop.f32.mrb[17].mxu1  ;;  %v5527_v0 = vld [vmem:[%s5265_s27] ss:$0 sm:$0xff] }
 0x3fc   : > { %v4606_v15 = vpop.f32.mrb[29].mxu0  ;;  %v1770_v16 = vpop.f32.mrb[18].mxu1  ;;  %v4229_v9 = vld [vmem:[%s5903_s8] ss:$0 sm:$0xff]  ;;  %s5917_s8 = sld [smem:[#allocation26_spill]] }
 0x3fd   : > { %v1836_v17 = vpop.f32.mrb[30].mxu0  ;;  %v1840_v18 = vadd.f32 %v1833_v10, %v1774_v11  ;;  %v1775_v19 = vadd.f32 %v1770_v16, %v1709_v8  ;;  %v4599_v20 = vpop.f32.mrb[19].mxu1 }
 0x3fe   : > { %v4607_v21 = vpop.f32.mrb[31].mxu0 }
 0x3ff   : > { %v1841_v22 = vadd.f32 %v1836_v17, %v1775_v19 }
 0x402   : > { %v1899_v23 = vpop.f32.mrb[20].mxu1 }
 0x403   : > { %v1906_v25 = vadd.f32 %v1899_v23, %v1840_v18  ;;  %v4614_v26 = vpop.f32.mrb[21].mxu1 }
 0x404   : > { %v1902_v27 = vpop.f32.mrb[22].mxu1 }
 0x405   : > { %v1915_v28 = vadd.f32 %v4226_v24, %v1906_v25  ;;  %v1907_v29 = vadd.f32 %v1902_v27, %v1841_v22  ;;  %v4615_v30 = vpop.f32.mrb[23].mxu1 }
 0x407   : > { %5009 = vtanh.f32 %v1915_v28  ;;  %v1916_v31 = vadd.f32 %v4226_v24, %v1907_v29  ;;  %v5154_v24 = vmov 65535  }
 0x408   : > { %v2112_v25 = vsel %vm2110_vm4, 4294967295, %v5154_v24 }
 0x409   : > { %5011 = vtanh.f32 %v1916_v31  ;;  %v2113_v29 = vsel %vm2111_vm5, %v2112_v25, 0 }
 0x411   : > { %v5010_v32 = vpop.eup %5009 }
 0x412   : > { %v1919_v33 = vadd.f32 %v5010_v32, %v5444_v48 }
 0x413   : > { %v5012_v34 = vpop.eup %5011 }
 0x414   : > { %v1921_v35 = vsel %vm1203_vm2, %v1919_v33, 0.0  ;;  %v1920_v36 = vadd.f32 %v5012_v34, %v5448_v49 }
 0x415   : > { %1922 = vadd.xlane.f32.xlu0 %v1921_v35  ;;  %v4959_v35 = vld [vmem:[%s5896_s14] sm:$0xff]  }
 0x416   : > { %v1924_v37 = vsel %vm1317_vm3, %v1920_v36, 0.0 }
 0x419   : > { %1925 = vadd.xlane.f32.xlu0 %v1924_v37  ;;  %v4960_v37 = vld [vmem:[%s5215_s19] sm:$0xff]  }
 0x4a2   : > { %v1923_v38 = vpop.xlane.xlu0 %1922 }
 0x4a3   : > { %v1928_v39 = vmul.f32 0.03125, %v1923_v38 }
 0x4a5   : > { %v1930_v40 = vsub.f32 %v1919_v33, %v1928_v39 }
 0x4a6   : > { %v1926_v41 = vpop.xlane.xlu0 %1925 }
 0x4a7   : > { %v1929_v42 = vmul.f32 0.03125, %v1926_v41  ;;  %v1932_v43 = vmul.f32 %v1930_v40, %v1930_v40 }
 0x4a9   : > { %v1931_v48 = vsub.f32 %v1920_v36, %v1929_v42  ;;  %v1934_v44 = vsel %vm1203_vm2, %v1932_v43, 0.0  ;;  %v4958_v36 = vld [vmem:[%s5896_s14 + $0x8] sm:$0xff]  }
 0x4aa   : > { %1935 = vadd.xlane.f32.xlu1 %v1934_v44 }
 0x4ab   : > { %v1933_v45 = vmul.f32 %v1931_v48, %v1931_v48 }
 0x4ad   : > { %v1937_v49 = vsel %vm1317_vm3, %v1933_v45, 0.0 }
 0x4ae   : > { %1938 = vadd.xlane.f32.xlu1 %v1937_v49 }
 0x537   : > { %v1936_v52 = vpop.xlane.xlu1 %1935 }
 0x538   : > { %v1940_v53 = vmul.f32 0.03125, %v1936_v52 }
 0x53a   : > { %v1942_v54 = vadd.f32 1e-05, %v1940_v53 }
 0x53b   : > { %v1939_v55 = vpop.xlane.xlu1 %1938 }
 0x53c   : > { %5013 = vrsqrt.f32 %v1942_v54  ;;  %v1941_v56 = vmul.f32 0.03125, %v1939_v55 }
 0x53e   : > { %v1943_v57 = vadd.f32 1e-05, %v1941_v56  ;;  %v2298_v56 = vld [vmem:[%s5220_s24] sm:$0x7] }
 0x540   : > { %5015 = vrsqrt.f32 %v1943_v57  ;;  %v4249_v57 = vld [vmem:[%s5220_s24 + $0x4] sm:$0x7] }
 0x546   : > { %v5014_v58 = vpop.eup %5013 }
 0x547   : > { %v1946_v59 = vmul.f32 %v5014_v58, %v1930_v40  ;;  %v4961_v58 = vld [vmem:[%s5904_s18 + $0x10] sm:$0xff]  }
 0x549   : > { %v1954_v62 = vmul.f32 %v5523_v60, %v1946_v59  ;;  %v4962_v59 = vld [vmem:[%s5904_s18] sm:$0xff]  }
 0x54a   : > { %v5016_v61 = vpop.eup %5015 }
 0x54b   : > { %v1947_v63 = vmul.f32 %v5016_v61, %v1931_v48  ;;  %v1962_v6 = vadd.f32 %v5527_v0, %v1954_v62 }
 0x54d   : > { %v1955_v4 = vmul.f32 %v5523_v60, %v1947_v63 }
 0x54f   : > { %v1963_v7 = vadd.f32 %v5527_v0, %v1955_v4 }
 0x551   : > { %v1964_v8 = vpack.c.bf16 %v1963_v7, %v1962_v6 }
 0x553   : > { %4621 = vmatmul.mubr.msk.bf16.vlgmr.msra.gmra.mrb[32].mxu0 %vm1203_vm2, %v1964_v8  ;;  %4629 = vmatmul.mubr.msk.bf16.vlgmr.msra.gmra.mrb[24].mxu1 %vm1203_vm2, %v1964_v8 }
 0x554   : > { %4634 = vmatprep.mubr.msk.bf16.mxu0 %vm5153_vm0, %v5152_v1  ;;  %4640 = vmatprep.mubr.msk.bf16.mxu1 %vm5153_vm0, %v5152_v1 }
 0x626   : > { %v2025_v10 = vpop.f32.mrb[32].mxu0  ;;  %v2088_v11 = vpop.f32.mrb[24].mxu1 }
 0x627   : > { %v2026_v14 = vadd.f32 %v4229_v9, %v2025_v10  ;;  %v2089_v15 = vadd.f32 %v4229_v9, %v2088_v11  ;;  %v4622_v16 = vpop.f32.mrb[33].mxu0  ;;  %v4630_v17 = vpop.f32.mrb[25].mxu1 }
 0x628   : > { %v2028_v18 = vpop.f32.mrb[34].mxu0  ;;  %v2091_v19 = vpop.f32.mrb[26].mxu1  ;;  %v4965_v16 = vld [vmem:[%s5904_s18 + $0x20] sm:$0xff]   ;;  %v4966_v17 = vld [vmem:[%s5904_s18 + $0x28] sm:$0xff]  }
 0x629   : > { %5017 = vtanh.f32 %v2026_v14  ;;  %v2029_v20 = vadd.f32 %v4229_v9, %v2028_v18  ;;  %v2092_v21 = vadd.f32 %v4229_v9, %v2091_v19  ;;  %v4623_v22 = vpop.f32.mrb[35].mxu0  ;;  %v4631_v23 = vpop.f32.mrb[27].mxu1  ;;  %v4261_v14 = vld [vmem:[%s5220_s24 + $0x8] sm:$0x7] }
 0x62a   : > { %5019 = vtanh.f32 %v2089_v15  ;;  %v4270_v15 = vld [vmem:[%s5220_s24 + $0xc] sm:$0x7] }
 0x62b   : > { %5021 = vtanh.f32 %v2029_v20 }
 0x62c   : > { %5023 = vtanh.f32 %v2092_v21 }
 0x633   : > { %v5018_v26 = vpop.eup %5017 }
 0x634   : > { %v5020_v27 = vpop.eup %5019 }
 0x635   : > { %v5022_v28 = vpop.eup %5021 }
 0x636   : > { %v5024_v30 = vpop.eup %5023  ;;  %v2036_v31 = vpack.c.bf16 %v5022_v28, %v5018_v26 }
 0x637   : > { %v2100_v32 = vpack.c.bf16 %v5024_v30, %v5020_v27 }
 0x638   : > { %v2167_v33 = vand.u32 %v2113_v29, %v2036_v31 }
 0x639   : > { %v2115_v34 = vand.u32 %v2113_v29, %v2100_v32  ;;  %v4967_v29 = vld [vmem:[%s5904_s18 + $0x30] sm:$0xff]  }
 0x63a   : > { %4639 = vmatpush3.bf16.msra.mxu1 %v2167_v33 }
 0x63b   : > { %4633 = vmatpush3.bf16.msra.mxu0 %v2115_v34  ;;  %4650 = vmatprep.subr.bf16.mxu1 %v5152_v1  ;;  %v4968_v34 = vld [vmem:[%s5904_s18 + $0x38] sm:$0xff]  }
 0x63c   : > { %4644 = vmatprep.subr.bf16.mxu0 %v5152_v1 }
 0x63d   : > { %4641 = vmatmul.mubr.msk.bf16.vlgmr.msra.gmra.mrb[28].mxu1 %vm2106_vm6, %v4959_v35 }
 0x63e   : > { %4635 = vmatmul.mubr.msk.bf16.vlgmr.msra.gmra.mrb[36].mxu0 %vm2106_vm6, %v4958_v36  ;;  %4652 = vmatprep.mubr.msk.bf16.mxu1 %vm5153_vm0, %v5152_v1 }
 0x63f   : > { %4645 = vmatpush3.bf16.msra.mxu0 %v5394_v5  ;;  %4646 = vmatprep.mubr.msk.bf16.mxu0 %vm5153_vm0, %v5152_v1 }
 0x640   : > { %4656 = vmatprep.subr.bf16.mxu0 %v5152_v1 }
 0x646   : > { %4647 = vmatmul.mubr.msk.bf16.vlgmr.msra.gmra.mrb[40].mxu0 %vm1027_vm1, %v4960_v37 }
 0x647   : > { %4658 = vmatprep.mubr.msk.bf16.mxu0 %vm5153_vm0, %v5152_v1 }
 0x710   : > { %v2203_v38 = vpop.f32.mrb[28].mxu1 }
 0x711   : > { %v2151_v39 = vpop.f32.mrb[36].mxu0  ;;  %v4642_v40 = vpop.f32.mrb[29].mxu1 }
 0x712   : > { %v5554_v41 = vadd.f32 %v2203_v38, %v2151_v39  ;;  %v4636_v42 = vpop.f32.mrb[37].mxu0  ;;  %v2206_v43 = vpop.f32.mrb[30].mxu1  ;;  %v4969_v40 = vld [vmem:[%s5905_s22 + $0x10] sm:$0xff]  }
 0x713   : > { %v2154_v5 = vpop.f32.mrb[38].mxu0  ;;  %v4643_v48 = vpop.f32.mrb[31].mxu1  ;;  %v4970_v42 = vld [vmem:[%s5905_s22] sm:$0xff]  }
 0x714   : > { %v5556_v44 = vadd.f32 %v2206_v43, %v2154_v5  ;;  %v4637_v45 = vpop.f32.mrb[39].mxu0  ;;  %v4971_v43 = vld [vmem:[%s5905_s22 + $0x18] sm:$0xff]   ;;  %v4972_v5 = vld [vmem:[%s5905_s22 + $0x8] sm:$0xff]  }
 0x719   : > { %v2286_v49 = vpop.f32.mrb[40].mxu0 }
 0x71a   : > { %v2293_v46 = vmul.f32 0.14285715, %v2286_v49  ;;  %v4648_v47 = vpop.f32.mrb[41].mxu0 }
 0x71b   : > { %v2289_v50 = vpop.f32.mrb[42].mxu0 }
 0x71c   : > { %v2294_v51 = vmul.f32 0.14285715, %v2289_v50  ;;  %v4649_v52 = vpop.f32.mrb[43].mxu0  ;;  %v5559_v53 = vsub.f32 %v5387_v2, %v2293_v46  ;;  %v4963_v2 = vld [vmem:[%s5904_s18 + $0x18] sm:$0xff]  }
 0x71e   : > { %v5562_v54 = vsub.f32 %v5389_v3, %v2294_v51  ;;  %v4964_v3 = vld [vmem:[%s5904_s18 + $0x8] sm:$0xff]   ;;  %v4279_v51 = vld [vmem:[%s5906_s28] ss:$0 sm:$0xff]  ;;  %s5909_s28 = sld [smem:[#allocation19_spill]] }
 0x720   : > { %v2297_v55 = vpack.c.bf16 %v5562_v54, %v5559_v53 }
 0x722   : > { %4651 = vmatpush3.bf16.msra.mxu1 %v2297_v55  ;;  %4657 = vmatpush3.bf16.msra.mxu0 %v2297_v55 }
 0x723   : > { %4662 = vmatprep.subr.bf16.mxu1 %v5152_v1  ;;  %4670 = vmatprep.subr.bf16.mxu0 %v5152_v1 }
 0x725   : > { %4653 = vmatmul.mubr.msk.bf16.vlgmr.msra.gmra.mrb[32].mxu1 %vm1027_vm1, %v2298_v56  ;;  %4659 = vmatmul.mubr.msk.bf16.vlgmr.msra.gmra.mrb[44].mxu0 %vm1027_vm1, %v4249_v57 }
 0x726   : > { %4663 = vmatpush3.bf16.msra.mxu1 %v4961_v58  ;;  %4671 = vmatpush3.bf16.msra.mxu0 %v4962_v59 }
 0x727   : > { %4664 = vmatprep.subr.bf16.mxu1 %v5152_v1  ;;  %4672 = vmatprep.subr.bf16.mxu0 %v5152_v1 }
 0x728   : > { %4666 = vmatprep.mubr.msk.bf16.mxu1 %vm5153_vm0, %v5152_v1  ;;  %4674 = vmatprep.mubr.msk.bf16.mxu0 %vm5153_vm0, %v5152_v1 }
 0x72a   : > { %4665 = vmatpush3.bf16.msra.mxu1 %v4963_v2  ;;  %4673 = vmatpush3.bf16.msra.mxu0 %v4964_v3  ;;  %v4973_v2 = vld [vmem:[%s5905_s22 + $0x20] sm:$0xff]  }
 0x72b   : > { %4678 = vmatprep.subr.bf16.mxu1 %v5152_v1  ;;  %4684 = vmatprep.subr.bf16.mxu0 %v5152_v1 }
 0x7f8   : > { %v2336_v61 = vpop.f32.mrb[32].mxu1  ;;  %v2386_v62 = vpop.f32.mrb[44].mxu0 }
 0x7f9   : > { %v2342_v63 = vpack.c.bf16 %v2336_v61, %v2336_v61  ;;  %v2392_v4 = vpack.c.bf16 %v2386_v62, %v2386_v62  ;;  %v4660_v6 = vpop.f32.mrb[45].mxu0  ;;  %v4654_v7 = vpop.f32.mrb[33].mxu1  ;;  %v4974_v62 = vld [vmem:[%s5905_s22 + $0x30] sm:$0xff]  }
 0x7fa   : > { %v2389_v8 = vpop.f32.mrb[46].mxu0  ;;  %v2339_v9 = vpop.f32.mrb[34].mxu1  ;;  %v4975_v6 = vld [vmem:[%s5905_s22 + $0x28] sm:$0xff]   ;;  %v4976_v7 = vld [vmem:[%s5905_s22 + $0x38] sm:$0xff]  }
 0x7fb   : > { %v4661_v10 = vpop.f32.mrb[47].mxu0  ;;  %4667 = vmatmul.mubr.msk.bf16.vlgmr.msra.gmra.mrb[36].mxu1 %vm1203_vm2, %v2392_v4  ;;  %4675 = vmatmul.mubr.msk.bf16.vlgmr.msra.gmra.mrb[48].mxu0 %vm1203_vm2, %v2342_v63  ;;  %v4655_v11 = vpop.f32.mrb[35].mxu1 }
 0x7fc   : > { %4679 = vmatpush3.bf16.msra.mxu1 %v2297_v55  ;;  %4680 = vmatprep.mubr.msk.bf16.mxu1 %vm5153_vm0, %v5152_v1  ;;  %v4977_v10 = vld [vmem:[%s5905_s22 + $0x40] sm:$0xff]  }
 0x7fd   : > { %4692 = vmatprep.subr.bf16.mxu1 %v5152_v1  ;;  %4688 = vmatprep.mubr.msk.bf16.mxu0 %vm5153_vm0, %v5152_v1 }
 0x7fe   : > { %4685 = vmatpush3.bf16.msra.mxu0 %v4965_v16 }
 0x7ff   : > { %4686 = vmatprep.subr.bf16.mxu0 %v5152_v1 }
 0x802   : > { %4687 = vmatpush3.bf16.msra.mxu0 %v4966_v17 }
 0x803   : > { %4681 = vmatmul.mubr.msk.bf16.vlgmr.msra.gmra.mrb[40].mxu1 %vm1027_vm1, %v4261_v14  ;;  %4698 = vmatprep.subr.bf16.mxu0 %v5152_v1 }
 0x804   : > { %4693 = vmatpush3.bf16.msra.mxu1 %v2297_v55  ;;  %4694 = vmatprep.mubr.msk.bf16.mxu1 %vm5153_vm0, %v5152_v1 }
 0x805   : > { %4706 = vmatprep.subr.bf16.mxu1 %v5152_v1 }
 0x80b   : > { %4695 = vmatmul.mubr.msk.bf16.vlgmr.msra.gmra.mrb[44].mxu1 %vm1027_vm1, %v4270_v15  ;;  %v4978_v15 = vld [vmem:[%s5905_s22 + $0x48] sm:$0xff]  }
 0x80c   : > { %4710 = vmatprep.mubr.msk.bf16.mxu1 %vm5153_vm0, %v5152_v1  ;;  %4707 = vmatpush3.bf16.msra.mxu1 %v4969_v40 }
 0x80d   : > { %4708 = vmatprep.subr.bf16.mxu1 %v5152_v1 }
 0x810   : > { %4709 = vmatpush3.bf16.msra.mxu1 %v4971_v43 }
 0x811   : > { %4722 = vmatprep.subr.bf16.mxu1 %v5152_v1 }
 0x8ce   : > { %v2447_v18 = vpop.f32.mrb[36].mxu1  ;;  %v2502_v19 = vpop.f32.mrb[48].mxu0 }
 0x8cf   : > { %v2503_v20 = vadd.f32 %v2502_v19, %v2447_v18  ;;  %v4668_v21 = vpop.f32.mrb[37].mxu1  ;;  %v4676_v22 = vpop.f32.mrb[49].mxu0 }
 0x8d0   : > { %v2450_v23 = vpop.f32.mrb[38].mxu1  ;;  %v2505_v25 = vpop.f32.mrb[50].mxu0 }
 0x8d1   : > { %v4669_v26 = vpop.f32.mrb[39].mxu1  ;;  %v4677_v27 = vpop.f32.mrb[51].mxu0 }
 0x8d6   : > { %v2547_v28 = vpop.f32.mrb[40].mxu1 }
 0x8d7   : > { %v2553_v30 = vpack.c.bf16 %v2547_v28, %v2547_v28  ;;  %v4682_v31 = vpop.f32.mrb[41].mxu1 }
 0x8d8   : > { %v2550_v32 = vpop.f32.mrb[42].mxu1 }
 0x8d9   : > { %v4683_v33 = vpop.f32.mrb[43].mxu1  ;;  %4689 = vmatmul.mubr.msk.bf16.vlgmr.msra.gmra.mrb[52].mxu0 %vm1203_vm2, %v2553_v30 }
 0x8da   : > { %4699 = vmatpush3.bf16.msra.mxu0 %v4967_v29  ;;  %4702 = vmatprep.mubr.msk.bf16.mxu0 %vm5153_vm0, %v5152_v1 }
 0x8db   : > { %4700 = vmatprep.subr.bf16.mxu0 %v5152_v1 }
 0x8de   : > { %v2654_v35 = vpop.f32.mrb[44].mxu1  ;;  %4701 = vmatpush3.bf16.msra.mxu0 %v4968_v34 }
 0x8df   : > { %v2660_v36 = vpack.c.bf16 %v2654_v35, %v2654_v35  ;;  %v4696_v37 = vpop.f32.mrb[45].mxu1  ;;  %4714 = vmatprep.subr.bf16.mxu0 %v5152_v1 }
 0x8e0   : > { %v2657_v38 = vpop.f32.mrb[46].mxu1 }
 0x8e1   : > { %v4697_v39 = vpop.f32.mrb[47].mxu1  ;;  %4703 = vmatmul.mubr.msk.bf16.vlgmr.msra.gmra.mrb[56].mxu0 %vm1203_vm2, %v2660_v36 }
 0x8e2   : > { %4718 = vmatprep.mubr.msk.bf16.mxu0 %vm5153_vm0, %v5152_v1  ;;  %4715 = vmatpush3.bf16.msra.mxu0 %v4970_v42  ;;  %v4311_v39 = vld [vmem:[%s5907_s2] ss:$0 sm:$0xff]  ;;  %s5910_s2 = sld [smem:[#allocation20_spill]] }
 0x8e3   : > { %4716 = vmatprep.subr.bf16.mxu0 %v5152_v1 }
 0x8e6   : > { %4717 = vmatpush3.bf16.msra.mxu0 %v4972_v5 }
 0x8e7   : > { %4730 = vmatprep.subr.bf16.mxu0 %v5152_v1 }
 0x9ac   : > { %v2608_v48 = vpop.f32.mrb[52].mxu0 }
 0x9ad   : > { %v2614_v45 = vadd.f32 %v2608_v48, %v2503_v20  ;;  %v4690_v49 = vpop.f32.mrb[53].mxu0 }
 0x9ae   : > { %v2611_v46 = vpop.f32.mrb[54].mxu0 }
 0x9af   : > { %v4691_v47 = vpop.f32.mrb[55].mxu0 }
 0x9b0   : > { %v5660_v47 = vadd.f32 %v5554_v41, %v5402_v12  ;;  %v4979_v41 = vld [vmem:[%s5908_s30] sm:$0xff]  }
 0x9b4   : > { %v2715_v50 = vpop.f32.mrb[56].mxu0 }
 0x9b5   : > { %v2721_v52 = vadd.f32 %v2715_v50, %v2614_v45  ;;  %v4704_v55 = vpop.f32.mrb[57].mxu0  ;;  %v2212_v50 = vsel %vm1203_vm2, %v5660_v47, 0.0 }
 0x9b6   : > { %v2718_v56 = vpop.f32.mrb[58].mxu0 }
 0x9b7   : > { %v2729_v57 = vadd.f32 %v4279_v51, %v2721_v52  ;;  %v4705_v58 = vpop.f32.mrb[59].mxu0 }
 0x9b8   : > { %v5667_v58 = vadd.f32 %v5556_v44, %v5405_v13 }
 0x9b9   : > { %5025 = vtanh.f32 %v2729_v57 }
 0x9ba   : > { %v2215_v12 = vsel %vm1203_vm2, %v5667_v58, 0.0 }
 0x9c3   : > { %v5624_v59 = vpop.eup %5025 }
 0x9c4   : > { %2734 = vst.msk [vmem:[#allocation3 + $0x4] sm:$0x1f] %vm2733_vm8, %v5624_v59 }
 0x9cb   : > { %v2741_v3 = vld [vmem:[#allocation3 + $0x1] sm:$0x1f] }
 0x9cc   : > { %v2735_v61 = vld [vmem:[#allocation3] sm:$0x1f]  ;;  %v2742_v63 = vpack.c.bf16 %v2741_v3, %v2741_v3 }
 0x9cd   : > { %v2736_v4 = vpack.c.bf16 %v2735_v61, %v2735_v61  ;;  %v2858_v8 = vld [vmem:[#allocation3 + $0x2] sm:$0x1f] }
 0x9ce   : > { %4711 = vmatmul.mubr.msk.bf16.vlgmr.msra.gmra.mrb[48].mxu1 %vm1203_vm2, %v2742_v63  ;;  %v2921_v9 = vld [vmem:[#allocation3 + $0x3] sm:$0x1f]  ;;  %v2859_v11 = vpack.c.bf16 %v2858_v8, %v2858_v8  ;;  %v5688_v8 = vld [vmem:[%s5909_s28] ss:$0 sm:$0xff]  ;;  %s5911_s28 = sld [smem:[#allocation21_spill]] }
 0x9cf   : > { %4719 = vmatmul.mubr.msk.bf16.vlgmr.msra.gmra.mrb[60].mxu0 %vm1203_vm2, %v2736_v4  ;;  %4723 = vmatpush3.bf16.msra.mxu1 %v4973_v2  ;;  %v2922_v14 = vpack.c.bf16 %v2921_v9, %v2921_v9  ;;  %v2984_v16 = vld [vmem:[#allocation3 + $0x4] sm:$0x1f]  ;;  %v4981_v2 = vld [vmem:[%s5908_s30 + $0x8] sm:$0xff]  }
 0x9d0   : > { %4731 = vmatpush3.bf16.msra.mxu0 %v4974_v62  ;;  %4724 = vmatprep.subr.bf16.mxu1 %v5152_v1  ;;  %v2985_v17 = vpack.c.bf16 %v2984_v16, %v2984_v16  ;;  %v4982_v3 = vld [vmem:[%s5908_s30 + $0x18] sm:$0xff]  }
 0x9d1   : > { %4732 = vmatprep.subr.bf16.mxu0 %v5152_v1  ;;  %4726 = vmatprep.mubr.msk.bf16.mxu1 %vm5153_vm0, %v5152_v1 }
 0x9d2   : > { %4734 = vmatprep.mubr.msk.bf16.mxu0 %vm5153_vm0, %v5152_v1 }
 0x9d3   : > { %4725 = vmatpush3.bf16.msra.mxu1 %v4975_v6 }
 0x9d4   : > { %4733 = vmatpush3.bf16.msra.mxu0 %v4976_v7  ;;  %4738 = vmatprep.subr.bf16.mxu1 %v5152_v1 }
 0x9d5   : > { %4746 = vmatprep.subr.bf16.mxu0 %v5152_v1 }
 0x9d6   : > { %4727 = vmatmul.mubr.msk.bf16.vlgmr.msra.gmra.mrb[52].mxu1 %vm1203_vm2, %v2859_v11 }
 0x9d7   : > { %4735 = vmatmul.mubr.msk.bf16.vlgmr.msra.gmra.mrb[64].mxu0 %vm1203_vm2, %v2922_v14  ;;  %4739 = vmatpush3.bf16.msra.mxu1 %v4977_v10 }
 0x9d8   : > { %4742 = vmatprep.mubr.msk.bf16.mxu1 %vm5153_vm0, %v5152_v1  ;;  %4740 = vmatprep.subr.bf16.mxu1 %v5152_v1 }
 0x9d9   : > { %4750 = vmatprep.mubr.msk.bf16.mxu0 %vm5153_vm0, %v5152_v1  ;;  %4747 = vmatpush3.bf16.msra.mxu0 %v4979_v41 }
 0x9da   : > { %4748 = vmatprep.subr.bf16.mxu0 %v5152_v1 }
 0x9db   : > { %4741 = vmatpush3.bf16.msra.mxu1 %v4978_v15 }
 0x9dc   : > { %4754 = vmatprep.subr.bf16.mxu1 %v5152_v1 }
 0x9dd   : > { %4749 = vmatpush3.bf16.msra.mxu0 %v4981_v2 }
 0x9de   : > { %4743 = vmatmul.mubr.msk.bf16.vlgmr.msra.gmra.mrb[56].mxu1 %vm1203_vm2, %v2985_v17  ;;  %4762 = vmatprep.subr.bf16.mxu0 %v5152_v1 }
 0x9df   : > { %4758 = vmatprep.mubr.msk.bf16.mxu1 %vm5153_vm0, %v5152_v1 }
 0xaa1   : > { %v2797_v18 = vpop.f32.mrb[48].mxu1 }
 0xaa2   : > { %v2852_v19 = vpop.f32.mrb[60].mxu0  ;;  %v4712_v21 = vpop.f32.mrb[49].mxu1 }
 0xaa3   : > { %v2853_v20 = vadd.f32 %v2852_v19, %v2797_v18  ;;  %v4720_v22 = vpop.f32.mrb[61].mxu0  ;;  %v2800_v23 = vpop.f32.mrb[50].mxu1  ;;  %v3216_v21 = vsel %vm3214_vm9, 4294967295, %v5154_v24  ;;  %v4986_v24 = vld [vmem:[%s5908_s30 + $0x28] sm:$0xff]  }
 0xaa4   : > { %v2855_v25 = vpop.f32.mrb[62].mxu0  ;;  %v4713_v26 = vpop.f32.mrb[51].mxu1  ;;  %v5693_v23 = vsel %vm3215_vm10, %v3216_v21, 0 }
 0xaa5   : > { %v4721_v27 = vpop.f32.mrb[63].mxu0 }
 0xaa9   : > { %v2914_v28 = vpop.f32.mrb[52].mxu1 }
 0xaaa   : > { %v2977_v29 = vpop.f32.mrb[64].mxu0  ;;  %v2920_v30 = vadd.f32 %v2914_v28, %v2853_v20  ;;  %v4728_v31 = vpop.f32.mrb[53].mxu1 }
 0xaab   : > { %v4736_v32 = vpop.f32.mrb[65].mxu0  ;;  %v2917_v33 = vpop.f32.mrb[54].mxu1  ;;  %v4983_v31 = vld [vmem:[%s5910_s2 + $0x8] sm:$0xff]  }
 0xaac   : > { %v2980_v34 = vpop.f32.mrb[66].mxu0  ;;  %v2983_v35 = vadd.f32 %v2977_v29, %v2920_v30  ;;  %v4729_v36 = vpop.f32.mrb[55].mxu1  ;;  %v4984_v30 = vld [vmem:[%s5910_s2] sm:$0xff]   ;;  %v4987_v33 = vld [vmem:[%s5908_s30 + $0x30] sm:$0xff]  }
 0xaad   : > { %v4737_v37 = vpop.f32.mrb[67].mxu0  ;;  %v4985_v32 = vld [vmem:[%s5908_s30 + $0x20] sm:$0xff]   ;;  %v4988_v34 = vld [vmem:[%s5908_s30 + $0x38] sm:$0xff]  }
 0xab1   : > { %v3040_v38 = vpop.f32.mrb[56].mxu1 }
 0xab2   : > { %v3046_v40 = vadd.f32 %v3040_v38, %v2983_v35  ;;  %v4744_v42 = vpop.f32.mrb[57].mxu1 }
 0xab3   : > { %v3043_v43 = vpop.f32.mrb[58].mxu1 }
 0xab4   : > { %v3054_v5 = vadd.f32 %v4311_v39, %v3046_v40  ;;  %v4745_v48 = vpop.f32.mrb[59].mxu1 }
 0xab6   : > { %5027 = vtanh.f32 %v3054_v5 }
 0xac0   : > { %v5028_v45 = vpop.eup %5027 }
 0xac1   : > { %v3056_v49 = vadd.f32 %v5028_v45, %v5624_v59  ;;  %v4980_v59 = vld [vmem:[%s5908_s30 + $0x10] sm:$0xff]  }
 0xac2   : > { %4755 = vmatpush3.bf16.msra.mxu1 %v4980_v59 }
 0xac3   : > { %v3057_v46 = vsel %vm2733_vm8, %v3056_v49, 0.0  ;;  %4756 = vmatprep.subr.bf16.mxu1 %v5152_v1 }
 0xac4   : > { %3058 = vadd.xlane.f32.xlu0 %v3057_v46 }
 0xac6   : > { %4757 = vmatpush3.bf16.msra.mxu1 %v4982_v3  ;;  %v4989_v3 = vld [vmem:[%s5910_s2 + $0x10] sm:$0xff]  }
 0xac7   : > { %4768 = vmatprep.subr.bf16.mxu1 %v5152_v1 }
 0xac8   : > { %2213 = vadd.xlane.f32.xlu0 %v2212_v50 }
 0xb51   : > { %v3059_v51 = vpop.xlane.xlu0 %3058 }
 0xb52   : > { %v3060_v52 = vmul.f32 0.03125, %v3059_v51 }
 0xb54   : > { %v3061_v55 = vsub.f32 %v3056_v49, %v3060_v52 }
 0xb56   : > { %v3062_v56 = vmul.f32 %v3061_v55, %v3061_v55 }
 0xb58   : > { %v3063_v57 = vsel %vm2733_vm8, %v3062_v56, 0.0 }
 0xb59   : > { %3064 = vadd.xlane.f32.xlu1 %v3063_v57 }
 0xb5d   : > { %2216 = vadd.xlane.f32.xlu1 %v2215_v12 }
 0xbe6   : > { %v3065_v13 = vpop.xlane.xlu1 %3064 }
 0xbe7   : > { %v3066_v44 = vmul.f32 0.03125, %v3065_v13 }
 0xbe9   : > { %v3067_v61 = vadd.f32 1e-05, %v3066_v44 }
 0xbeb   : > { %5029 = vrsqrt.f32 %v3067_v61 }
 0xbf5   : > { %v5030_v62 = vpop.eup %5029 }
 0xbf6   : > { %v3069_v63 = vmul.f32 %v5030_v62, %v3061_v55  ;;  %v4990_v62 = vld [vmem:[%s5910_s2 + $0x18] sm:$0xff]   ;;  %s5912_s2 = sld [smem:[#allocation22_spill]] }
 0xbf8   : > { %v3070_v4 = vmul.f32 %v5523_v60, %v3069_v63 }
 0xbfa   : > { %v3071_v6 = vadd.f32 %v5527_v0, %v3070_v4 }
 0xbfc   : > { %v3072_v7 = vpack.c.bf16 %v3071_v6, %v3071_v6 }
 0xbfe   : > { %4751 = vmatmul.mubr.msk.bf16.vlgmr.msra.gmra.mrb[68].mxu0 %vm1203_vm2, %v3072_v7  ;;  %4759 = vmatmul.mubr.msk.bf16.vlgmr.msra.gmra.mrb[60].mxu1 %vm1203_vm2, %v3072_v7 }
 0xbff   : > { %4764 = vmatprep.mubr.msk.bf16.mxu0 %vm5153_vm0, %v5152_v1  ;;  %4770 = vmatprep.mubr.msk.bf16.mxu1 %vm5153_vm0, %v5152_v1 }
 0xcd1   : > { %v3133_v9 = vpop.f32.mrb[68].mxu0  ;;  %v3194_v10 = vpop.f32.mrb[60].mxu1 }
 0xcd2   : > { %v3134_v11 = vadd.f32 %v5688_v8, %v3133_v9  ;;  %v3195_v14 = vadd.f32 %v5688_v8, %v3194_v10  ;;  %v4752_v15 = vpop.f32.mrb[69].mxu0  ;;  %v4760_v16 = vpop.f32.mrb[61].mxu1 }
 0xcd3   : > { %v3136_v17 = vpop.f32.mrb[70].mxu0  ;;  %v3197_v18 = vpop.f32.mrb[62].mxu1 }
 0xcd4   : > { %5031 = vtanh.f32 %v3134_v11  ;;  %v4753_v19 = vpop.f32.mrb[71].mxu0  ;;  %v4761_v20 = vpop.f32.mrb[63].mxu1 }
 0xcd5   : > { %5033 = vtanh.f32 %v3195_v14  ;;  %v2217_v11 = vpop.xlane.xlu1 %2216 }
 0xcd6   : > { %v2219_v15 = vmul.f32 0.03125, %v2217_v11 }
 0xcd8   : > { %v2221_v21 = vsub.f32 %v5667_v58, %v2219_v15 }
 0xcde   : > { %v5032_v22 = vpop.eup %5031 }
 0xcdf   : > { %v5034_v25 = vpop.eup %5033  ;;  %v3142_v26 = vpack.c.bf16 %v5032_v22, %v5032_v22 }
 0xce0   : > { %v3204_v27 = vpack.c.bf16 %v5034_v25, %v5034_v25 }
 0xce1   : > { %v3271_v28 = vand.u32 %v5693_v23, %v3142_v26 }
 0xce2   : > { %v3219_v29 = vand.u32 %v5693_v23, %v3204_v27 }
 0xce3   : > { %4769 = vmatpush3.bf16.msra.mxu1 %v3271_v28 }
 0xce4   : > { %4763 = vmatpush3.bf16.msra.mxu0 %v3219_v29  ;;  %4782 = vmatprep.subr.bf16.mxu1 %v5152_v1 }
 0xce5   : > { %4774 = vmatprep.subr.bf16.mxu0 %v5152_v1 }
 0xce6   : > { %4771 = vmatmul.mubr.msk.bf16.vlgmr.msra.gmra.mrb[64].mxu1 %vm3210_vm11, %v4984_v30 }
 0xce7   : > { %4765 = vmatmul.mubr.msk.bf16.vlgmr.msra.gmra.mrb[72].mxu0 %vm3210_vm11, %v4983_v31  ;;  %4784 = vmatprep.mubr.msk.bf16.mxu1 %vm5153_vm0, %v5152_v1  ;;  %v4991_v31 = vld [vmem:[%s5911_s28] sm:$0xff]  }
 0xce8   : > { %4775 = vmatpush3.bf16.msra.mxu0 %v4985_v32  ;;  %4778 = vmatprep.mubr.msk.bf16.mxu0 %vm5153_vm0, %v5152_v1  ;;  %v4992_v32 = vld [vmem:[%s5911_s28 + $0x8] sm:$0xff]  }
 0xce9   : > { %4776 = vmatprep.subr.bf16.mxu0 %v5152_v1 }
 0xcec   : > { %4777 = vmatpush3.bf16.msra.mxu0 %v4986_v24 }
 0xced   : > { %4788 = vmatprep.subr.bf16.mxu0 %v5152_v1 }
 0xcef   : > { %4779 = vmatmul.mubr.msk.bf16.vlgmr.msra.gmra.mrb[76].mxu0 %vm1203_vm2, %v3072_v7 }
 0xcf0   : > { %4789 = vmatpush3.bf16.msra.mxu0 %v4987_v33  ;;  %4792 = vmatprep.mubr.msk.bf16.mxu0 %vm5153_vm0, %v5152_v1 }
 0xcf1   : > { %4790 = vmatprep.subr.bf16.mxu0 %v5152_v1 }
 0xcf4   : > { %4791 = vmatpush3.bf16.msra.mxu0 %v4988_v34 }
 0xcf5   : > { %4802 = vmatprep.subr.bf16.mxu0 %v5152_v1 }
 0xcf7   : > { %4793 = vmatmul.mubr.msk.bf16.vlgmr.msra.gmra.mrb[80].mxu0 %vm1203_vm2, %v3072_v7  ;;  %v2214_v7 = vpop.xlane.xlu0 %2213 }
 0xcf8   : > { %4806 = vmatprep.mubr.msk.bf16.mxu0 %vm5153_vm0, %v5152_v1  ;;  %v2218_v14 = vmul.f32 0.03125, %v2214_v7 }
 0xcfa   : > { %v2220_v17 = vsub.f32 %v5660_v47, %v2218_v14  ;;  %v2223_v47 = vmul.f32 %v2221_v21, %v2221_v21 }
 0xcfc   : > { %v2222_v28 = vmul.f32 %v2220_v17, %v2220_v17  ;;  %v2227_v58 = vsel %vm1203_vm2, %v2223_v47, 0.0 }
 0xcfe   : > { %v2224_v30 = vsel %vm1203_vm2, %v2222_v28, 0.0 }
 0xdb9   : > { %v3307_v35 = vpop.f32.mrb[64].mxu1 }
 0xdba   : > { %v3255_v36 = vpop.f32.mrb[72].mxu0  ;;  %v4772_v37 = vpop.f32.mrb[65].mxu1 }
 0xdbb   : > { %v3308_v38 = vadd.f32 %v3307_v35, %v3255_v36  ;;  %v4766_v39 = vpop.f32.mrb[73].mxu0  ;;  %v3310_v40 = vpop.f32.mrb[66].mxu1 }
 0xdbc   : > { %v3258_v42 = vpop.f32.mrb[74].mxu0  ;;  %v4773_v43 = vpop.f32.mrb[67].mxu1 }
 0xdbd   : > { %v3311_v5 = vadd.f32 %v3310_v40, %v3258_v42  ;;  %v4767_v48 = vpop.f32.mrb[75].mxu0 }
 0xdc2   : > { %v3365_v45 = vpop.f32.mrb[76].mxu0 }
 0xdc3   : > { %v3366_v49 = vadd.f32 %v5688_v8, %v3365_v45  ;;  %v4780_v46 = vpop.f32.mrb[77].mxu0 }
 0xdc4   : > { %v3368_v50 = vpop.f32.mrb[78].mxu0 }
 0xdc5   : > { %5035 = vtanh.f32 %v3366_v49  ;;  %v4781_v51 = vpop.f32.mrb[79].mxu0 }
 0xdca   : > { %v3481_v52 = vpop.f32.mrb[80].mxu0 }
 0xdcb   : > { %v3482_v55 = vadd.f32 %v5688_v8, %v3481_v52  ;;  %v4794_v56 = vpop.f32.mrb[81].mxu0 }
 0xdcc   : > { %v3484_v57 = vpop.f32.mrb[82].mxu0 }
 0xdcd   : > { %5037 = vtanh.f32 %v3482_v55  ;;  %v4795_v12 = vpop.f32.mrb[83].mxu0 }
 0xdcf   : > { %v5036_v41 = vpop.eup %5035 }
 0xdd0   : > { %v3375_v59 = vpack.c.bf16 %v5036_v41, %v5036_v41  ;;  %v4993_v41 = vld [vmem:[%s5911_s28 + $0x10] sm:$0xff]  }
 0xdd1   : > { %4803 = vmatpush3.bf16.msra.mxu0 %v4993_v41 }
 0xdd2   : > { %v3385_v2 = vand.u32 %v3375_v59, %v5693_v23  ;;  %v4994_v59 = vld [vmem:[%s5911_s28 + $0x18] sm:$0xff]   ;;  %4804 = vmatprep.subr.bf16.mxu0 %v5152_v1 }
 0xdd4   : > { %4783 = vmatpush3.bf16.msra.mxu1 %v3385_v2 }
 0xdd5   : > { %4796 = vmatprep.subr.bf16.mxu1 %v5152_v1  ;;  %4805 = vmatpush3.bf16.msra.mxu0 %v4994_v59 }
 0xdd6   : > { %4818 = vmatprep.subr.bf16.mxu0 %v5152_v1 }
 0xdd7   : > { %v5038_v13 = vpop.eup %5037  ;;  %4785 = vmatmul.mubr.msk.bf16.vlgmr.msra.gmra.mrb[68].mxu1 %vm3210_vm11, %v4989_v3 }
 0xdd8   : > { %v3491_v44 = vpack.c.bf16 %v5038_v13, %v5038_v13  ;;  %4798 = vmatprep.mubr.msk.bf16.mxu1 %vm5153_vm0, %v5152_v1 }
 0xdda   : > { %v3501_v61 = vand.u32 %v3491_v44, %v5693_v23 }
 0xddc   : > { %4797 = vmatpush3.bf16.msra.mxu1 %v3501_v61 }
 0xddd   : > { %4810 = vmatprep.subr.bf16.mxu1 %v5152_v1 }
 0xddf   : > { %4799 = vmatmul.mubr.msk.bf16.vlgmr.msra.gmra.mrb[72].mxu1 %vm3210_vm11, %v4990_v62 }
 0xde0   : > { %4814 = vmatprep.mubr.msk.bf16.mxu1 %vm5153_vm0, %v5152_v1  ;;  %4811 = vmatpush3.bf16.msra.mxu1 %v4991_v31 }
 0xde1   : > { %4812 = vmatprep.subr.bf16.mxu1 %v5152_v1 }
 0xde4   : > { %4813 = vmatpush3.bf16.msra.mxu1 %v4992_v32 }
 0xde5   : > { %4826 = vmatprep.subr.bf16.mxu1 %v5152_v1 }
 0xeaa   : > { %v3421_v63 = vpop.f32.mrb[68].mxu1 }
 0xeab   : > { %v3428_v4 = vadd.f32 %v3421_v63, %v3308_v38  ;;  %v4786_v6 = vpop.f32.mrb[69].mxu1 }
 0xeac   : > { %v3424_v8 = vpop.f32.mrb[70].mxu1 }
 0xead   : > { %v3429_v9 = vadd.f32 %v3424_v8, %v3311_v5  ;;  %v4787_v10 = vpop.f32.mrb[71].mxu1 }
 0xeb2   : > { %v3537_v16 = vpop.f32.mrb[72].mxu1 }
 0xeb3   : > { %v3544_v18 = vadd.f32 %v3537_v16, %v3428_v4  ;;  %v4800_v19 = vpop.f32.mrb[73].mxu1 }
 0xeb4   : > { %v3540_v20 = vpop.f32.mrb[74].mxu1 }
 0xeb5   : > { %v3545_v22 = vadd.f32 %v3540_v20, %v3429_v9  ;;  %v4801_v23 = vpop.f32.mrb[75].mxu1  ;;  %v3546_v25 = vadd.f32 %v3544_v18, %v5559_v53  ;;  %v4361_v20 = vld [vmem:[%s5912_s2] ss:$0 sm:$0xff]  ;;  %s5914_s2 = sld [smem:[#allocation27_spill]] }
 0xeb7   : > { %v3548_v26 = vsel %vm1203_vm2, %v3546_v25, 0.0  ;;  %v3547_v27 = vadd.f32 %v3545_v22, %v5562_v54 }
 0xeb8   : > { %3549 = vadd.xlane.f32.xlu0 %v3548_v26 }
 0xeb9   : > { %v3551_v29 = vsel %vm1203_vm2, %v3547_v27, 0.0 }
 0xeba   : > { %3552 = vadd.xlane.f32.xlu1 %v3551_v29 }
 0xebc   : > { %2225 = vadd.xlane.f32.xlu0 %v2224_v30 }
 0xebe   : > { %2228 = vadd.xlane.f32.xlu1 %v2227_v58 }
 0xf45   : > { %v3550_v53 = vpop.xlane.xlu0 %3549 }
 0xf46   : > { %v3554_v54 = vmul.f32 0.03125, %v3550_v53 }
 0xf47   : > { %v3553_v24 = vpop.xlane.xlu1 %3552 }
 0xf48   : > { %v3556_v33 = vsub.f32 %v3546_v25, %v3554_v54  ;;  %v3555_v34 = vmul.f32 0.03125, %v3553_v24 }
 0xf49   : > { %v2226_v35 = vpop.xlane.xlu0 %2225 }
 0xf4a   : > { %v3557_v36 = vsub.f32 %v3547_v27, %v3555_v34  ;;  %v2230_v37 = vmul.f32 0.03125, %v2226_v35  ;;  %v3558_v38 = vmul.f32 %v3556_v33, %v3556_v33  ;;  %v4995_v34 = vld [vmem:[%s5913_s3] sm:$0xff]   ;;  %v4996_v35 = vld [vmem:[%s5913_s3 + $0x8] sm:$0xff]   ;;  %s5915_s3 = sld [smem:[#allocation23_spill]] }
 0xf4b   : > { %v2229_v39 = vpop.xlane.xlu1 %2228 }
 0xf4c   : > { %v2232_v40 = vadd.f32 1e-05, %v2230_v37  ;;  %v2231_v42 = vmul.f32 0.03125, %v2229_v39  ;;  %v3560_v43 = vsel %vm1203_vm2, %v3558_v38, 0.0  ;;  %v3559_v5 = vmul.f32 %v3557_v36, %v3557_v36  ;;  %v4998_v37 = vld [vmem:[%s5914_s2 + $0x8] sm:$0xff]   ;;  %v4999_v38 = vld [vmem:[%s5914_s2 + $0x10] sm:$0xff]  }
 0xf4d   : > { %3561 = vadd.xlane.f32.xlu0 %v3560_v43  ;;  %v5000_v39 = vld [vmem:[%s5914_s2 + $0x18] sm:$0xff]  }
 0xf4e   : > { %5039 = vrsqrt.f32 %v2232_v40  ;;  %v2233_v48 = vadd.f32 1e-05, %v2231_v42  ;;  %v3563_v45 = vsel %vm1203_vm2, %v3559_v5, 0.0  ;;  %v5001_v40 = vld [vmem:[%s5914_s2 + $0x20] sm:$0xff]   ;;  %v5002_v42 = vld [vmem:[%s5914_s2 + $0x28] sm:$0xff]  }
 0xf4f   : > { %3564 = vadd.xlane.f32.xlu1 %v3563_v45 }
 0xf50   : > { %5041 = vrsqrt.f32 %v2233_v48 }
 0xf58   : > { %v5040_v49 = vpop.eup %5039 }
 0xf59   : > { %v2236_v46 = vmul.f32 %v5040_v49, %v2220_v17 }
 0xf5a   : > { %v5042_v50 = vpop.eup %5041 }
 0xf5b   : > { %v2238_v51 = vmul.f32 %v5523_v60, %v2236_v46  ;;  %v2237_v52 = vmul.f32 %v5042_v50, %v2221_v21 }
 0xf5d   : > { %v2239_v55 = vmul.f32 %v5523_v60, %v2237_v52  ;;  %v2240_v56 = vadd.f32 %v5527_v0, %v2238_v51  ;;  %v4362_v51 = vld [vmem:[%s5915_s3] ss:$0 sm:$0xff]  ;;  %s4380_s3 = sshll.u32 %s5351_s0, 4  ;;  %s5156_s0 = smov [#allocation5]  }
 0xf5e   : > { %s5059_s13 = sshll.u32 %s5156_s0, 4  ;;  %s5060_s13 = int_to_ptr.vmem [resolvable:$false] %s5059_s13 }
 0xf5f   : > { %v2241_v57 = vadd.f32 %v5527_v0, %v2239_v55  ;;  %s5061_s14 = scalar_lea.vmem %s5060_s13, 32 }
 0xf61   : > { %v3578_v12 = vpack.c.bf16 %v2241_v57, %v2240_v56 }
 0xf63   : > { %4815 = vmatmul.mubr.msk.bf16.vlgmr.msra.gmra.mrb[76].mxu1 %vm1203_vm2, %v3578_v12  ;;  %v4363_v12 = vld [vmem:[%s5916_s5] ss:$0 sm:$0xff]  ;;  %s5919_s5 = sld [smem:[#allocation29_spill]] }
 0xf64   : > { %4842 = vmatprep.mubr.msk.bf16.mxu1 %vm5153_vm0, %v5152_v1 }
 0xfda   : > { %v3562_v2 = vpop.xlane.xlu0 %3561 }
 0xfdb   : > { %v3566_v3 = vmul.f32 0.03125, %v3562_v2 }
 0xfdc   : > { %v3565_v13 = vpop.xlane.xlu1 %3564 }
 0xfdd   : > { %v3568_v44 = vadd.f32 1e-05, %v3566_v3  ;;  %v3567_v61 = vmul.f32 0.03125, %v3565_v13  ;;  %v5003_v13 = vld [vmem:[%s5914_s2 + $0x30] sm:$0xff]  }
 0xfdf   : > { %5043 = vrsqrt.f32 %v3568_v44  ;;  %v3569_v62 = vadd.f32 1e-05, %v3567_v61  ;;  %v5004_v44 = vld [vmem:[%s5914_s2 + $0x38] sm:$0xff]   ;;  %v4364_v61 = vld [vmem:[%s5917_s8] ss:$0 sm:$0xff] }
 0xfe1   : > { %5045 = vrsqrt.f32 %v3569_v62 }
 0xfe9   : > { %v5044_v63 = vpop.eup %5043 }
 0xfea   : > { %v3572_v4 = vmul.f32 %v5044_v63, %v3556_v33 }
 0xfeb   : > { %v5046_v6 = vpop.eup %5045 }
 0xfec   : > { %v3574_v7 = vmul.f32 %v5523_v60, %v3572_v4  ;;  %v3573_v8 = vmul.f32 %v5046_v6, %v3557_v36  ;;  %v4997_v36 = vld [vmem:[%s5914_s2] sm:$0xff]   ;;  %s5820_s2 = scalar_lea.hbm %s5328_s4, %s4380_s3 }
 0xfed   : > { %4827 = vmatpush3.bf16.msra.mxu1 %v4997_v36 }
 0xfee   : > { %v3575_v9 = vmul.f32 %v5523_v60, %v3573_v8  ;;  %v3576_v10 = vadd.f32 %v5527_v0, %v3574_v7  ;;  %4828 = vmatprep.subr.bf16.mxu1 %v5152_v1 }
 0xff0   : > { %v3577_v11 = vadd.f32 %v5527_v0, %v3575_v9 }
 0xff1   : > { %4829 = vmatpush3.bf16.msra.mxu1 %v4998_v37 }
 0xff2   : > { %v3583_v14 = vpack.c.bf16 %v3577_v11, %v3576_v10  ;;  %4830 = vmatprep.subr.bf16.mxu1 %v5152_v1  ;;  %v4368_v10 = vld [vmem:[%s5918_s9] ss:$0 sm:$0xff]  ;;  %s1007_s9 = sand.u32 1, %s5109_s10  }
 0xff3   : > { %s1008_s8 = scalar_lea.vmem [#allocation5], %s1007_s9 }
 0xff4   : > { %4807 = vmatmul.mubr.msk.bf16.vlgmr.msra.gmra.mrb[84].mxu0 %vm1203_vm2, %v3583_v14 }
 0xff5   : > { %4822 = vmatprep.mubr.msk.bf16.mxu0 %vm5153_vm0, %v5152_v1  ;;  %4819 = vmatpush3.bf16.msra.mxu0 %v4995_v34 }
 0xff6   : > { %4820 = vmatprep.subr.bf16.mxu0 %v5152_v1  ;;  %4831 = vmatpush3.bf16.msra.mxu1 %v4999_v38 }
 0xff7   : > { %4832 = vmatprep.subr.bf16.mxu1 %v5152_v1 }
 0xff9   : > { %4821 = vmatpush3.bf16.msra.mxu0 %v4996_v35  ;;  %v4377_v35 = vld [vmem:[%s5919_s5] ss:$0 sm:$0xff]  ;;  %s4054_s5 = sshll.u32 %s1008_s8, 4  ;;  %s5822_s5 = int_to_ptr.vmem [resolvable:$true] %s4054_s5 }
 0xffa   : > { %4846 = vmatprep.subr.bf16.mxu0 %v5152_v1  ;;  %4833 = vmatpush3.bf16.msra.mxu1 %v5000_v39  ;;  %p5062_p0 = scmp.lt.s32.totalorder %s5822_s5, %s5060_s13 }
 0xffb   : > { %4834 = vmatprep.subr.bf16.mxu1 %v5152_v1 }
 0xffe   : > { %4835 = vmatpush3.bf16.msra.mxu1 %v5001_v40  ;;  %v4378_v40 = vld [vmem:[%s5920_s6] ss:$0 sm:$0xff]  ;;  %s4042_s6 = scalar_lea.sflag [#allocation6], %s1007_s9 }
 0xfff   : > { %4836 = vmatprep.subr.bf16.mxu1 %v5152_v1 }
0x1002   : > { %4837 = vmatpush3.bf16.msra.mxu1 %v5002_v42 }
0x1003   : > { %4838 = vmatprep.subr.bf16.mxu1 %v5152_v1 }
0x1006   : > { %4839 = vmatpush3.bf16.msra.mxu1 %v5003_v13 }
0x1007   : > { %4840 = vmatprep.subr.bf16.mxu1 %v5152_v1 }
0x100a   : > { %4841 = vmatpush3.bf16.msra.mxu1 %v5004_v44 }
0x1036   : > { %v3694_v15 = vpop.f32.mrb[76].mxu1 }
0x1037   : > { %v4816_v16 = vpop.f32.mrb[77].mxu1 }
0x1038   : > { %v3697_v17 = vpop.f32.mrb[78].mxu1 }
0x1039   : > { %v4817_v18 = vpop.f32.mrb[79].mxu1 }
0x10c7   : > { %v3638_v19 = vpop.f32.mrb[84].mxu0 }
0x10c8   : > { %v3695_v21 = vadd.f32 %v3694_v15, %v3638_v19  ;;  %v4808_v22 = vpop.f32.mrb[85].mxu0 }
0x10c9   : > { %v3641_v23 = vpop.f32.mrb[86].mxu0 }
0x10ca   : > { %v5768_v60 = vadd.f32 %v4361_v20, %v3695_v21  ;;  %v3698_v25 = vadd.f32 %v3697_v17, %v3641_v23  ;;  %v4809_v26 = vpop.f32.mrb[87].mxu0 }
0x10cc   : > { %v5770_v0 = vadd.f32 %v4361_v20, %v3698_v25  ;;  %v3712_v27 = vsel %vm1203_vm2, %v5768_v60, 0.0 }
0x10cd   : > { %3713 = vadd.xlane.f32.xlu0 %v3712_v27 }
0x10ce   : > { %v3715_v28 = vsel %vm1203_vm2, %v5770_v0, 0.0 }
0x10cf   : > { %3716 = vadd.xlane.f32.xlu1 %v3715_v28 }
0x115a   : > { %v3714_v29 = vpop.xlane.xlu0 %3713 }
0x115b   : > { %v3718_v47 = vmul.f32 0.03125, %v3714_v29 }
0x115c   : > { %v3717_v30 = vpop.xlane.xlu1 %3716 }
0x115d   : > { %v3720_v58 = vsub.f32 %v5768_v60, %v3718_v47  ;;  %v3719_v31 = vmul.f32 0.03125, %v3717_v30 }
0x115f   : > { %v3721_v32 = vsub.f32 %v5770_v0, %v3719_v31  ;;  %v3722_v53 = vmul.f32 %v3720_v58, %v3720_v58 }
0x1161   : > { %v3724_v54 = vsel %vm1203_vm2, %v3722_v53, 0.0  ;;  %v3723_v24 = vmul.f32 %v3721_v32, %v3721_v32 }
0x1162   : > { %3725 = vadd.xlane.f32.xlu0 %v3724_v54 }
0x1163   : > { %v3727_v33 = vsel %vm1203_vm2, %v3723_v24, 0.0 }
0x1164   : > { %3728 = vadd.xlane.f32.xlu1 %v3727_v33 }
0x11ef   : > { %v3726_v43 = vpop.xlane.xlu0 %3725 }
0x11f0   : > { %v3730_v5 = vmul.f32 0.03125, %v3726_v43 }
0x11f1   : > { %v3729_v48 = vpop.xlane.xlu1 %3728 }
0x11f2   : > { %v3732_v45 = vadd.f32 1e-05, %v3730_v5  ;;  %v3731_v49 = vmul.f32 0.03125, %v3729_v48 }
0x11f4   : > { %5047 = vrsqrt.f32 %v3732_v45  ;;  %v3733_v46 = vadd.f32 1e-05, %v3731_v49  ;;  %v3981_v49 = vld [vmem:[%s5921_s12] sm:$0x1]  ;;  %s5055_s12 = scalar_lea.vmem %s5822_s5, 16 }
0x11f5   : > { %p5056_p11 = scmp.ne.s32.totalorder %s5822_s5, %s5055_s12  ;;  %p5063_p1 = scmp.lt.s32.totalorder %s5061_s14, %s5055_s12 }
0x11f6   : > { %5049 = vrsqrt.f32 %v3733_v46  ;;  %v3989_v46 = vlaneseq }
0x11f7   : > { %p5057_p12 = pnand %p5056_p11, %p5368_p5  ;;  %p5064_p2 = por %p5063_p1, %p5062_p0 }
0x11f9   : > { %p5058_p13 = pneg %p5057_p12 }
0x11fb   : > { %p5065_p3 = pnand %p5064_p2, %p5058_p13 }
0x11fe   : > { %v5048_v50 = vpop.eup %5047 }
0x11ff   : > { %v3736_v52 = vmul.f32 %v5048_v50, %v3720_v58  ;;  %v5155_v58 = vmov 0   ;;  %v3990_v50 = vshrl.u32 %v3989_v46, 7 }
0x1200   : > { %v5050_v55 = vpop.eup %5049  ;;  %4928 = vset.pattern.permute.xlu0 %v5155_v58 }
0x1201   : > { %v3744_v56 = vmul.f32 %v4362_v51, %v3736_v52  ;;  %v3737_v57 = vmul.f32 %v5050_v55, %v3721_v32 }
0x1203   : > { %v3745_v41 = vmul.f32 %v4362_v51, %v3737_v57  ;;  %v3752_v59 = vadd.f32 %v4363_v12, %v3744_v56  ;;  %v3991_v51 = vsub.s32 0, %v3990_v50 }
0x1205   : > { %v3753_v2 = vadd.f32 %v4363_v12, %v3745_v41 }
0x1207   : > { %v3754_v3 = vpack.c.bf16 %v3753_v2, %v3752_v59 }
0x1209   : > { %4823 = vmatmul.mubr.msk.bf16.vlgmr.msra.gmra.mrb[88].mxu0 %vm1203_vm2, %v3754_v3 }
0x120a   : > { %4848 = vmatprep.mubr.msk.bf16.mxu0 %vm5153_vm0, %v5152_v1 }
0x12dc   : > { %v3815_v62 = vpop.f32.mrb[88].mxu0 }
0x12dd   : > { %v4824_v63 = vpop.f32.mrb[89].mxu0  ;;  %v3816_v6 = vadd.f32 %v4364_v61, %v3815_v62 }
0x12de   : > { %v3818_v4 = vpop.f32.mrb[90].mxu0 }
0x12df   : > { %v3819_v7 = vadd.f32 %v4364_v61, %v3818_v4  ;;  %v4825_v8 = vpop.f32.mrb[91].mxu0 }
0x12e1   : > { %v3822_v9 = vpack.c.bf16 %v3819_v7, %v3816_v6 }
0x12e3   : > { %4843 = vmatmul.mubr.bf16.vlgmr.msra.gmra.mrb[80].mxu1 %v3822_v9 }
0x13b6   : > { %v3928_v11 = vpop.f32.mrb[80].mxu1 }
0x13b7   : > { %v3929_v14 = vadd.f32 %v4368_v10, %v3928_v11  ;;  %v4844_v15 = vpop.f32.mrb[81].mxu1 }
0x13b8   : > { %v3931_v16 = vpop.f32.mrb[82].mxu1 }
0x13b9   : > { %v3932_v17 = vadd.f32 %v4368_v10, %v3931_v16  ;;  %v4845_v18 = vpop.f32.mrb[83].mxu1  ;;  %v3935_v1 = vadd.f32 %v3929_v14, %v5768_v60 }
0x13bb   : > { %v3939_v19 = vsel %vm1203_vm2, %v3935_v1, 0.0  ;;  %v3936_v20 = vadd.f32 %v3932_v17, %v5770_v0  ;;  %v3983_v0 = vld [vmem:[#allocation4] sm:$0x1] }
0x13bc   : > { %3940 = vadd.xlane.f32.xlu0 %v3939_v19 }
0x13bd   : > { %v3942_v21 = vsel %vm1203_vm2, %v3936_v20, 0.0 }
0x13be   : > { %3943 = vadd.xlane.f32.xlu1 %v3942_v21 }
0x1449   : > { %v3941_v22 = vpop.xlane.xlu0 %3940 }
0x144a   : > { %v3945_v23 = vmul.f32 0.03125, %v3941_v22 }
0x144b   : > { %v3944_v25 = vpop.xlane.xlu1 %3943 }
0x144c   : > { %v3947_v26 = vsub.f32 %v3935_v1, %v3945_v23  ;;  %v3946_v27 = vmul.f32 0.03125, %v3944_v25 }
0x144e   : > { %v3948_v28 = vsub.f32 %v3936_v20, %v3946_v27  ;;  %v3949_v29 = vmul.f32 %v3947_v26, %v3947_v26 }
0x1450   : > { %v3951_v47 = vsel %vm1203_vm2, %v3949_v29, 0.0  ;;  %v3950_v30 = vmul.f32 %v3948_v28, %v3948_v28 }
0x1451   : > { %3952 = vadd.xlane.f32.xlu0 %v3951_v47 }
0x1452   : > { %v3954_v60 = vsel %vm1203_vm2, %v3950_v30, 0.0 }
0x1453   : > { %3955 = vadd.xlane.f32.xlu1 %v3954_v60 }
0x1467   : > { %3986 = vperm.xlu0 %4928, %v3983_v0  }
0x14de   : > { %v3953_v31 = vpop.xlane.xlu0 %3952 }
0x14df   : > { %v3957_v32 = vmul.f32 0.03125, %v3953_v31 }
0x14e0   : > { %v3956_v53 = vpop.xlane.xlu1 %3955 }
0x14e1   : > { %v3959_v54 = vadd.f32 1e-05, %v3957_v32  ;;  %v3958_v24 = vmul.f32 0.03125, %v3956_v53 }
0x14e3   : > { %5051 = vrsqrt.f32 %v3959_v54  ;;  %v3960_v33 = vadd.f32 1e-05, %v3958_v24 }
0x14e5   : > { %5053 = vrsqrt.f32 %v3960_v33 }
0x14e6   : > { %v3987_v52 = vpop.permute.xlu0 %3986 }
0x14e7   : > { %v3992_v55 = vrot.slane %v3987_v52, %v3991_v51 }
0x14ed   : > { %v5052_v34 = vpop.eup %5051 }
0x14ee   : > { %v3963_v36 = vmul.f32 %v5052_v34, %v3947_v26 }
0x14ef   : > { %v5054_v37 = vpop.eup %5053 }
0x14f0   : > { %v3964_v38 = vmul.f32 %v5054_v37, %v3948_v28  ;;  %v3971_v39 = vmul.f32 %v4377_v35, %v3963_v36 }
0x14f2   : > { %v3972_v42 = vmul.f32 %v4377_v35, %v3964_v38  ;;  %v3979_v43 = vadd.f32 %v4378_v40, %v3971_v39 }
0x14f4   : > { %v3980_v5 = vadd.f32 %v4378_v40, %v3972_v42 }
0x14f6   : > { %v3982_v48 = vpack.c.bf16 %v3980_v5, %v3979_v43 }
0x14f8   : > { %v3997_v45 = vsel %vm1203_vm2, %v3982_v48, 0 }
0x14f9   : > { %4847 = vmatpush3.bf16.xpose.msra.mxu0 %v3997_v45 }
0x1500   : > { %4849 = vmatmul.mubr.msk.bf16.vlgmr.msra.gmra.mrb[92].mxu0 %vm1203_vm2, %v3981_v49 }
0x15d3   : > { %v4033_v56 = vpop.f32.mrb[92].mxu0 }
0x15d4   : > { %v4034_v57 = vadd.f32 %v4033_v56, %v3992_v55  ;;  %v4850_v12 = vpop.f32.mrb[93].mxu0 }
0x15d5   : > { %v4036_v41 = vpop.f32.mrb[94].mxu0 }
0x15d6   : > { %v4851_v59 = vpop.f32.mrb[95].mxu0  ;;  %4040 = vst.msk [vmem:[%s1008_s8] sm:$0x1] %vm4039_vm12, %v4034_v57 }
0x15d7   : > { %5068 = shalt.err (!%p5065_p3)
}
0x15d8   : > { %s5069_s9 = scalar_lea.hbm %s5820_s2, 16  ;;  %s5073_s3 = scalar_lea.hbm %s5328_s4, 32 }
0x15d9   : > { %p5070_p4 = scmp.ne.s32.totalorder %s5820_s2, %s5069_s9  ;;  %p5074_p9 = scmp.lt.u32.totalorder %s5820_s2, %s5328_s4 }
0x15da   : > { %p5075_p10 = scmp.lt.u32.totalorder %s5073_s3, %s5069_s9  ;;  %p5077_p12 = scmp.lt.u32.totalorder %s5069_s9, %s5820_s2 }
0x15db   : > { %p5071_p7 = pnand %p5070_p4, %p5368_p5 }
0x15dc   : > { %p5076_p11 = por %p5075_p10, %p5074_p9 }
0x15dd   : > { %p5072_p8 = pneg %p5071_p7 }
0x15de   : > { %p5078_p0 = por %p5077_p12, %p5076_p11 }
0x15e0   : > { %p5079_p13 = pnand %p5078_p0, %p5072_p8 }
0x15e2   : > { %5082 = shalt.err (!%p5079_p13)
}
0x15e3   : > { %4852 = dma.vmem_to_hbm [thread:$0]  (%p5368_p5), %s5822_s5, 16, %s5820_s2, %s4042_s6  }
0x15e4 PF: > { %p4858_p1 = scmp.ge.s32.totalorder %s5117_s15, 2  ;;  %s4066_s13 = sand.u32 1, %s5105_s7  }
0x15e5   : > { %s4067_s14 = scalar_lea.sflag [#allocation6], %s4066_s13 }
0x15e6   : > { %p4855_p2 = pnand %p4858_p1, %p5372_p6 }
0x15e8   : > { %5100 = dma.done.wait (!%p4855_p2), %s4067_s14, 16  }
0x15e9   : > { %5102 = vsyncadd (!%p4855_p2), %s4067_s14, 4294967280  ;;  %p79_p3 = scmp.ge.s32.totalorder %s5355_s16, 4   ;;  %s5922_s7 = smov %s5109_s10 }
0x15ea   : > { %s5923_s10 = smov %s5113_s11  ;;  %s5924_s11 = smov %s5366_s23 }
0x15eb   : > { %s5925_s15 = smov %s5355_s16  ;;  %81 = sbr.rel (!%p79_p3) target bundleno = 69 (0x45), region = 249 }
0x15f2   :  { %4071 = vsyncpa [#allocation6], 1 }
0x15f3   :  { %4073 = vsyncpa [#allocation6 + $0x1], 1 }

</bundles_post_ra>
